<compile_context>
chip_gen: v7x
topology: tpu7x:2x2x1
jax: 0.10.0
libtpu: 0.0.40
codegen_flags: <defaults>
</compile_context>

<pallas_src>
import jax
import jax.numpy as jnp
from jax.experimental import pallas as pl
from jax.experimental.pallas import tpu as pltpu


CONV_OUT = 8
KSIZE = 3
EMBEDDING_DIM = 32
HIDDEN = 64
B_PAD = 8            # pad batch rows to a full sublane tile


# ---------------------------------------------------------------------------
# Fused Pallas kernel
# ---------------------------------------------------------------------------
def fused_kernel(patches_ref, wc_ref, bc_ref, wfr_ref, g_ref, bh_ref, out_ref):
    n_cls = bh_ref.shape[1]
    out_c = wc_ref.shape[1]

    # Conv as one MXU matmul over im2col patches, fused bias + ReLU.
    r = jnp.dot(patches_ref[...], wc_ref[...],
                preferred_element_type=jnp.float32)           # [B*H*W, out_c]
    r = jnp.maximum(r + bc_ref[...], 0.0)

    # Folded avgpool + NCHW-flatten + (emb->fc1->fc2) weights, applied per
    # conv-output channel:  t[p, cls] = sum_o relu[p, o] * wfr[p, o*C + cls]
    t = jnp.zeros((r.shape[0], n_cls), jnp.float32)
    for o in range(out_c):                                    # static unroll (8)
        t = t + r[:, o:o + 1] * wfr_ref[:, o * n_cls:(o + 1) * n_cls]

    # Per-sample spatial sum (and batch padding to 8 rows) as one tiny matmul.
    logits = jnp.dot(g_ref[...], t,
                     preferred_element_type=jnp.float32) + bh_ref[...]

    # Row-wise softmax (dim=1), numerically stabilized.
    m = jnp.max(logits, axis=-1, keepdims=True)
    e = jnp.exp(logits - m)
    out_ref[...] = e * pl.reciprocal(jnp.sum(e, axis=-1, keepdims=True),
                                     approx=False)


def _full_spec(shape):
    # Whole-array block (full dims satisfy the (8,128) rule).
    return pl.BlockSpec(shape, lambda i: tuple(0 for _ in shape))


def fused_forward_pallas(patches, wc, bc, wfr, g, bh):
    n_rows, k = patches.shape
    out_c = wc.shape[1]
    n_cls = bh.shape[1]
    b_pad = g.shape[0]
    return pl.pallas_call(
        fused_kernel,
        out_shape=jax.ShapeDtypeStruct((b_pad, n_cls), jnp.float32),
        grid=(1,),
        in_specs=[
            _full_spec((n_rows, k)),
            _full_spec((k, out_c)),
            _full_spec((1, out_c)),
            _full_spec((n_rows, out_c * n_cls)),
            _full_spec((b_pad, n_rows)),
            _full_spec((1, n_cls)),
        ],
        out_specs=_full_spec((b_pad, n_cls)),
        compiler_params=pltpu.CompilerParams(
            dimension_semantics=("arbitrary",)),
    )(patches, wc, bc, wfr, g, bh)


# ---------------------------------------------------------------------------
# Parameter initialization (deterministic embedding_net + classifier head)
# ---------------------------------------------------------------------------
def init_params(key, c_in, h, w, num_classes):
    hp, wp = h // 2, w // 2
    feat_dim = CONV_OUT * hp * wp
    ks = jax.random.split(key, 10)

    def unif(k, shape, fan_in):
        bound = 1.0 / jnp.sqrt(jnp.float32(fan_in))
        return jax.random.uniform(k, shape, jnp.float32, -bound, bound)

    return {
        # conv weight, PyTorch layout [outC, inC, kh, kw]
        "conv_w": unif(ks[0], (CONV_OUT, c_in, KSIZE, KSIZE), c_in * KSIZE * KSIZE),
        "conv_b": unif(ks[1], (CONV_OUT,), c_in * KSIZE * KSIZE),
        # Linear weights in PyTorch layout [out, in]
        "emb_w": unif(ks[2], (EMBEDDING_DIM, feat_dim), feat_dim),
        "emb_b": unif(ks[3], (EMBEDDING_DIM,), feat_dim),
        "fc1_w": unif(ks[4], (HIDDEN, EMBEDDING_DIM), EMBEDDING_DIM),
        "fc1_b": unif(ks[5], (HIDDEN,), EMBEDDING_DIM),
        "fc2_w": unif(ks[6], (num_classes, HIDDEN), HIDDEN),
        "fc2_b": unif(ks[7], (num_classes,), HIDDEN),
    }


# ---------------------------------------------------------------------------
# One-time parameter folding (hoisted out of the per-call path)
# ---------------------------------------------------------------------------
def fold_params(params, x_shape):
    b, c_in, h, w = x_shape
    hp, wp = h // 2, w // 2
    n_cls = params["fc2_w"].shape[0]

    # conv weight in im2col layout [C*kh*kw, outC]; bias as a row.
    wc = params["conv_w"].reshape(CONV_OUT, c_in * KSIZE * KSIZE).T
    bc = params["conv_b"].reshape(1, CONV_OUT)

    # Fold embedding Linear -> fc1 -> fc2 (no nonlinearity between them).
    w_head = params["emb_w"].T @ params["fc1_w"].T @ params["fc2_w"].T    # [feat, C]
    b_head = (params["emb_b"] @ params["fc1_w"].T + params["fc1_b"]) \
        @ params["fc2_w"].T + params["fc2_b"]                             # [C]

    # Fold 2x2 avg-pool + NCHW flatten into the head weight, per conv pixel:
    #   wfr[h*W+w, o*C+cls] = 0.25 * w_head[o*Hp*Wp + (h//2)*Wp + (w//2), cls]
    w4 = w_head.reshape(CONV_OUT, hp, wp, n_cls)
    w4 = jnp.repeat(jnp.repeat(w4, 2, axis=1), 2, axis=2) * 0.25          # [O,H,W,C]
    wfr = w4.transpose(1, 2, 0, 3).reshape(h * w, CONV_OUT * n_cls)
    wfr = jnp.tile(wfr, (b, 1))                                           # [B*H*W, O*C]

    # Per-sample spatial-sum matrix, batch padded to a full 8-row tile.
    b_pad = max(B_PAD, ((b + B_PAD - 1) // B_PAD) * B_PAD)
    g = (jnp.arange(b * h * w)[None, :] // (h * w)
         == jnp.arange(b_pad)[:, None]).astype(jnp.float32)               # [b_pad, B*H*W]

    return {"wc": wc, "bc": bc, "wfr": wfr, "g": g, "bh": b_head.reshape(1, -1)}


# ---------------------------------------------------------------------------
# Forward pass
# ---------------------------------------------------------------------------
def im2col(x):
    """x: [B, C, H, W] -> patches [B*H*W, C*9] (channel-major, (ky,kx) inner)."""
    B, C, H, W = x.shape
    xp = jnp.pad(x, ((0, 0), (0, 0), (1, 1), (1, 1)))
    cols = []
    for ky in range(KSIZE):
        for kx in range(KSIZE):
            cols.append(xp[:, :, ky:ky + H, kx:kx + W])       # [B, C, H, W]
    p = jnp.stack(cols, axis=2)                                # [B, C, 9, H, W]
    p = p.transpose(0, 3, 4, 1, 2)                             # [B, H, W, C, 9]
    return p.reshape(B * H * W, C * KSIZE * KSIZE)


def siamese_classifier_forward(folded, x):
    b = x.shape[0]
    # TODO(synk): patch extraction stays in XLA; moving im2col in-kernel
    # (shifted VMEM slices of padded NHWC input) needs 4-D value reshapes
    # that Mosaic does not reliably lower at these layouts.
    patches = im2col(x)                                        # [B*H*W, C*9]
    probs_pad = fused_forward_pallas(patches, folded["wc"], folded["bc"],
                                     folded["wfr"], folded["g"], folded["bh"])
    return probs_pad[:b]


def reference_forward(params, x):
    """Plain-JAX reference mirroring the PyTorch semantics."""
    B, C, H, W = x.shape
    conv = jax.lax.conv_general_dilated(
        x, params["conv_w"], window_strides=(1, 1), padding="SAME",
        dimension_numbers=("NCHW", "OIHW", "NCHW"))
    conv = jax.nn.relu(conv + params["conv_b"].reshape(1, -1, 1, 1))
    conv = conv.reshape(B, CONV_OUT, H // 2, 2, W // 2, 2).mean(axis=(3, 5))
    feat = conv.reshape(B, -1)
    emb = feat @ params["emb_w"].T + params["emb_b"]
    h = emb @ params["fc1_w"].T + params["fc1_b"]
    logits = h @ params["fc2_w"].T + params["fc2_b"]
    return jax.nn.softmax(logits, axis=1)


if __name__ == "__main__":
    B, C, H, W = 2, 4, 16, 16
    NUM_CLASSES = 10

    key = jax.random.PRNGKey(0)
    kx, _ = jax.random.split(key)
    x = jax.random.normal(kx, (B, C, H, W), jnp.float32)
    params = init_params(jax.random.PRNGKey(42), C, H, W, NUM_CLASSES)

    folded = fold_params(params, x.shape)           # one-time param prep
    forward = jax.jit(siamese_classifier_forward)

    probs = jax.block_until_ready(forward(folded, x))
    ref = jax.block_until_ready(reference_forward(params, x))

    assert probs.shape == (B, NUM_CLASSES)
    assert jnp.allclose(jnp.sum(probs, axis=1), 1.0, atol=1e-5)
    assert jnp.allclose(probs, ref, atol=2e-5, rtol=2e-5)
    print("KERNEL_OK")
</pallas_src>

<mosaic_0001>
module attributes {stable_mosaic.version = 11 : i64} {
  func.func @fused_kernel(%arg0: i32, %arg1: memref<512x36xf32, #tpu.memory_space<vmem>>, %arg2: memref<36x8xf32, #tpu.memory_space<vmem>>, %arg3: memref<1x8xf32, #tpu.memory_space<vmem>>, %arg4: memref<512x80xf32, #tpu.memory_space<vmem>>, %arg5: memref<8x512xf32, #tpu.memory_space<vmem>>, %arg6: memref<1x10xf32, #tpu.memory_space<vmem>>, %arg7: memref<8x10xf32, #tpu.memory_space<vmem>>) attributes {dimension_semantics = [#tpu.dimension_semantics<arbitrary>], iteration_bounds = array<i64: 1>, scalar_prefetch = 0 : i64, scratch_operands = 0 : i64, tpu.core_type = #tpu.core_type<tc>, window_params = [{pipeline_mode = #tpu.pipeline_mode<synchronous>, transform_indices = @transform_0, window_bounds = array<i64: 512, 36>}, {pipeline_mode = #tpu.pipeline_mode<synchronous>, transform_indices = @transform_1, window_bounds = array<i64: 36, 8>}, {pipeline_mode = #tpu.pipeline_mode<synchronous>, transform_indices = @transform_2, window_bounds = array<i64: 1, 8>}, {pipeline_mode = #tpu.pipeline_mode<synchronous>, transform_indices = @transform_3, window_bounds = array<i64: 512, 80>}, {pipeline_mode = #tpu.pipeline_mode<synchronous>, transform_indices = @transform_4, window_bounds = array<i64: 8, 512>}, {pipeline_mode = #tpu.pipeline_mode<synchronous>, transform_indices = @transform_5, window_bounds = array<i64: 1, 10>}, {pipeline_mode = #tpu.pipeline_mode<synchronous>, transform_indices = @transform_6, window_bounds = array<i64: 8, 10>}]} {
    %c0 = arith.constant 0 : index
    %c0_0 = arith.constant 0 : index
    %0 = vector.load %arg1[%c0, %c0_0] : memref<512x36xf32, #tpu.memory_space<vmem>>, vector<512x36xf32>
    %c0_1 = arith.constant 0 : index
    %c0_2 = arith.constant 0 : index
    %1 = vector.load %arg2[%c0_1, %c0_2] : memref<36x8xf32, #tpu.memory_space<vmem>>, vector<36x8xf32>
    %cst = arith.constant dense<0.000000e+00> : vector<512x8xf32>
    %2 = tpu.matmul %0, %1, %cst {dimension_numbers = #tpu.dot_dimension_numbers<[1], [0], [0], [1], [0, 0, 1, 1], [], []>} : vector<512x36xf32>, vector<36x8xf32>, vector<512x8xf32> -> vector<512x8xf32>
    %c0_3 = arith.constant 0 : index
    %c0_4 = arith.constant 0 : index
    %3 = vector.load %arg3[%c0_3, %c0_4] : memref<1x8xf32, #tpu.memory_space<vmem>>, vector<1x8xf32>
    %4 = vector.broadcast %3 : vector<1x8xf32> to vector<512x8xf32>
    %5 = arith.addf %2, %4 : vector<512x8xf32>
    %cst_5 = arith.constant 0.000000e+00 : f32
    %6 = vector.broadcast %cst_5 : f32 to vector<512x8xf32>
    %7 = arith.maximumf %5, %6 : vector<512x8xf32>
    %cst_6 = arith.constant 0.000000e+00 : f32
    %8 = vector.broadcast %cst_6 : f32 to vector<512x10xf32>
    %9 = vector.extract_strided_slice %7 {offsets = [0, 0], sizes = [512, 1], strides = [1, 1]} : vector<512x8xf32> to vector<512x1xf32>
    %c0_7 = arith.constant 0 : index
    %c0_8 = arith.constant 0 : index
    %10 = vector.load %arg4[%c0_7, %c0_8] : memref<512x80xf32, #tpu.memory_space<vmem>>, vector<512x10xf32>
    %11 = vector.broadcast %9 : vector<512x1xf32> to vector<512x10xf32>
    %12 = arith.mulf %11, %10 : vector<512x10xf32>
    %13 = arith.addf %8, %12 : vector<512x10xf32>
    %14 = vector.extract_strided_slice %7 {offsets = [0, 1], sizes = [512, 1], strides = [1, 1]} : vector<512x8xf32> to vector<512x1xf32>
    %c0_9 = arith.constant 0 : index
    %c10 = arith.constant 10 : index
    %15 = vector.load %arg4[%c0_9, %c10] : memref<512x80xf32, #tpu.memory_space<vmem>>, vector<512x10xf32>
    %16 = vector.broadcast %14 : vector<512x1xf32> to vector<512x10xf32>
    %17 = arith.mulf %16, %15 : vector<512x10xf32>
    %18 = arith.addf %13, %17 : vector<512x10xf32>
    %19 = vector.extract_strided_slice %7 {offsets = [0, 2], sizes = [512, 1], strides = [1, 1]} : vector<512x8xf32> to vector<512x1xf32>
    %c0_10 = arith.constant 0 : index
    %c20 = arith.constant 20 : index
    %20 = vector.load %arg4[%c0_10, %c20] : memref<512x80xf32, #tpu.memory_space<vmem>>, vector<512x10xf32>
    %21 = vector.broadcast %19 : vector<512x1xf32> to vector<512x10xf32>
    %22 = arith.mulf %21, %20 : vector<512x10xf32>
    %23 = arith.addf %18, %22 : vector<512x10xf32>
    %24 = vector.extract_strided_slice %7 {offsets = [0, 3], sizes = [512, 1], strides = [1, 1]} : vector<512x8xf32> to vector<512x1xf32>
    %c0_11 = arith.constant 0 : index
    %c30 = arith.constant 30 : index
    %25 = vector.load %arg4[%c0_11, %c30] : memref<512x80xf32, #tpu.memory_space<vmem>>, vector<512x10xf32>
    %26 = vector.broadcast %24 : vector<512x1xf32> to vector<512x10xf32>
    %27 = arith.mulf %26, %25 : vector<512x10xf32>
    %28 = arith.addf %23, %27 : vector<512x10xf32>
    %29 = vector.extract_strided_slice %7 {offsets = [0, 4], sizes = [512, 1], strides = [1, 1]} : vector<512x8xf32> to vector<512x1xf32>
    %c0_12 = arith.constant 0 : index
    %c40 = arith.constant 40 : index
    %30 = vector.load %arg4[%c0_12, %c40] : memref<512x80xf32, #tpu.memory_space<vmem>>, vector<512x10xf32>
    %31 = vector.broadcast %29 : vector<512x1xf32> to vector<512x10xf32>
    %32 = arith.mulf %31, %30 : vector<512x10xf32>
    %33 = arith.addf %28, %32 : vector<512x10xf32>
    %34 = vector.extract_strided_slice %7 {offsets = [0, 5], sizes = [512, 1], strides = [1, 1]} : vector<512x8xf32> to vector<512x1xf32>
    %c0_13 = arith.constant 0 : index
    %c50 = arith.constant 50 : index
    %35 = vector.load %arg4[%c0_13, %c50] : memref<512x80xf32, #tpu.memory_space<vmem>>, vector<512x10xf32>
    %36 = vector.broadcast %34 : vector<512x1xf32> to vector<512x10xf32>
    %37 = arith.mulf %36, %35 : vector<512x10xf32>
    %38 = arith.addf %33, %37 : vector<512x10xf32>
    %39 = vector.extract_strided_slice %7 {offsets = [0, 6], sizes = [512, 1], strides = [1, 1]} : vector<512x8xf32> to vector<512x1xf32>
    %c0_14 = arith.constant 0 : index
    %c60 = arith.constant 60 : index
    %40 = vector.load %arg4[%c0_14, %c60] : memref<512x80xf32, #tpu.memory_space<vmem>>, vector<512x10xf32>
    %41 = vector.broadcast %39 : vector<512x1xf32> to vector<512x10xf32>
    %42 = arith.mulf %41, %40 : vector<512x10xf32>
    %43 = arith.addf %38, %42 : vector<512x10xf32>
    %44 = vector.extract_strided_slice %7 {offsets = [0, 7], sizes = [512, 1], strides = [1, 1]} : vector<512x8xf32> to vector<512x1xf32>
    %c0_15 = arith.constant 0 : index
    %c70 = arith.constant 70 : index
    %45 = vector.load %arg4[%c0_15, %c70] : memref<512x80xf32, #tpu.memory_space<vmem>>, vector<512x10xf32>
    %46 = vector.broadcast %44 : vector<512x1xf32> to vector<512x10xf32>
    %47 = arith.mulf %46, %45 : vector<512x10xf32>
    %48 = arith.addf %43, %47 : vector<512x10xf32>
    %c0_16 = arith.constant 0 : index
    %c0_17 = arith.constant 0 : index
    %49 = vector.load %arg5[%c0_16, %c0_17] : memref<8x512xf32, #tpu.memory_space<vmem>>, vector<8x512xf32>
    %cst_18 = arith.constant dense<0.000000e+00> : vector<8x10xf32>
    %50 = tpu.matmul %49, %48, %cst_18 {dimension_numbers = #tpu.dot_dimension_numbers<[1], [0], [0], [1], [0, 0, 1, 1], [], []>} : vector<8x512xf32>, vector<512x10xf32>, vector<8x10xf32> -> vector<8x10xf32>
    %c0_19 = arith.constant 0 : index
    %c0_20 = arith.constant 0 : index
    %51 = vector.load %arg6[%c0_19, %c0_20] : memref<1x10xf32, #tpu.memory_space<vmem>>, vector<1x10xf32>
    %52 = vector.broadcast %51 : vector<1x10xf32> to vector<8x10xf32>
    %53 = arith.addf %50, %52 : vector<8x10xf32>
    %cst_21 = arith.constant dense<0xFF800000> : vector<8xf32>
    %54 = vector.multi_reduction <maximumf>, %53, %cst_21 [1] : vector<8x10xf32> to vector<8xf32>
    %55 = vector.shape_cast %54 : vector<8xf32> to vector<8x1xf32>
    %56 = vector.broadcast %55 : vector<8x1xf32> to vector<8x10xf32>
    %57 = arith.subf %53, %56 : vector<8x10xf32>
    %58 = math.exp %57 : vector<8x10xf32>
    %cst_22 = arith.constant dense<0.000000e+00> : vector<8xf32>
    %59 = vector.multi_reduction <add>, %58, %cst_22 [1] : vector<8x10xf32> to vector<8xf32>
    %60 = vector.shape_cast %59 : vector<8xf32> to vector<8x1xf32>
    %61 = tpu.reciprocal %60 : vector<8x1xf32> -> vector<8x1xf32>
    %62 = vector.broadcast %61 : vector<8x1xf32> to vector<8x10xf32>
    %63 = arith.mulf %58, %62 : vector<8x10xf32>
    %c0_23 = arith.constant 0 : index
    %c0_24 = arith.constant 0 : index
    %64 = vector.load %arg7[%c0_23, %c0_24] : memref<8x10xf32, #tpu.memory_space<vmem>>, vector<8x10xf32>
    tpu.vector_store %arg7[%c0_23, %c0_24], %63 {strides = array<i32>} : memref<8x10xf32, #tpu.memory_space<vmem>>, vector<8x10xf32>,
    return
  }
  func.func @transform_0(%arg0: i32) -> (i32, i32) {
    %c0_i32 = arith.constant 0 : i32
    %c0_i32_0 = arith.constant 0 : i32
    %c0_i32_1 = arith.constant 0 : i32
    return %c0_i32, %c0_i32_0 : i32, i32
  }
  func.func @transform_1(%arg0: i32) -> (i32, i32) {
    %c0_i32 = arith.constant 0 : i32
    %c0_i32_0 = arith.constant 0 : i32
    %c0_i32_1 = arith.constant 0 : i32
    return %c0_i32, %c0_i32_0 : i32, i32
  }
  func.func @transform_2(%arg0: i32) -> (i32, i32) {
    %c0_i32 = arith.constant 0 : i32
    %c0_i32_0 = arith.constant 0 : i32
    %c0_i32_1 = arith.constant 0 : i32
    return %c0_i32, %c0_i32_0 : i32, i32
  }
  func.func @transform_3(%arg0: i32) -> (i32, i32) {
    %c0_i32 = arith.constant 0 : i32
    %c0_i32_0 = arith.constant 0 : i32
    %c0_i32_1 = arith.constant 0 : i32
    return %c0_i32, %c0_i32_0 : i32, i32
  }
  func.func @transform_4(%arg0: i32) -> (i32, i32) {
    %c0_i32 = arith.constant 0 : i32
    %c0_i32_0 = arith.constant 0 : i32
    %c0_i32_1 = arith.constant 0 : i32
    return %c0_i32, %c0_i32_0 : i32, i32
  }
  func.func @transform_5(%arg0: i32) -> (i32, i32) {
    %c0_i32 = arith.constant 0 : i32
    %c0_i32_0 = arith.constant 0 : i32
    %c0_i32_1 = arith.constant 0 : i32
    return %c0_i32, %c0_i32_0 : i32, i32
  }
  func.func @transform_6(%arg0: i32) -> (i32, i32) {
    %c0_i32 = arith.constant 0 : i32
    %c0_i32_0 = arith.constant 0 : i32
    %c0_i32_1 = arith.constant 0 : i32
    return %c0_i32, %c0_i32_0 : i32, i32
  }
}

</mosaic_0001>

<bundles_post_ra>
// kernel: siamese_classifier_forward.1
= control target key start
LH: loop header
LB: loop body
LE: loop exit
PB: predicated region body
PF: predicated region fallthrough
CT: control target
= control target key end

     0   :  { %vm99_vm0 = vcmask 293888   ;;  %vm292_vm1 = vcmask 1043456   ;;  %v11964_v47 = vmov 0   ;;  %s6658_s14 = smov 118   ;;  %s6661_s15 = smov 98   ;;  %vm5888_vm2 = vcmask 80896   ;;  %s11955_s1 = inlined_call_operand.vmem [shape: f32[36,8], index: 1, kind: input, shape index: {}]   ;;  %s11956_s0 = inlined_call_operand.vmem [shape: f32[512,36], index: 0, kind: input, shape index: {}]   ;;  %s11957_s2 = inlined_call_operand.vmem [shape: f32[1,8], index: 2, kind: input, shape index: {}]   ;;  %s11958_s3 = inlined_call_operand.vmem [shape: f32[512,80], index: 3, kind: input, shape index: {}]   ;;  %s11959_s4 = inlined_call_operand.vmem [shape: f32[8,512], index: 4, kind: input, shape index: {}]   ;;  %s11960_s5 = inlined_call_operand.vmem [shape: f32[1,10], index: 5, kind: input, shape index: {}]   ;;  %s11961_s6 = inlined_call_operand.vmem [shape: f32[8,10], index: 6, kind: output, shape index: {}]  }
   0x1   :  { %v87_v0 = vld [vmem:[%s11955_s1] sm:$0xff]  ;;  %v88_v1 = vld [vmem:[%s11955_s1 + $0x8] sm:$0xff]  ;;  %v89_v2 = vld [vmem:[%s11955_s1 + $0x10] sm:$0xff]  ;;  %6311 = vset.pattern.permute.xlu1 %v11964_v47  ;;  %6310 = vset.pattern.permute.xlu0 %v11964_v47  ;;  %s6669_s10 = smov 58  }
   0x2   :  { %v6217_v3 = vpack.c.bf16 %v88_v1, %v87_v0  ;;  %v90_v4 = vld [vmem:[%s11955_s1 + $0x18] sm:$0xff]  ;;  %v23_v5 = vld [vmem:[%s11956_s0] sm:$0xff]  ;;  %v65_v7 = vld [vmem:[%s11956_s0 + $0x150] sm:$0xff] }
   0x3   :  { %v6221_v6 = vpack.c.bf16 %v90_v4, %v89_v2  ;;  %6121 = vmatprep.mubr.msk.f32.mxu0 %vm99_vm0, %v23_v5  ;;  %v91_v8 = vld [vmem:[%s11955_s1 + $0x20] sm:$0xf]  ;;  %6184 = vmatprep.mubr.msk.f32.mxu1 %vm99_vm0, %v65_v7  ;;  %v24_v9 = vld [vmem:[%s11956_s0 + $0x8] sm:$0xff]  ;;  %v66_v10 = vld [vmem:[%s11956_s0 + $0x158] sm:$0xff] }
   0x4   :  { %6218 = vmatprep.subr.bf16.mxu0 %v6217_v3  ;;  %6289 = vmatprep.subr.bf16.mxu1 %v6217_v3  ;;  %v25_v11 = vld [vmem:[%s11956_s0 + $0x10] sm:$0xff]  ;;  %v67_v12 = vld [vmem:[%s11956_s0 + $0x160] sm:$0xff]  ;;  %v26_v13 = vld [vmem:[%s11956_s0 + $0x18] sm:$0xff] }
   0x5   :  { %6220 = vmatpush3.bf16.msra.mxu0 %v6217_v3  ;;  %6292 = vmatpush3.bf16.msra.mxu1 %v6217_v3  ;;  %v68_v14 = vld [vmem:[%s11956_s0 + $0x168] sm:$0xff]  ;;  %v27_v15 = vld [vmem:[%s11956_s0 + $0x20] sm:$0xff]  ;;  %v69_v16 = vld [vmem:[%s11956_s0 + $0x170] sm:$0xff] }
   0x6   :  { %6222 = vmatprep.subr.bf16.mxu0 %v6221_v6  ;;  %6290 = vmatprep.subr.bf16.mxu1 %v6221_v6  ;;  %v28_v17 = vld [vmem:[%s11956_s0 + $0x28] sm:$0xff]  ;;  %v70_v18 = vld [vmem:[%s11956_s0 + $0x178] sm:$0xff]  ;;  %v29_v19 = vld [vmem:[%s11956_s0 + $0x30] sm:$0xff] }
   0x7   :  { %v71_v20 = vld [vmem:[%s11956_s0 + $0x180] sm:$0xff]  ;;  %v30_v21 = vld [vmem:[%s11956_s0 + $0x38] sm:$0xff]  ;;  %v72_v22 = vld [vmem:[%s11956_s0 + $0x188] sm:$0xff] }
   0x8   :  { %v31_v23 = vld [vmem:[%s11956_s0 + $0x40] sm:$0xff]  ;;  %v73_v24 = vld [vmem:[%s11956_s0 + $0x190] sm:$0xff]  ;;  %v32_v25 = vld [vmem:[%s11956_s0 + $0x48] sm:$0xff] }
   0x9   :  { %6224 = vmatpush3.bf16.msra.mxu0 %v6221_v6  ;;  %6293 = vmatpush3.bf16.msra.mxu1 %v6221_v6  ;;  %v74_v26 = vld [vmem:[%s11956_s0 + $0x198] sm:$0xff]  ;;  %v33_v27 = vld [vmem:[%s11956_s0 + $0x50] sm:$0xff]  ;;  %v75_v28 = vld [vmem:[%s11956_s0 + $0x1a0] sm:$0xff] }
   0xa   :  { %6119 = vmatprep.subr.msk.mxu0 %vm292_vm1, %v91_v8  ;;  %6291 = vmatprep.subr.msk.mxu1 %vm292_vm1, %v91_v8  ;;  %v34_v29 = vld [vmem:[%s11956_s0 + $0x58] sm:$0xff]  ;;  %v76_v30 = vld [vmem:[%s11956_s0 + $0x1a8] sm:$0xff]  ;;  %v35_v31 = vld [vmem:[%s11956_s0 + $0x60] sm:$0xff] }
   0xb   :  { %v77_v32 = vld [vmem:[%s11956_s0 + $0x1b0] sm:$0xff]  ;;  %v36_v33 = vld [vmem:[%s11956_s0 + $0x68] sm:$0xff]  ;;  %v78_v34 = vld [vmem:[%s11956_s0 + $0x1b8] sm:$0xff] }
   0xc   :  { %v37_v35 = vld [vmem:[%s11956_s0 + $0x70] sm:$0xff]  ;;  %v79_v36 = vld [vmem:[%s11956_s0 + $0x1c0] sm:$0xff]  ;;  %v38_v37 = vld [vmem:[%s11956_s0 + $0x78] sm:$0xff] }
   0xd   :  { %6120 = vmatpush3.msk.msra.mxu0 %vm292_vm1, %v91_v8  ;;  %6294 = vmatpush3.msk.msra.mxu1 %vm292_vm1, %v91_v8  ;;  %v80_v38 = vld [vmem:[%s11956_s0 + $0x1c8] sm:$0xff]  ;;  %v39_v39 = vld [vmem:[%s11956_s0 + $0x80] sm:$0xff]  ;;  %v81_v40 = vld [vmem:[%s11956_s0 + $0x1d0] sm:$0xff] }
   0xe   :  { %6122 = vmatmul.mubr.msk.f32.vlgmr.msra.gmra.mrb[0].mxu0 %vm99_vm0, %v24_v9  ;;  %6185 = vmatmul.mubr.msk.f32.vlgmr.msra.gmra.mrb[0].mxu1 %vm99_vm0, %v66_v10  ;;  %v40_v41 = vld [vmem:[%s11956_s0 + $0x88] sm:$0xff]  ;;  %v82_v42 = vld [vmem:[%s11956_s0 + $0x1d8] sm:$0xff]  ;;  %v41_v43 = vld [vmem:[%s11956_s0 + $0x90] sm:$0xff] }
   0xf   :  { %6124 = vmatprep.mubr.msk.f32.mxu0 %vm99_vm0, %v25_v11  ;;  %6187 = vmatprep.mubr.msk.f32.mxu1 %vm99_vm0, %v67_v12  ;;  %v83_v44 = vld [vmem:[%s11956_s0 + $0x1e0] sm:$0xff]  ;;  %v42_v45 = vld [vmem:[%s11956_s0 + $0x98] sm:$0xff]  ;;  %v84_v46 = vld [vmem:[%s11956_s0 + $0x1e8] sm:$0xff] }
  0x10   :  { %v43_v48 = vld [vmem:[%s11956_s0 + $0xa0] sm:$0xff]  ;;  %v44_v49 = vld [vmem:[%s11956_s0 + $0xa8] sm:$0xff]  ;;  %v85_v50 = vld [vmem:[%s11956_s0 + $0x1f0] sm:$0xff] }
  0x11   :  { %v86_v51 = vld [vmem:[%s11956_s0 + $0x1f8] sm:$0xff]  ;;  %v45_v52 = vld [vmem:[%s11956_s0 + $0xb0] sm:$0xff]  ;;  %v47_v54 = vld [vmem:[%s11956_s0 + $0xc0] sm:$0xff] }
  0x12   :  { %6125 = vmatmul.mubr.msk.f32.gmra.mrb[2].mxu0 %vm99_vm0, %v26_v13  ;;  %6188 = vmatmul.mubr.msk.f32.gmra.mrb[2].mxu1 %vm99_vm0, %v68_v14  ;;  %v46_v53 = vld [vmem:[%s11956_s0 + $0xb8] sm:$0xff]  ;;  %v48_v55 = vld [vmem:[%s11956_s0 + $0xc8] sm:$0xff]  ;;  %v49_v56 = vld [vmem:[%s11956_s0 + $0xd0] sm:$0xff] }
  0x13   :  { %6127 = vmatprep.mubr.msk.f32.mxu0 %vm99_vm0, %v27_v15  ;;  %6190 = vmatprep.mubr.msk.f32.mxu1 %vm99_vm0, %v69_v16  ;;  %v50_v57 = vld [vmem:[%s11956_s0 + $0xd8] sm:$0xff]  ;;  %v51_v58 = vld [vmem:[%s11956_s0 + $0xe0] sm:$0xff]  ;;  %v52_v59 = vld [vmem:[%s11956_s0 + $0xe8] sm:$0xff] }
  0x14   :  { %v53_v60 = vld [vmem:[%s11956_s0 + $0xf0] sm:$0xff]  ;;  %v54_v61 = vld [vmem:[%s11956_s0 + $0xf8] sm:$0xff]  ;;  %v55_v62 = vld [vmem:[%s11956_s0 + $0x100] sm:$0xff] }
  0x15   :  { %v56_v63 = vld [vmem:[%s11956_s0 + $0x108] sm:$0xff]  ;;  %v57_v0 = vld [vmem:[%s11956_s0 + $0x110] sm:$0xff]  ;;  %v58_v1 = vld [vmem:[%s11956_s0 + $0x118] sm:$0xff] }
  0x16   :  { %6128 = vmatmul.mubr.msk.f32.gmra.mrb[4].mxu0 %vm99_vm0, %v28_v17  ;;  %6191 = vmatmul.mubr.msk.f32.gmra.mrb[4].mxu1 %vm99_vm0, %v70_v18  ;;  %v59_v2 = vld [vmem:[%s11956_s0 + $0x120] sm:$0xff]  ;;  %v60_v3 = vld [vmem:[%s11956_s0 + $0x128] sm:$0xff]  ;;  %v61_v5 = vld [vmem:[%s11956_s0 + $0x130] sm:$0xff] }
  0x17   :  { %6130 = vmatprep.mubr.msk.f32.mxu0 %vm99_vm0, %v29_v19  ;;  %6193 = vmatprep.mubr.msk.f32.mxu1 %vm99_vm0, %v71_v20  ;;  %v6965_v4 = vld [vmem:[%s11957_s2] ss:$0 sm:$0xff]  ;;  %v62_v6 = vld [vmem:[%s11956_s0 + $0x138] sm:$0xff] }
  0x18   :  { %v63_v19 = vld [vmem:[%s11956_s0 + $0x140] sm:$0xff] }
  0x1a   :  { %6131 = vmatmul.mubr.msk.f32.gmra.mrb[6].mxu0 %vm99_vm0, %v30_v21  ;;  %6194 = vmatmul.mubr.msk.f32.gmra.mrb[6].mxu1 %vm99_vm0, %v72_v22 }
  0x1b   :  { %6133 = vmatprep.mubr.msk.f32.mxu0 %vm99_vm0, %v31_v23  ;;  %6196 = vmatprep.mubr.msk.f32.mxu1 %vm99_vm0, %v73_v24  ;;  %v11962_v23 = vmov 1  }
  0x1e   :  { %6134 = vmatmul.mubr.msk.f32.gmra.mrb[8].mxu0 %vm99_vm0, %v32_v25  ;;  %6197 = vmatmul.mubr.msk.f32.gmra.mrb[8].mxu1 %vm99_vm0, %v74_v26  ;;  %v64_v26 = vld [vmem:[%s11956_s0 + $0x148] sm:$0xff] }
  0x1f   :  { %6136 = vmatprep.mubr.msk.f32.mxu0 %vm99_vm0, %v33_v27  ;;  %6199 = vmatprep.mubr.msk.f32.mxu1 %vm99_vm0, %v75_v28 }
  0x22   :  { %6137 = vmatmul.mubr.msk.f32.gmra.mrb[10].mxu0 %vm99_vm0, %v34_v29  ;;  %6200 = vmatmul.mubr.msk.f32.gmra.mrb[10].mxu1 %vm99_vm0, %v76_v30 }
  0x23   :  { %6139 = vmatprep.mubr.msk.f32.mxu0 %vm99_vm0, %v35_v31  ;;  %6202 = vmatprep.mubr.msk.f32.mxu1 %vm99_vm0, %v77_v32 }
  0x26   :  { %6140 = vmatmul.mubr.msk.f32.gmra.mrb[12].mxu0 %vm99_vm0, %v36_v33  ;;  %6203 = vmatmul.mubr.msk.f32.gmra.mrb[12].mxu1 %vm99_vm0, %v78_v34  ;;  %v11968_v33 = vmov 2  }
  0x27   :  { %6142 = vmatprep.mubr.msk.f32.mxu0 %vm99_vm0, %v37_v35  ;;  %6205 = vmatprep.mubr.msk.f32.mxu1 %vm99_vm0, %v79_v36 }
  0x2a   :  { %6143 = vmatmul.mubr.msk.f32.gmra.mrb[14].mxu0 %vm99_vm0, %v38_v37  ;;  %6206 = vmatmul.mubr.msk.f32.gmra.mrb[14].mxu1 %vm99_vm0, %v80_v38 }
  0x2b   :  { %6145 = vmatprep.mubr.msk.f32.mxu0 %vm99_vm0, %v39_v39  ;;  %6208 = vmatprep.mubr.msk.f32.mxu1 %vm99_vm0, %v81_v40 }
  0x2e   :  { %6146 = vmatmul.mubr.msk.f32.gmra.mrb[16].mxu0 %vm99_vm0, %v40_v41  ;;  %6209 = vmatmul.mubr.msk.f32.gmra.mrb[16].mxu1 %vm99_vm0, %v82_v42 }
  0x2f   :  { %6148 = vmatprep.mubr.msk.f32.mxu0 %vm99_vm0, %v41_v43  ;;  %6211 = vmatprep.mubr.msk.f32.mxu1 %vm99_vm0, %v83_v44 }
  0x32   :  { %6149 = vmatmul.mubr.msk.f32.gmra.mrb[18].mxu0 %vm99_vm0, %v42_v45  ;;  %6212 = vmatmul.mubr.msk.f32.gmra.mrb[18].mxu1 %vm99_vm0, %v84_v46 }
  0x33   :  { %6151 = vmatprep.mubr.msk.f32.mxu0 %vm99_vm0, %v43_v48  ;;  %6214 = vmatprep.mubr.msk.f32.mxu1 %vm99_vm0, %v85_v50 }
  0x36   :  { %6152 = vmatmul.mubr.msk.f32.gmra.mrb[20].mxu0 %vm99_vm0, %v44_v49  ;;  %6215 = vmatmul.mubr.msk.f32.gmra.mrb[20].mxu1 %vm99_vm0, %v86_v51 }
  0x37   :  { %6154 = vmatprep.mubr.msk.f32.mxu0 %vm99_vm0, %v45_v52 }
  0x3a   :  { %6155 = vmatmul.mubr.msk.f32.gmra.mrb[22].mxu0 %vm99_vm0, %v46_v53 }
  0x3b   :  { %6157 = vmatprep.mubr.msk.f32.mxu0 %vm99_vm0, %v47_v54 }
  0x3e   :  { %6158 = vmatmul.mubr.msk.f32.gmra.mrb[24].mxu0 %vm99_vm0, %v48_v55 }
  0x3f   :  { %6160 = vmatprep.mubr.msk.f32.mxu0 %vm99_vm0, %v49_v56 }
  0x42   :  { %6161 = vmatmul.mubr.msk.f32.gmra.mrb[26].mxu0 %vm99_vm0, %v50_v57 }
  0x43   :  { %6163 = vmatprep.mubr.msk.f32.mxu0 %vm99_vm0, %v51_v58 }
  0x46   :  { %6164 = vmatmul.mubr.msk.f32.gmra.mrb[28].mxu0 %vm99_vm0, %v52_v59 }
  0x47   :  { %6166 = vmatprep.mubr.msk.f32.mxu0 %vm99_vm0, %v53_v60 }
  0x4a   :  { %6167 = vmatmul.mubr.msk.f32.gmra.mrb[30].mxu0 %vm99_vm0, %v54_v61 }
  0x4b   :  { %6169 = vmatprep.mubr.msk.f32.mxu0 %vm99_vm0, %v55_v62 }
  0x4e   :  { %6170 = vmatmul.mubr.msk.f32.gmra.mrb[32].mxu0 %vm99_vm0, %v56_v63 }
  0x4f   :  { %6172 = vmatprep.mubr.msk.f32.mxu0 %vm99_vm0, %v57_v0 }
  0x52   :  { %6173 = vmatmul.mubr.msk.f32.gmra.mrb[34].mxu0 %vm99_vm0, %v58_v1 }
  0x53   :  { %6175 = vmatprep.mubr.msk.f32.mxu0 %vm99_vm0, %v59_v2 }
  0x56   :  { %6176 = vmatmul.mubr.msk.f32.gmra.mrb[36].mxu0 %vm99_vm0, %v60_v3 }
  0x57   :  { %6178 = vmatprep.mubr.msk.f32.mxu0 %vm99_vm0, %v61_v5 }
  0x5a   :  { %6179 = vmatmul.mubr.msk.f32.gmra.mrb[38].mxu0 %vm99_vm0, %v62_v6 }
  0x5b   :  { %6181 = vmatprep.mubr.msk.f32.mxu0 %vm99_vm0, %v63_v19 }
  0x5e   :  { %6182 = vmatmul.mubr.msk.f32.gmra.mrb[40].mxu0 %vm99_vm0, %v64_v26 }
  0xe1   :  { %v6123_v7 = vpop.f32.mrb[0].mxu0  ;;  %v6186_v8 = vpop.f32.mrb[0].mxu1 }
  0xe2   :  { %v368_v9 = vadd.f32 %v6123_v7, %v6965_v4  ;;  %v578_v10 = vadd.f32 %v6186_v8, %v6965_v4  ;;  %v572_v11 = vpop.f32.mrb[1].mxu1  ;;  %v362_v12 = vpop.f32.mrb[1].mxu0 }
  0xe3   :  { %v573_v20 = vadd.f32 %v6965_v4, %v572_v11  ;;  %v363_v30 = vadd.f32 %v6965_v4, %v362_v12 }
  0xe4   :  { %v6977_v13 = vmax.f32 %v368_v9, 0.0  ;;  %v6979_v14 = vmax.f32 %v578_v10, 0.0 }
  0xe5   :  { %v6126_v15 = vpop.f32.mrb[2].mxu0  ;;  %v6189_v16 = vpop.f32.mrb[2].mxu1  ;;  %v7002_v27 = vmax.f32 %v573_v20, 0.0  ;;  %v7021_v37 = vmax.f32 %v363_v30, 0.0 }
  0xe6   :  { %12228 = vst [vmem:[#allocation2_spill] sm:$0xff] %v6977_v13  ;;  %12229 = vst [vmem:[#allocation3_spill] sm:$0xff] %v6979_v14  ;;  %1026 = vperm.xlu1 %6311, %v6979_v14   ;;  %816 = vperm.xlu0 %6310, %v6977_v13   ;;  %v372_v17 = vpop.f32.mrb[3].mxu0  ;;  %v582_v18 = vpop.f32.mrb[3].mxu1  ;;  %v378_v34 = vadd.f32 %v6126_v15, %v6965_v4  ;;  %v588_v41 = vadd.f32 %v6189_v16, %v6965_v4 }
  0xe7   :  { %12230 = vst [vmem:[#allocation4_spill] sm:$0xff] %v7002_v27  ;;  %12231 = vst [vmem:[#allocation5_spill] sm:$0xff] %v7021_v37  ;;  %v373_v53 = vadd.f32 %v6965_v4, %v372_v17  ;;  %v583_v56 = vadd.f32 %v6965_v4, %v582_v18 }
  0xe8   :  { %v7030_v40 = vmax.f32 %v378_v34, 0.0  ;;  %v7043_v46 = vmax.f32 %v588_v41, 0.0 }
  0xe9   :  { %v6129_v21 = vpop.f32.mrb[4].mxu0  ;;  %v6987_v22 = vpop.f32.mrb[4].mxu1  ;;  %v7066_v55 = vmax.f32 %v373_v53, 0.0  ;;  %v7075_v59 = vmax.f32 %v583_v56, 0.0 }
  0xea   :  { %6312 = vset.pattern.permute.xlu1 %v11962_v23  ;;  %6313 = vset.pattern.permute.xlu0 %v11962_v23  ;;  %v6992_v24 = vpop.f32.mrb[5].mxu0  ;;  %v6994_v25 = vpop.f32.mrb[5].mxu1  ;;  %12232 = vst [vmem:[#allocation6_spill] sm:$0xff] %v7030_v40  ;;  %12233 = vst [vmem:[#allocation7_spill] sm:$0xff] %v7043_v46  ;;  %v388_v58 = vadd.f32 %v6129_v21, %v6965_v4  ;;  %v598_v62 = vadd.f32 %v6987_v22, %v6965_v4 }
  0xeb   :  { %1262 = vperm.xlu1 %6312, %v6977_v13   ;;  %1430 = vperm.xlu0 %6313, %v6979_v14   ;;  %12234 = vst [vmem:[#allocation8_spill] sm:$0xff] %v7066_v55  ;;  %12235 = vst [vmem:[#allocation9_spill] sm:$0xff] %v7075_v59  ;;  %v383_v0 = vadd.f32 %v6965_v4, %v6992_v24  ;;  %v593_v2 = vadd.f32 %v6965_v4, %v6994_v25 }
  0xec   :  { %v7082_v61 = vmax.f32 %v388_v58, 0.0  ;;  %v7088_v63 = vmax.f32 %v598_v62, 0.0 }
  0xed   :  { %v7004_v28 = vpop.f32.mrb[6].mxu0  ;;  %v7006_v29 = vpop.f32.mrb[6].mxu1  ;;  %v7096_v1 = vmax.f32 %v383_v0, 0.0  ;;  %v7106_v6 = vmax.f32 %v593_v2, 0.0 }
  0xee   :  { %v7009_v31 = vpop.f32.mrb[7].mxu0  ;;  %v7011_v32 = vpop.f32.mrb[7].mxu1  ;;  %12236 = vst [vmem:[#allocation10_spill] sm:$0xff] %v7082_v61  ;;  %12237 = vst [vmem:[#allocation11_spill] sm:$0xff] %v7088_v63  ;;  %v398_v8 = vadd.f32 %v7004_v28, %v6965_v4  ;;  %v608_v11 = vadd.f32 %v7006_v29, %v6965_v4 }
  0xef   :  { %1426 = vperm.xlu1 %6312, %v7002_v27   ;;  %6314 = vset.pattern.permute.xlu0 %v11968_v33  ;;  %12238 = vst [vmem:[#allocation12_spill] sm:$0xff] %v7096_v1  ;;  %12239 = vst [vmem:[#allocation13_spill] sm:$0xff] %v7106_v6  ;;  %v393_v15 = vadd.f32 %v6965_v4, %v7009_v31  ;;  %v603_v17 = vadd.f32 %v6965_v4, %v7011_v32 }
  0xf0   :  { %1902 = vperm.xlu0 %6314, %v6977_v13   ;;  %v7122_v10 = vmax.f32 %v398_v8, 0.0  ;;  %v7128_v12 = vmax.f32 %v608_v11, 0.0 }
  0xf1   :  { %v7017_v35 = vpop.f32.mrb[8].mxu0  ;;  %v7019_v36 = vpop.f32.mrb[8].mxu1  ;;  %v7136_v16 = vmax.f32 %v393_v15, 0.0  ;;  %v7146_v20 = vmax.f32 %v603_v17, 0.0 }
  0xf2   :  { %v7023_v38 = vpop.f32.mrb[9].mxu0  ;;  %v7025_v39 = vpop.f32.mrb[9].mxu1  ;;  %12240 = vst [vmem:[#allocation14_spill] sm:$0xff] %v7122_v10  ;;  %12241 = vst [vmem:[#allocation15_spill] sm:$0xff] %v7128_v12  ;;  %v408_v22 = vadd.f32 %v7017_v35, %v6965_v4  ;;  %v618_v26 = vadd.f32 %v7019_v36, %v6965_v4 }
  0xf3   :  { %6317 = vset.pattern.permute.xlu1 %v11968_v33  ;;  %12242 = vst [vmem:[#allocation16_spill] sm:$0xff] %v7136_v16  ;;  %12243 = vst [vmem:[#allocation17_spill] sm:$0xff] %v7146_v20  ;;  %v403_v29 = vadd.f32 %v6965_v4, %v7023_v38  ;;  %v613_v31 = vadd.f32 %v6965_v4, %v7025_v39 }
  0xf4   :  { %6315 = vset.pattern.permute.xlu0 %v11964_v47  ;;  %1898 = vperm.xlu1 %6317, %v7021_v37   ;;  %v7162_v25 = vmax.f32 %v408_v22, 0.0  ;;  %v7168_v28 = vmax.f32 %v618_v26, 0.0 }
  0xf5   :  { %811 = vperm.xlu0 %6315, %v7021_v37   ;;  %v7034_v42 = vpop.f32.mrb[10].mxu0  ;;  %v7036_v43 = vpop.f32.mrb[10].mxu1  ;;  %v7176_v30 = vmax.f32 %v403_v29, 0.0  ;;  %v7184_v34 = vmax.f32 %v613_v31, 0.0 }
  0xf6   :  { %v7038_v44 = vpop.f32.mrb[11].mxu0  ;;  %v7040_v45 = vpop.f32.mrb[11].mxu1  ;;  %12244 = vst [vmem:[#allocation18_spill] sm:$0xff] %v7162_v25  ;;  %12245 = vst [vmem:[#allocation19_spill] sm:$0xff] %v7168_v28  ;;  %v418_v38 = vadd.f32 %v7034_v42, %v6965_v4  ;;  %v628_v53 = vadd.f32 %v7036_v43, %v6965_v4 }
  0xf7   :  { %12246 = vst [vmem:[#allocation20_spill] sm:$0xff] %v7176_v30  ;;  %12247 = vst [vmem:[#allocation21_spill] sm:$0xff] %v7184_v34  ;;  %v413_v42 = vadd.f32 %v6965_v4, %v7038_v44  ;;  %v623_v43 = vadd.f32 %v6965_v4, %v7040_v45 }
  0xf8   :  { %6318 = vset.pattern.permute.xlu1 %v11964_v47  ;;  %v7202_v41 = vmax.f32 %v418_v38, 0.0  ;;  %v7208_v56 = vmax.f32 %v628_v53, 0.0 }
  0xf9   :  { %826 = vperm.xlu1 %6318, %v7030_v40   ;;  %1021 = vperm.xlu0 %6315, %v7002_v27   ;;  %v7047_v48 = vpop.f32.mrb[12].mxu0  ;;  %v7049_v49 = vpop.f32.mrb[12].mxu1  ;;  %v7216_v58 = vmax.f32 %v413_v42, 0.0  ;;  %v7224_v0 = vmax.f32 %v623_v43, 0.0 }
  0xfa   :  { %v7051_v50 = vpop.f32.mrb[13].mxu0  ;;  %v7053_v51 = vpop.f32.mrb[13].mxu1  ;;  %12248 = vst [vmem:[#allocation22_spill] sm:$0xff] %v7202_v41  ;;  %12249 = vst [vmem:[#allocation23_spill] sm:$0xff] %v7208_v56  ;;  %v428_v45 = vadd.f32 %v7047_v48, %v6965_v4  ;;  %v638_v15 = vadd.f32 %v7049_v49, %v6965_v4 }
  0xfb   :  { %12250 = vst [vmem:[#allocation24_spill] sm:$0xff] %v7216_v58  ;;  %12251 = vst [vmem:[#allocation25_spill] sm:$0xff] %v7224_v0  ;;  %v423_v29 = vadd.f32 %v6965_v4, %v7051_v50  ;;  %v633_v42 = vadd.f32 %v6965_v4, %v7053_v51 }
  0xfc   :  { %v7242_v11 = vmax.f32 %v428_v45, 0.0  ;;  %v7254_v26 = vmax.f32 %v638_v15, 0.0 }
  0xfd   :  { %1036 = vperm.xlu1 %6318, %v7043_v46   ;;  %6316 = vset.pattern.permute.xlu0 %v11962_v23  ;;  %v7058_v52 = vpop.f32.mrb[14].mxu0  ;;  %v7064_v54 = vpop.f32.mrb[14].mxu1  ;;  %v7268_v53 = vmax.f32 %v423_v29, 0.0  ;;  %v7278_v45 = vmax.f32 %v633_v42, 0.0 }
  0xfe   :  { %1258 = vperm.xlu0 %6316, %v7021_v37   ;;  %v7072_v57 = vpop.f32.mrb[15].mxu0  ;;  %v7080_v60 = vpop.f32.mrb[15].mxu1  ;;  %12254 = vst [vmem:[#allocation28_spill] sm:$0xff] %v7242_v11  ;;  %12255 = vst [vmem:[#allocation29_spill] sm:$0xff] %v7254_v26  ;;  %v438_v42 = vadd.f32 %v7058_v52, %v6965_v4 }
  0xff   :  { %12257 = vst [vmem:[#allocation31_spill] sm:$0xff] %v7268_v53  ;;  %12260 = vst [vmem:[#allocation34_spill] sm:$0xff] %v7278_v45 }
 0x101   :  { %6319 = vset.pattern.permute.xlu1 %v11968_v33  ;;  %v7101_v3 = vpop.f32.mrb[16].mxu0  ;;  %v7103_v5 = vpop.f32.mrb[16].mxu1 }
 0x102   :  { %1910 = vperm.xlu1 %6319, %v7030_v40   ;;  %1270 = vperm.xlu0 %6316, %v7030_v40   ;;  %v7113_v7 = vpop.f32.mrb[17].mxu0  ;;  %v7120_v9 = vpop.f32.mrb[17].mxu1  ;;  %v658_v13 = vadd.f32 %v7103_v5, %v6965_v4 }
 0x104   :  { %v7374_v37 = vmax.f32 %v658_v13, 0.0  ;;  %v653_v13 = vadd.f32 %v6965_v4, %v7120_v9 }
 0x105   :  { %v7141_v18 = vpop.f32.mrb[18].mxu0  ;;  %v7143_v19 = vpop.f32.mrb[18].mxu1 }
 0x106   :  { %6320 = vset.pattern.permute.xlu1 %v11964_v47  ;;  %1438 = vperm.xlu0 %6316, %v7043_v46   ;;  %v7153_v21 = vpop.f32.mrb[19].mxu0  ;;  %v7160_v24 = vpop.f32.mrb[19].mxu1  ;;  %12278 = vst [vmem:[#allocation49_spill] sm:$0xff] %v7374_v37 }
 0x107   :  { %821 = vperm.xlu1 %6320, %v7066_v55  }
 0x109   :  { %v7181_v32 = vpop.f32.mrb[20].mxu0  ;;  %v7188_v35 = vpop.f32.mrb[20].mxu1 }
 0x10a   :  { %6321 = vset.pattern.permute.xlu0 %v11964_v47  ;;  %v7193_v36 = vpop.f32.mrb[21].mxu0  ;;  %v7200_v39 = vpop.f32.mrb[21].mxu1 }
 0x10b   :  { %6322 = vset.pattern.permute.xlu1 %v11962_v23  ;;  %1031 = vperm.xlu0 %6321, %v7075_v59  }
 0x10c   :  { %1266 = vperm.xlu1 %6322, %v7066_v55  }
 0x10d   :  { %v7221_v62 = vpop.f32.mrb[22].mxu0 }
 0x10e   :  { %v7229_v44 = vpop.f32.mrb[23].mxu0 }
 0x10f   :  { %6325 = vset.pattern.permute.xlu0 %v11962_v23 }
 0x110   :  { %1434 = vperm.xlu1 %6322, %v7075_v59   ;;  %1278 = vperm.xlu0 %6325, %v7082_v61  }
 0x111   :  { %v7247_v17 = vpop.f32.mrb[24].mxu0 }
 0x112   :  { %v7261_v49 = vpop.f32.mrb[25].mxu0 }
 0x114   :  { %6323 = vset.pattern.permute.xlu1 %v11968_v33  ;;  %1446 = vperm.xlu0 %6325, %v7088_v63  }
 0x115   :  { %1906 = vperm.xlu1 %6323, %v7066_v55   ;;  %v7288_v51 = vpop.f32.mrb[26].mxu0  ;;  %v12274_v55 = vmov 2  }
 0x118   :  { %6327 = vset.pattern.permute.xlu0 %v11964_v47 }
 0x119   :  { %6324 = vset.pattern.permute.xlu1 %v11964_v47  ;;  %831 = vperm.xlu0 %6327, %v7096_v1  }
 0x11a   :  { %836 = vperm.xlu1 %6324, %v7082_v61  }
 0x11d   :  { %1041 = vperm.xlu0 %6327, %v7106_v6  }
 0x11e   :  { %1046 = vperm.xlu1 %6324, %v7088_v63  }
 0x121   :  { %6329 = vset.pattern.permute.xlu0 %v11968_v33 }
 0x122   :  { %6326 = vset.pattern.permute.xlu1 %v11968_v33  ;;  %1914 = vperm.xlu0 %6329, %v7096_v1  }
 0x123   :  { %1918 = vperm.xlu1 %6326, %v7082_v61  }
 0x126   :  { %6331 = vset.pattern.permute.xlu0 %v11962_v23 }
 0x127   :  { %6328 = vset.pattern.permute.xlu1 %v11962_v23  ;;  %1286 = vperm.xlu0 %6331, %v7122_v10  }
 0x128   :  { %1274 = vperm.xlu1 %6328, %v7096_v1  }
 0x12b   :  { %1454 = vperm.xlu0 %6331, %v7128_v12  }
 0x12c   :  { %1442 = vperm.xlu1 %6328, %v7106_v6  }
 0x12f   :  { %6333 = vset.pattern.permute.xlu0 %v11964_v47 }
 0x130   :  { %6330 = vset.pattern.permute.xlu1 %v11964_v47  ;;  %841 = vperm.xlu0 %6333, %v7136_v16  }
 0x131   :  { %846 = vperm.xlu1 %6330, %v7122_v10  }
 0x134   :  { %1051 = vperm.xlu0 %6333, %v7146_v20  }
 0x135   :  { %1056 = vperm.xlu1 %6330, %v7128_v12  }
 0x138   :  { %6335 = vset.pattern.permute.xlu0 %v11968_v33 }
 0x139   :  { %6332 = vset.pattern.permute.xlu1 %v11968_v33  ;;  %1922 = vperm.xlu0 %6335, %v7136_v16  }
 0x13a   :  { %1926 = vperm.xlu1 %6332, %v7122_v10  }
 0x13d   :  { %6337 = vset.pattern.permute.xlu0 %v11962_v23 }
 0x13e   :  { %6334 = vset.pattern.permute.xlu1 %v11962_v23  ;;  %1294 = vperm.xlu0 %6337, %v7162_v25  }
 0x13f   :  { %1282 = vperm.xlu1 %6334, %v7136_v16  }
 0x142   :  { %1462 = vperm.xlu0 %6337, %v7168_v28  }
 0x143   :  { %1450 = vperm.xlu1 %6334, %v7146_v20  }
 0x146   :  { %6339 = vset.pattern.permute.xlu0 %v11964_v47 }
 0x147   :  { %6336 = vset.pattern.permute.xlu1 %v11964_v47  ;;  %851 = vperm.xlu0 %6339, %v7176_v30  }
 0x148   :  { %856 = vperm.xlu1 %6336, %v7162_v25  }
 0x14b   :  { %1061 = vperm.xlu0 %6339, %v7184_v34  }
 0x14c   :  { %1066 = vperm.xlu1 %6336, %v7168_v28  }
 0x14f   :  { %6341 = vset.pattern.permute.xlu0 %v11968_v33 }
 0x150   :  { %6338 = vset.pattern.permute.xlu1 %v11968_v33  ;;  %1930 = vperm.xlu0 %6341, %v7176_v30  }
 0x151   :  { %1934 = vperm.xlu1 %6338, %v7162_v25  }
 0x154   :  { %6343 = vset.pattern.permute.xlu0 %v11962_v23 }
 0x155   :  { %6340 = vset.pattern.permute.xlu1 %v11962_v23  ;;  %1302 = vperm.xlu0 %6343, %v7202_v41  }
 0x156   :  { %1290 = vperm.xlu1 %6340, %v7176_v30  }
 0x159   :  { %1470 = vperm.xlu0 %6343, %v7208_v56  }
 0x15a   :  { %1458 = vperm.xlu1 %6340, %v7184_v34  }
 0x15d   :  { %6345 = vset.pattern.permute.xlu0 %v11964_v47 }
 0x15e   :  { %6342 = vset.pattern.permute.xlu1 %v11964_v47  ;;  %861 = vperm.xlu0 %6345, %v7216_v58  }
 0x15f   :  { %866 = vperm.xlu1 %6342, %v7202_v41  }
 0x162   :  { %1071 = vperm.xlu0 %6345, %v7224_v0  }
 0x163   :  { %1076 = vperm.xlu1 %6342, %v7208_v56  }
 0x165   :  { %v7235_v2 = vpop.permute.xlu1 %1026  ;;  %v7237_v8 = vpop.permute.xlu0 %816 }
 0x166   :  { %12252 = vst [vmem:[#allocation26_spill] sm:$0xff] %v7235_v2  ;;  %12253 = vst [vmem:[#allocation27_spill] sm:$0xff] %v7237_v8  ;;  %6347 = vset.pattern.permute.xlu0 %v11968_v33 }
 0x167   :  { %6344 = vset.pattern.permute.xlu1 %v11968_v33  ;;  %1938 = vperm.xlu0 %6347, %v7216_v58  }
 0x168   :  { %1942 = vperm.xlu1 %6344, %v7202_v41  }
 0x16a   :  { %v7249_v48 = vpop.permute.xlu1 %1262  ;;  %v7251_v22 = vpop.permute.xlu0 %1430 }
 0x16b   :  { %6349 = vset.pattern.permute.xlu0 %v11962_v23 }
 0x16c   :  { %6346 = vset.pattern.permute.xlu1 %v11962_v23  ;;  %1310 = vperm.xlu0 %6349, %v7242_v11  }
 0x16d   :  { %1298 = vperm.xlu1 %6346, %v7216_v58  }
 0x16e   :  { %v7263_v31 = vpop.permute.xlu1 %1426 }
 0x16f   :  { %v7265_v38 = vpop.permute.xlu0 %1902 }
 0x170   :  { %12256 = vst [vmem:[#allocation30_spill] sm:$0xff] %v7265_v38  ;;  %1478 = vperm.xlu0 %6349, %v7254_v26  }
 0x171   :  { %1466 = vperm.xlu1 %6346, %v7224_v0  }
 0x173   :  { %v7273_v43 = vpop.permute.xlu1 %1898 }
 0x174   :  { %12258 = vst [vmem:[#allocation32_spill] sm:$0xff] %v7273_v43  ;;  %6351 = vset.pattern.permute.xlu0 %v11964_v47  ;;  %v7276_v50 = vpop.permute.xlu0 %811 }
 0x175   :  { %12259 = vst [vmem:[#allocation33_spill] sm:$0xff] %v7276_v50  ;;  %6348 = vset.pattern.permute.xlu1 %v11964_v47  ;;  %871 = vperm.xlu0 %6351, %v7268_v53   ;;  %v7295_v47 = vpop.f32.mrb[27].mxu0  ;;  %v12266_v50 = vmov 1  }
 0x176   :  { %876 = vperm.xlu1 %6348, %v7242_v11   ;;  %v7312_v8 = vpop.f32.mrb[28].mxu0 }
 0x177   :  { %v7325_v30 = vpop.f32.mrb[29].mxu0 }
 0x178   :  { %v7283_v15 = vpop.permute.xlu1 %826  ;;  %v7285_v29 = vpop.permute.xlu0 %1021 }
 0x179   :  { %12261 = vst [vmem:[#allocation35_spill] sm:$0xff] %v7283_v15  ;;  %12262 = vst [vmem:[#allocation36_spill] sm:$0xff] %v7285_v29  ;;  %1081 = vperm.xlu0 %6351, %v7278_v45   ;;  %v7302_v29 = vmax.f32 %v438_v42, 0.0  ;;  %v648_v15 = vadd.f32 %v7064_v54, %v6965_v4  ;;  %v433_v42 = vadd.f32 %v6965_v4, %v7072_v57  ;;  %v12271_v57 = vmov 0  }
 0x17a   :  { %1086 = vperm.xlu1 %6348, %v7254_v26  }
 0x17b   :  { %12264 = vst [vmem:[#allocation38_spill] sm:$0xff] %v7302_v29  ;;  %v7314_v58 = vmax.f32 %v648_v15, 0.0  ;;  %v643_v15 = vadd.f32 %v6965_v4, %v7080_v60 }
 0x17c   :  { %v7293_v23 = vpop.permute.xlu1 %1036 }
 0x17d   :  { %12263 = vst [vmem:[#allocation37_spill] sm:$0xff] %v7293_v23  ;;  %6353 = vset.pattern.permute.xlu0 %v11968_v33  ;;  %v7298_v2 = vpop.permute.xlu0 %1258  ;;  %12267 = vst [vmem:[#allocation40_spill] sm:$0xff] %v7314_v58  ;;  %v7338_v41 = vmax.f32 %v643_v15, 0.0  ;;  %v448_v15 = vadd.f32 %v7101_v3, %v6965_v4 }
 0x17e   :  { %6350 = vset.pattern.permute.xlu1 %v11968_v33  ;;  %1946 = vperm.xlu0 %6353, %v7268_v53  }
 0x17f   :  { %1950 = vperm.xlu1 %6350, %v7242_v11   ;;  %v7328_v11 = vmax.f32 %v433_v42, 0.0  ;;  %12272 = vst [vmem:[#allocation44_spill] sm:$0xff] %v7338_v41  ;;  %v7362_v10 = vmax.f32 %v448_v15, 0.0  ;;  %v443_v15 = vadd.f32 %v6965_v4, %v7113_v7 }
 0x181   :  { %v7307_v52 = vpop.permute.xlu1 %1910  ;;  %v7309_v23 = vpop.permute.xlu0 %1270  ;;  %12269 = vst [vmem:[#allocation42_spill] sm:$0xff] %v7328_v11  ;;  %12275 = vst [vmem:[#allocation46_spill] sm:$0xff] %v7362_v10 }
 0x182   :  { %12265 = vst [vmem:[#allocation39_spill] sm:$0xff] %v7307_v52  ;;  %6355 = vset.pattern.permute.xlu0 %v12266_v50 }
 0x183   :  { %6352 = vset.pattern.permute.xlu1 %v12266_v50  ;;  %1318 = vperm.xlu0 %6355, %v7302_v29  }
 0x184   :  { %1306 = vperm.xlu1 %6352, %v7268_v53  }
 0x185   :  { %v7321_v54 = vpop.permute.xlu0 %1438 }
 0x186   :  { %v7323_v33 = vpop.permute.xlu1 %821 }
 0x187   :  { %12268 = vst [vmem:[#allocation41_spill] sm:$0xff] %v7323_v33  ;;  %1486 = vperm.xlu0 %6355, %v7314_v58   ;;  %v7342_v33 = vpop.f32.mrb[30].mxu0 }
 0x188   :  { %1474 = vperm.xlu1 %6352, %v7278_v45   ;;  %v7351_v60 = vpop.f32.mrb[31].mxu0 }
 0x189   :  { %v7367_v61 = vpop.f32.mrb[32].mxu0 }
 0x18a   :  { %v7333_v16 = vpop.permute.xlu0 %1031  ;;  %v7381_v5 = vpop.f32.mrb[33].mxu0 }
 0x18b   :  { %12270 = vst [vmem:[#allocation43_spill] sm:$0xff] %v7333_v16  ;;  %v7335_v53 = vpop.permute.xlu1 %1266  ;;  %6357 = vset.pattern.permute.xlu0 %v12271_v57  ;;  %v7393_v52 = vpop.f32.mrb[34].mxu0 }
 0x18c   :  { %6354 = vset.pattern.permute.xlu1 %v12271_v57  ;;  %881 = vperm.xlu0 %6357, %v7328_v11  }
 0x18d   :  { %886 = vperm.xlu1 %6354, %v7302_v29  }
 0x18f   :  { %v7345_v42 = vpop.permute.xlu1 %1434  ;;  %v7347_v1 = vpop.permute.xlu0 %1278 }
 0x190   :  { %1091 = vperm.xlu0 %6357, %v7338_v41  }
 0x191   :  { %1096 = vperm.xlu1 %6354, %v7314_v58  }
 0x193   :  { %v7355_v16 = vpop.permute.xlu0 %1446 }
 0x194   :  { %v7357_v25 = vpop.permute.xlu1 %1906  ;;  %6359 = vset.pattern.permute.xlu0 %v12274_v55 }
 0x195   :  { %12273 = vst [vmem:[#allocation45_spill] sm:$0xff] %v7357_v25  ;;  %6356 = vset.pattern.permute.xlu1 %v12274_v55  ;;  %1954 = vperm.xlu0 %6359, %v7328_v11  }
 0x196   :  { %1958 = vperm.xlu1 %6356, %v7302_v29  }
 0x198   :  { %v7369_v3 = vpop.permute.xlu0 %831 }
 0x199   :  { %12276 = vst [vmem:[#allocation47_spill] sm:$0xff] %v7369_v3  ;;  %v7371_v40 = vpop.permute.xlu1 %836  ;;  %6361 = vset.pattern.permute.xlu0 %v12266_v50 }
 0x19a   :  { %12277 = vst [vmem:[#allocation48_spill] sm:$0xff] %v7371_v40  ;;  %6358 = vset.pattern.permute.xlu1 %v12266_v50  ;;  %1326 = vperm.xlu0 %6361, %v7362_v10   ;;  %v7388_v40 = vmax.f32 %v443_v15, 0.0  ;;  %v7405_v15 = vpop.f32.mrb[35].mxu0 }
 0x19b   :  { %1314 = vperm.xlu1 %6358, %v7328_v11   ;;  %v7417_v38 = vpop.f32.mrb[36].mxu0 }
 0x19c   :  { %v7383_v29 = vpop.permute.xlu0 %1041  ;;  %12281 = vst [vmem:[#allocation52_spill] sm:$0xff] %v7388_v40 }
 0x19d   :  { %12279 = vst [vmem:[#allocation50_spill] sm:$0xff] %v7383_v29  ;;  %v7385_v3 = vpop.permute.xlu1 %1046  ;;  %v7400_v29 = vmax.f32 %v653_v13, 0.0  ;;  %v458_v13 = vadd.f32 %v7141_v18, %v6965_v4  ;;  %v7429_v18 = vpop.f32.mrb[37].mxu0 }
 0x19e   :  { %12280 = vst [vmem:[#allocation51_spill] sm:$0xff] %v7385_v3  ;;  %1494 = vperm.xlu0 %6361, %v7374_v37  }
 0x19f   :  { %1482 = vperm.xlu1 %6358, %v7338_v41   ;;  %12284 = vst [vmem:[#allocation55_spill] sm:$0xff] %v7400_v29  ;;  %v7424_v25 = vmax.f32 %v458_v13, 0.0  ;;  %v453_v13 = vadd.f32 %v6965_v4, %v7153_v21 }
 0x1a1   :  { %v7395_v11 = vpop.permute.xlu0 %1914  ;;  %12285 = vst [vmem:[#allocation56_spill] sm:$0xff] %v7424_v25 }
 0x1a2   :  { %12282 = vst [vmem:[#allocation53_spill] sm:$0xff] %v7395_v11  ;;  %v7397_v7 = vpop.permute.xlu1 %1918  ;;  %6363 = vset.pattern.permute.xlu0 %v12271_v57 }
 0x1a3   :  { %12283 = vst [vmem:[#allocation54_spill] sm:$0xff] %v7397_v7  ;;  %6360 = vset.pattern.permute.xlu1 %v12271_v57  ;;  %891 = vperm.xlu0 %6363, %v7388_v40  }
 0x1a4   :  { %896 = vperm.xlu1 %6360, %v7362_v10  }
 0x1a6   :  { %v7407_v3 = vpop.permute.xlu0 %1286 }
 0x1a7   :  { %v7409_v9 = vpop.permute.xlu1 %1274  ;;  %1101 = vperm.xlu0 %6363, %v7400_v29  }
 0x1a8   :  { %1106 = vperm.xlu1 %6360, %v7374_v37   ;;  %v668_v37 = vadd.f32 %v7143_v19, %v6965_v4 }
 0x1aa   :  { %v7415_v7 = vpop.permute.xlu0 %1454  ;;  %v7436_v26 = vmax.f32 %v668_v37, 0.0  ;;  %v663_v37 = vadd.f32 %v6965_v4, %v7160_v24 }
 0x1ab   :  { %v7419_v11 = vpop.permute.xlu1 %1442  ;;  %6365 = vset.pattern.permute.xlu0 %v12274_v55 }
 0x1ac   :  { %6362 = vset.pattern.permute.xlu1 %v12274_v55  ;;  %1962 = vperm.xlu0 %6365, %v7388_v40   ;;  %12288 = vst [vmem:[#allocation59_spill] sm:$0xff] %v7436_v26 }
 0x1ad   :  { %1966 = vperm.xlu1 %6362, %v7362_v10  }
 0x1af   :  { %v7431_v43 = vpop.permute.xlu0 %841 }
 0x1b0   :  { %12286 = vst [vmem:[#allocation57_spill] sm:$0xff] %v7431_v43  ;;  %v7433_v58 = vpop.permute.xlu1 %846  ;;  %6367 = vset.pattern.permute.xlu0 %v12266_v50  ;;  %v7447_v43 = vpop.f32.mrb[38].mxu0 }
 0x1b1   :  { %12287 = vst [vmem:[#allocation58_spill] sm:$0xff] %v7433_v58  ;;  %6364 = vset.pattern.permute.xlu1 %v12266_v50  ;;  %1334 = vperm.xlu0 %6367, %v7424_v25   ;;  %v7450_v58 = vmax.f32 %v453_v13, 0.0  ;;  %v7455_v56 = vpop.f32.mrb[39].mxu0 }
 0x1b2   :  { %1322 = vperm.xlu1 %6364, %v7388_v40   ;;  %v7473_v24 = vpop.f32.mrb[40].mxu0 }
 0x1b3   :  { %v7443_v19 = vpop.permute.xlu0 %1051  ;;  %12291 = vst [vmem:[#allocation62_spill] sm:$0xff] %v7450_v58 }
 0x1b4   :  { %12289 = vst [vmem:[#allocation60_spill] sm:$0xff] %v7443_v19  ;;  %v7445_v10 = vpop.permute.xlu1 %1056  ;;  %v7462_v19 = vmax.f32 %v663_v37, 0.0  ;;  %v468_v37 = vadd.f32 %v7181_v32, %v6965_v4 }
 0x1b5   :  { %12290 = vst [vmem:[#allocation61_spill] sm:$0xff] %v7445_v10  ;;  %1502 = vperm.xlu0 %6367, %v7436_v26  }
 0x1b6   :  { %1490 = vperm.xlu1 %6364, %v7400_v29   ;;  %12294 = vst [vmem:[#allocation65_spill] sm:$0xff] %v7462_v19  ;;  %v7484_v29 = vpop.f32.mrb[41].mxu0  ;;  %v7486_v41 = vmax.f32 %v468_v37, 0.0  ;;  %v463_v37 = vadd.f32 %v6965_v4, %v7193_v36 }
 0x1b8   :  { %v7457_v40 = vpop.permute.xlu0 %1922  ;;  %12295 = vst [vmem:[#allocation66_spill] sm:$0xff] %v7486_v41 }
 0x1b9   :  { %12292 = vst [vmem:[#allocation63_spill] sm:$0xff] %v7457_v40  ;;  %v7459_v21 = vpop.permute.xlu1 %1926  ;;  %6369 = vset.pattern.permute.xlu0 %v12271_v57 }
 0x1ba   :  { %12293 = vst [vmem:[#allocation64_spill] sm:$0xff] %v7459_v21  ;;  %6366 = vset.pattern.permute.xlu1 %v12271_v57  ;;  %901 = vperm.xlu0 %6369, %v7450_v58  }
 0x1bb   :  { %906 = vperm.xlu1 %6366, %v7424_v25  }
 0x1bd   :  { %v7467_v13 = vpop.permute.xlu0 %1294 }
 0x1be   :  { %v7469_v10 = vpop.permute.xlu1 %1282  ;;  %1111 = vperm.xlu0 %6369, %v7462_v19  }
 0x1bf   :  { %1116 = vperm.xlu1 %6366, %v7436_v26   ;;  %v678_v26 = vadd.f32 %v7188_v35, %v6965_v4 }
 0x1c1   :  { %v7477_v21 = vpop.permute.xlu0 %1462  ;;  %v7496_v45 = vmax.f32 %v678_v26, 0.0  ;;  %v673_v26 = vadd.f32 %v6965_v4, %v7200_v39  ;;  %v478_v39 = vadd.f32 %v7221_v62, %v6965_v4 }
 0x1c2   :  { %v7479_v40 = vpop.permute.xlu1 %1450  ;;  %6371 = vset.pattern.permute.xlu0 %v12274_v55 }
 0x1c3   :  { %6368 = vset.pattern.permute.xlu1 %v12274_v55  ;;  %1970 = vperm.xlu0 %6371, %v7450_v58   ;;  %12298 = vst [vmem:[#allocation69_spill] sm:$0xff] %v7496_v45  ;;  %v7518_v36 = vmax.f32 %v673_v26, 0.0 }
 0x1c4   :  { %1974 = vperm.xlu1 %6368, %v7424_v25  }
 0x1c5   :  { %12304 = vst [vmem:[#allocation75_spill] sm:$0xff] %v7518_v36 }
 0x1c6   :  { %v7491_v32 = vpop.permute.xlu0 %851 }
 0x1c7   :  { %12296 = vst [vmem:[#allocation67_spill] sm:$0xff] %v7491_v32  ;;  %v7493_v28 = vpop.permute.xlu1 %856  ;;  %6373 = vset.pattern.permute.xlu0 %v12266_v50  ;;  %v7508_v32 = vmax.f32 %v463_v37, 0.0 }
 0x1c8   :  { %12297 = vst [vmem:[#allocation68_spill] sm:$0xff] %v7493_v28  ;;  %6370 = vset.pattern.permute.xlu1 %v12266_v50  ;;  %1342 = vperm.xlu0 %6373, %v7486_v41  }
 0x1c9   :  { %1330 = vperm.xlu1 %6370, %v7450_v58   ;;  %12301 = vst [vmem:[#allocation72_spill] sm:$0xff] %v7508_v32  ;;  %v7538_v58 = vmax.f32 %v478_v39, 0.0 }
 0x1ca   :  { %v7503_v25 = vpop.permute.xlu0 %1061 }
 0x1cb   :  { %12299 = vst [vmem:[#allocation70_spill] sm:$0xff] %v7503_v25  ;;  %v7505_v35 = vpop.permute.xlu1 %1066  ;;  %12305 = vst [vmem:[#allocation76_spill] sm:$0xff] %v7538_v58 }
 0x1cc   :  { %12300 = vst [vmem:[#allocation71_spill] sm:$0xff] %v7505_v35  ;;  %1510 = vperm.xlu0 %6373, %v7496_v45  }
 0x1cd   :  { %1498 = vperm.xlu1 %6370, %v7462_v19  }
 0x1cf   :  { %v7513_v28 = vpop.permute.xlu0 %1930 }
 0x1d0   :  { %12302 = vst [vmem:[#allocation73_spill] sm:$0xff] %v7513_v28  ;;  %v7515_v12 = vpop.permute.xlu1 %1934  ;;  %6375 = vset.pattern.permute.xlu0 %v12271_v57 }
 0x1d1   :  { %12303 = vst [vmem:[#allocation74_spill] sm:$0xff] %v7515_v12  ;;  %6372 = vset.pattern.permute.xlu1 %v12271_v57  ;;  %911 = vperm.xlu0 %6375, %v7508_v32   ;;  %v473_v12 = vadd.f32 %v6965_v4, %v7229_v44  ;;  %v488_v44 = vadd.f32 %v7247_v17, %v6965_v4 }
 0x1d2   :  { %916 = vperm.xlu1 %6372, %v7486_v41  }
 0x1d4   :  { %v7523_v37 = vpop.permute.xlu0 %1302 }
 0x1d5   :  { %v7525_v35 = vpop.permute.xlu1 %1290  ;;  %1121 = vperm.xlu0 %6375, %v7518_v36  }
 0x1d6   :  { %1126 = vperm.xlu1 %6372, %v7496_v45   ;;  %v7550_v45 = vmax.f32 %v473_v12, 0.0  ;;  %v7570_v12 = vmax.f32 %v488_v44, 0.0 }
 0x1d8   :  { %v7531_v25 = vpop.permute.xlu0 %1470  ;;  %12308 = vst [vmem:[#allocation79_spill] sm:$0xff] %v7550_v45  ;;  %12313 = vst [vmem:[#allocation84_spill] sm:$0xff] %v7570_v12 }
 0x1d9   :  { %v7533_v26 = vpop.permute.xlu1 %1458  ;;  %6377 = vset.pattern.permute.xlu0 %v12274_v55 }
 0x1da   :  { %6374 = vset.pattern.permute.xlu1 %v12274_v55  ;;  %1978 = vperm.xlu0 %6377, %v7508_v32  }
 0x1db   :  { %1982 = vperm.xlu1 %6374, %v7486_v41  }
 0x1dd   :  { %v7543_v28 = vpop.permute.xlu0 %861 }
 0x1de   :  { %12306 = vst [vmem:[#allocation77_spill] sm:$0xff] %v7543_v28  ;;  %v7545_v62 = vpop.permute.xlu1 %866  ;;  %6379 = vset.pattern.permute.xlu0 %v12266_v50 }
 0x1df   :  { %12307 = vst [vmem:[#allocation78_spill] sm:$0xff] %v7545_v62  ;;  %6376 = vset.pattern.permute.xlu1 %v12266_v50  ;;  %1350 = vperm.xlu0 %6379, %v7538_v58  }
 0x1e0   :  { %1338 = vperm.xlu1 %6376, %v7508_v32  }
 0x1e1   :  { %v7553_v39 = vpop.permute.xlu0 %1071 }
 0x1e2   :  { %12309 = vst [vmem:[#allocation80_spill] sm:$0xff] %v7553_v39  ;;  %v7555_v41 = vpop.permute.xlu1 %1076  ;;  %v483_v39 = vadd.f32 %v6965_v4, %v7261_v49 }
 0x1e3   :  { %12310 = vst [vmem:[#allocation81_spill] sm:$0xff] %v7555_v41  ;;  %6381 = vset.pattern.permute.xlu0 %v12271_v57 }
 0x1e4   :  { %1506 = vperm.xlu1 %6376, %v7518_v36   ;;  %921 = vperm.xlu0 %6381, %v7550_v45   ;;  %v7582_v32 = vmax.f32 %v483_v39, 0.0  ;;  %v498_v39 = vadd.f32 %v7288_v51, %v6965_v4 }
 0x1e6   :  { %v7562_v28 = vpop.permute.xlu0 %1938  ;;  %12314 = vst [vmem:[#allocation85_spill] sm:$0xff] %v7582_v32 }
 0x1e7   :  { %12311 = vst [vmem:[#allocation82_spill] sm:$0xff] %v7562_v28  ;;  %v7564_v62 = vpop.permute.xlu1 %1942 }
 0x1e8   :  { %12312 = vst [vmem:[#allocation83_spill] sm:$0xff] %v7564_v62  ;;  %6378 = vset.pattern.permute.xlu1 %v12271_v57  ;;  %6383 = vset.pattern.permute.xlu0 %v12274_v55 }
 0x1e9   :  { %926 = vperm.xlu1 %6378, %v7538_v58   ;;  %1986 = vperm.xlu0 %6383, %v7550_v45  }
 0x1eb   :  { %v7572_v41 = vpop.permute.xlu0 %1310 }
 0x1ec   :  { %v7576_v17 = vpop.permute.xlu1 %1298 }
 0x1ed   :  { %6380 = vset.pattern.permute.xlu1 %v12274_v55  ;;  %6385 = vset.pattern.permute.xlu0 %v12266_v50 }
 0x1ee   :  { %1990 = vperm.xlu1 %6380, %v7538_v58   ;;  %1358 = vperm.xlu0 %6385, %v7570_v12  }
 0x1ef   :  { %v7584_v62 = vpop.permute.xlu0 %1478 }
 0x1f0   :  { %v7586_v44 = vpop.permute.xlu1 %1466 }
 0x1f2   :  { %6382 = vset.pattern.permute.xlu1 %v12266_v50  ;;  %6387 = vset.pattern.permute.xlu0 %v12271_v57 }
 0x1f3   :  { %1346 = vperm.xlu1 %6382, %v7550_v45   ;;  %931 = vperm.xlu0 %6387, %v7582_v32   ;;  %v7604_v45 = vmax.f32 %v498_v39, 0.0  ;;  %v508_v39 = vadd.f32 %v7312_v8, %v6965_v4 }
 0x1f4   :  { %v7592_v49 = vpop.permute.xlu0 %871 }
 0x1f5   :  { %12315 = vst [vmem:[#allocation86_spill] sm:$0xff] %v7592_v49  ;;  %v7594_v28 = vpop.permute.xlu1 %876  ;;  %12318 = vst [vmem:[#allocation89_spill] sm:$0xff] %v7604_v45  ;;  %v493_v49 = vadd.f32 %v6965_v4, %v7295_v47 }
 0x1f6   :  { %12316 = vst [vmem:[#allocation87_spill] sm:$0xff] %v7594_v28 }
 0x1f7   :  { %6384 = vset.pattern.permute.xlu1 %v12271_v57  ;;  %6389 = vset.pattern.permute.xlu0 %v12274_v55  ;;  %v7614_v51 = vmax.f32 %v493_v49, 0.0 }
 0x1f8   :  { %936 = vperm.xlu1 %6384, %v7570_v12   ;;  %1994 = vperm.xlu0 %6389, %v7582_v32   ;;  %v7602_v58 = vpop.permute.xlu0 %1081 }
 0x1f9   :  { %12317 = vst [vmem:[#allocation88_spill] sm:$0xff] %v7602_v58  ;;  %v7606_v36 = vpop.permute.xlu1 %1086  ;;  %12320 = vst [vmem:[#allocation91_spill] sm:$0xff] %v7614_v51 }
 0x1fa   :  { %12319 = vst [vmem:[#allocation90_spill] sm:$0xff] %v7606_v36  ;;  %v7628_v36 = vmax.f32 %v508_v39, 0.0  ;;  %v518_v39 = vadd.f32 %v7342_v33, %v6965_v4 }
 0x1fc   :  { %6386 = vset.pattern.permute.xlu1 %v12274_v55  ;;  %6391 = vset.pattern.permute.xlu0 %v12266_v50  ;;  %v7654_v19 = vmax.f32 %v518_v39, 0.0  ;;  %v528_v39 = vadd.f32 %v7367_v61, %v6965_v4 }
 0x1fd   :  { %1998 = vperm.xlu1 %6386, %v7570_v12   ;;  %1366 = vperm.xlu0 %6391, %v7604_v45   ;;  %v7616_v28 = vpop.permute.xlu0 %1946  ;;  %v503_v12 = vadd.f32 %v6965_v4, %v7325_v30 }
 0x1fe   :  { %12321 = vst [vmem:[#allocation92_spill] sm:$0xff] %v7616_v28  ;;  %v7618_v58 = vpop.permute.xlu1 %1950 }
 0x1ff   :  { %12322 = vst [vmem:[#allocation93_spill] sm:$0xff] %v7618_v58  ;;  %v7642_v58 = vmax.f32 %v503_v12, 0.0  ;;  %v513_v12 = vadd.f32 %v6965_v4, %v7351_v60 }
 0x201   :  { %6388 = vset.pattern.permute.xlu1 %v12266_v50  ;;  %6392 = vset.pattern.permute.xlu0 %v12271_v57 }
 0x202   :  { %1354 = vperm.xlu1 %6388, %v7582_v32   ;;  %941 = vperm.xlu0 %6392, %v7614_v51   ;;  %v7626_v47 = vpop.permute.xlu0 %1318 }
 0x203   :  { %v7630_v49 = vpop.permute.xlu1 %1306 }
 0x206   :  { %6390 = vset.pattern.permute.xlu1 %v12271_v57  ;;  %6395 = vset.pattern.permute.xlu0 %v12266_v50  ;;  %v7636_v8 = vpop.permute.xlu0 %1486 }
 0x207   :  { %946 = vperm.xlu1 %6390, %v7604_v45   ;;  %v7639_v32 = vpop.permute.xlu1 %1474  ;;  %1374 = vperm.xlu0 %6395, %v7628_v36  }
 0x20b   :  { %6393 = vset.pattern.permute.xlu1 %v12266_v50  ;;  %6396 = vset.pattern.permute.xlu0 %v12271_v57  ;;  %v7648_v30 = vpop.permute.xlu0 %881 }
 0x20c   :  { %12323 = vst [vmem:[#allocation94_spill] sm:$0xff] %v7648_v30  ;;  %1362 = vperm.xlu1 %6393, %v7614_v51   ;;  %v7651_v28 = vpop.permute.xlu1 %886  ;;  %951 = vperm.xlu0 %6396, %v7642_v58   ;;  %v7666_v30 = vmax.f32 %v513_v12, 0.0  ;;  %v523_v12 = vadd.f32 %v6965_v4, %v7381_v5 }
 0x20d   :  { %12324 = vst [vmem:[#allocation95_spill] sm:$0xff] %v7651_v28 }
 0x20f   :  { %v7658_v0 = vpop.permute.xlu0 %1091 }
 0x210   :  { %12325 = vst [vmem:[#allocation96_spill] sm:$0xff] %v7658_v0  ;;  %6394 = vset.pattern.permute.xlu1 %v12271_v57  ;;  %v7661_v33 = vpop.permute.xlu1 %1096  ;;  %6399 = vset.pattern.permute.xlu0 %v12266_v50 }
 0x211   :  { %12326 = vst [vmem:[#allocation97_spill] sm:$0xff] %v7661_v33  ;;  %956 = vperm.xlu1 %6394, %v7628_v36   ;;  %1382 = vperm.xlu0 %6399, %v7654_v19   ;;  %v7678_v33 = vmax.f32 %v528_v39, 0.0  ;;  %v538_v39 = vadd.f32 %v7393_v52, %v6965_v4 }
 0x213   :  { %v7702_v63 = vmax.f32 %v538_v39, 0.0 }
 0x214   :  { %v7670_v28 = vpop.permute.xlu0 %1954 }
 0x215   :  { %12327 = vst [vmem:[#allocation98_spill] sm:$0xff] %v7670_v28  ;;  %6397 = vset.pattern.permute.xlu1 %v12266_v50  ;;  %v7673_v60 = vpop.permute.xlu1 %1958  ;;  %6400 = vset.pattern.permute.xlu0 %v12271_v57 }
 0x216   :  { %12328 = vst [vmem:[#allocation99_spill] sm:$0xff] %v7673_v60  ;;  %1370 = vperm.xlu1 %6397, %v7642_v58   ;;  %961 = vperm.xlu0 %6400, %v7666_v30   ;;  %v7690_v60 = vmax.f32 %v523_v12, 0.0  ;;  %v533_v12 = vadd.f32 %v6965_v4, %v7405_v15 }
 0x218   :  { %v7714_v52 = vmax.f32 %v533_v12, 0.0 }
 0x219   :  { %v7682_v0 = vpop.permute.xlu0 %1326 }
 0x21a   :  { %6398 = vset.pattern.permute.xlu1 %v12271_v57  ;;  %v7685_v61 = vpop.permute.xlu1 %1314  ;;  %6403 = vset.pattern.permute.xlu0 %v12266_v50  ;;  %12331 = vst [vmem:[#allocation102_spill] sm:$0xff] %v7714_v52 }
 0x21b   :  { %966 = vperm.xlu1 %6398, %v7654_v19   ;;  %1390 = vperm.xlu0 %6403, %v7678_v33  }
 0x21d   :  { %v7692_v28 = vpop.permute.xlu0 %1494 }
 0x21e   :  { %v7696_v5 = vpop.permute.xlu1 %1482 }
 0x21f   :  { %6401 = vset.pattern.permute.xlu1 %v12266_v50  ;;  %6404 = vset.pattern.permute.xlu0 %v12271_v57 }
 0x220   :  { %1378 = vperm.xlu1 %6401, %v7666_v30   ;;  %971 = vperm.xlu0 %6404, %v7690_v60  }
 0x222   :  { %v7704_v34 = vpop.permute.xlu0 %891 }
 0x223   :  { %12329 = vst [vmem:[#allocation100_spill] sm:$0xff] %v7704_v34  ;;  %v7708_v46 = vpop.permute.xlu1 %896  ;;  %v548_v34 = vadd.f32 %v7417_v38, %v6965_v4 }
 0x224   :  { %12330 = vst [vmem:[#allocation101_spill] sm:$0xff] %v7708_v46  ;;  %6402 = vset.pattern.permute.xlu1 %v12271_v57  ;;  %6407 = vset.pattern.permute.xlu0 %v12266_v50 }
 0x225   :  { %976 = vperm.xlu1 %6402, %v7678_v33   ;;  %1398 = vperm.xlu0 %6407, %v7702_v63   ;;  %v7726_v15 = vmax.f32 %v548_v34, 0.0 }
 0x226   :  { %v7716_v20 = vpop.permute.xlu0 %1101 }
 0x227   :  { %12332 = vst [vmem:[#allocation103_spill] sm:$0xff] %v7716_v20  ;;  %v7718_v39 = vpop.permute.xlu1 %1106  ;;  %12334 = vst [vmem:[#allocation105_spill] sm:$0xff] %v7726_v15 }
 0x228   :  { %12333 = vst [vmem:[#allocation104_spill] sm:$0xff] %v7718_v39  ;;  %v6450_v39 = vld [vmem:[%s11957_s2] ss:$0 sm:$0xff]  ;;  %s6665_s2 = smov 78  }
 0x229   :  { %6405 = vset.pattern.permute.xlu1 %v12266_v50  ;;  %6408 = vset.pattern.permute.xlu0 %v12271_v57  ;;  %v543_v4 = vadd.f32 %v6450_v39, %v7429_v18  ;;  %v553_v14 = vadd.f32 %v6450_v39, %v7455_v56 }
 0x22a   :  { %1386 = vperm.xlu1 %6405, %v7690_v60   ;;  %981 = vperm.xlu0 %6408, %v7714_v52  }
 0x22b   :  { %v7728_v46 = vpop.permute.xlu0 %1962  ;;  %v7740_v34 = vmax.f32 %v543_v4, 0.0  ;;  %v7764_v6 = vmax.f32 %v553_v14, 0.0  ;;  %v563_v14 = vadd.f32 %v6450_v39, %v7484_v29 }
 0x22c   :  { %12335 = vst [vmem:[#allocation106_spill] sm:$0xff] %v7728_v46  ;;  %v7730_v12 = vpop.permute.xlu1 %1966 }
 0x22d   :  { %12336 = vst [vmem:[#allocation107_spill] sm:$0xff] %v7730_v12  ;;  %12337 = vst [vmem:[#allocation108_spill] sm:$0xff] %v7740_v34  ;;  %v558_v12 = vadd.f32 %v6450_v39, %v7447_v43 }
 0x22e   :  { %6406 = vset.pattern.permute.xlu1 %v12271_v57  ;;  %6411 = vset.pattern.permute.xlu0 %v12266_v50  ;;  %12340 = vst [vmem:[#allocation111_spill] sm:$0xff] %v7764_v6 }
 0x22f   :  { %986 = vperm.xlu1 %6406, %v7702_v63   ;;  %1406 = vperm.xlu0 %6411, %v7726_v15   ;;  %v7753_v46 = vmax.f32 %v558_v12, 0.0  ;;  %v568_v12 = vadd.f32 %v6450_v39, %v7473_v24 }
 0x230   :  { %v7742_v38 = vpop.permute.xlu0 %1334 }
 0x231   :  { %v7744_v20 = vpop.permute.xlu1 %1322  ;;  %12338 = vst [vmem:[#allocation109_spill] sm:$0xff] %v7753_v46 }
 0x233   :  { %6409 = vset.pattern.permute.xlu1 %v12266_v50  ;;  %6412 = vset.pattern.permute.xlu0 %v12271_v57 }
 0x234   :  { %1394 = vperm.xlu1 %6409, %v7714_v52   ;;  %991 = vperm.xlu0 %6412, %v7740_v34   ;;  %v7751_v18 = vpop.permute.xlu0 %1502 }
 0x235   :  { %v7755_v4 = vpop.permute.xlu1 %1490 }
 0x238   :  { %6410 = vset.pattern.permute.xlu1 %v12271_v57  ;;  %6415 = vset.pattern.permute.xlu0 %v12266_v50 }
 0x239   :  { %996 = vperm.xlu1 %6410, %v7726_v15   ;;  %1414 = vperm.xlu0 %6415, %v7753_v46   ;;  %v7762_v43 = vpop.permute.xlu0 %901  ;;  %v7777_v15 = vmax.f32 %v568_v12, 0.0 }
 0x23a   :  { %12339 = vst [vmem:[#allocation110_spill] sm:$0xff] %v7762_v43  ;;  %v7766_v59 = vpop.permute.xlu1 %906 }
 0x23b   :  { %12341 = vst [vmem:[#allocation112_spill] sm:$0xff] %v7766_v59  ;;  %12344 = vst [vmem:[#allocation115_spill] sm:$0xff] %v7777_v15 }
 0x23d   :  { %6413 = vset.pattern.permute.xlu1 %v12266_v50  ;;  %6416 = vset.pattern.permute.xlu0 %v12271_v57  ;;  %v7771_v56 = vpop.permute.xlu0 %1111 }
 0x23e   :  { %12342 = vst [vmem:[#allocation113_spill] sm:$0xff] %v7771_v56  ;;  %1402 = vperm.xlu1 %6413, %v7740_v34   ;;  %v7774_v27 = vpop.permute.xlu1 %1116  ;;  %1001 = vperm.xlu0 %6416, %v7764_v6   ;;  %v7788_v56 = vmax.f32 %v563_v14, 0.0 }
 0x23f   :  { %12343 = vst [vmem:[#allocation114_spill] sm:$0xff] %v7774_v27  ;;  %v7803_v27 = vld [vmem:[%s11958_s3 + $0x8] sm:$0xff] }
 0x240   :  { %12347 = vst [vmem:[#allocation118_spill] sm:$0xff] %v7788_v56  ;;  %v1514_v59 = vmul.f32 %v7249_v48, %v7803_v27 }
 0x242   :  { %6414 = vset.pattern.permute.xlu1 %v12271_v57  ;;  %6419 = vset.pattern.permute.xlu0 %v12266_v50  ;;  %v7782_v24 = vpop.permute.xlu0 %1970 }
 0x243   :  { %12345 = vst [vmem:[#allocation116_spill] sm:$0xff] %v7782_v24  ;;  %1006 = vperm.xlu1 %6414, %v7753_v46   ;;  %v7785_v43 = vpop.permute.xlu1 %1974  ;;  %1422 = vperm.xlu0 %6419, %v7777_v15  }
 0x244   :  { %12346 = vst [vmem:[#allocation117_spill] sm:$0xff] %v7785_v43 }
 0x247   :  { %6417 = vset.pattern.permute.xlu1 %v12266_v50  ;;  %6420 = vset.pattern.permute.xlu0 %v12271_v57  ;;  %v7792_v12 = vpop.permute.xlu0 %1342 }
 0x248   :  { %1410 = vperm.xlu1 %6417, %v7764_v6   ;;  %v7795_v29 = vpop.permute.xlu1 %1330  ;;  %1011 = vperm.xlu0 %6420, %v7788_v56  }
 0x24b   :  { %v7798_v39 = vpop.permute.xlu0 %1510 }
 0x24c   :  { %6418 = vset.pattern.permute.xlu1 %v12271_v57  ;;  %v7806_v14 = vpop.permute.xlu1 %1498  ;;  %6421 = vset.pattern.permute.xlu0 %v12274_v55  ;;  %v7822_v57 = vld [vmem:[%s11958_s3 + $0x158] sm:$0xff] }
 0x24d   :  { %1016 = vperm.xlu1 %6418, %v7777_v15   ;;  %2002 = vperm.xlu0 %6421, %v7614_v51   ;;  %12350 = vst [vmem:[#allocation121_spill] sm:$0xff] %v7822_v57  ;;  %v1556_v51 = vmul.f32 %v7251_v22, %v7822_v57  ;;  %v7844_v22 = vld [vmem:[%s11958_s3] sm:$0xff] }
 0x250   :  { %v7813_v43 = vpop.permute.xlu0 %911 }
 0x251   :  { %12348 = vst [vmem:[#allocation119_spill] sm:$0xff] %v7813_v43  ;;  %6422 = vset.pattern.permute.xlu1 %v12266_v50  ;;  %v7816_v24 = vpop.permute.xlu1 %916  ;;  %1643 = vrot.lane.b32.xlu0 %v1514_v59, %s6658_s14  ;;  %v7835_v59 = vld [vmem:[%s11958_s3 + $0x18] sm:$0xff] }
 0x252   :  { %12349 = vst [vmem:[#allocation120_spill] sm:$0xff] %v7816_v24  ;;  %1418 = vperm.xlu1 %6422, %v7788_v56   ;;  %v1516_v50 = vmul.f32 %v7309_v23, %v7835_v59  ;;  %v7857_v23 = vld [vmem:[%s11958_s3 + $0x168] sm:$0xff] }
 0x253   :  { %12354 = vst [vmem:[#allocation125_spill] sm:$0xff] %v7857_v23  ;;  %v1558_v24 = vmul.f32 %v7321_v54, %v7857_v23  ;;  %v7884_v54 = vld [vmem:[%s11958_s3 + $0x10] sm:$0xff]  ;;  %v7904_v23 = vld [vmem:[%s11958_s3 + $0x160] sm:$0xff] }
 0x254   :  { %v7827_v48 = vpop.permute.xlu0 %1121  ;;  %12358 = vst [vmem:[#allocation129_spill] sm:$0xff] %v7904_v23 }
 0x255   :  { %12351 = vst [vmem:[#allocation122_spill] sm:$0xff] %v7827_v48  ;;  %v7829_v43 = vpop.permute.xlu1 %1126  ;;  %1727 = vrot.lane.b32.xlu0 %v1556_v51, %s6658_s14  ;;  %v1513_v51 = vmul.f32 %v7298_v2, %v7844_v22  ;;  %v7869_v2 = vld [vmem:[%s11958_s3 + $0x28] sm:$0xff] }
 0x256   :  { %12352 = vst [vmem:[#allocation123_spill] sm:$0xff] %v7829_v43  ;;  %6423 = vset.pattern.permute.xlu1 %v12274_v55  ;;  %v7852_v43 = vld [vmem:[%s11958_s3 + $0x150] sm:$0xff]  ;;  %v1518_v57 = vmul.f32 %v7347_v1, %v7869_v2 }
 0x257   :  { %2006 = vperm.xlu1 %6423, %v7604_v45   ;;  %12353 = vst [vmem:[#allocation124_spill] sm:$0xff] %v7852_v43 }
 0x259   :  { %1647 = vrot.lane.b32.xlu0 %v1516_v50, %s6658_s14  ;;  %v7859_v55 = vpop.permute.xlu0 %1978  ;;  %v1555_v50 = vmul.f32 %v7263_v31, %v7852_v43  ;;  %v7889_v31 = vld [vmem:[%s11958_s3 + $0x178] sm:$0xff] }
 0x25a   :  { %v7861_v48 = vpop.permute.xlu1 %1982  ;;  %12356 = vst [vmem:[#allocation127_spill] sm:$0xff] %v7889_v31  ;;  %v1560_v1 = vmul.f32 %v7355_v16, %v7889_v31  ;;  %v8316_v43 = vld [vmem:[%s11958_s3 + $0x118] sm:$0xff] }
 0x25b   :  { %12355 = vst [vmem:[#allocation126_spill] sm:$0xff] %v7861_v48  ;;  %1641 = vrot.lane.b32.xlu1 %v1513_v51, %s6658_s14  ;;  %12392 = vst [vmem:[#allocation163_spill] sm:$0xff] %v8316_v43 }
 0x25d   :  { %1731 = vrot.lane.b32.xlu0 %v1558_v24, %s6658_s14  ;;  %v1515_v24 = vmul.f32 %v7335_v53, %v7884_v54  ;;  %v7909_v53 = vld [vmem:[%s11958_s3 + $0x38] sm:$0xff] }
 0x25e   :  { %v7874_v45 = vpop.permute.xlu0 %1350  ;;  %v1520_v16 = vmul.f32 %v7407_v3, %v7909_v53 }
 0x25f   :  { %v7878_v48 = vpop.permute.xlu1 %1338  ;;  %1725 = vrot.lane.b32.xlu1 %v1555_v50, %s6658_s14 }
 0x261   :  { %1651 = vrot.lane.b32.xlu0 %v1518_v57, %s6658_s14  ;;  %v1557_v57 = vmul.f32 %v7345_v42, %v7904_v23 }
 0x263   :  { %v7896_v51 = vpop.permute.xlu1 %1506  ;;  %1645 = vrot.lane.b32.xlu1 %v1515_v24, %s6658_s14  ;;  %v7899_v50 = vpop.permute.xlu0 %921  ;;  %v7920_v24 = vld [vmem:[%s11958_s3 + $0x20] sm:$0xff] }
 0x264   :  { %12357 = vst [vmem:[#allocation128_spill] sm:$0xff] %v7899_v50  ;;  %v7925_v50 = vld [vmem:[%s11958_s3 + $0x188] sm:$0xff]  ;;  %v1517_v42 = vmul.f32 %v7409_v9, %v7920_v24 }
 0x265   :  { %1735 = vrot.lane.b32.xlu0 %v1560_v1, %s6658_s14  ;;  %12359 = vst [vmem:[#allocation130_spill] sm:$0xff] %v7925_v50  ;;  %v1562_v3 = vmul.f32 %v7415_v7, %v7925_v50 }
 0x267   :  { %1729 = vrot.lane.b32.xlu1 %v1557_v57, %s6658_s14  ;;  %v7940_v57 = vld [vmem:[%s11958_s3 + $0x170] sm:$0xff] }
 0x268   :  { %v7927_v31 = vpop.permute.xlu1 %926  ;;  %v7931_v1 = vpop.permute.xlu0 %1986  ;;  %12361 = vst [vmem:[#allocation132_spill] sm:$0xff] %v7940_v57  ;;  %v1559_v9 = vmul.f32 %v7419_v11, %v7940_v57  ;;  %v7965_v11 = vld [vmem:[%s11958_s3 + $0x198] sm:$0xff]  ;;  %v7980_v57 = vld [vmem:[%s11958_s3 + $0x180] sm:$0xff] }
 0x269   :  { %12360 = vst [vmem:[#allocation131_spill] sm:$0xff] %v7927_v31  ;;  %1655 = vrot.lane.b32.xlu0 %v1520_v16, %s6658_s14  ;;  %v7945_v31 = vld [vmem:[%s11958_s3 + $0x48] sm:$0xff]  ;;  %12362 = vst [vmem:[#allocation133_spill] sm:$0xff] %v7965_v11 }
 0x26a   :  { %v1522_v16 = vmul.f32 %v7467_v13, %v7945_v31  ;;  %12364 = vst [vmem:[#allocation135_spill] sm:$0xff] %v7980_v57 }
 0x26b   :  { %1649 = vrot.lane.b32.xlu1 %v1517_v42, %s6658_s14  ;;  %v7960_v42 = vld [vmem:[%s11958_s3 + $0x30] sm:$0xff] }
 0x26d   :  { %v7949_v23 = vpop.permute.xlu1 %1990  ;;  %1739 = vrot.lane.b32.xlu0 %v1562_v3, %s6658_s14  ;;  %v7952_v7 = vpop.permute.xlu0 %1358  ;;  %v1519_v3 = vmul.f32 %v7469_v10, %v7960_v42  ;;  %v7985_v10 = vld [vmem:[%s11958_s3 + $0x58] sm:$0xff] }
 0x26f   :  { %1733 = vrot.lane.b32.xlu1 %v1559_v9, %s6658_s14  ;;  %v1564_v9 = vmul.f32 %v7477_v21, %v7965_v11  ;;  %v1524_v21 = vmul.f32 %v7523_v37, %v7985_v10  ;;  %v8003_v11 = vld [vmem:[%s11958_s3 + $0x1a8] sm:$0xff] }
 0x270   :  { %12366 = vst [vmem:[#allocation137_spill] sm:$0xff] %v8003_v11  ;;  %v1566_v37 = vmul.f32 %v7531_v25, %v8003_v11  ;;  %v8041_v11 = vld [vmem:[%s11958_s3 + $0x1b8] sm:$0xff] }
 0x271   :  { %1659 = vrot.lane.b32.xlu0 %v1522_v16, %s6658_s14  ;;  %v1561_v16 = vmul.f32 %v7479_v40, %v7980_v57  ;;  %12368 = vst [vmem:[#allocation139_spill] sm:$0xff] %v8041_v11 }
 0x272   :  { %v7970_v50 = vpop.permute.xlu1 %1346  ;;  %v7972_v13 = vpop.permute.xlu0 %931 }
 0x273   :  { %12363 = vst [vmem:[#allocation134_spill] sm:$0xff] %v7972_v13  ;;  %1653 = vrot.lane.b32.xlu1 %v1519_v3, %s6658_s14  ;;  %v7998_v3 = vld [vmem:[%s11958_s3 + $0x40] sm:$0xff] }
 0x275   :  { %1743 = vrot.lane.b32.xlu0 %v1564_v9, %s6658_s14  ;;  %v1521_v9 = vmul.f32 %v7525_v35, %v7998_v3 }
 0x277   :  { %v7992_v13 = vpop.permute.xlu1 %936  ;;  %1737 = vrot.lane.b32.xlu1 %v1561_v16, %s6658_s14  ;;  %v8005_v40 = vpop.permute.xlu0 %1994  ;;  %v8016_v16 = vld [vmem:[%s11958_s3 + $0x190] sm:$0xff] }
 0x278   :  { %12365 = vst [vmem:[#allocation136_spill] sm:$0xff] %v7992_v13  ;;  %12367 = vst [vmem:[#allocation138_spill] sm:$0xff] %v8016_v16  ;;  %v8021_v13 = vld [vmem:[%s11958_s3 + $0x68] sm:$0xff] }
 0x279   :  { %1663 = vrot.lane.b32.xlu0 %v1524_v21, %s6658_s14  ;;  %v1563_v21 = vmul.f32 %v7533_v26, %v8016_v16  ;;  %v1526_v25 = vmul.f32 %v7572_v41, %v8021_v13 }
 0x27b   :  { %1657 = vrot.lane.b32.xlu1 %v1521_v9, %s6658_s14  ;;  %v8036_v9 = vld [vmem:[%s11958_s3 + $0x50] sm:$0xff] }
 0x27c   :  { %v8023_v57 = vpop.permute.xlu1 %1998  ;;  %v8025_v35 = vpop.permute.xlu0 %1366  ;;  %v1523_v26 = vmul.f32 %v7576_v17, %v8036_v9  ;;  %v8061_v17 = vld [vmem:[%s11958_s3 + $0x78] sm:$0xff] }
 0x27d   :  { %1747 = vrot.lane.b32.xlu0 %v1566_v37, %s6658_s14  ;;  %v1568_v37 = vmul.f32 %v7584_v62, %v8041_v11  ;;  %v8076_v11 = vld [vmem:[%s11958_s3 + $0x60] sm:$0xff] }
 0x27f   :  { %1741 = vrot.lane.b32.xlu1 %v1563_v21, %s6658_s14  ;;  %v8056_v21 = vld [vmem:[%s11958_s3 + $0x1a0] sm:$0xff] }
 0x280   :  { %12370 = vst [vmem:[#allocation141_spill] sm:$0xff] %v8056_v21 }
 0x281   :  { %v8045_v16 = vpop.permute.xlu1 %1354  ;;  %1667 = vrot.lane.b32.xlu0 %v1526_v25, %s6658_s14  ;;  %v8048_v41 = vpop.permute.xlu0 %941  ;;  %v1565_v25 = vmul.f32 %v7586_v44, %v8056_v21  ;;  %v8081_v44 = vld [vmem:[%s11958_s3 + $0x1c8] sm:$0xff] }
 0x282   :  { %12369 = vst [vmem:[#allocation140_spill] sm:$0xff] %v8048_v41  ;;  %12372 = vst [vmem:[#allocation143_spill] sm:$0xff] %v8081_v44  ;;  %v8099_v21 = vld [vmem:[%s11958_s3 + $0x88] sm:$0xff] }
 0x283   :  { %1661 = vrot.lane.b32.xlu1 %v1523_v26, %s6658_s14  ;;  %v1528_v26 = vmul.f32 %v7626_v47, %v8061_v17  ;;  %v1570_v47 = vmul.f32 %v7636_v8, %v8081_v44  ;;  %v1530_v8 = vmul.f32 %v7682_v0, %v8099_v21  ;;  %v8117_v44 = vld [vmem:[%s11958_s3 + $0x1d8] sm:$0xff] }
 0x284   :  { %12375 = vst [vmem:[#allocation146_spill] sm:$0xff] %v8117_v44  ;;  %v1572_v0 = vmul.f32 %v7692_v28, %v8117_v44  ;;  %v8170_v44 = vld [vmem:[%s11958_s3 + $0x1d0] sm:$0xff] }
 0x285   :  { %1751 = vrot.lane.b32.xlu0 %v1568_v37, %s6658_s14  ;;  %v1525_v37 = vmul.f32 %v7630_v49, %v8076_v11  ;;  %12381 = vst [vmem:[#allocation152_spill] sm:$0xff] %v8170_v44 }
 0x286   :  { %v8066_v41 = vpop.permute.xlu1 %946  ;;  %v8068_v62 = vpop.permute.xlu0 %1374 }
 0x287   :  { %12371 = vst [vmem:[#allocation142_spill] sm:$0xff] %v8066_v41  ;;  %1745 = vrot.lane.b32.xlu1 %v1565_v25, %s6658_s14  ;;  %v8094_v25 = vld [vmem:[%s11958_s3 + $0x1b0] sm:$0xff] }
 0x288   :  { %12373 = vst [vmem:[#allocation144_spill] sm:$0xff] %v8094_v25 }
 0x289   :  { %1671 = vrot.lane.b32.xlu0 %v1528_v26, %s6658_s14  ;;  %v1567_v26 = vmul.f32 %v7639_v32, %v8094_v25 }
 0x28b   :  { %v8088_v41 = vpop.permute.xlu1 %1362  ;;  %1665 = vrot.lane.b32.xlu1 %v1525_v37, %s6658_s14  ;;  %v8101_v49 = vpop.permute.xlu0 %951  ;;  %v8112_v37 = vld [vmem:[%s11958_s3 + $0x70] sm:$0xff] }
 0x28c   :  { %12374 = vst [vmem:[#allocation145_spill] sm:$0xff] %v8101_v49 }
 0x28d   :  { %1755 = vrot.lane.b32.xlu0 %v1570_v47, %s6658_s14  ;;  %v1527_v47 = vmul.f32 %v7685_v61, %v8112_v37 }
 0x28f   :  { %1749 = vrot.lane.b32.xlu1 %v1567_v26, %s6658_s14  ;;  %v8132_v26 = vld [vmem:[%s11958_s3 + $0x1c0] sm:$0xff] }
 0x290   :  { %v8119_v49 = vpop.permute.xlu1 %956  ;;  %v8121_v32 = vpop.permute.xlu0 %1382  ;;  %12377 = vst [vmem:[#allocation148_spill] sm:$0xff] %v8132_v26  ;;  %v1569_v61 = vmul.f32 %v7696_v5, %v8132_v26  ;;  %v8157_v5 = vld [vmem:[%s11958_s3 + $0x1e8] sm:$0xff] }
 0x291   :  { %12376 = vst [vmem:[#allocation147_spill] sm:$0xff] %v8119_v49  ;;  %1675 = vrot.lane.b32.xlu0 %v1530_v8, %s6658_s14  ;;  %v8137_v49 = vld [vmem:[%s11958_s3 + $0x98] sm:$0xff]  ;;  %12379 = vst [vmem:[#allocation150_spill] sm:$0xff] %v8157_v5  ;;  %v8175_v26 = vld [vmem:[%s11958_s3 + $0xa8] sm:$0xff] }
 0x292   :  { %v1532_v8 = vmul.f32 %v7742_v38, %v8137_v49 }
 0x293   :  { %1669 = vrot.lane.b32.xlu1 %v1527_v47, %s6658_s14  ;;  %v8152_v47 = vld [vmem:[%s11958_s3 + $0x80] sm:$0xff] }
 0x295   :  { %v8141_v25 = vpop.permute.xlu1 %1370  ;;  %1759 = vrot.lane.b32.xlu0 %v1572_v0, %s6658_s14  ;;  %v8144_v28 = vpop.permute.xlu0 %961  ;;  %v1529_v0 = vmul.f32 %v7744_v20, %v8152_v47  ;;  %v1571_v20 = vmul.f32 %v7755_v4, %v8170_v44  ;;  %v8265_v44 = vld [vmem:[%s11958_s3 + $0xe8] sm:$0xff] }
 0x296   :  { %12378 = vst [vmem:[#allocation149_spill] sm:$0xff] %v8144_v28 }
 0x297   :  { %1753 = vrot.lane.b32.xlu1 %v1569_v61, %s6658_s14  ;;  %v1574_v61 = vmul.f32 %v7751_v18, %v8157_v5  ;;  %v1534_v18 = vmul.f32 %v7792_v12, %v8175_v26  ;;  %v8211_v5 = vld [vmem:[%s11958_s3 + $0xb8] sm:$0xff] }
 0x299   :  { %1679 = vrot.lane.b32.xlu0 %v1532_v8, %s6658_s14 }
 0x29a   :  { %v8162_v28 = vpop.permute.xlu1 %966  ;;  %v1391_v38 = vpop.permute.xlu0 %1390 }
 0x29b   :  { %12380 = vst [vmem:[#allocation151_spill] sm:$0xff] %v8162_v28  ;;  %1673 = vrot.lane.b32.xlu1 %v1529_v0, %s6658_s14  ;;  %v8188_v0 = vld [vmem:[%s11958_s3 + $0x90] sm:$0xff]  ;;  %v8193_v28 = vld [vmem:[%s11958_s3 + $0x1f8] sm:$0xff] }
 0x29c   :  { %12382 = vst [vmem:[#allocation153_spill] sm:$0xff] %v8193_v28  ;;  %v1576_v12 = vmul.f32 %v7798_v39, %v8193_v28  ;;  %v1536_v39 = vmul.f32 %v7874_v45, %v8211_v5 }
 0x29d   :  { %1763 = vrot.lane.b32.xlu0 %v1574_v61, %s6658_s14  ;;  %v1531_v61 = vmul.f32 %v7795_v29, %v8188_v0 }
 0x29f   :  { %v8182_v8 = vpop.permute.xlu1 %1378  ;;  %1757 = vrot.lane.b32.xlu1 %v1571_v20, %s6658_s14  ;;  %v8195_v4 = vpop.permute.xlu0 %971  ;;  %v8206_v20 = vld [vmem:[%s11958_s3 + $0x1e0] sm:$0xff] }
 0x2a0   :  { %12383 = vst [vmem:[#allocation154_spill] sm:$0xff] %v8195_v4  ;;  %12384 = vst [vmem:[#allocation155_spill] sm:$0xff] %v8206_v20 }
 0x2a1   :  { %1683 = vrot.lane.b32.xlu0 %v1534_v18, %s6658_s14  ;;  %v1573_v18 = vmul.f32 %v7806_v14, %v8206_v20  ;;  %v8247_v20 = vld [vmem:[%s11958_s3 + $0xd8] sm:$0xff] }
 0x2a3   :  { %1677 = vrot.lane.b32.xlu1 %v1531_v61, %s6658_s14  ;;  %v8224_v61 = vld [vmem:[%s11958_s3 + $0xa0] sm:$0xff] }
 0x2a4   :  { %v8213_v4 = vpop.permute.xlu1 %976  ;;  %v1399_v29 = vpop.permute.xlu0 %1398  ;;  %v1533_v14 = vmul.f32 %v7878_v48, %v8224_v61 }
 0x2a5   :  { %12385 = vst [vmem:[#allocation156_spill] sm:$0xff] %v8213_v4  ;;  %1767 = vrot.lane.b32.xlu0 %v1576_v12, %s6658_s14  ;;  %v8229_v4 = vld [vmem:[%s11958_s3 + $0xc8] sm:$0xff] }
 0x2a6   :  { %v1538_v45 = vmul.f32 %v7952_v7, %v8229_v4 }
 0x2a7   :  { %1761 = vrot.lane.b32.xlu1 %v1573_v18, %s6658_s14  ;;  %v8242_v18 = vld [vmem:[%s11958_s3 + $0x1f0] sm:$0xff] }
 0x2a8   :  { %12387 = vst [vmem:[#allocation158_spill] sm:$0xff] %v8242_v18  ;;  %v1575_v48 = vmul.f32 %v7896_v51, %v8242_v18  ;;  %v8283_v18 = vld [vmem:[%s11958_s3 + $0xf8] sm:$0xff] }
 0x2a9   :  { %v1387_v28 = vpop.permute.xlu1 %1386  ;;  %1687 = vrot.lane.b32.xlu0 %v1536_v39, %s6658_s14  ;;  %v8234_v12 = vpop.permute.xlu0 %981 }
 0x2aa   :  { %12386 = vst [vmem:[#allocation157_spill] sm:$0xff] %v8234_v12  ;;  %v8260_v12 = vld [vmem:[%s11958_s3 + $0xb0] sm:$0xff] }
 0x2ab   :  { %1681 = vrot.lane.b32.xlu1 %v1533_v14, %s6658_s14  ;;  %v1540_v14 = vmul.f32 %v8025_v35, %v8247_v20  ;;  %v1535_v51 = vmul.f32 %v7970_v50, %v8260_v12  ;;  %v1542_v35 = vmul.f32 %v8068_v62, %v8265_v44  ;;  %v1544_v62 = vmul.f32 %v8121_v32, %v8283_v18 }
 0x2ad   :  { %1691 = vrot.lane.b32.xlu0 %v1538_v45, %s6658_s14 }
 0x2ae   :  { %v8252_v39 = vpop.permute.xlu1 %986  ;;  %v1407_v7 = vpop.permute.xlu0 %1406 }
 0x2af   :  { %12388 = vst [vmem:[#allocation159_spill] sm:$0xff] %v8252_v39  ;;  %1765 = vrot.lane.b32.xlu1 %v1575_v48, %s6658_s14  ;;  %v8278_v39 = vld [vmem:[%s11958_s3 + $0xc0] sm:$0xff] }
 0x2b0   :  { %v1537_v50 = vmul.f32 %v8045_v16, %v8278_v39 }
 0x2b1   :  { %1695 = vrot.lane.b32.xlu0 %v1540_v14, %s6658_s14  ;;  %v8294_v14 = vld [vmem:[%s11958_s3 + $0xd0] sm:$0xff] }
 0x2b3   :  { %v1395_v45 = vpop.permute.xlu1 %1394  ;;  %1685 = vrot.lane.b32.xlu1 %v1535_v51, %s6658_s14  ;;  %v8273_v48 = vpop.permute.xlu0 %991  ;;  %v8299_v51 = vld [vmem:[%s11958_s3 + $0x108] sm:$0xff] }
 0x2b4   :  { %12389 = vst [vmem:[#allocation160_spill] sm:$0xff] %v8273_v48  ;;  %12390 = vst [vmem:[#allocation161_spill] sm:$0xff] %v8299_v51  ;;  %v1546_v32 = vmul.f32 %v1391_v38, %v8299_v51  ;;  %v1548_v38 = vmul.f32 %v1399_v29, %v8316_v43  ;;  %v8333_v51 = vld [vmem:[%s11958_s3 + $0x128] sm:$0xff]  ;;  %v8350_v43 = vld [vmem:[%s11958_s3 + $0x138] sm:$0xff] }
 0x2b5   :  { %1699 = vrot.lane.b32.xlu0 %v1542_v35, %s6658_s14  ;;  %v1539_v35 = vmul.f32 %v8088_v41, %v8294_v14  ;;  %12394 = vst [vmem:[#allocation165_spill] sm:$0xff] %v8333_v51  ;;  %12396 = vst [vmem:[#allocation167_spill] sm:$0xff] %v8350_v43 }
 0x2b7   :  { %1689 = vrot.lane.b32.xlu1 %v1537_v50, %s6658_s14  ;;  %v8311_v50 = vld [vmem:[%s11958_s3 + $0xe0] sm:$0xff] }
 0x2b8   :  { %v8301_v48 = vpop.permute.xlu1 %996  ;;  %v1415_v16 = vpop.permute.xlu0 %1414 }
 0x2b9   :  { %12391 = vst [vmem:[#allocation162_spill] sm:$0xff] %v8301_v48  ;;  %1703 = vrot.lane.b32.xlu0 %v1544_v62, %s6658_s14  ;;  %v1541_v48 = vmul.f32 %v8141_v25, %v8311_v50 }
 0x2bb   :  { %1693 = vrot.lane.b32.xlu1 %v1539_v35, %s6658_s14  ;;  %v8328_v35 = vld [vmem:[%s11958_s3 + $0xf0] sm:$0xff] }
 0x2bc   :  { %v1543_v25 = vmul.f32 %v8182_v8, %v8328_v35 }
 0x2bd   :  { %v1403_v41 = vpop.permute.xlu1 %1402  ;;  %1707 = vrot.lane.b32.xlu0 %v1546_v32, %s6658_s14  ;;  %v8321_v62 = vpop.permute.xlu0 %1001 }
 0x2be   :  { %12393 = vst [vmem:[#allocation164_spill] sm:$0xff] %v8321_v62  ;;  %v8345_v62 = vld [vmem:[%s11958_s3 + $0x100] sm:$0xff] }
 0x2bf   :  { %1697 = vrot.lane.b32.xlu1 %v1541_v48, %s6658_s14  ;;  %v1550_v48 = vmul.f32 %v1407_v7, %v8333_v51  ;;  %v1545_v8 = vmul.f32 %v1387_v28, %v8345_v62  ;;  %v8357_v7 = vld [vmem:[%s11958_s3 + $0x148] sm:$0xff]  ;;  %v8366_v51 = vld [vmem:[%s11958_s3 + $0x110] sm:$0xff] }
 0x2c0   :  { %v1547_v28 = vmul.f32 %v1395_v45, %v8366_v51  ;;  %v8387_v45 = vld [vmem:[%s11958_s3 + $0x130] sm:$0xff] }
 0x2c1   :  { %1711 = vrot.lane.b32.xlu0 %v1548_v38, %s6658_s14  ;;  %v1552_v38 = vmul.f32 %v1415_v16, %v8350_v43  ;;  %v8375_v16 = vld [vmem:[%s11958_s3 + $0x120] sm:$0xff] }
 0x2c2   :  { %v8338_v32 = vpop.permute.xlu1 %1006  ;;  %v1423_v29 = vpop.permute.xlu0 %1422  ;;  %v1549_v43 = vmul.f32 %v1403_v41, %v8375_v16  ;;  %v8397_v41 = vld [vmem:[%s11958_s3 + $0x140] sm:$0xff] }
 0x2c3   :  { %12395 = vst [vmem:[#allocation166_spill] sm:$0xff] %v8338_v32  ;;  %1701 = vrot.lane.b32.xlu1 %v1543_v25, %s6658_s14 }
 0x2c5   :  { %1715 = vrot.lane.b32.xlu0 %v1550_v48, %s6658_s14  ;;  %v1554_v48 = vmul.f32 %v1423_v29, %v8357_v7 }
 0x2c7   :  { %v1411_v25 = vpop.permute.xlu1 %1410  ;;  %1705 = vrot.lane.b32.xlu1 %v1545_v8, %s6658_s14  ;;  %v8361_v32 = vpop.permute.xlu0 %1011 }
 0x2c8   :  { %12397 = vst [vmem:[#allocation168_spill] sm:$0xff] %v8361_v32 }
 0x2c9   :  { %1719 = vrot.lane.b32.xlu0 %v1552_v38, %s6658_s14  ;;  %v1551_v38 = vmul.f32 %v1411_v25, %v8387_v45 }
 0x2cb   :  { %1709 = vrot.lane.b32.xlu1 %v1547_v28, %s6658_s14 }
 0x2cc   :  { %v8377_v8 = vpop.permute.xlu1 %1016  ;;  %v8379_v32 = vpop.permute.xlu0 %2002 }
 0x2cd   :  { %12398 = vst [vmem:[#allocation169_spill] sm:$0xff] %v8377_v8  ;;  %1723 = vrot.lane.b32.xlu0 %v1554_v48, %s6658_s14 }
 0x2cf   :  { %1713 = vrot.lane.b32.xlu1 %v1549_v43, %s6658_s14 }
 0x2d0   :  { %v8389_v29 = vpop.permute.xlu0 %1643 }
 0x2d1   :  { %12399 = vst [vmem:[#allocation170_spill] sm:$0xff] %v8389_v29  ;;  %v1419_v28 = vpop.permute.xlu1 %1418  ;;  %2010 = vperm.xlu0 %6421, %v7642_v58  }
 0x2d2   :  { %v1553_v48 = vmul.f32 %v1419_v28, %v8397_v41 }
 0x2d3   :  { %1717 = vrot.lane.b32.xlu1 %v1551_v38, %s6658_s14 }
 0x2d4   :  { %v8399_v43 = vpop.permute.xlu0 %1727 }
 0x2d5   :  { %12400 = vst [vmem:[#allocation171_spill] sm:$0xff] %v8399_v43  ;;  %2018 = vperm.xlu0 %6421, %v7666_v30  }
 0x2d6   :  { %v8403_v8 = vpop.permute.xlu1 %2006 }
 0x2d7   :  { %1721 = vrot.lane.b32.xlu1 %v1553_v48, %s6658_s14  ;;  %s6659_s14 = smov 108  }
 0x2d8   :  { %v8406_v25 = vpop.permute.xlu0 %1647 }
 0x2d9   :  { %12401 = vst [vmem:[#allocation172_spill] sm:$0xff] %v8406_v25  ;;  %2026 = vperm.xlu0 %6421, %v7690_v60  }
 0x2da   :  { %v8409_v38 = vpop.permute.xlu1 %1641 }
 0x2db   :  { %12402 = vst [vmem:[#allocation173_spill] sm:$0xff] %v8409_v38  ;;  %2014 = vperm.xlu1 %6423, %v7628_v36  }
 0x2dc   :  { %v8412_v29 = vpop.permute.xlu0 %1731 }
 0x2dd   :  { %12403 = vst [vmem:[#allocation174_spill] sm:$0xff] %v8412_v29  ;;  %2034 = vperm.xlu0 %6421, %v7714_v52  }
 0x2de   :  { %v8415_v43 = vpop.permute.xlu1 %1725 }
 0x2df   :  { %12404 = vst [vmem:[#allocation175_spill] sm:$0xff] %v8415_v43  ;;  %2022 = vperm.xlu1 %6423, %v7654_v19  }
 0x2e0   :  { %v8418_v28 = vpop.permute.xlu0 %1651 }
 0x2e1   :  { %12405 = vst [vmem:[#allocation176_spill] sm:$0xff] %v8418_v28  ;;  %2042 = vperm.xlu0 %6421, %v7740_v34   ;;  %v12411_v28 = vld [vmem:[#allocation105_spill] sm:$0xff] }
 0x2e2   :  { %v8421_v48 = vpop.permute.xlu1 %1645 }
 0x2e3   :  { %12406 = vst [vmem:[#allocation177_spill] sm:$0xff] %v8421_v48  ;;  %2030 = vperm.xlu1 %6423, %v7678_v33   ;;  %v12413_v48 = vld [vmem:[#allocation4_spill] sm:$0xff] }
 0x2e4   :  { %v8424_v25 = vpop.permute.xlu0 %1735 }
 0x2e5   :  { %12407 = vst [vmem:[#allocation178_spill] sm:$0xff] %v8424_v25  ;;  %2050 = vperm.xlu0 %6421, %v7764_v6  }
 0x2e6   :  { %v8427_v38 = vpop.permute.xlu1 %1729 }
 0x2e7   :  { %12408 = vst [vmem:[#allocation179_spill] sm:$0xff] %v8427_v38  ;;  %2038 = vperm.xlu1 %6423, %v7702_v63   ;;  %v12416_v38 = vld [vmem:[#allocation9_spill] sm:$0xff] }
 0x2e8   :  { %v8430_v29 = vpop.permute.xlu0 %1655 }
 0x2e9   :  { %12409 = vst [vmem:[#allocation180_spill] sm:$0xff] %v8430_v29  ;;  %2058 = vperm.xlu0 %6421, %v7788_v56  }
 0x2ea   :  { %v8433_v43 = vpop.permute.xlu1 %1649 }
 0x2eb   :  { %12410 = vst [vmem:[#allocation181_spill] sm:$0xff] %v8433_v43  ;;  %2046 = vperm.xlu1 %6423, %v12411_v28   ;;  %v12419_v43 = vld [vmem:[#allocation13_spill] sm:$0xff] }
 0x2ec   :  { %v8436_v34 = vpop.permute.xlu0 %1739 }
 0x2ed   :  { %12412 = vst [vmem:[#allocation105_spill] sm:$0xff] %v8436_v34  ;;  %2066 = vperm.xlu0 %6421, %v12413_v48   ;;  %v12421_v34 = vld [vmem:[#allocation3_spill] sm:$0xff] }
 0x2ee   :  { %v8439_v52 = vpop.permute.xlu1 %1733 }
 0x2ef   :  { %12414 = vst [vmem:[#allocation182_spill] sm:$0xff] %v8439_v52  ;;  %2054 = vperm.xlu1 %6423, %v7753_v46   ;;  %v12423_v52 = vld [vmem:[#allocation17_spill] sm:$0xff] }
 0x2f0   :  { %v8442_v25 = vpop.permute.xlu0 %1659 }
 0x2f1   :  { %12415 = vst [vmem:[#allocation183_spill] sm:$0xff] %v8442_v25  ;;  %2074 = vperm.xlu0 %6421, %v12416_v38   ;;  %v12425_v25 = vld [vmem:[#allocation7_spill] sm:$0xff] }
 0x2f2   :  { %v8445_v6 = vpop.permute.xlu1 %1653 }
 0x2f3   :  { %12417 = vst [vmem:[#allocation184_spill] sm:$0xff] %v8445_v6  ;;  %2062 = vperm.xlu1 %6423, %v7777_v15   ;;  %v12427_v6 = vld [vmem:[#allocation21_spill] sm:$0xff] }
 0x2f4   :  { %v8448_v29 = vpop.permute.xlu0 %1743 }
 0x2f5   :  { %12418 = vst [vmem:[#allocation185_spill] sm:$0xff] %v8448_v29  ;;  %2082 = vperm.xlu0 %6421, %v12419_v43   ;;  %v12429_v29 = vld [vmem:[#allocation11_spill] sm:$0xff] }
 0x2f6   :  { %v8451_v56 = vpop.permute.xlu1 %1737 }
 0x2f7   :  { %12420 = vst [vmem:[#allocation186_spill] sm:$0xff] %v8451_v56  ;;  %2070 = vperm.xlu1 %6423, %v12421_v34   ;;  %v12431_v56 = vld [vmem:[#allocation25_spill] sm:$0xff] }
 0x2f8   :  { %v8454_v48 = vpop.permute.xlu0 %1663 }
 0x2f9   :  { %12422 = vst [vmem:[#allocation187_spill] sm:$0xff] %v8454_v48  ;;  %2090 = vperm.xlu0 %6421, %v12423_v52   ;;  %v12433_v48 = vld [vmem:[#allocation15_spill] sm:$0xff] }
 0x2fa   :  { %v8457_v46 = vpop.permute.xlu1 %1657 }
 0x2fb   :  { %12424 = vst [vmem:[#allocation188_spill] sm:$0xff] %v8457_v46  ;;  %2078 = vperm.xlu1 %6423, %v12425_v25   ;;  %v12435_v46 = vld [vmem:[#allocation34_spill] sm:$0xff] }
 0x2fc   :  { %v8460_v38 = vpop.permute.xlu0 %1747 }
 0x2fd   :  { %12426 = vst [vmem:[#allocation189_spill] sm:$0xff] %v8460_v38  ;;  %2098 = vperm.xlu0 %6421, %v12427_v6   ;;  %v12437_v38 = vld [vmem:[#allocation19_spill] sm:$0xff] }
 0x2fe   :  { %v8463_v15 = vpop.permute.xlu1 %1741 }
 0x2ff   :  { %12428 = vst [vmem:[#allocation190_spill] sm:$0xff] %v8463_v15  ;;  %2086 = vperm.xlu1 %6423, %v12429_v29   ;;  %v12439_v15 = vld [vmem:[#allocation44_spill] sm:$0xff] }
 0x300   :  { %v8466_v43 = vpop.permute.xlu0 %1667 }
 0x301   :  { %12430 = vst [vmem:[#allocation191_spill] sm:$0xff] %v8466_v43  ;;  %2106 = vperm.xlu0 %6421, %v12431_v56   ;;  %v12441_v43 = vld [vmem:[#allocation23_spill] sm:$0xff] }
 0x302   :  { %v8469_v34 = vpop.permute.xlu1 %1661 }
 0x303   :  { %12432 = vst [vmem:[#allocation192_spill] sm:$0xff] %v8469_v34  ;;  %2094 = vperm.xlu1 %6423, %v12433_v48   ;;  %v12443_v34 = vld [vmem:[#allocation55_spill] sm:$0xff] }
 0x304   :  { %v8472_v52 = vpop.permute.xlu0 %1751 }
 0x305   :  { %12434 = vst [vmem:[#allocation193_spill] sm:$0xff] %v8472_v52  ;;  %2114 = vperm.xlu0 %6421, %v12435_v46   ;;  %v12445_v52 = vld [vmem:[#allocation29_spill] sm:$0xff] }
 0x306   :  { %v8475_v25 = vpop.permute.xlu1 %1745 }
 0x307   :  { %12436 = vst [vmem:[#allocation194_spill] sm:$0xff] %v8475_v25  ;;  %2102 = vperm.xlu1 %6423, %v12437_v38   ;;  %v12447_v25 = vld [vmem:[#allocation65_spill] sm:$0xff] }
 0x308   :  { %v8478_v6 = vpop.permute.xlu0 %1671 }
 0x309   :  { %12438 = vst [vmem:[#allocation195_spill] sm:$0xff] %v8478_v6  ;;  %2122 = vperm.xlu0 %6421, %v12439_v15   ;;  %v12449_v6 = vld [vmem:[#allocation40_spill] sm:$0xff] }
 0x30a   :  { %v8481_v29 = vpop.permute.xlu1 %1665 }
 0x30b   :  { %12440 = vst [vmem:[#allocation196_spill] sm:$0xff] %v8481_v29  ;;  %2110 = vperm.xlu1 %6423, %v12441_v43   ;;  %v12451_v29 = vld [vmem:[#allocation75_spill] sm:$0xff] }
 0x30c   :  { %v8484_v56 = vpop.permute.xlu0 %1755 }
 0x30d   :  { %12442 = vst [vmem:[#allocation197_spill] sm:$0xff] %v8484_v56  ;;  %2130 = vperm.xlu0 %6421, %v12443_v34   ;;  %v12453_v56 = vld [vmem:[#allocation32_spill] sm:$0xff] }
 0x30e   :  { %v8487_v48 = vpop.permute.xlu1 %1749  ;;  %v2153_v34 = vmul.f32 %v12453_v56, %v7844_v22  ;;  %v12461_v22 = vld [vmem:[#allocation53_spill] sm:$0xff] }
 0x30f   :  { %12444 = vst [vmem:[#allocation198_spill] sm:$0xff] %v8487_v48  ;;  %2118 = vperm.xlu1 %6423, %v12445_v52   ;;  %v12454_v48 = vld [vmem:[#allocation49_spill] sm:$0xff] }
 0x310   :  { %v8490_v46 = vpop.permute.xlu0 %1675 }
 0x311   :  { %12446 = vst [vmem:[#allocation199_spill] sm:$0xff] %v8490_v46  ;;  %2138 = vperm.xlu0 %6421, %v12447_v25  }
 0x312   :  { %v8493_v38 = vpop.permute.xlu1 %1669 }
 0x313   :  { %12448 = vst [vmem:[#allocation200_spill] sm:$0xff] %v8493_v38  ;;  %2126 = vperm.xlu1 %6423, %v12449_v6   ;;  %v6660_v38 = vmov 3  }
 0x314   :  { %v8496_v15 = vpop.permute.xlu0 %1759 }
 0x315   :  { %12450 = vst [vmem:[#allocation201_spill] sm:$0xff] %v8496_v15  ;;  %2146 = vperm.xlu0 %6421, %v12451_v29   ;;  %v12457_v15 = vld [vmem:[#allocation45_spill] sm:$0xff]  ;;  %v12458_v29 = vld [vmem:[#allocation59_spill] sm:$0xff] }
 0x316   :  { %v8499_v43 = vpop.permute.xlu1 %1753  ;;  %v2155_v25 = vmul.f32 %v12457_v15, %v7884_v54  ;;  %v12466_v54 = vld [vmem:[#allocation63_spill] sm:$0xff] }
 0x317   :  { %12452 = vst [vmem:[#allocation202_spill] sm:$0xff] %v8499_v43  ;;  %2134 = vperm.xlu1 %6423, %v12454_v48   ;;  %v12462_v48 = vld [vmem:[#allocation69_spill] sm:$0xff] }
 0x318   :  { %v8504_v52 = vpop.permute.xlu0 %1679 }
 0x319   :  { %12455 = vst [vmem:[#allocation32_spill] sm:$0xff] %v8504_v52  ;;  %2281 = vrot.lane.b32.xlu0 %v2153_v34, %s6659_s14  ;;  %v2157_v52 = vmul.f32 %v12461_v22, %v7920_v24  ;;  %v12468_v24 = vld [vmem:[#allocation39_spill] sm:$0xff] }
 0x31a   :  { %v8507_v46 = vpop.permute.xlu1 %1673  ;;  %6424 = vset.pattern.permute.xlu0 %v6660_v38  ;;  %v2156_v22 = vmul.f32 %v12468_v24, %v7835_v59  ;;  %v12474_v59 = vld [vmem:[#allocation82_spill] sm:$0xff] }
 0x31b   :  { %12456 = vst [vmem:[#allocation203_spill] sm:$0xff] %v8507_v46  ;;  %2142 = vperm.xlu1 %6423, %v12458_v29   ;;  %v12464_v46 = vld [vmem:[#allocation30_spill] sm:$0xff] }
 0x31c   :  { %v8512_v43 = vpop.permute.xlu0 %1763  ;;  %v2154_v6 = vmul.f32 %v12464_v46, %v7803_v27  ;;  %v12470_v27 = vld [vmem:[#allocation73_spill] sm:$0xff] }
 0x31d   :  { %12459 = vst [vmem:[#allocation45_spill] sm:$0xff] %v8512_v43  ;;  %2285 = vrot.lane.b32.xlu0 %v2155_v25, %s6659_s14  ;;  %v2159_v43 = vmul.f32 %v12466_v54, %v7960_v42  ;;  %v2161_v46 = vmul.f32 %v12470_v27, %v7998_v3  ;;  %v12472_v42 = vld [vmem:[#allocation54_spill] sm:$0xff]  ;;  %v2163_v54 = vmul.f32 %v12474_v59, %v8036_v9  ;;  %v12476_v3 = vld [vmem:[#allocation64_spill] sm:$0xff] }
 0x31e   :  { %v8515_v56 = vpop.permute.xlu1 %1757  ;;  %v2160_v24 = vmul.f32 %v12476_v3, %v7909_v53  ;;  %v12480_v9 = vld [vmem:[#allocation74_spill] sm:$0xff] }
 0x31f   :  { %12460 = vst [vmem:[#allocation204_spill] sm:$0xff] %v8515_v56  ;;  %2150 = vperm.xlu1 %6423, %v12462_v48   ;;  %v12482_v53 = vld [vmem:[#allocation98_spill] sm:$0xff] }
 0x320   :  { %v8520_v34 = vpop.permute.xlu0 %1683  ;;  %v2167_v59 = vmul.f32 %v12482_v53, %v8112_v37  ;;  %v12488_v37 = vld [vmem:[#allocation93_spill] sm:$0xff] }
 0x321   :  { %12463 = vst [vmem:[#allocation53_spill] sm:$0xff] %v8520_v34  ;;  %2289 = vrot.lane.b32.xlu0 %v2157_v52, %s6659_s14 }
 0x322   :  { %v8525_v15 = vpop.permute.xlu1 %1677 }
 0x323   :  { %12465 = vst [vmem:[#allocation30_spill] sm:$0xff] %v8525_v15  ;;  %2283 = vrot.lane.b32.xlu1 %v2154_v6, %s6659_s14  ;;  %v2158_v6 = vmul.f32 %v12472_v42, %v7869_v2  ;;  %v12478_v2 = vld [vmem:[#allocation92_spill] sm:$0xff]  ;;  %v2162_v42 = vmul.f32 %v12480_v9, %v7945_v31  ;;  %v12486_v31 = vld [vmem:[#allocation106_spill] sm:$0xff]  ;;  %v2166_v9 = vmul.f32 %v12488_v37, %v8021_v13 }
 0x324   :  { %v8530_v25 = vpop.permute.xlu0 %1767  ;;  %6425 = vset.pattern.permute.xlu1 %v6660_v38  ;;  %v2165_v27 = vmul.f32 %v12478_v2, %v8076_v11  ;;  %v12484_v11 = vld [vmem:[#allocation83_spill] sm:$0xff]  ;;  %v2169_v2 = vmul.f32 %v12486_v31, %v8152_v47  ;;  %v2173_v13 = vmul.f32 %v7859_v55, %v8224_v61  ;;  %v12498_v55 = vld [vmem:[#allocation117_spill] sm:$0xff] }
 0x325   :  { %12467 = vst [vmem:[#allocation63_spill] sm:$0xff] %v8530_v25  ;;  %2293 = vrot.lane.b32.xlu0 %v2159_v43, %s6659_s14  ;;  %v2164_v3 = vmul.f32 %v12484_v11, %v7985_v10  ;;  %v12490_v10 = vld [vmem:[#allocation116_spill] sm:$0xff]  ;;  %v12492_v47 = vld [vmem:[#allocation99_spill] sm:$0xff]  ;;  %v2172_v61 = vmul.f32 %v12498_v55, %v8137_v49  ;;  %v2179_v49 = vmul.f32 %v8379_v32, %v8294_v14 }
 0x326   :  { %v8535_v56 = vpop.permute.xlu1 %1761  ;;  %v2171_v53 = vmul.f32 %v12490_v10, %v8188_v0  ;;  %v2168_v11 = vmul.f32 %v12492_v47, %v8061_v17  ;;  %v12495_v0 = vld [vmem:[#allocation107_spill] sm:$0xff]  ;;  %v2175_v17 = vmul.f32 %v7931_v1, %v8260_v12  ;;  %v12501_v1 = vld [vmem:[#allocation126_spill] sm:$0xff] }
 0x327   :  { %12469 = vst [vmem:[#allocation39_spill] sm:$0xff] %v8535_v56  ;;  %2287 = vrot.lane.b32.xlu1 %v2156_v22, %s6659_s14  ;;  %v2174_v12 = vmul.f32 %v12501_v1, %v8175_v26  ;;  %v12507_v1 = vld [vmem:[#allocation161_spill] sm:$0xff]  ;;  %v12563_v56 = vld [vmem:[#allocation46_spill] sm:$0xff] }
 0x328   :  { %v8540_v52 = vpop.permute.xlu0 %1687 }
 0x329   :  { %12471 = vst [vmem:[#allocation73_spill] sm:$0xff] %v8540_v52  ;;  %2297 = vrot.lane.b32.xlu0 %v2161_v46, %s6659_s14 }
 0x32a   :  { %v8545_v38 = vpop.permute.xlu1 %1681 }
 0x32b   :  { %12473 = vst [vmem:[#allocation54_spill] sm:$0xff] %v8545_v38  ;;  %2291 = vrot.lane.b32.xlu1 %v2158_v6, %s6659_s14 }
 0x32c   :  { %v8550_v43 = vpop.permute.xlu0 %1691 }
 0x32d   :  { %12475 = vst [vmem:[#allocation82_spill] sm:$0xff] %v8550_v43  ;;  %2301 = vrot.lane.b32.xlu0 %v2163_v54, %s6659_s14  ;;  %v12591_v43 = vld [vmem:[#allocation91_spill] sm:$0xff] }
 0x32e   :  { %v8555_v22 = vpop.permute.xlu1 %1765 }
 0x32f   :  { %12477 = vst [vmem:[#allocation64_spill] sm:$0xff] %v8555_v22  ;;  %2295 = vrot.lane.b32.xlu1 %v2160_v24, %s6659_s14  ;;  %v12561_v22 = vld [vmem:[#allocation24_spill] sm:$0xff] }
 0x330   :  { %v8560_v46 = vpop.permute.xlu0 %1695 }
 0x331   :  { %12479 = vst [vmem:[#allocation92_spill] sm:$0xff] %v8560_v46  ;;  %2305 = vrot.lane.b32.xlu0 %v2165_v27, %s6659_s14  ;;  %v12585_v46 = vld [vmem:[#allocation79_spill] sm:$0xff] }
 0x332   :  { %v8565_v6 = vpop.permute.xlu1 %1685 }
 0x333   :  { %12481 = vst [vmem:[#allocation74_spill] sm:$0xff] %v8565_v6  ;;  %2299 = vrot.lane.b32.xlu1 %v2162_v42, %s6659_s14 }
 0x334   :  { %v8570_v54 = vpop.permute.xlu0 %1699 }
 0x335   :  { %12483 = vst [vmem:[#allocation98_spill] sm:$0xff] %v8570_v54  ;;  %2309 = vrot.lane.b32.xlu0 %v2167_v59, %s6659_s14  ;;  %v12581_v54 = vld [vmem:[#allocation72_spill] sm:$0xff] }
 0x336   :  { %v8575_v24 = vpop.permute.xlu1 %1689 }
 0x337   :  { %12485 = vst [vmem:[#allocation83_spill] sm:$0xff] %v8575_v24  ;;  %2303 = vrot.lane.b32.xlu1 %v2164_v3, %s6659_s14 }
 0x338   :  { %v8580_v27 = vpop.permute.xlu0 %1703 }
 0x339   :  { %12487 = vst [vmem:[#allocation106_spill] sm:$0xff] %v8580_v27  ;;  %2313 = vrot.lane.b32.xlu0 %v2169_v2, %s6659_s14  ;;  %v2170_v2 = vmul.f32 %v12495_v0, %v8099_v21  ;;  %v2177_v21 = vmul.f32 %v8005_v40, %v8278_v39  ;;  %v2176_v40 = vmul.f32 %v7949_v23, %v8211_v5 }
 0x33a   :  { %v8585_v42 = vpop.permute.xlu1 %1693  ;;  %v2180_v23 = vmul.f32 %v8403_v8, %v8247_v20 }
 0x33b   :  { %12489 = vst [vmem:[#allocation93_spill] sm:$0xff] %v8585_v42  ;;  %2307 = vrot.lane.b32.xlu1 %v2166_v9, %s6659_s14 }
 0x33c   :  { %v8590_v59 = vpop.permute.xlu0 %1707 }
 0x33d   :  { %12491 = vst [vmem:[#allocation116_spill] sm:$0xff] %v8590_v59  ;;  %2317 = vrot.lane.b32.xlu0 %v2171_v53, %s6659_s14  ;;  %v12573_v59 = vld [vmem:[#allocation52_spill] sm:$0xff] }
 0x33e   :  { %v8595_v3 = vpop.permute.xlu1 %1697 }
 0x33f   :  { %12493 = vst [vmem:[#allocation99_spill] sm:$0xff] %v8595_v3  ;;  %2311 = vrot.lane.b32.xlu1 %v2168_v11, %s6659_s14 }
 0x340   :  { %v8600_v31 = vpop.permute.xlu0 %1711 }
 0x341   :  { %12494 = vst [vmem:[#allocation205_spill] sm:$0xff] %v8600_v31  ;;  %2321 = vrot.lane.b32.xlu0 %v2173_v13, %s6659_s14  ;;  %v2178_v13 = vmul.f32 %v8023_v57, %v8229_v4  ;;  %v12571_v31 = vld [vmem:[#allocation66_spill] sm:$0xff] }
 0x342   :  { %v8605_v37 = vpop.permute.xlu1 %1701 }
 0x343   :  { %12496 = vst [vmem:[#allocation107_spill] sm:$0xff] %v8605_v37  ;;  %2315 = vrot.lane.b32.xlu1 %v2170_v2, %s6659_s14  ;;  %v12575_v37 = vld [vmem:[#allocation76_spill] sm:$0xff] }
 0x344   :  { %v8610_v9 = vpop.permute.xlu0 %1715 }
 0x345   :  { %12497 = vst [vmem:[#allocation206_spill] sm:$0xff] %v8610_v9  ;;  %2325 = vrot.lane.b32.xlu0 %v2175_v17, %s6659_s14  ;;  %v12569_v9 = vld [vmem:[#allocation42_spill] sm:$0xff] }
 0x346   :  { %v8615_v10 = vpop.permute.xlu1 %1705 }
 0x347   :  { %12499 = vst [vmem:[#allocation117_spill] sm:$0xff] %v8615_v10  ;;  %2319 = vrot.lane.b32.xlu1 %v2172_v61, %s6659_s14 }
 0x348   :  { %v8620_v53 = vpop.permute.xlu0 %1719 }
 0x349   :  { %12500 = vst [vmem:[#allocation207_spill] sm:$0xff] %v8620_v53  ;;  %2329 = vrot.lane.b32.xlu0 %v2177_v21, %s6659_s14  ;;  %v12567_v53 = vld [vmem:[#allocation56_spill] sm:$0xff] }
 0x34a   :  { %v8625_v47 = vpop.permute.xlu1 %1709 }
 0x34b   :  { %12502 = vst [vmem:[#allocation126_spill] sm:$0xff] %v8625_v47  ;;  %2323 = vrot.lane.b32.xlu1 %v2174_v12, %s6659_s14 }
 0x34c   :  { %v8630_v11 = vpop.permute.xlu0 %1723 }
 0x34d   :  { %12503 = vst [vmem:[#allocation208_spill] sm:$0xff] %v8630_v11  ;;  %2333 = vrot.lane.b32.xlu0 %v2179_v49, %s6659_s14  ;;  %v12565_v11 = vld [vmem:[#allocation31_spill] sm:$0xff] }
 0x34e   :  { %v8635_v39 = vpop.permute.xlu1 %1713 }
 0x34f   :  { %12504 = vst [vmem:[#allocation209_spill] sm:$0xff] %v8635_v39  ;;  %2327 = vrot.lane.b32.xlu1 %v2176_v40, %s6659_s14  ;;  %v12508_v40 = vld [vmem:[#allocation163_spill] sm:$0xff] }
 0x350   :  { %v2011_v26 = vpop.permute.xlu0 %2010 }
 0x351   :  { %v2181_v0 = vmul.f32 %v2011_v26, %v8311_v50 }
 0x352   :  { %v8641_v14 = vpop.permute.xlu1 %1717 }
 0x353   :  { %12505 = vst [vmem:[#allocation210_spill] sm:$0xff] %v8641_v14  ;;  %2331 = vrot.lane.b32.xlu1 %v2178_v13, %s6659_s14  ;;  %2337 = vrot.lane.b32.xlu0 %v2181_v0, %s6659_s14  ;;  %v12509_v0 = vld [vmem:[#allocation165_spill] sm:$0xff] }
 0x354   :  { %v2019_v32 = vpop.permute.xlu0 %2018 }
 0x355   :  { %v2183_v5 = vmul.f32 %v2019_v32, %v8328_v35 }
 0x356   :  { %v8648_v2 = vpop.permute.xlu1 %1721 }
 0x357   :  { %12506 = vst [vmem:[#allocation211_spill] sm:$0xff] %v8648_v2  ;;  %2335 = vrot.lane.b32.xlu1 %v2180_v23, %s6659_s14  ;;  %2341 = vrot.lane.b32.xlu0 %v2183_v5, %s6659_s14  ;;  %v12510_v5 = vld [vmem:[#allocation124_spill] sm:$0xff] }
 0x358   :  { %v2027_v57 = vpop.permute.xlu0 %2026 }
 0x359   :  { %v2185_v4 = vmul.f32 %v2027_v57, %v8345_v62 }
 0x35a   :  { %v2015_v50 = vpop.permute.xlu1 %2014 }
 0x35b   :  { %v2182_v17 = vmul.f32 %v2015_v50, %v8265_v44  ;;  %2345 = vrot.lane.b32.xlu0 %v2185_v4, %s6659_s14  ;;  %v12511_v4 = vld [vmem:[#allocation167_spill] sm:$0xff] }
 0x35c   :  { %v2035_v55 = vpop.permute.xlu0 %2034 }
 0x35d   :  { %v2187_v61 = vmul.f32 %v2035_v55, %v8366_v51  ;;  %2339 = vrot.lane.b32.xlu1 %v2182_v17, %s6659_s14  ;;  %v12512_v55 = vld [vmem:[#allocation129_spill] sm:$0xff] }
 0x35e   :  { %v2023_v20 = vpop.permute.xlu1 %2022 }
 0x35f   :  { %v2184_v35 = vmul.f32 %v2023_v20, %v8283_v18  ;;  %2349 = vrot.lane.b32.xlu0 %v2187_v61, %s6659_s14 }
 0x360   :  { %v2043_v8 = vpop.permute.xlu0 %2042 }
 0x361   :  { %v2189_v21 = vmul.f32 %v2043_v8, %v8375_v16  ;;  %2343 = vrot.lane.b32.xlu1 %v2184_v35, %s6659_s14  ;;  %v12513_v8 = vld [vmem:[#allocation132_spill] sm:$0xff] }
 0x362   :  { %v2031_v62 = vpop.permute.xlu1 %2030 }
 0x363   :  { %v2186_v44 = vmul.f32 %v2031_v62, %v12507_v1  ;;  %2353 = vrot.lane.b32.xlu0 %v2189_v21, %s6659_s14  ;;  %v12514_v1 = vld [vmem:[#allocation121_spill] sm:$0xff] }
 0x364   :  { %v2051_v12 = vpop.permute.xlu0 %2050 }
 0x365   :  { %v2191_v51 = vmul.f32 %v2051_v12, %v8387_v45  ;;  %2347 = vrot.lane.b32.xlu1 %v2186_v44, %s6659_s14 }
 0x366   :  { %v2039_v49 = vpop.permute.xlu1 %2038 }
 0x367   :  { %v2188_v18 = vmul.f32 %v2039_v49, %v12508_v40  ;;  %2357 = vrot.lane.b32.xlu0 %v2191_v51, %s6659_s14  ;;  %v12515_v51 = vld [vmem:[#allocation135_spill] sm:$0xff] }
 0x368   :  { %v2059_v26 = vpop.permute.xlu0 %2058 }
 0x369   :  { %v2193_v16 = vmul.f32 %v2059_v26, %v8397_v41  ;;  %2351 = vrot.lane.b32.xlu1 %v2188_v18, %s6659_s14  ;;  %v12516_v18 = vld [vmem:[#allocation125_spill] sm:$0xff] }
 0x36a   :  { %v2047_v13 = vpop.permute.xlu1 %2046 }
 0x36b   :  { %v2190_v32 = vmul.f32 %v2047_v13, %v12509_v0  ;;  %2361 = vrot.lane.b32.xlu0 %v2193_v16, %s6659_s14  ;;  %v12517_v16 = vld [vmem:[#allocation138_spill] sm:$0xff] }
 0x36c   :  { %v2067_v23 = vpop.permute.xlu0 %2066 }
 0x36d   :  { %v2195_v45 = vmul.f32 %v2067_v23, %v12510_v5  ;;  %2355 = vrot.lane.b32.xlu1 %v2190_v32, %s6659_s14  ;;  %v12518_v32 = vld [vmem:[#allocation127_spill] sm:$0xff] }
 0x36e   :  { %v2055_v57 = vpop.permute.xlu1 %2054 }
 0x36f   :  { %v2192_v50 = vmul.f32 %v2055_v57, %v12511_v4  ;;  %2365 = vrot.lane.b32.xlu0 %v2195_v45, %s6659_s14  ;;  %v12519_v45 = vld [vmem:[#allocation141_spill] sm:$0xff] }
 0x370   :  { %v2075_v17 = vpop.permute.xlu0 %2074 }
 0x371   :  { %v2197_v41 = vmul.f32 %v2075_v17, %v12512_v55  ;;  %2359 = vrot.lane.b32.xlu1 %v2192_v50, %s6659_s14  ;;  %v12520_v50 = vld [vmem:[#allocation130_spill] sm:$0xff] }
 0x372   :  { %v2063_v61 = vpop.permute.xlu1 %2062 }
 0x373   :  { %v2194_v20 = vmul.f32 %v2063_v61, %v8357_v7  ;;  %2369 = vrot.lane.b32.xlu0 %v2197_v41, %s6659_s14  ;;  %v12521_v41 = vld [vmem:[#allocation144_spill] sm:$0xff] }
 0x374   :  { %v2083_v35 = vpop.permute.xlu0 %2082 }
 0x375   :  { %v2199_v21 = vmul.f32 %v2083_v35, %v12513_v8  ;;  %2363 = vrot.lane.b32.xlu1 %v2194_v20, %s6659_s14  ;;  %v12522_v35 = vld [vmem:[#allocation133_spill] sm:$0xff] }
 0x376   :  { %v2071_v62 = vpop.permute.xlu1 %2070 }
 0x377   :  { %v2196_v44 = vmul.f32 %v2071_v62, %v12514_v1  ;;  %2373 = vrot.lane.b32.xlu0 %v2199_v21, %s6659_s14  ;;  %v12523_v62 = vld [vmem:[#allocation148_spill] sm:$0xff] }
 0x378   :  { %v2091_v12 = vpop.permute.xlu0 %2090 }
 0x379   :  { %v2201_v49 = vmul.f32 %v2091_v12, %v12515_v51  ;;  %2367 = vrot.lane.b32.xlu1 %v2196_v44, %s6659_s14  ;;  %v12524_v12 = vld [vmem:[#allocation137_spill] sm:$0xff] }
 0x37a   :  { %v2079_v40 = vpop.permute.xlu1 %2078 }
 0x37b   :  { %v2198_v7 = vmul.f32 %v2079_v40, %v12516_v18  ;;  %2377 = vrot.lane.b32.xlu0 %v2201_v49, %s6659_s14  ;;  %v12525_v40 = vld [vmem:[#allocation152_spill] sm:$0xff] }
 0x37c   :  { %v2099_v26 = vpop.permute.xlu0 %2098 }
 0x37d   :  { %v2203_v13 = vmul.f32 %v2099_v26, %v12517_v16  ;;  %2371 = vrot.lane.b32.xlu1 %v2198_v7, %s6659_s14  ;;  %v12526_v26 = vld [vmem:[#allocation139_spill] sm:$0xff] }
 0x37e   :  { %v2087_v0 = vpop.permute.xlu1 %2086 }
 0x37f   :  { %v2200_v23 = vmul.f32 %v2087_v0, %v12518_v32  ;;  %2381 = vrot.lane.b32.xlu0 %v2203_v13, %s6659_s14  ;;  %v12527_v0 = vld [vmem:[#allocation155_spill] sm:$0xff] }
 0x380   :  { %v2107_v5 = vpop.permute.xlu0 %2106 }
 0x381   :  { %v2205_v57 = vmul.f32 %v2107_v5, %v12519_v45  ;;  %2375 = vrot.lane.b32.xlu1 %v2200_v23, %s6659_s14  ;;  %v12528_v5 = vld [vmem:[#allocation143_spill] sm:$0xff] }
 0x382   :  { %v2095_v4 = vpop.permute.xlu1 %2094 }
 0x383   :  { %v2202_v17 = vmul.f32 %v2095_v4, %v12520_v50  ;;  %2385 = vrot.lane.b32.xlu0 %v2205_v57, %s6659_s14  ;;  %v12529_v4 = vld [vmem:[#allocation158_spill] sm:$0xff] }
 0x384   :  { %v2115_v55 = vpop.permute.xlu0 %2114 }
 0x385   :  { %v2207_v61 = vmul.f32 %v2115_v55, %v12521_v41  ;;  %2379 = vrot.lane.b32.xlu1 %v2202_v17, %s6659_s14  ;;  %v12530_v55 = vld [vmem:[#allocation146_spill] sm:$0xff] }
 0x386   :  { %v2103_v20 = vpop.permute.xlu1 %2102 }
 0x387   :  { %v2204_v8 = vmul.f32 %v2103_v20, %v12522_v35  ;;  %2389 = vrot.lane.b32.xlu0 %v2207_v61, %s6659_s14  ;;  %v12532_v35 = vld [vmem:[#allocation150_spill] sm:$0xff] }
 0x388   :  { %v2123_v21 = vpop.permute.xlu0 %2122 }
 0x389   :  { %v2209_v1 = vmul.f32 %v2123_v21, %v12523_v62  ;;  %2383 = vrot.lane.b32.xlu1 %v2204_v8, %s6659_s14  ;;  %v12533_v21 = vld [vmem:[#allocation5_spill] sm:$0xff] }
 0x38a   :  { %v2111_v44 = vpop.permute.xlu1 %2110 }
 0x38b   :  { %v2206_v51 = vmul.f32 %v2111_v44, %v12524_v12  ;;  %2393 = vrot.lane.b32.xlu0 %v2209_v1, %s6659_s14  ;;  %v12535_v44 = vld [vmem:[#allocation153_spill] sm:$0xff] }
 0x38c   :  { %v2131_v49 = vpop.permute.xlu0 %2130 }
 0x38d   :  { %v2211_v18 = vmul.f32 %v2131_v49, %v12525_v40  ;;  %2387 = vrot.lane.b32.xlu1 %v2206_v51, %s6659_s14  ;;  %v12536_v51 = vld [vmem:[#allocation6_spill] sm:$0xff] }
 0x38e   :  { %v2119_v7 = vpop.permute.xlu1 %2118 }
 0x38f   :  { %v2208_v16 = vmul.f32 %v2119_v7, %v12526_v26  ;;  %2397 = vrot.lane.b32.xlu0 %v2211_v18, %s6659_s14  ;;  %v12539_v18 = vld [vmem:[#allocation10_spill] sm:$0xff] }
 0x390   :  { %v2139_v13 = vpop.permute.xlu0 %2138  ;;  %v12541_v26 = vld [vmem:[#allocation2_spill] sm:$0xff] }
 0x391   :  { %v2213_v32 = vmul.f32 %v2139_v13, %v12527_v0  ;;  %2391 = vrot.lane.b32.xlu1 %v2208_v16, %s6659_s14  ;;  %v12543_v13 = vld [vmem:[#allocation14_spill] sm:$0xff] }
 0x392   :  { %v2127_v23 = vpop.permute.xlu1 %2126 }
 0x393   :  { %v2210_v45 = vmul.f32 %v2127_v23, %v12528_v5  ;;  %2401 = vrot.lane.b32.xlu0 %v2213_v32, %s6659_s14  ;;  %v12545_v32 = vld [vmem:[#allocation8_spill] sm:$0xff]  ;;  %v12547_v5 = vld [vmem:[#allocation18_spill] sm:$0xff] }
 0x394   :  { %v2147_v57 = vpop.permute.xlu0 %2146 }
 0x395   :  { %v2215_v50 = vmul.f32 %v2147_v57, %v12529_v4  ;;  %2395 = vrot.lane.b32.xlu1 %v2210_v45, %s6659_s14  ;;  %v12549_v57 = vld [vmem:[#allocation12_spill] sm:$0xff] }
 0x396   :  { %v2135_v17 = vpop.permute.xlu1 %2134 }
 0x397   :  { %v2212_v41 = vmul.f32 %v2135_v17, %v12530_v55  ;;  %2405 = vrot.lane.b32.xlu0 %v2215_v50, %s6659_s14  ;;  %v12551_v50 = vld [vmem:[#allocation22_spill] sm:$0xff]  ;;  %v12553_v55 = vld [vmem:[#allocation16_spill] sm:$0xff] }
 0x398   :  { %v8715_v61 = vpop.permute.xlu0 %2281 }
 0x399   :  { %12531 = vst [vmem:[#allocation161_spill] sm:$0xff] %v8715_v61  ;;  %2399 = vrot.lane.b32.xlu1 %v2212_v41, %s6659_s14 }
 0x39a   :  { %v2143_v20 = vpop.permute.xlu1 %2142 }
 0x39b   :  { %v2214_v8 = vmul.f32 %v2143_v20, %v12532_v35  ;;  %2538 = vperm.xlu0 %6424, %v12533_v21   ;;  %v12555_v20 = vld [vmem:[#allocation28_spill] sm:$0xff] }
 0x39c   :  { %v8720_v62 = vpop.permute.xlu0 %2285 }
 0x39d   :  { %12534 = vst [vmem:[#allocation163_spill] sm:$0xff] %v8720_v62  ;;  %2403 = vrot.lane.b32.xlu1 %v2214_v8, %s6659_s14  ;;  %v12557_v8 = vld [vmem:[#allocation20_spill] sm:$0xff] }
 0x39e   :  { %v2151_v1 = vpop.permute.xlu1 %2150 }
 0x39f   :  { %v2216_v12 = vmul.f32 %v2151_v1, %v12535_v44  ;;  %2550 = vperm.xlu0 %6424, %v12536_v51   ;;  %v12559_v44 = vld [vmem:[#allocation38_spill] sm:$0xff] }
 0x3a0   :  { %v8725_v49 = vpop.permute.xlu0 %2289 }
 0x3a1   :  { %12537 = vst [vmem:[#allocation165_spill] sm:$0xff] %v8725_v49  ;;  %2407 = vrot.lane.b32.xlu1 %v2216_v12, %s6659_s14 }
 0x3a2   :  { %v8728_v40 = vpop.permute.xlu1 %2283 }
 0x3a3   :  { %12538 = vst [vmem:[#allocation124_spill] sm:$0xff] %v8728_v40  ;;  %2558 = vperm.xlu0 %6424, %v12539_v18  }
 0x3a4   :  { %v8731_v7 = vpop.permute.xlu0 %2293 }
 0x3a5   :  { %12540 = vst [vmem:[#allocation167_spill] sm:$0xff] %v8731_v7  ;;  %2542 = vperm.xlu1 %6425, %v12541_v26  }
 0x3a6   :  { %v8734_v16 = vpop.permute.xlu1 %2287 }
 0x3a7   :  { %12542 = vst [vmem:[#allocation129_spill] sm:$0xff] %v8734_v16  ;;  %2566 = vperm.xlu0 %6424, %v12543_v13  }
 0x3a8   :  { %v8737_v0 = vpop.permute.xlu0 %2297 }
 0x3a9   :  { %12544 = vst [vmem:[#allocation132_spill] sm:$0xff] %v8737_v0  ;;  %2546 = vperm.xlu1 %6425, %v12545_v32  }
 0x3aa   :  { %v8740_v23 = vpop.permute.xlu1 %2291 }
 0x3ab   :  { %12546 = vst [vmem:[#allocation121_spill] sm:$0xff] %v8740_v23  ;;  %2574 = vperm.xlu0 %6424, %v12547_v5  }
 0x3ac   :  { %v8743_v45 = vpop.permute.xlu0 %2301 }
 0x3ad   :  { %12548 = vst [vmem:[#allocation135_spill] sm:$0xff] %v8743_v45  ;;  %2554 = vperm.xlu1 %6425, %v12549_v57   ;;  %v12583_v45 = vld [vmem:[#allocation89_spill] sm:$0xff] }
 0x3ae   :  { %v8746_v4 = vpop.permute.xlu1 %2295 }
 0x3af   :  { %12550 = vst [vmem:[#allocation125_spill] sm:$0xff] %v8746_v4  ;;  %2582 = vperm.xlu0 %6424, %v12551_v50  }
 0x3b0   :  { %v8749_v17 = vpop.permute.xlu0 %2305 }
 0x3b1   :  { %12552 = vst [vmem:[#allocation138_spill] sm:$0xff] %v8749_v17  ;;  %2562 = vperm.xlu1 %6425, %v12553_v55   ;;  %v12579_v17 = vld [vmem:[#allocation84_spill] sm:$0xff] }
 0x3b2   :  { %v8752_v41 = vpop.permute.xlu1 %2299 }
 0x3b3   :  { %12554 = vst [vmem:[#allocation127_spill] sm:$0xff] %v8752_v41  ;;  %2590 = vperm.xlu0 %6424, %v12555_v20  }
 0x3b4   :  { %v8755_v35 = vpop.permute.xlu0 %2309 }
 0x3b5   :  { %12556 = vst [vmem:[#allocation141_spill] sm:$0xff] %v8755_v35  ;;  %2570 = vperm.xlu1 %6425, %v12557_v8  }
 0x3b6   :  { %v8758_v1 = vpop.permute.xlu1 %2303 }
 0x3b7   :  { %12558 = vst [vmem:[#allocation130_spill] sm:$0xff] %v8758_v1  ;;  %2598 = vperm.xlu0 %6424, %v12559_v44  }
 0x3b8   :  { %v8761_v12 = vpop.permute.xlu0 %2313 }
 0x3b9   :  { %12560 = vst [vmem:[#allocation144_spill] sm:$0xff] %v8761_v12  ;;  %2578 = vperm.xlu1 %6425, %v12561_v22  }
 0x3ba   :  { %v8764_v25 = vpop.permute.xlu1 %2307 }
 0x3bb   :  { %12562 = vst [vmem:[#allocation133_spill] sm:$0xff] %v8764_v25  ;;  %2606 = vperm.xlu0 %6424, %v12563_v56  }
 0x3bc   :  { %v8767_v2 = vpop.permute.xlu0 %2317 }
 0x3bd   :  { %12564 = vst [vmem:[#allocation148_spill] sm:$0xff] %v8767_v2  ;;  %2586 = vperm.xlu1 %6425, %v12565_v11  }
 0x3be   :  { %v8770_v14 = vpop.permute.xlu1 %2311 }
 0x3bf   :  { %12566 = vst [vmem:[#allocation137_spill] sm:$0xff] %v8770_v14  ;;  %2614 = vperm.xlu0 %6424, %v12567_v53   ;;  %v12577_v14 = vld [vmem:[#allocation62_spill] sm:$0xff] }
 0x3c0   :  { %v8773_v39 = vpop.permute.xlu0 %2321 }
 0x3c1   :  { %12568 = vst [vmem:[#allocation152_spill] sm:$0xff] %v8773_v39  ;;  %2594 = vperm.xlu1 %6425, %v12569_v9  }
 0x3c2   :  { %v8776_v47 = vpop.permute.xlu1 %2315 }
 0x3c3   :  { %12570 = vst [vmem:[#allocation139_spill] sm:$0xff] %v8776_v47  ;;  %2622 = vperm.xlu0 %6424, %v12571_v31  }
 0x3c4   :  { %v8779_v10 = vpop.permute.xlu0 %2325 }
 0x3c5   :  { %12572 = vst [vmem:[#allocation155_spill] sm:$0xff] %v8779_v10  ;;  %2602 = vperm.xlu1 %6425, %v12573_v59  }
 0x3c6   :  { %v8782_v35 = vpop.permute.xlu1 %2319 }
 0x3c7   :  { %12574 = vst [vmem:[#allocation143_spill] sm:$0xff] %v8782_v35  ;;  %2630 = vperm.xlu0 %6424, %v12575_v37  }
 0x3c8   :  { %v8785_v27 = vpop.permute.xlu0 %2329 }
 0x3c9   :  { %12576 = vst [vmem:[#allocation158_spill] sm:$0xff] %v8785_v27  ;;  %2610 = vperm.xlu1 %6425, %v12577_v14   ;;  %v12588_v27 = vld [vmem:[#allocation85_spill] sm:$0xff] }
 0x3ca   :  { %v8788_v25 = vpop.permute.xlu1 %2323 }
 0x3cb   :  { %12578 = vst [vmem:[#allocation146_spill] sm:$0xff] %v8788_v25  ;;  %2638 = vperm.xlu0 %6424, %v12579_v17  }
 0x3cc   :  { %v8791_v3 = vpop.permute.xlu0 %2333 }
 0x3cd   :  { %12580 = vst [vmem:[#allocation150_spill] sm:$0xff] %v8791_v3  ;;  %2618 = vperm.xlu1 %6425, %v12581_v54  }
 0x3ce   :  { %v8794_v1 = vpop.permute.xlu1 %2327 }
 0x3cf   :  { %12582 = vst [vmem:[#allocation5_spill] sm:$0xff] %v8794_v1  ;;  %2646 = vperm.xlu0 %6424, %v12583_v45  }
 0x3d0   :  { %v8797_v42 = vpop.permute.xlu0 %2337 }
 0x3d1   :  { %12584 = vst [vmem:[#allocation153_spill] sm:$0xff] %v8797_v42  ;;  %2626 = vperm.xlu1 %6425, %v12585_v46  }
 0x3d2   :  { %v8800_v0 = vpop.permute.xlu1 %2331 }
 0x3d3   :  { %12586 = vst [vmem:[#allocation6_spill] sm:$0xff] %v8800_v0  ;;  %2654 = vperm.xlu0 %6424, %v7628_v36  }
 0x3d4   :  { %v8803_v41 = vpop.permute.xlu0 %2341 }
 0x3d5   :  { %12587 = vst [vmem:[#allocation10_spill] sm:$0xff] %v8803_v41  ;;  %2634 = vperm.xlu1 %6425, %v12588_v27  }
 0x3d6   :  { %v8806_v24 = vpop.permute.xlu1 %2335 }
 0x3d7   :  { %12589 = vst [vmem:[#allocation2_spill] sm:$0xff] %v8806_v24  ;;  %2662 = vperm.xlu0 %6424, %v7654_v19  }
 0x3d8   :  { %v8809_v3 = vpop.permute.xlu0 %2345 }
 0x3d9   :  { %12590 = vst [vmem:[#allocation14_spill] sm:$0xff] %v8809_v3  ;;  %2642 = vperm.xlu1 %6425, %v12591_v43  }
 0x3da   :  { %v8812_v7 = vpop.permute.xlu1 %2339 }
 0x3db   :  { %12592 = vst [vmem:[#allocation8_spill] sm:$0xff] %v8812_v7  ;;  %2670 = vperm.xlu0 %6424, %v7678_v33  }
 0x3dc   :  { %v8815_v42 = vpop.permute.xlu0 %2349 }
 0x3dd   :  { %12593 = vst [vmem:[#allocation18_spill] sm:$0xff] %v8815_v42  ;;  %2650 = vperm.xlu1 %6425, %v7642_v58   ;;  %v12599_v42 = vld [vmem:[#allocation109_spill] sm:$0xff] }
 0x3de   :  { %v8818_v0 = vpop.permute.xlu1 %2343 }
 0x3df   :  { %12594 = vst [vmem:[#allocation12_spill] sm:$0xff] %v8818_v0  ;;  %2678 = vperm.xlu0 %6424, %v7702_v63   ;;  %v12601_v0 = vld [vmem:[#allocation102_spill] sm:$0xff] }
 0x3e0   :  { %v8821_v41 = vpop.permute.xlu0 %2353 }
 0x3e1   :  { %12595 = vst [vmem:[#allocation22_spill] sm:$0xff] %v8821_v41  ;;  %2658 = vperm.xlu1 %6425, %v7666_v30   ;;  %v12603_v41 = vld [vmem:[#allocation115_spill] sm:$0xff] }
 0x3e2   :  { %v8824_v24 = vpop.permute.xlu1 %2347 }
 0x3e3   :  { %12596 = vst [vmem:[#allocation16_spill] sm:$0xff] %v8824_v24  ;;  %2686 = vperm.xlu0 %6424, %v12411_v28   ;;  %v12605_v24 = vld [vmem:[#allocation108_spill] sm:$0xff] }
 0x3e4   :  { %v8827_v3 = vpop.permute.xlu0 %2357 }
 0x3e5   :  { %12597 = vst [vmem:[#allocation28_spill] sm:$0xff] %v8827_v3  ;;  %2666 = vperm.xlu1 %6425, %v7690_v60   ;;  %v12607_v3 = vld [vmem:[#allocation3_spill] sm:$0xff] }
 0x3e6   :  { %v8830_v7 = vpop.permute.xlu1 %2351 }
 0x3e7   :  { %12598 = vst [vmem:[#allocation20_spill] sm:$0xff] %v8830_v7  ;;  %2694 = vperm.xlu0 %6424, %v12599_v42   ;;  %v12609_v7 = vld [vmem:[#allocation111_spill] sm:$0xff] }
 0x3e8   :  { %v8833_v4 = vpop.permute.xlu0 %2361 }
 0x3e9   :  { %12600 = vst [vmem:[#allocation38_spill] sm:$0xff] %v8833_v4  ;;  %2674 = vperm.xlu1 %6425, %v12601_v0   ;;  %v12611_v4 = vld [vmem:[#allocation7_spill] sm:$0xff] }
 0x3ea   :  { %v8836_v1 = vpop.permute.xlu1 %2355 }
 0x3eb   :  { %12602 = vst [vmem:[#allocation24_spill] sm:$0xff] %v8836_v1  ;;  %2702 = vperm.xlu0 %6424, %v12603_v41   ;;  %v12613_v1 = vld [vmem:[#allocation118_spill] sm:$0xff] }
 0x3ec   :  { %v8839_v10 = vpop.permute.xlu0 %2365 }
 0x3ed   :  { %12604 = vst [vmem:[#allocation46_spill] sm:$0xff] %v8839_v10  ;;  %2682 = vperm.xlu1 %6425, %v12605_v24   ;;  %v12615_v10 = vld [vmem:[#allocation11_spill] sm:$0xff] }
 0x3ee   :  { %v8842_v6 = vpop.permute.xlu1 %2359 }
 0x3ef   :  { %12606 = vst [vmem:[#allocation31_spill] sm:$0xff] %v8842_v6  ;;  %2710 = vperm.xlu0 %6424, %v12607_v3   ;;  %v12617_v6 = vld [vmem:[#allocation4_spill] sm:$0xff] }
 0x3f0   :  { %v8845_v52 = vpop.permute.xlu0 %2369 }
 0x3f1   :  { %12608 = vst [vmem:[#allocation56_spill] sm:$0xff] %v8845_v52  ;;  %2690 = vperm.xlu1 %6425, %v12609_v7   ;;  %v12619_v52 = vld [vmem:[#allocation15_spill] sm:$0xff] }
 0x3f2   :  { %v8848_v49 = vpop.permute.xlu1 %2363 }
 0x3f3   :  { %12610 = vst [vmem:[#allocation42_spill] sm:$0xff] %v8848_v49  ;;  %2718 = vperm.xlu0 %6424, %v12611_v4   ;;  %v12621_v49 = vld [vmem:[#allocation9_spill] sm:$0xff] }
 0x3f4   :  { %v8851_v23 = vpop.permute.xlu0 %2373 }
 0x3f5   :  { %12612 = vst [vmem:[#allocation66_spill] sm:$0xff] %v8851_v23  ;;  %2698 = vperm.xlu1 %6425, %v12613_v1   ;;  %v12623_v23 = vld [vmem:[#allocation19_spill] sm:$0xff] }
 0x3f6   :  { %v8854_v25 = vpop.permute.xlu1 %2367 }
 0x3f7   :  { %12614 = vst [vmem:[#allocation52_spill] sm:$0xff] %v8854_v25  ;;  %2726 = vperm.xlu0 %6424, %v12615_v10   ;;  %v12625_v25 = vld [vmem:[#allocation13_spill] sm:$0xff] }
 0x3f8   :  { %v8857_v39 = vpop.permute.xlu0 %2377 }
 0x3f9   :  { %12616 = vst [vmem:[#allocation76_spill] sm:$0xff] %v8857_v39  ;;  %2706 = vperm.xlu1 %6425, %v12617_v6   ;;  %v12627_v39 = vld [vmem:[#allocation23_spill] sm:$0xff] }
 0x3fa   :  { %v8860_v38 = vpop.permute.xlu1 %2371 }
 0x3fb   :  { %12618 = vst [vmem:[#allocation62_spill] sm:$0xff] %v8860_v38  ;;  %2734 = vperm.xlu0 %6424, %v12619_v52   ;;  %v12629_v38 = vld [vmem:[#allocation17_spill] sm:$0xff] }
 0x3fc   :  { %v8863_v34 = vpop.permute.xlu0 %2381 }
 0x3fd   :  { %12620 = vst [vmem:[#allocation84_spill] sm:$0xff] %v8863_v34  ;;  %2714 = vperm.xlu1 %6425, %v12621_v49   ;;  %v12631_v34 = vld [vmem:[#allocation29_spill] sm:$0xff] }
 0x3fe   :  { %v8866_v62 = vpop.permute.xlu1 %2375 }
 0x3ff   :  { %12622 = vst [vmem:[#allocation72_spill] sm:$0xff] %v8866_v62  ;;  %2742 = vperm.xlu0 %6424, %v12623_v23   ;;  %v12633_v62 = vld [vmem:[#allocation21_spill] sm:$0xff] }
 0x400   :  { %v8869_v16 = vpop.permute.xlu0 %2385 }
 0x401   :  { %12624 = vst [vmem:[#allocation89_spill] sm:$0xff] %v8869_v16  ;;  %2722 = vperm.xlu1 %6425, %v12625_v25   ;;  %v12635_v16 = vld [vmem:[#allocation40_spill] sm:$0xff] }
 0x402   :  { %v8872_v35 = vpop.permute.xlu1 %2379 }
 0x403   :  { %12626 = vst [vmem:[#allocation79_spill] sm:$0xff] %v8872_v35  ;;  %2750 = vperm.xlu0 %6424, %v12627_v39   ;;  %v12637_v35 = vld [vmem:[#allocation25_spill] sm:$0xff] }
 0x404   :  { %v8875_v2 = vpop.permute.xlu0 %2389 }
 0x405   :  { %12628 = vst [vmem:[#allocation85_spill] sm:$0xff] %v8875_v2  ;;  %2730 = vperm.xlu1 %6425, %v12629_v38   ;;  %v12639_v2 = vld [vmem:[#allocation49_spill] sm:$0xff] }
 0x406   :  { %v8878_v15 = vpop.permute.xlu1 %2383 }
 0x407   :  { %12630 = vst [vmem:[#allocation91_spill] sm:$0xff] %v8878_v15  ;;  %2758 = vperm.xlu0 %6424, %v12631_v34   ;;  %v12641_v15 = vld [vmem:[#allocation34_spill] sm:$0xff] }
 0x408   :  { %v8881_v61 = vpop.permute.xlu0 %2393 }
 0x409   :  { %12632 = vst [vmem:[#allocation109_spill] sm:$0xff] %v8881_v61  ;;  %2738 = vperm.xlu1 %6425, %v12633_v62   ;;  %v12643_v61 = vld [vmem:[#allocation44_spill] sm:$0xff] }
 0x40a   :  { %v8884_v40 = vpop.permute.xlu1 %2387 }
 0x40b   :  { %12634 = vst [vmem:[#allocation102_spill] sm:$0xff] %v8884_v40  ;;  %2766 = vperm.xlu0 %6424, %v12635_v16  }
 0x40c   :  { %v8887_v47 = vpop.permute.xlu0 %2397 }
 0x40d   :  { %12636 = vst [vmem:[#allocation115_spill] sm:$0xff] %v8887_v47  ;;  %2746 = vperm.xlu1 %6425, %v12637_v35   ;;  %v12646_v47 = vld [vmem:[#allocation55_spill] sm:$0xff] }
 0x40e   :  { %v8890_v12 = vpop.permute.xlu1 %2391 }
 0x40f   :  { %12638 = vst [vmem:[#allocation108_spill] sm:$0xff] %v8890_v12  ;;  %2774 = vperm.xlu0 %6424, %v12639_v2  }
 0x410   :  { %v8893_v39 = vpop.permute.xlu0 %2401 }
 0x411   :  { %12640 = vst [vmem:[#allocation3_spill] sm:$0xff] %v8893_v39  ;;  %2754 = vperm.xlu1 %6425, %v12641_v15   ;;  %v12648_v39 = vld [vmem:[#allocation65_spill] sm:$0xff] }
 0x412   :  { %v8896_v34 = vpop.permute.xlu1 %2395 }
 0x413   :  { %12642 = vst [vmem:[#allocation111_spill] sm:$0xff] %v8896_v34  ;;  %2782 = vperm.xlu0 %6424, %v12458_v29   ;;  %v12650_v34 = vld [vmem:[#allocation75_spill] sm:$0xff] }
 0x414   :  { %v8900_v40 = vpop.permute.xlu0 %2405 }
 0x415   :  { %2762 = vperm.xlu1 %6425, %v12643_v61   ;;  %12644 = vst [vmem:[#allocation7_spill] sm:$0xff] %v8900_v40  ;;  %v8915_v40 = vld [vmem:[%s11958_s3] sm:$0xff] }
 0x416   :  { %v8902_v16 = vpop.permute.xlu1 %2399  ;;  %12651 = vst [vmem:[#allocation213_spill] sm:$0xff] %v8915_v40 }
 0x417   :  { %12645 = vst [vmem:[#allocation118_spill] sm:$0xff] %v8902_v16  ;;  %2790 = vperm.xlu0 %6424, %v12462_v48  }
 0x419   :  { %2770 = vperm.xlu1 %6425, %v12646_v47  }
 0x41a   :  { %v8906_v12 = vpop.permute.xlu1 %2403  ;;  %v2539_v2 = vpop.permute.xlu0 %2538 }
 0x41b   :  { %12647 = vst [vmem:[#allocation4_spill] sm:$0xff] %v8906_v12  ;;  %v2793_v16 = vmul.f32 %v8915_v40, %v2539_v2  ;;  %v8921_v12 = vld [vmem:[%s11958_s3 + $0x8] sm:$0xff]  ;;  %v8929_v2 = vld [vmem:[%s11958_s3 + $0x18] sm:$0xff] }
 0x41c   :  { %12652 = vst [vmem:[#allocation214_spill] sm:$0xff] %v8921_v12  ;;  %12653 = vst [vmem:[#allocation215_spill] sm:$0xff] %v8929_v2 }
 0x41d   :  { %2778 = vperm.xlu1 %6425, %v12648_v39  }
 0x41e   :  { %v2551_v15 = vpop.permute.xlu0 %2550  ;;  %v8909_v23 = vpop.permute.xlu1 %2407 }
 0x41f   :  { %12649 = vst [vmem:[#allocation212_spill] sm:$0xff] %v8909_v23  ;;  %v2796_v40 = vmul.f32 %v8929_v2, %v2551_v15  ;;  %v8949_v2 = vld [vmem:[%s11958_s3 + $0x20] sm:$0xff] }
 0x420   :  { %12656 = vst [vmem:[#allocation218_spill] sm:$0xff] %v8949_v2 }
 0x421   :  { %2786 = vperm.xlu1 %6425, %v12650_v34   ;;  %v6662_v34 = vmov 4  }
 0x422   :  { %v2559_v29 = vpop.permute.xlu0 %2558  ;;  %6427 = vset.pattern.permute.xlu0 %v6662_v34 }
 0x424   :  { %v2543_v48 = vpop.permute.xlu1 %2542 }
 0x425   :  { %v2794_v39 = vmul.f32 %v8921_v12, %v2543_v48  ;;  %2921 = vrot.lane.b32.xlu1 %v2793_v16, %s6661_s15  ;;  %v8935_v48 = vld [vmem:[%s11958_s3 + $0x10] sm:$0xff] }
 0x426   :  { %v2567_v23 = vpop.permute.xlu0 %2566  ;;  %6426 = vset.pattern.permute.xlu1 %v6662_v34  ;;  %12654 = vst [vmem:[#allocation216_spill] sm:$0xff] %v8935_v48 }
 0x427   :  { %2923 = vrot.lane.b32.xlu0 %v2794_v39, %s6661_s15  ;;  %v8943_v39 = vld [vmem:[%s11958_s3 + $0x28] sm:$0xff] }
 0x428   :  { %v2547_v47 = vpop.permute.xlu1 %2546  ;;  %12655 = vst [vmem:[#allocation217_spill] sm:$0xff] %v8943_v39  ;;  %v2798_v15 = vmul.f32 %v8943_v39, %v2559_v29  ;;  %v8963_v39 = vld [vmem:[%s11958_s3 + $0x30] sm:$0xff] }
 0x429   :  { %v2795_v16 = vmul.f32 %v8935_v48, %v2547_v47  ;;  %12658 = vst [vmem:[#allocation220_spill] sm:$0xff] %v8963_v39 }
 0x42a   :  { %v2575_v12 = vpop.permute.xlu0 %2574 }
 0x42b   :  { %2925 = vrot.lane.b32.xlu1 %v2795_v16, %s6661_s15  ;;  %2927 = vrot.lane.b32.xlu0 %v2796_v40, %s6661_s15  ;;  %v8957_v16 = vld [vmem:[%s11958_s3 + $0x38] sm:$0xff] }
 0x42c   :  { %v2555_v34 = vpop.permute.xlu1 %2554  ;;  %12657 = vst [vmem:[#allocation219_spill] sm:$0xff] %v8957_v16  ;;  %v2800_v29 = vmul.f32 %v8957_v16, %v2567_v23  ;;  %v8977_v16 = vld [vmem:[%s11958_s3 + $0x40] sm:$0xff] }
 0x42d   :  { %v2797_v47 = vmul.f32 %v8949_v2, %v2555_v34  ;;  %12660 = vst [vmem:[#allocation222_spill] sm:$0xff] %v8977_v16 }
 0x42e   :  { %v2583_v48 = vpop.permute.xlu0 %2582 }
 0x42f   :  { %2929 = vrot.lane.b32.xlu1 %v2797_v47, %s6661_s15  ;;  %2931 = vrot.lane.b32.xlu0 %v2798_v15, %s6661_s15  ;;  %v8971_v47 = vld [vmem:[%s11958_s3 + $0x48] sm:$0xff] }
 0x430   :  { %v2563_v40 = vpop.permute.xlu1 %2562  ;;  %12659 = vst [vmem:[#allocation221_spill] sm:$0xff] %v8971_v47  ;;  %v2802_v23 = vmul.f32 %v8971_v47, %v2575_v12  ;;  %v8991_v47 = vld [vmem:[%s11958_s3 + $0x50] sm:$0xff] }
 0x431   :  { %v2799_v34 = vmul.f32 %v8963_v39, %v2563_v40  ;;  %12662 = vst [vmem:[#allocation224_spill] sm:$0xff] %v8991_v47 }
 0x432   :  { %v2591_v2 = vpop.permute.xlu0 %2590 }
 0x433   :  { %2933 = vrot.lane.b32.xlu1 %v2799_v34, %s6661_s15  ;;  %2935 = vrot.lane.b32.xlu0 %v2800_v29, %s6661_s15  ;;  %v8985_v34 = vld [vmem:[%s11958_s3 + $0x58] sm:$0xff] }
 0x434   :  { %v2571_v15 = vpop.permute.xlu1 %2570  ;;  %12661 = vst [vmem:[#allocation223_spill] sm:$0xff] %v8985_v34  ;;  %v2804_v12 = vmul.f32 %v8985_v34, %v2583_v48  ;;  %v9005_v34 = vld [vmem:[%s11958_s3 + $0x60] sm:$0xff] }
 0x435   :  { %v2801_v40 = vmul.f32 %v8977_v16, %v2571_v15  ;;  %12664 = vst [vmem:[#allocation226_spill] sm:$0xff] %v9005_v34 }
 0x436   :  { %v2599_v39 = vpop.permute.xlu0 %2598 }
 0x437   :  { %2937 = vrot.lane.b32.xlu1 %v2801_v40, %s6661_s15  ;;  %2939 = vrot.lane.b32.xlu0 %v2802_v23, %s6661_s15  ;;  %v8999_v40 = vld [vmem:[%s11958_s3 + $0x68] sm:$0xff] }
 0x438   :  { %v2579_v29 = vpop.permute.xlu1 %2578  ;;  %12663 = vst [vmem:[#allocation225_spill] sm:$0xff] %v8999_v40  ;;  %v2806_v48 = vmul.f32 %v8999_v40, %v2591_v2  ;;  %v9019_v40 = vld [vmem:[%s11958_s3 + $0x70] sm:$0xff] }
 0x439   :  { %v2803_v15 = vmul.f32 %v8991_v47, %v2579_v29  ;;  %12666 = vst [vmem:[#allocation228_spill] sm:$0xff] %v9019_v40 }
 0x43a   :  { %v2607_v16 = vpop.permute.xlu0 %2606 }
 0x43b   :  { %2941 = vrot.lane.b32.xlu1 %v2803_v15, %s6661_s15  ;;  %2943 = vrot.lane.b32.xlu0 %v2804_v12, %s6661_s15  ;;  %v9013_v15 = vld [vmem:[%s11958_s3 + $0x78] sm:$0xff] }
 0x43c   :  { %v2587_v23 = vpop.permute.xlu1 %2586  ;;  %12665 = vst [vmem:[#allocation227_spill] sm:$0xff] %v9013_v15  ;;  %v2808_v2 = vmul.f32 %v9013_v15, %v2599_v39  ;;  %v9033_v15 = vld [vmem:[%s11958_s3 + $0x80] sm:$0xff] }
 0x43d   :  { %v2805_v29 = vmul.f32 %v9005_v34, %v2587_v23  ;;  %12668 = vst [vmem:[#allocation230_spill] sm:$0xff] %v9033_v15 }
 0x43e   :  { %v2615_v47 = vpop.permute.xlu0 %2614 }
 0x43f   :  { %2945 = vrot.lane.b32.xlu1 %v2805_v29, %s6661_s15  ;;  %2947 = vrot.lane.b32.xlu0 %v2806_v48, %s6661_s15  ;;  %v9027_v29 = vld [vmem:[%s11958_s3 + $0x88] sm:$0xff] }
 0x440   :  { %v2595_v12 = vpop.permute.xlu1 %2594  ;;  %12667 = vst [vmem:[#allocation229_spill] sm:$0xff] %v9027_v29  ;;  %v2810_v39 = vmul.f32 %v9027_v29, %v2607_v16  ;;  %v9047_v29 = vld [vmem:[%s11958_s3 + $0x90] sm:$0xff] }
 0x441   :  { %v2807_v23 = vmul.f32 %v9019_v40, %v2595_v12  ;;  %12670 = vst [vmem:[#allocation232_spill] sm:$0xff] %v9047_v29 }
 0x442   :  { %v2623_v34 = vpop.permute.xlu0 %2622 }
 0x443   :  { %2949 = vrot.lane.b32.xlu1 %v2807_v23, %s6661_s15  ;;  %2951 = vrot.lane.b32.xlu0 %v2808_v2, %s6661_s15  ;;  %v9041_v23 = vld [vmem:[%s11958_s3 + $0x98] sm:$0xff] }
 0x444   :  { %v2603_v48 = vpop.permute.xlu1 %2602  ;;  %12669 = vst [vmem:[#allocation231_spill] sm:$0xff] %v9041_v23  ;;  %v2812_v16 = vmul.f32 %v9041_v23, %v2615_v47  ;;  %v9061_v23 = vld [vmem:[%s11958_s3 + $0xa0] sm:$0xff] }
 0x445   :  { %v2809_v12 = vmul.f32 %v9033_v15, %v2603_v48  ;;  %12672 = vst [vmem:[#allocation234_spill] sm:$0xff] %v9061_v23 }
 0x446   :  { %v2631_v40 = vpop.permute.xlu0 %2630 }
 0x447   :  { %2953 = vrot.lane.b32.xlu1 %v2809_v12, %s6661_s15  ;;  %2955 = vrot.lane.b32.xlu0 %v2810_v39, %s6661_s15  ;;  %v9055_v12 = vld [vmem:[%s11958_s3 + $0xa8] sm:$0xff] }
 0x448   :  { %v2611_v2 = vpop.permute.xlu1 %2610  ;;  %12671 = vst [vmem:[#allocation233_spill] sm:$0xff] %v9055_v12  ;;  %v2814_v47 = vmul.f32 %v9055_v12, %v2623_v34  ;;  %v9075_v12 = vld [vmem:[%s11958_s3 + $0xb0] sm:$0xff] }
 0x449   :  { %v2811_v48 = vmul.f32 %v9047_v29, %v2611_v2  ;;  %12674 = vst [vmem:[#allocation236_spill] sm:$0xff] %v9075_v12 }
 0x44a   :  { %v2639_v15 = vpop.permute.xlu0 %2638 }
 0x44b   :  { %2957 = vrot.lane.b32.xlu1 %v2811_v48, %s6661_s15  ;;  %2959 = vrot.lane.b32.xlu0 %v2812_v16, %s6661_s15  ;;  %v9069_v48 = vld [vmem:[%s11958_s3 + $0xb8] sm:$0xff] }
 0x44c   :  { %v2619_v39 = vpop.permute.xlu1 %2618  ;;  %12673 = vst [vmem:[#allocation235_spill] sm:$0xff] %v9069_v48  ;;  %v2816_v34 = vmul.f32 %v9069_v48, %v2631_v40  ;;  %v9089_v48 = vld [vmem:[%s11958_s3 + $0xc0] sm:$0xff] }
 0x44d   :  { %v2813_v2 = vmul.f32 %v9061_v23, %v2619_v39  ;;  %12676 = vst [vmem:[#allocation238_spill] sm:$0xff] %v9089_v48 }
 0x44e   :  { %v2647_v29 = vpop.permute.xlu0 %2646 }
 0x44f   :  { %2961 = vrot.lane.b32.xlu1 %v2813_v2, %s6661_s15  ;;  %2963 = vrot.lane.b32.xlu0 %v2814_v47, %s6661_s15  ;;  %v9083_v2 = vld [vmem:[%s11958_s3 + $0xc8] sm:$0xff] }
 0x450   :  { %v2627_v16 = vpop.permute.xlu1 %2626  ;;  %12675 = vst [vmem:[#allocation237_spill] sm:$0xff] %v9083_v2  ;;  %v2818_v40 = vmul.f32 %v9083_v2, %v2639_v15  ;;  %v9103_v2 = vld [vmem:[%s11958_s3 + $0xd0] sm:$0xff] }
 0x451   :  { %v2815_v39 = vmul.f32 %v9075_v12, %v2627_v16  ;;  %12678 = vst [vmem:[#allocation240_spill] sm:$0xff] %v9103_v2 }
 0x452   :  { %v2655_v23 = vpop.permute.xlu0 %2654 }
 0x453   :  { %2965 = vrot.lane.b32.xlu1 %v2815_v39, %s6661_s15  ;;  %2967 = vrot.lane.b32.xlu0 %v2816_v34, %s6661_s15  ;;  %v9097_v39 = vld [vmem:[%s11958_s3 + $0xd8] sm:$0xff] }
 0x454   :  { %v2635_v47 = vpop.permute.xlu1 %2634  ;;  %12677 = vst [vmem:[#allocation239_spill] sm:$0xff] %v9097_v39  ;;  %v2820_v15 = vmul.f32 %v9097_v39, %v2647_v29  ;;  %v9117_v39 = vld [vmem:[%s11958_s3 + $0xe0] sm:$0xff] }
 0x455   :  { %v2817_v16 = vmul.f32 %v9089_v48, %v2635_v47  ;;  %12680 = vst [vmem:[#allocation242_spill] sm:$0xff] %v9117_v39 }
 0x456   :  { %v2663_v12 = vpop.permute.xlu0 %2662 }
 0x457   :  { %2969 = vrot.lane.b32.xlu1 %v2817_v16, %s6661_s15  ;;  %2971 = vrot.lane.b32.xlu0 %v2818_v40, %s6661_s15  ;;  %v9111_v16 = vld [vmem:[%s11958_s3 + $0xe8] sm:$0xff] }
 0x458   :  { %v2643_v34 = vpop.permute.xlu1 %2642  ;;  %12679 = vst [vmem:[#allocation241_spill] sm:$0xff] %v9111_v16  ;;  %v2822_v29 = vmul.f32 %v9111_v16, %v2655_v23  ;;  %v9131_v16 = vld [vmem:[%s11958_s3 + $0xf0] sm:$0xff] }
 0x459   :  { %v2819_v47 = vmul.f32 %v9103_v2, %v2643_v34  ;;  %12682 = vst [vmem:[#allocation244_spill] sm:$0xff] %v9131_v16 }
 0x45a   :  { %v2671_v48 = vpop.permute.xlu0 %2670 }
 0x45b   :  { %2973 = vrot.lane.b32.xlu1 %v2819_v47, %s6661_s15  ;;  %2975 = vrot.lane.b32.xlu0 %v2820_v15, %s6661_s15  ;;  %v9125_v47 = vld [vmem:[%s11958_s3 + $0xf8] sm:$0xff] }
 0x45c   :  { %v2651_v40 = vpop.permute.xlu1 %2650  ;;  %12681 = vst [vmem:[#allocation243_spill] sm:$0xff] %v9125_v47  ;;  %v2824_v23 = vmul.f32 %v9125_v47, %v2663_v12  ;;  %v9145_v47 = vld [vmem:[%s11958_s3 + $0x100] sm:$0xff] }
 0x45d   :  { %v2821_v34 = vmul.f32 %v9117_v39, %v2651_v40  ;;  %12684 = vst [vmem:[#allocation246_spill] sm:$0xff] %v9145_v47 }
 0x45e   :  { %v2679_v2 = vpop.permute.xlu0 %2678 }
 0x45f   :  { %2977 = vrot.lane.b32.xlu1 %v2821_v34, %s6661_s15  ;;  %2979 = vrot.lane.b32.xlu0 %v2822_v29, %s6661_s15  ;;  %v9139_v34 = vld [vmem:[%s11958_s3 + $0x108] sm:$0xff] }
 0x460   :  { %v2659_v15 = vpop.permute.xlu1 %2658  ;;  %12683 = vst [vmem:[#allocation245_spill] sm:$0xff] %v9139_v34  ;;  %v2826_v12 = vmul.f32 %v9139_v34, %v2671_v48  ;;  %v9159_v34 = vld [vmem:[%s11958_s3 + $0x110] sm:$0xff] }
 0x461   :  { %v2823_v40 = vmul.f32 %v9131_v16, %v2659_v15  ;;  %12686 = vst [vmem:[#allocation248_spill] sm:$0xff] %v9159_v34 }
 0x462   :  { %v2687_v39 = vpop.permute.xlu0 %2686 }
 0x463   :  { %2981 = vrot.lane.b32.xlu1 %v2823_v40, %s6661_s15  ;;  %2983 = vrot.lane.b32.xlu0 %v2824_v23, %s6661_s15  ;;  %v9153_v40 = vld [vmem:[%s11958_s3 + $0x118] sm:$0xff] }
 0x464   :  { %v2667_v29 = vpop.permute.xlu1 %2666  ;;  %12685 = vst [vmem:[#allocation247_spill] sm:$0xff] %v9153_v40  ;;  %v2828_v48 = vmul.f32 %v9153_v40, %v2679_v2  ;;  %v9173_v40 = vld [vmem:[%s11958_s3 + $0x120] sm:$0xff] }
 0x465   :  { %v2825_v15 = vmul.f32 %v9145_v47, %v2667_v29  ;;  %12688 = vst [vmem:[#allocation250_spill] sm:$0xff] %v9173_v40 }
 0x466   :  { %v2695_v16 = vpop.permute.xlu0 %2694 }
 0x467   :  { %2985 = vrot.lane.b32.xlu1 %v2825_v15, %s6661_s15  ;;  %2987 = vrot.lane.b32.xlu0 %v2826_v12, %s6661_s15  ;;  %v9167_v15 = vld [vmem:[%s11958_s3 + $0x128] sm:$0xff] }
 0x468   :  { %v2675_v23 = vpop.permute.xlu1 %2674  ;;  %12687 = vst [vmem:[#allocation249_spill] sm:$0xff] %v9167_v15  ;;  %v2830_v2 = vmul.f32 %v9167_v15, %v2687_v39  ;;  %v9187_v15 = vld [vmem:[%s11958_s3 + $0x130] sm:$0xff] }
 0x469   :  { %v2827_v29 = vmul.f32 %v9159_v34, %v2675_v23  ;;  %12690 = vst [vmem:[#allocation252_spill] sm:$0xff] %v9187_v15 }
 0x46a   :  { %v2703_v47 = vpop.permute.xlu0 %2702 }
 0x46b   :  { %2989 = vrot.lane.b32.xlu1 %v2827_v29, %s6661_s15  ;;  %2991 = vrot.lane.b32.xlu0 %v2828_v48, %s6661_s15  ;;  %v9181_v29 = vld [vmem:[%s11958_s3 + $0x138] sm:$0xff] }
 0x46c   :  { %v2683_v12 = vpop.permute.xlu1 %2682  ;;  %12689 = vst [vmem:[#allocation251_spill] sm:$0xff] %v9181_v29  ;;  %v2832_v39 = vmul.f32 %v9181_v29, %v2695_v16  ;;  %v9201_v29 = vld [vmem:[%s11958_s3 + $0x140] sm:$0xff] }
 0x46d   :  { %v2829_v23 = vmul.f32 %v9173_v40, %v2683_v12  ;;  %12692 = vst [vmem:[#allocation254_spill] sm:$0xff] %v9201_v29 }
 0x46e   :  { %v2711_v34 = vpop.permute.xlu0 %2710 }
 0x46f   :  { %2993 = vrot.lane.b32.xlu1 %v2829_v23, %s6661_s15  ;;  %2995 = vrot.lane.b32.xlu0 %v2830_v2, %s6661_s15  ;;  %v9195_v23 = vld [vmem:[%s11958_s3 + $0x148] sm:$0xff] }
 0x470   :  { %v2691_v48 = vpop.permute.xlu1 %2690  ;;  %12691 = vst [vmem:[#allocation253_spill] sm:$0xff] %v9195_v23  ;;  %v2834_v16 = vmul.f32 %v9195_v23, %v2703_v47  ;;  %v9215_v23 = vld [vmem:[%s11958_s3 + $0x150] sm:$0xff] }
 0x471   :  { %v2831_v12 = vmul.f32 %v9187_v15, %v2691_v48  ;;  %12694 = vst [vmem:[#allocation256_spill] sm:$0xff] %v9215_v23 }
 0x472   :  { %v2719_v40 = vpop.permute.xlu0 %2718 }
 0x473   :  { %2997 = vrot.lane.b32.xlu1 %v2831_v12, %s6661_s15  ;;  %2999 = vrot.lane.b32.xlu0 %v2832_v39, %s6661_s15  ;;  %v9209_v12 = vld [vmem:[%s11958_s3 + $0x158] sm:$0xff] }
 0x474   :  { %v2699_v2 = vpop.permute.xlu1 %2698  ;;  %12693 = vst [vmem:[#allocation255_spill] sm:$0xff] %v9209_v12  ;;  %v2836_v47 = vmul.f32 %v9209_v12, %v2711_v34  ;;  %v9229_v12 = vld [vmem:[%s11958_s3 + $0x160] sm:$0xff] }
 0x475   :  { %v2833_v48 = vmul.f32 %v9201_v29, %v2699_v2  ;;  %12696 = vst [vmem:[#allocation258_spill] sm:$0xff] %v9229_v12 }
 0x476   :  { %v2727_v15 = vpop.permute.xlu0 %2726 }
 0x477   :  { %3001 = vrot.lane.b32.xlu1 %v2833_v48, %s6661_s15  ;;  %3003 = vrot.lane.b32.xlu0 %v2834_v16, %s6661_s15  ;;  %v9223_v48 = vld [vmem:[%s11958_s3 + $0x168] sm:$0xff] }
 0x478   :  { %v2707_v39 = vpop.permute.xlu1 %2706  ;;  %12695 = vst [vmem:[#allocation257_spill] sm:$0xff] %v9223_v48  ;;  %v2838_v34 = vmul.f32 %v9223_v48, %v2719_v40  ;;  %v9243_v48 = vld [vmem:[%s11958_s3 + $0x170] sm:$0xff] }
 0x479   :  { %v2835_v2 = vmul.f32 %v9215_v23, %v2707_v39  ;;  %12698 = vst [vmem:[#allocation260_spill] sm:$0xff] %v9243_v48 }
 0x47a   :  { %v2735_v29 = vpop.permute.xlu0 %2734 }
 0x47b   :  { %3005 = vrot.lane.b32.xlu1 %v2835_v2, %s6661_s15  ;;  %3007 = vrot.lane.b32.xlu0 %v2836_v47, %s6661_s15  ;;  %v9237_v2 = vld [vmem:[%s11958_s3 + $0x178] sm:$0xff] }
 0x47c   :  { %v2715_v16 = vpop.permute.xlu1 %2714  ;;  %12697 = vst [vmem:[#allocation259_spill] sm:$0xff] %v9237_v2  ;;  %v2840_v40 = vmul.f32 %v9237_v2, %v2727_v15  ;;  %v9257_v2 = vld [vmem:[%s11958_s3 + $0x180] sm:$0xff] }
 0x47d   :  { %v2837_v39 = vmul.f32 %v9229_v12, %v2715_v16  ;;  %12700 = vst [vmem:[#allocation262_spill] sm:$0xff] %v9257_v2 }
 0x47e   :  { %v2743_v23 = vpop.permute.xlu0 %2742 }
 0x47f   :  { %3009 = vrot.lane.b32.xlu1 %v2837_v39, %s6661_s15  ;;  %3011 = vrot.lane.b32.xlu0 %v2838_v34, %s6661_s15  ;;  %v9251_v39 = vld [vmem:[%s11958_s3 + $0x188] sm:$0xff] }
 0x480   :  { %v2723_v47 = vpop.permute.xlu1 %2722  ;;  %12699 = vst [vmem:[#allocation261_spill] sm:$0xff] %v9251_v39  ;;  %v2842_v15 = vmul.f32 %v9251_v39, %v2735_v29  ;;  %v9271_v39 = vld [vmem:[%s11958_s3 + $0x190] sm:$0xff] }
 0x481   :  { %v2839_v16 = vmul.f32 %v9243_v48, %v2723_v47  ;;  %12702 = vst [vmem:[#allocation264_spill] sm:$0xff] %v9271_v39 }
 0x482   :  { %v2751_v12 = vpop.permute.xlu0 %2750 }
 0x483   :  { %3013 = vrot.lane.b32.xlu1 %v2839_v16, %s6661_s15  ;;  %3015 = vrot.lane.b32.xlu0 %v2840_v40, %s6661_s15  ;;  %v9265_v16 = vld [vmem:[%s11958_s3 + $0x198] sm:$0xff] }
 0x484   :  { %v2731_v34 = vpop.permute.xlu1 %2730  ;;  %12701 = vst [vmem:[#allocation263_spill] sm:$0xff] %v9265_v16  ;;  %v2844_v29 = vmul.f32 %v9265_v16, %v2743_v23  ;;  %v9285_v16 = vld [vmem:[%s11958_s3 + $0x1a0] sm:$0xff] }
 0x485   :  { %v2841_v47 = vmul.f32 %v9257_v2, %v2731_v34  ;;  %12704 = vst [vmem:[#allocation266_spill] sm:$0xff] %v9285_v16 }
 0x486   :  { %v2759_v48 = vpop.permute.xlu0 %2758 }
 0x487   :  { %3017 = vrot.lane.b32.xlu1 %v2841_v47, %s6661_s15  ;;  %3019 = vrot.lane.b32.xlu0 %v2842_v15, %s6661_s15  ;;  %v9279_v47 = vld [vmem:[%s11958_s3 + $0x1a8] sm:$0xff] }
 0x488   :  { %v2739_v40 = vpop.permute.xlu1 %2738  ;;  %12703 = vst [vmem:[#allocation265_spill] sm:$0xff] %v9279_v47  ;;  %v2846_v23 = vmul.f32 %v9279_v47, %v2751_v12  ;;  %v9299_v47 = vld [vmem:[%s11958_s3 + $0x1b0] sm:$0xff] }
 0x489   :  { %v2843_v34 = vmul.f32 %v9271_v39, %v2739_v40  ;;  %12706 = vst [vmem:[#allocation268_spill] sm:$0xff] %v9299_v47 }
 0x48a   :  { %v2767_v2 = vpop.permute.xlu0 %2766 }
 0x48b   :  { %3021 = vrot.lane.b32.xlu1 %v2843_v34, %s6661_s15  ;;  %3023 = vrot.lane.b32.xlu0 %v2844_v29, %s6661_s15  ;;  %v9293_v34 = vld [vmem:[%s11958_s3 + $0x1b8] sm:$0xff] }
 0x48c   :  { %v2747_v15 = vpop.permute.xlu1 %2746  ;;  %12705 = vst [vmem:[#allocation267_spill] sm:$0xff] %v9293_v34  ;;  %v2848_v12 = vmul.f32 %v9293_v34, %v2759_v48  ;;  %v9313_v34 = vld [vmem:[%s11958_s3 + $0x1c0] sm:$0xff] }
 0x48d   :  { %v2845_v40 = vmul.f32 %v9285_v16, %v2747_v15  ;;  %12708 = vst [vmem:[#allocation270_spill] sm:$0xff] %v9313_v34 }
 0x48e   :  { %v2775_v39 = vpop.permute.xlu0 %2774 }
 0x48f   :  { %3025 = vrot.lane.b32.xlu1 %v2845_v40, %s6661_s15  ;;  %3027 = vrot.lane.b32.xlu0 %v2846_v23, %s6661_s15  ;;  %v9307_v40 = vld [vmem:[%s11958_s3 + $0x1c8] sm:$0xff] }
 0x490   :  { %v2755_v29 = vpop.permute.xlu1 %2754  ;;  %12707 = vst [vmem:[#allocation269_spill] sm:$0xff] %v9307_v40  ;;  %v2850_v48 = vmul.f32 %v9307_v40, %v2767_v2  ;;  %v9327_v40 = vld [vmem:[%s11958_s3 + $0x1d0] sm:$0xff] }
 0x491   :  { %v2847_v15 = vmul.f32 %v9299_v47, %v2755_v29 }
 0x492   :  { %v2783_v16 = vpop.permute.xlu0 %2782 }
 0x493   :  { %3029 = vrot.lane.b32.xlu1 %v2847_v15, %s6661_s15  ;;  %3031 = vrot.lane.b32.xlu0 %v2848_v12, %s6661_s15  ;;  %v9321_v15 = vld [vmem:[%s11958_s3 + $0x1d8] sm:$0xff] }
 0x494   :  { %v2763_v23 = vpop.permute.xlu1 %2762  ;;  %12709 = vst [vmem:[#allocation271_spill] sm:$0xff] %v9321_v15  ;;  %v2852_v2 = vmul.f32 %v9321_v15, %v2775_v39  ;;  %v9343_v15 = vld [vmem:[%s11958_s3 + $0x1e0] sm:$0xff] }
 0x495   :  { %v2849_v29 = vmul.f32 %v9313_v34, %v2763_v23 }
 0x496   :  { %v2791_v47 = vpop.permute.xlu0 %2790 }
 0x497   :  { %3033 = vrot.lane.b32.xlu1 %v2849_v29, %s6661_s15  ;;  %3035 = vrot.lane.b32.xlu0 %v2850_v48, %s6661_s15  ;;  %v9337_v29 = vld [vmem:[%s11958_s3 + $0x1e8] sm:$0xff] }
 0x498   :  { %v2771_v12 = vpop.permute.xlu1 %2770  ;;  %12711 = vst [vmem:[#allocation273_spill] sm:$0xff] %v9337_v29  ;;  %v2854_v39 = vmul.f32 %v9337_v29, %v2783_v16  ;;  %v9359_v29 = vld [vmem:[%s11958_s3 + $0x1f0] sm:$0xff] }
 0x499   :  { %v2851_v23 = vmul.f32 %v9327_v40, %v2771_v12 }
 0x49a   :  { %v9330_v34 = vpop.permute.xlu0 %2923 }
 0x49b   :  { %12710 = vst [vmem:[#allocation272_spill] sm:$0xff] %v9330_v34  ;;  %3037 = vrot.lane.b32.xlu1 %v2851_v23, %s6661_s15  ;;  %3039 = vrot.lane.b32.xlu0 %v2852_v2, %s6661_s15  ;;  %v9353_v23 = vld [vmem:[%s11958_s3 + $0x1f8] sm:$0xff] }
 0x49c   :  { %v2779_v48 = vpop.permute.xlu1 %2778  ;;  %12713 = vst [vmem:[#allocation275_spill] sm:$0xff] %v9353_v23  ;;  %v2856_v16 = vmul.f32 %v9353_v23, %v2791_v47 }
 0x49d   :  { %v2853_v12 = vmul.f32 %v9343_v15, %v2779_v48 }
 0x49e   :  { %v9346_v34 = vpop.permute.xlu0 %2927 }
 0x49f   :  { %12712 = vst [vmem:[#allocation274_spill] sm:$0xff] %v9346_v34  ;;  %3041 = vrot.lane.b32.xlu1 %v2853_v12, %s6661_s15  ;;  %3043 = vrot.lane.b32.xlu0 %v2854_v39, %s6661_s15 }
 0x4a0   :  { %v2787_v2 = vpop.permute.xlu1 %2786 }
 0x4a1   :  { %v2855_v48 = vmul.f32 %v9359_v29, %v2787_v2 }
 0x4a2   :  { %v9362_v34 = vpop.permute.xlu0 %2931 }
 0x4a3   :  { %12714 = vst [vmem:[#allocation276_spill] sm:$0xff] %v9362_v34  ;;  %3045 = vrot.lane.b32.xlu1 %v2855_v48, %s6661_s15  ;;  %3047 = vrot.lane.b32.xlu0 %v2856_v16, %s6661_s15  ;;  %s6664_s15 = smov 88  }
 0x4a4   :  { %v9366_v39 = vpop.permute.xlu1 %2921 }
 0x4a5   :  { %12715 = vst [vmem:[#allocation277_spill] sm:$0xff] %v9366_v39 }
 0x4a6   :  { %v9368_v12 = vpop.permute.xlu0 %2935 }
 0x4a7   :  { %12716 = vst [vmem:[#allocation278_spill] sm:$0xff] %v9368_v12  ;;  %3178 = vperm.xlu1 %6426, %v12533_v21   ;;  %3182 = vperm.xlu0 %6427, %v12541_v26  }
 0x4a8   :  { %v9372_v47 = vpop.permute.xlu1 %2925 }
 0x4a9   :  { %12717 = vst [vmem:[#allocation279_spill] sm:$0xff] %v9372_v47 }
 0x4aa   :  { %v9374_v23 = vpop.permute.xlu0 %2939 }
 0x4ab   :  { %12718 = vst [vmem:[#allocation280_spill] sm:$0xff] %v9374_v23  ;;  %3186 = vperm.xlu1 %6426, %v12545_v32   ;;  %3194 = vperm.xlu0 %6427, %v12549_v57  }
 0x4ac   :  { %v9378_v2 = vpop.permute.xlu1 %2929 }
 0x4ad   :  { %12719 = vst [vmem:[#allocation281_spill] sm:$0xff] %v9378_v2 }
 0x4ae   :  { %v9380_v48 = vpop.permute.xlu0 %2943 }
 0x4af   :  { %12720 = vst [vmem:[#allocation282_spill] sm:$0xff] %v9380_v48  ;;  %3190 = vperm.xlu1 %6426, %v12536_v51   ;;  %3202 = vperm.xlu0 %6427, %v12553_v55  }
 0x4b0   :  { %v9384_v16 = vpop.permute.xlu1 %2933 }
 0x4b1   :  { %12721 = vst [vmem:[#allocation283_spill] sm:$0xff] %v9384_v16 }
 0x4b2   :  { %v9386_v12 = vpop.permute.xlu0 %2947 }
 0x4b3   :  { %12722 = vst [vmem:[#allocation284_spill] sm:$0xff] %v9386_v12  ;;  %3198 = vperm.xlu1 %6426, %v12539_v18   ;;  %3210 = vperm.xlu0 %6427, %v12557_v8  }
 0x4b4   :  { %v9390_v23 = vpop.permute.xlu1 %2937 }
 0x4b5   :  { %12723 = vst [vmem:[#allocation285_spill] sm:$0xff] %v9390_v23 }
 0x4b6   :  { %v9392_v34 = vpop.permute.xlu0 %2951 }
 0x4b7   :  { %12724 = vst [vmem:[#allocation286_spill] sm:$0xff] %v9392_v34  ;;  %3206 = vperm.xlu1 %6426, %v12543_v13   ;;  %3218 = vperm.xlu0 %6427, %v12561_v22  }
 0x4b8   :  { %v9396_v48 = vpop.permute.xlu1 %2941 }
 0x4b9   :  { %12725 = vst [vmem:[#allocation287_spill] sm:$0xff] %v9396_v48 }
 0x4ba   :  { %v9398_v2 = vpop.permute.xlu0 %2955 }
 0x4bb   :  { %12726 = vst [vmem:[#allocation288_spill] sm:$0xff] %v9398_v2  ;;  %3214 = vperm.xlu1 %6426, %v12547_v5   ;;  %3226 = vperm.xlu0 %6427, %v12565_v11   ;;  %v12771_v2 = vld [vmem:[#allocation23_spill] sm:$0xff] }
 0x4bc   :  { %v9402_v12 = vpop.permute.xlu1 %2945 }
 0x4bd   :  { %12727 = vst [vmem:[#allocation289_spill] sm:$0xff] %v9402_v12 }
 0x4be   :  { %v9404_v16 = vpop.permute.xlu0 %2959 }
 0x4bf   :  { %12728 = vst [vmem:[#allocation290_spill] sm:$0xff] %v9404_v16  ;;  %3222 = vperm.xlu1 %6426, %v12551_v50   ;;  %3234 = vperm.xlu0 %6427, %v12569_v9  }
 0x4c0   :  { %v9408_v34 = vpop.permute.xlu1 %2949 }
 0x4c1   :  { %12729 = vst [vmem:[#allocation291_spill] sm:$0xff] %v9408_v34 }
 0x4c2   :  { %v9410_v23 = vpop.permute.xlu0 %2963 }
 0x4c3   :  { %12730 = vst [vmem:[#allocation292_spill] sm:$0xff] %v9410_v23  ;;  %3230 = vperm.xlu1 %6426, %v12555_v20   ;;  %3242 = vperm.xlu0 %6427, %v12573_v59  }
 0x4c4   :  { %v9414_v48 = vpop.permute.xlu1 %2953 }
 0x4c5   :  { %12731 = vst [vmem:[#allocation293_spill] sm:$0xff] %v9414_v48  ;;  %v12768_v48 = vld [vmem:[#allocation34_spill] sm:$0xff] }
 0x4c6   :  { %v9416_v47 = vpop.permute.xlu0 %2967 }
 0x4c7   :  { %12732 = vst [vmem:[#allocation294_spill] sm:$0xff] %v9416_v47  ;;  %3238 = vperm.xlu1 %6426, %v12559_v44   ;;  %3250 = vperm.xlu0 %6427, %v12577_v14  }
 0x4c8   :  { %v9420_v12 = vpop.permute.xlu1 %2957 }
 0x4c9   :  { %12733 = vst [vmem:[#allocation295_spill] sm:$0xff] %v9420_v12 }
 0x4ca   :  { %v9422_v16 = vpop.permute.xlu0 %2971 }
 0x4cb   :  { %12734 = vst [vmem:[#allocation296_spill] sm:$0xff] %v9422_v16  ;;  %3246 = vperm.xlu1 %6426, %v12563_v56   ;;  %3258 = vperm.xlu0 %6427, %v12581_v54  }
 0x4cc   :  { %v9426_v34 = vpop.permute.xlu1 %2961 }
 0x4cd   :  { %12735 = vst [vmem:[#allocation297_spill] sm:$0xff] %v9426_v34 }
 0x4ce   :  { %v9428_v23 = vpop.permute.xlu0 %2975 }
 0x4cf   :  { %12736 = vst [vmem:[#allocation298_spill] sm:$0xff] %v9428_v23  ;;  %3254 = vperm.xlu1 %6426, %v12567_v53   ;;  %3266 = vperm.xlu0 %6427, %v12585_v46  }
 0x4d0   :  { %v9432_v47 = vpop.permute.xlu1 %2965 }
 0x4d1   :  { %12737 = vst [vmem:[#allocation299_spill] sm:$0xff] %v9432_v47 }
 0x4d2   :  { %v9434_v39 = vpop.permute.xlu0 %2979 }
 0x4d3   :  { %12738 = vst [vmem:[#allocation300_spill] sm:$0xff] %v9434_v39  ;;  %3262 = vperm.xlu1 %6426, %v12571_v31   ;;  %3274 = vperm.xlu0 %6427, %v12588_v27  }
 0x4d4   :  { %v9438_v16 = vpop.permute.xlu1 %2969 }
 0x4d5   :  { %12739 = vst [vmem:[#allocation301_spill] sm:$0xff] %v9438_v16 }
 0x4d6   :  { %v9440_v12 = vpop.permute.xlu0 %2983 }
 0x4d7   :  { %12740 = vst [vmem:[#allocation302_spill] sm:$0xff] %v9440_v12  ;;  %3270 = vperm.xlu1 %6426, %v12575_v37   ;;  %3282 = vperm.xlu0 %6427, %v12591_v43  }
 0x4d8   :  { %v9444_v23 = vpop.permute.xlu1 %2973 }
 0x4d9   :  { %12741 = vst [vmem:[#allocation303_spill] sm:$0xff] %v9444_v23 }
 0x4da   :  { %v9446_v34 = vpop.permute.xlu0 %2987 }
 0x4db   :  { %12742 = vst [vmem:[#allocation304_spill] sm:$0xff] %v9446_v34  ;;  %3278 = vperm.xlu1 %6426, %v12579_v17   ;;  %3290 = vperm.xlu0 %6427, %v7642_v58  }
 0x4dc   :  { %v9450_v39 = vpop.permute.xlu1 %2977 }
 0x4dd   :  { %12743 = vst [vmem:[#allocation305_spill] sm:$0xff] %v9450_v39 }
 0x4de   :  { %v9452_v47 = vpop.permute.xlu0 %2991 }
 0x4df   :  { %12744 = vst [vmem:[#allocation306_spill] sm:$0xff] %v9452_v47  ;;  %3286 = vperm.xlu1 %6426, %v12583_v45   ;;  %3298 = vperm.xlu0 %6427, %v7666_v30  }
 0x4e0   :  { %v9456_v12 = vpop.permute.xlu1 %2981 }
 0x4e1   :  { %12745 = vst [vmem:[#allocation307_spill] sm:$0xff] %v9456_v12 }
 0x4e2   :  { %v9458_v16 = vpop.permute.xlu0 %2995 }
 0x4e3   :  { %12746 = vst [vmem:[#allocation308_spill] sm:$0xff] %v9458_v16  ;;  %3294 = vperm.xlu1 %6426, %v7628_v36   ;;  %3306 = vperm.xlu0 %6427, %v7690_v60  }
 0x4e4   :  { %v9462_v34 = vpop.permute.xlu1 %2985 }
 0x4e5   :  { %12747 = vst [vmem:[#allocation309_spill] sm:$0xff] %v9462_v34 }
 0x4e6   :  { %v9464_v23 = vpop.permute.xlu0 %2999 }
 0x4e7   :  { %12748 = vst [vmem:[#allocation310_spill] sm:$0xff] %v9464_v23  ;;  %3302 = vperm.xlu1 %6426, %v7654_v19   ;;  %3314 = vperm.xlu0 %6427, %v12601_v0  }
 0x4e8   :  { %v9468_v47 = vpop.permute.xlu1 %2989 }
 0x4e9   :  { %12749 = vst [vmem:[#allocation311_spill] sm:$0xff] %v9468_v47 }
 0x4ea   :  { %v9470_v39 = vpop.permute.xlu0 %3003 }
 0x4eb   :  { %12750 = vst [vmem:[#allocation312_spill] sm:$0xff] %v9470_v39  ;;  %3310 = vperm.xlu1 %6426, %v7678_v33   ;;  %3322 = vperm.xlu0 %6427, %v12605_v24  }
 0x4ec   :  { %v9474_v16 = vpop.permute.xlu1 %2993 }
 0x4ed   :  { %12751 = vst [vmem:[#allocation313_spill] sm:$0xff] %v9474_v16 }
 0x4ee   :  { %v9476_v12 = vpop.permute.xlu0 %3007 }
 0x4ef   :  { %12752 = vst [vmem:[#allocation314_spill] sm:$0xff] %v9476_v12  ;;  %3318 = vperm.xlu1 %6426, %v7702_v63   ;;  %3330 = vperm.xlu0 %6427, %v12609_v7  }
 0x4f0   :  { %v9480_v23 = vpop.permute.xlu1 %2997 }
 0x4f1   :  { %12753 = vst [vmem:[#allocation315_spill] sm:$0xff] %v9480_v23 }
 0x4f2   :  { %v9482_v34 = vpop.permute.xlu0 %3011 }
 0x4f3   :  { %12754 = vst [vmem:[#allocation316_spill] sm:$0xff] %v9482_v34  ;;  %3326 = vperm.xlu1 %6426, %v12411_v28   ;;  %3338 = vperm.xlu0 %6427, %v12613_v1  }
 0x4f4   :  { %v9486_v39 = vpop.permute.xlu1 %3001 }
 0x4f5   :  { %12755 = vst [vmem:[#allocation317_spill] sm:$0xff] %v9486_v39 }
 0x4f6   :  { %v9488_v47 = vpop.permute.xlu0 %3015 }
 0x4f7   :  { %12756 = vst [vmem:[#allocation318_spill] sm:$0xff] %v9488_v47  ;;  %3334 = vperm.xlu1 %6426, %v12599_v42   ;;  %3346 = vperm.xlu0 %6427, %v12617_v6  }
 0x4f8   :  { %v9492_v12 = vpop.permute.xlu1 %3005 }
 0x4f9   :  { %12757 = vst [vmem:[#allocation319_spill] sm:$0xff] %v9492_v12 }
 0x4fa   :  { %v9494_v16 = vpop.permute.xlu0 %3019 }
 0x4fb   :  { %12758 = vst [vmem:[#allocation320_spill] sm:$0xff] %v9494_v16  ;;  %3342 = vperm.xlu1 %6426, %v12603_v41   ;;  %3354 = vperm.xlu0 %6427, %v12621_v49   ;;  %v12767_v16 = vld [vmem:[#allocation19_spill] sm:$0xff] }
 0x4fc   :  { %v9498_v34 = vpop.permute.xlu1 %3009 }
 0x4fd   :  { %12759 = vst [vmem:[#allocation321_spill] sm:$0xff] %v9498_v34 }
 0x4fe   :  { %v9500_v23 = vpop.permute.xlu0 %3023 }
 0x4ff   :  { %12760 = vst [vmem:[#allocation322_spill] sm:$0xff] %v9500_v23  ;;  %3350 = vperm.xlu1 %6426, %v12607_v3   ;;  %3362 = vperm.xlu0 %6427, %v12625_v25  }
 0x500   :  { %v9504_v47 = vpop.permute.xlu1 %3013 }
 0x501   :  { %12761 = vst [vmem:[#allocation323_spill] sm:$0xff] %v9504_v47 }
 0x502   :  { %v9508_v12 = vpop.permute.xlu0 %3027 }
 0x503   :  { %3358 = vperm.xlu1 %6426, %v12611_v4   ;;  %3370 = vperm.xlu0 %6427, %v12629_v38   ;;  %12762 = vst [vmem:[#allocation324_spill] sm:$0xff] %v9508_v12  ;;  %v12786_v38 = vld [vmem:[#allocation213_spill] sm:$0xff] }
 0x504   :  { %v9510_v39 = vpop.permute.xlu1 %3017 }
 0x505   :  { %12763 = vst [vmem:[#allocation325_spill] sm:$0xff] %v9510_v39 }
 0x506   :  { %v9516_v23 = vpop.permute.xlu0 %3031 }
 0x507   :  { %3366 = vperm.xlu1 %6426, %v12615_v10   ;;  %3378 = vperm.xlu0 %6427, %v12633_v62   ;;  %12765 = vst [vmem:[#allocation327_spill] sm:$0xff] %v9516_v23  ;;  %v12774_v62 = vld [vmem:[#allocation29_spill] sm:$0xff] }
 0x508   :  { %v9514_v34 = vpop.permute.xlu1 %3021 }
 0x509   :  { %12764 = vst [vmem:[#allocation326_spill] sm:$0xff] %v9514_v34 }
 0x50a   :  { %v9524_v12 = vpop.permute.xlu0 %3035 }
 0x50b   :  { %3374 = vperm.xlu1 %6426, %v12619_v52   ;;  %3386 = vperm.xlu0 %6427, %v12637_v35   ;;  %12769 = vst [vmem:[#allocation329_spill] sm:$0xff] %v9524_v12  ;;  %v12775_v35 = vld [vmem:[#allocation55_spill] sm:$0xff]  ;;  %v12787_v52 = vld [vmem:[#allocation69_spill] sm:$0xff] }
 0x50c   :  { %v9520_v47 = vpop.permute.xlu1 %3025 }
 0x50d   :  { %12766 = vst [vmem:[#allocation328_spill] sm:$0xff] %v9520_v47 }
 0x50e   :  { %v9532_v23 = vpop.permute.xlu0 %3039 }
 0x50f   :  { %3382 = vperm.xlu1 %6426, %v12767_v16   ;;  %3394 = vperm.xlu0 %6427, %v12768_v48   ;;  %12773 = vst [vmem:[#allocation332_spill] sm:$0xff] %v9532_v23  ;;  %v12777_v16 = vld [vmem:[#allocation40_spill] sm:$0xff]  ;;  %v12778_v48 = vld [vmem:[#allocation65_spill] sm:$0xff] }
 0x510   :  { %v9526_v39 = vpop.permute.xlu1 %3029 }
 0x511   :  { %12770 = vst [vmem:[#allocation330_spill] sm:$0xff] %v9526_v39 }
 0x512   :  { %v9540_v12 = vpop.permute.xlu0 %3043 }
 0x513   :  { %3390 = vperm.xlu1 %6426, %v12771_v2   ;;  %3402 = vperm.xlu0 %6427, %v12643_v61   ;;  %12779 = vst [vmem:[#allocation334_spill] sm:$0xff] %v9540_v12  ;;  %v12781_v2 = vld [vmem:[#allocation49_spill] sm:$0xff]  ;;  %v12782_v61 = vld [vmem:[#allocation75_spill] sm:$0xff]  ;;  %v12788_v12 = vld [vmem:[#allocation214_spill] sm:$0xff] }
 0x514   :  { %v9530_v34 = vpop.permute.xlu1 %3033 }
 0x515   :  { %12772 = vst [vmem:[#allocation331_spill] sm:$0xff] %v9530_v34 }
 0x516   :  { %v9546_v34 = vpop.permute.xlu0 %3047 }
 0x517   :  { %3398 = vperm.xlu1 %6426, %v12774_v62   ;;  %3410 = vperm.xlu0 %6427, %v12775_v35   ;;  %12783 = vst [vmem:[#allocation336_spill] sm:$0xff] %v9546_v34  ;;  %v12785_v62 = vld [vmem:[#allocation59_spill] sm:$0xff]  ;;  %v12789_v34 = vld [vmem:[#allocation216_spill] sm:$0xff] }
 0x518   :  { %v9536_v47 = vpop.permute.xlu1 %3037 }
 0x519   :  { %12776 = vst [vmem:[#allocation333_spill] sm:$0xff] %v9536_v47 }
 0x51b   :  { %3406 = vperm.xlu1 %6426, %v12777_v16   ;;  %3418 = vperm.xlu0 %6427, %v12778_v48   ;;  %v6663_v48 = vmov 5  }
 0x51c   :  { %v9542_v39 = vpop.permute.xlu1 %3041 }
 0x51d   :  { %12780 = vst [vmem:[#allocation335_spill] sm:$0xff] %v9542_v39 }
 0x51f   :  { %3414 = vperm.xlu1 %6426, %v12781_v2   ;;  %3426 = vperm.xlu0 %6427, %v12782_v61  }
 0x520   :  { %v9548_v23 = vpop.permute.xlu1 %3045 }
 0x521   :  { %12784 = vst [vmem:[#allocation337_spill] sm:$0xff] %v9548_v23 }
 0x523   :  { %3422 = vperm.xlu1 %6426, %v12785_v62   ;;  %6428 = vset.pattern.permute.xlu0 %v6663_v48  ;;  %v12791_v62 = vld [vmem:[#allocation215_spill] sm:$0xff] }
 0x526   :  { %v3179_v35 = vpop.permute.xlu1 %3178  ;;  %v3183_v47 = vpop.permute.xlu0 %3182 }
 0x527   :  { %v3433_v16 = vmul.f32 %v12786_v38, %v3179_v35  ;;  %3430 = vperm.xlu1 %6426, %v12787_v52   ;;  %v3434_v39 = vmul.f32 %v12788_v12, %v3183_v47  ;;  %v12790_v35 = vld [vmem:[#allocation218_spill] sm:$0xff] }
 0x529   :  { %3561 = vrot.lane.b32.xlu0 %v3433_v16, %s6664_s15  ;;  %v12792_v16 = vld [vmem:[#allocation220_spill] sm:$0xff] }
 0x52a   :  { %v3187_v61 = vpop.permute.xlu1 %3186  ;;  %v3195_v2 = vpop.permute.xlu0 %3194 }
 0x52b   :  { %v3435_v25 = vmul.f32 %v12789_v34, %v3187_v61  ;;  %3563 = vrot.lane.b32.xlu1 %v3434_v39, %s6664_s15  ;;  %v3437_v52 = vmul.f32 %v12790_v35, %v3195_v2  ;;  %v12793_v61 = vld [vmem:[#allocation217_spill] sm:$0xff]  ;;  %v12795_v35 = vld [vmem:[#allocation219_spill] sm:$0xff] }
 0x52c   :  { %6429 = vset.pattern.permute.xlu1 %v6663_v48  ;;  %v12794_v48 = vld [vmem:[#allocation222_spill] sm:$0xff] }
 0x52d   :  { %3565 = vrot.lane.b32.xlu0 %v3435_v25, %s6664_s15 }
 0x52e   :  { %v3191_v23 = vpop.permute.xlu1 %3190  ;;  %v3203_v38 = vpop.permute.xlu0 %3202 }
 0x52f   :  { %v3436_v10 = vmul.f32 %v12791_v62, %v3191_v23  ;;  %v3439_v49 = vmul.f32 %v12792_v16, %v3203_v38  ;;  %v12796_v23 = vld [vmem:[#allocation224_spill] sm:$0xff]  ;;  %v12797_v16 = vld [vmem:[#allocation221_spill] sm:$0xff] }
 0x531   :  { %3567 = vrot.lane.b32.xlu1 %v3436_v10, %s6664_s15  ;;  %3569 = vrot.lane.b32.xlu0 %v3437_v52, %s6664_s15 }
 0x532   :  { %v3199_v12 = vpop.permute.xlu1 %3198  ;;  %v3211_v47 = vpop.permute.xlu0 %3210 }
 0x533   :  { %v3438_v34 = vmul.f32 %v12793_v61, %v3199_v12  ;;  %v3441_v2 = vmul.f32 %v12794_v48, %v3211_v47  ;;  %v12799_v48 = vld [vmem:[#allocation223_spill] sm:$0xff] }
 0x535   :  { %3571 = vrot.lane.b32.xlu1 %v3438_v34, %s6664_s15  ;;  %3573 = vrot.lane.b32.xlu0 %v3439_v49, %s6664_s15  ;;  %v12798_v34 = vld [vmem:[#allocation226_spill] sm:$0xff] }
 0x536   :  { %v3207_v25 = vpop.permute.xlu1 %3206  ;;  %v3219_v39 = vpop.permute.xlu0 %3218 }
 0x537   :  { %v3440_v62 = vmul.f32 %v12795_v35, %v3207_v25  ;;  %v3443_v38 = vmul.f32 %v12796_v23, %v3219_v39  ;;  %v12801_v23 = vld [vmem:[#allocation225_spill] sm:$0xff] }
 0x539   :  { %3575 = vrot.lane.b32.xlu1 %v3440_v62, %s6664_s15  ;;  %3577 = vrot.lane.b32.xlu0 %v3441_v2, %s6664_s15  ;;  %v12800_v62 = vld [vmem:[#allocation228_spill] sm:$0xff] }
 0x53a   :  { %v3215_v52 = vpop.permute.xlu1 %3214  ;;  %v3227_v10 = vpop.permute.xlu0 %3226 }
 0x53b   :  { %v3442_v12 = vmul.f32 %v12797_v16, %v3215_v52  ;;  %v3445_v47 = vmul.f32 %v12798_v34, %v3227_v10  ;;  %v12803_v34 = vld [vmem:[#allocation227_spill] sm:$0xff] }
 0x53d   :  { %3579 = vrot.lane.b32.xlu1 %v3442_v12, %s6664_s15  ;;  %3581 = vrot.lane.b32.xlu0 %v3443_v38, %s6664_s15  ;;  %v12802_v12 = vld [vmem:[#allocation230_spill] sm:$0xff] }
 0x53e   :  { %v3223_v49 = vpop.permute.xlu1 %3222  ;;  %v3235_v61 = vpop.permute.xlu0 %3234 }
 0x53f   :  { %v3444_v25 = vmul.f32 %v12799_v48, %v3223_v49  ;;  %v3447_v39 = vmul.f32 %v12800_v62, %v3235_v61  ;;  %v12805_v62 = vld [vmem:[#allocation229_spill] sm:$0xff] }
 0x541   :  { %3583 = vrot.lane.b32.xlu1 %v3444_v25, %s6664_s15  ;;  %3585 = vrot.lane.b32.xlu0 %v3445_v47, %s6664_s15  ;;  %v12804_v25 = vld [vmem:[#allocation232_spill] sm:$0xff] }
 0x542   :  { %v3231_v2 = vpop.permute.xlu1 %3230  ;;  %v3243_v35 = vpop.permute.xlu0 %3242 }
 0x543   :  { %v3446_v52 = vmul.f32 %v12801_v23, %v3231_v2  ;;  %v3449_v10 = vmul.f32 %v12802_v12, %v3243_v35  ;;  %v12807_v12 = vld [vmem:[#allocation231_spill] sm:$0xff] }
 0x545   :  { %3587 = vrot.lane.b32.xlu1 %v3446_v52, %s6664_s15  ;;  %3589 = vrot.lane.b32.xlu0 %v3447_v39, %s6664_s15  ;;  %v12806_v52 = vld [vmem:[#allocation234_spill] sm:$0xff] }
 0x546   :  { %v3239_v38 = vpop.permute.xlu1 %3238  ;;  %v3251_v16 = vpop.permute.xlu0 %3250 }
 0x547   :  { %v3448_v49 = vmul.f32 %v12803_v34, %v3239_v38  ;;  %v3451_v61 = vmul.f32 %v12804_v25, %v3251_v16  ;;  %v12809_v25 = vld [vmem:[#allocation233_spill] sm:$0xff] }
 0x549   :  { %3591 = vrot.lane.b32.xlu1 %v3448_v49, %s6664_s15  ;;  %3593 = vrot.lane.b32.xlu0 %v3449_v10, %s6664_s15  ;;  %v12808_v49 = vld [vmem:[#allocation236_spill] sm:$0xff] }
 0x54a   :  { %v3247_v47 = vpop.permute.xlu1 %3246  ;;  %v3259_v48 = vpop.permute.xlu0 %3258 }
 0x54b   :  { %v3450_v2 = vmul.f32 %v12805_v62, %v3247_v47  ;;  %v3453_v35 = vmul.f32 %v12806_v52, %v3259_v48  ;;  %v12811_v52 = vld [vmem:[#allocation235_spill] sm:$0xff] }
 0x54d   :  { %3595 = vrot.lane.b32.xlu1 %v3450_v2, %s6664_s15  ;;  %3597 = vrot.lane.b32.xlu0 %v3451_v61, %s6664_s15  ;;  %v12810_v2 = vld [vmem:[#allocation238_spill] sm:$0xff] }
 0x54e   :  { %v3255_v39 = vpop.permute.xlu1 %3254  ;;  %v3267_v23 = vpop.permute.xlu0 %3266 }
 0x54f   :  { %v3452_v38 = vmul.f32 %v12807_v12, %v3255_v39  ;;  %v3455_v16 = vmul.f32 %v12808_v49, %v3267_v23  ;;  %v12813_v49 = vld [vmem:[#allocation237_spill] sm:$0xff] }
 0x551   :  { %3599 = vrot.lane.b32.xlu1 %v3452_v38, %s6664_s15  ;;  %3601 = vrot.lane.b32.xlu0 %v3453_v35, %s6664_s15  ;;  %v12812_v38 = vld [vmem:[#allocation240_spill] sm:$0xff] }
 0x552   :  { %v3263_v10 = vpop.permute.xlu1 %3262  ;;  %v3275_v34 = vpop.permute.xlu0 %3274 }
 0x553   :  { %v3454_v47 = vmul.f32 %v12809_v25, %v3263_v10  ;;  %v3457_v48 = vmul.f32 %v12810_v2, %v3275_v34  ;;  %v12815_v2 = vld [vmem:[#allocation239_spill] sm:$0xff] }
 0x555   :  { %3603 = vrot.lane.b32.xlu1 %v3454_v47, %s6664_s15  ;;  %3605 = vrot.lane.b32.xlu0 %v3455_v16, %s6664_s15  ;;  %v12814_v47 = vld [vmem:[#allocation242_spill] sm:$0xff] }
 0x556   :  { %v3271_v61 = vpop.permute.xlu1 %3270  ;;  %v3283_v62 = vpop.permute.xlu0 %3282 }
 0x557   :  { %v3456_v39 = vmul.f32 %v12811_v52, %v3271_v61  ;;  %v3459_v23 = vmul.f32 %v12812_v38, %v3283_v62  ;;  %v12817_v38 = vld [vmem:[#allocation241_spill] sm:$0xff] }
 0x559   :  { %3607 = vrot.lane.b32.xlu1 %v3456_v39, %s6664_s15  ;;  %3609 = vrot.lane.b32.xlu0 %v3457_v48, %s6664_s15  ;;  %v12816_v39 = vld [vmem:[#allocation244_spill] sm:$0xff] }
 0x55a   :  { %v3279_v35 = vpop.permute.xlu1 %3278  ;;  %v3291_v12 = vpop.permute.xlu0 %3290 }
 0x55b   :  { %v3458_v10 = vmul.f32 %v12813_v49, %v3279_v35  ;;  %v3461_v34 = vmul.f32 %v12814_v47, %v3291_v12  ;;  %v12819_v47 = vld [vmem:[#allocation243_spill] sm:$0xff] }
 0x55d   :  { %3611 = vrot.lane.b32.xlu1 %v3458_v10, %s6664_s15  ;;  %3613 = vrot.lane.b32.xlu0 %v3459_v23, %s6664_s15  ;;  %v12818_v10 = vld [vmem:[#allocation246_spill] sm:$0xff] }
 0x55e   :  { %v3287_v16 = vpop.permute.xlu1 %3286  ;;  %v3299_v25 = vpop.permute.xlu0 %3298 }
 0x55f   :  { %v3460_v61 = vmul.f32 %v12815_v2, %v3287_v16  ;;  %v3463_v62 = vmul.f32 %v12816_v39, %v3299_v25  ;;  %v12821_v39 = vld [vmem:[#allocation245_spill] sm:$0xff] }
 0x561   :  { %3615 = vrot.lane.b32.xlu1 %v3460_v61, %s6664_s15  ;;  %3617 = vrot.lane.b32.xlu0 %v3461_v34, %s6664_s15  ;;  %v12820_v61 = vld [vmem:[#allocation248_spill] sm:$0xff] }
 0x562   :  { %v3295_v48 = vpop.permute.xlu1 %3294  ;;  %v3307_v52 = vpop.permute.xlu0 %3306 }
 0x563   :  { %v3462_v35 = vmul.f32 %v12817_v38, %v3295_v48  ;;  %v3465_v12 = vmul.f32 %v12818_v10, %v3307_v52  ;;  %v12823_v10 = vld [vmem:[#allocation247_spill] sm:$0xff] }
 0x565   :  { %3619 = vrot.lane.b32.xlu1 %v3462_v35, %s6664_s15  ;;  %3621 = vrot.lane.b32.xlu0 %v3463_v62, %s6664_s15  ;;  %v12822_v35 = vld [vmem:[#allocation250_spill] sm:$0xff] }
 0x566   :  { %v3303_v23 = vpop.permute.xlu1 %3302  ;;  %v3315_v49 = vpop.permute.xlu0 %3314 }
 0x567   :  { %v3464_v16 = vmul.f32 %v12819_v47, %v3303_v23  ;;  %v3467_v25 = vmul.f32 %v12820_v61, %v3315_v49  ;;  %v12825_v61 = vld [vmem:[#allocation249_spill] sm:$0xff] }
 0x569   :  { %3623 = vrot.lane.b32.xlu1 %v3464_v16, %s6664_s15  ;;  %3625 = vrot.lane.b32.xlu0 %v3465_v12, %s6664_s15  ;;  %v12824_v16 = vld [vmem:[#allocation252_spill] sm:$0xff] }
 0x56a   :  { %v3311_v34 = vpop.permute.xlu1 %3310  ;;  %v3323_v2 = vpop.permute.xlu0 %3322 }
 0x56b   :  { %v3466_v48 = vmul.f32 %v12821_v39, %v3311_v34  ;;  %v3469_v52 = vmul.f32 %v12822_v35, %v3323_v2  ;;  %v12827_v35 = vld [vmem:[#allocation251_spill] sm:$0xff] }
 0x56d   :  { %3627 = vrot.lane.b32.xlu1 %v3466_v48, %s6664_s15  ;;  %3629 = vrot.lane.b32.xlu0 %v3467_v25, %s6664_s15  ;;  %v12826_v48 = vld [vmem:[#allocation254_spill] sm:$0xff] }
 0x56e   :  { %v3319_v62 = vpop.permute.xlu1 %3318  ;;  %v3331_v38 = vpop.permute.xlu0 %3330 }
 0x56f   :  { %v3468_v23 = vmul.f32 %v12823_v10, %v3319_v62  ;;  %v3471_v49 = vmul.f32 %v12824_v16, %v3331_v38  ;;  %v12829_v16 = vld [vmem:[#allocation253_spill] sm:$0xff] }
 0x571   :  { %3631 = vrot.lane.b32.xlu1 %v3468_v23, %s6664_s15  ;;  %3633 = vrot.lane.b32.xlu0 %v3469_v52, %s6664_s15  ;;  %v12828_v23 = vld [vmem:[#allocation256_spill] sm:$0xff] }
 0x572   :  { %v3327_v12 = vpop.permute.xlu1 %3326  ;;  %v3339_v47 = vpop.permute.xlu0 %3338 }
 0x573   :  { %v3470_v34 = vmul.f32 %v12825_v61, %v3327_v12  ;;  %v3473_v2 = vmul.f32 %v12826_v48, %v3339_v47  ;;  %v12831_v48 = vld [vmem:[#allocation255_spill] sm:$0xff] }
 0x575   :  { %3635 = vrot.lane.b32.xlu1 %v3470_v34, %s6664_s15  ;;  %3637 = vrot.lane.b32.xlu0 %v3471_v49, %s6664_s15  ;;  %v12830_v34 = vld [vmem:[#allocation258_spill] sm:$0xff] }
 0x576   :  { %v3335_v25 = vpop.permute.xlu1 %3334  ;;  %v3347_v39 = vpop.permute.xlu0 %3346 }
 0x577   :  { %v3472_v62 = vmul.f32 %v12827_v35, %v3335_v25  ;;  %v3475_v38 = vmul.f32 %v12828_v23, %v3347_v39  ;;  %v12833_v23 = vld [vmem:[#allocation257_spill] sm:$0xff] }
 0x579   :  { %3639 = vrot.lane.b32.xlu1 %v3472_v62, %s6664_s15  ;;  %3641 = vrot.lane.b32.xlu0 %v3473_v2, %s6664_s15  ;;  %v12832_v62 = vld [vmem:[#allocation260_spill] sm:$0xff] }
 0x57a   :  { %v3343_v52 = vpop.permute.xlu1 %3342  ;;  %v3355_v10 = vpop.permute.xlu0 %3354 }
 0x57b   :  { %v3474_v12 = vmul.f32 %v12829_v16, %v3343_v52  ;;  %v3477_v47 = vmul.f32 %v12830_v34, %v3355_v10  ;;  %v12835_v34 = vld [vmem:[#allocation259_spill] sm:$0xff] }
 0x57d   :  { %3643 = vrot.lane.b32.xlu1 %v3474_v12, %s6664_s15  ;;  %3645 = vrot.lane.b32.xlu0 %v3475_v38, %s6664_s15  ;;  %v12834_v12 = vld [vmem:[#allocation262_spill] sm:$0xff] }
 0x57e   :  { %v3351_v49 = vpop.permute.xlu1 %3350  ;;  %v3363_v61 = vpop.permute.xlu0 %3362 }
 0x57f   :  { %v3476_v25 = vmul.f32 %v12831_v48, %v3351_v49  ;;  %v3479_v39 = vmul.f32 %v12832_v62, %v3363_v61  ;;  %v12837_v62 = vld [vmem:[#allocation261_spill] sm:$0xff] }
 0x581   :  { %3647 = vrot.lane.b32.xlu1 %v3476_v25, %s6664_s15  ;;  %3649 = vrot.lane.b32.xlu0 %v3477_v47, %s6664_s15  ;;  %v12836_v25 = vld [vmem:[#allocation264_spill] sm:$0xff] }
 0x582   :  { %v3359_v2 = vpop.permute.xlu1 %3358  ;;  %v3371_v35 = vpop.permute.xlu0 %3370 }
 0x583   :  { %v3478_v52 = vmul.f32 %v12833_v23, %v3359_v2  ;;  %v3481_v10 = vmul.f32 %v12834_v12, %v3371_v35  ;;  %v12839_v12 = vld [vmem:[#allocation263_spill] sm:$0xff] }
 0x585   :  { %3651 = vrot.lane.b32.xlu1 %v3478_v52, %s6664_s15  ;;  %3653 = vrot.lane.b32.xlu0 %v3479_v39, %s6664_s15  ;;  %v12838_v52 = vld [vmem:[#allocation266_spill] sm:$0xff] }
 0x586   :  { %v3367_v38 = vpop.permute.xlu1 %3366  ;;  %v3379_v16 = vpop.permute.xlu0 %3378 }
 0x587   :  { %v3480_v49 = vmul.f32 %v12835_v34, %v3367_v38  ;;  %v3483_v61 = vmul.f32 %v12836_v25, %v3379_v16  ;;  %v12841_v25 = vld [vmem:[#allocation265_spill] sm:$0xff] }
 0x589   :  { %3655 = vrot.lane.b32.xlu1 %v3480_v49, %s6664_s15  ;;  %3657 = vrot.lane.b32.xlu0 %v3481_v10, %s6664_s15  ;;  %v12840_v49 = vld [vmem:[#allocation268_spill] sm:$0xff] }
 0x58a   :  { %v3375_v47 = vpop.permute.xlu1 %3374  ;;  %v3387_v48 = vpop.permute.xlu0 %3386 }
 0x58b   :  { %v3482_v2 = vmul.f32 %v12837_v62, %v3375_v47  ;;  %v3485_v35 = vmul.f32 %v12838_v52, %v3387_v48  ;;  %v12843_v52 = vld [vmem:[#allocation267_spill] sm:$0xff] }
 0x58d   :  { %3659 = vrot.lane.b32.xlu1 %v3482_v2, %s6664_s15  ;;  %3661 = vrot.lane.b32.xlu0 %v3483_v61, %s6664_s15  ;;  %v12842_v2 = vld [vmem:[#allocation270_spill] sm:$0xff] }
 0x58e   :  { %v3383_v39 = vpop.permute.xlu1 %3382  ;;  %v3395_v23 = vpop.permute.xlu0 %3394 }
 0x58f   :  { %v3484_v38 = vmul.f32 %v12839_v12, %v3383_v39  ;;  %v3487_v16 = vmul.f32 %v12840_v49, %v3395_v23 }
 0x591   :  { %3663 = vrot.lane.b32.xlu1 %v3484_v38, %s6664_s15  ;;  %3665 = vrot.lane.b32.xlu0 %v3485_v35, %s6664_s15  ;;  %v12844_v38 = vld [vmem:[#allocation269_spill] sm:$0xff] }
 0x592   :  { %v3391_v10 = vpop.permute.xlu1 %3390  ;;  %v3403_v34 = vpop.permute.xlu0 %3402 }
 0x593   :  { %v3486_v47 = vmul.f32 %v12841_v25, %v3391_v10  ;;  %v3489_v48 = vmul.f32 %v12842_v2, %v3403_v34  ;;  %v12845_v25 = vld [vmem:[#allocation271_spill] sm:$0xff] }
 0x595   :  { %3667 = vrot.lane.b32.xlu1 %v3486_v47, %s6664_s15  ;;  %3669 = vrot.lane.b32.xlu0 %v3487_v16, %s6664_s15 }
 0x596   :  { %v3399_v61 = vpop.permute.xlu1 %3398  ;;  %v3411_v62 = vpop.permute.xlu0 %3410 }
 0x597   :  { %v3488_v39 = vmul.f32 %v12843_v52, %v3399_v61  ;;  %v3491_v23 = vmul.f32 %v9327_v40, %v3411_v62  ;;  %v12847_v62 = vld [vmem:[#allocation273_spill] sm:$0xff] }
 0x599   :  { %3671 = vrot.lane.b32.xlu1 %v3488_v39, %s6664_s15  ;;  %3673 = vrot.lane.b32.xlu0 %v3489_v48, %s6664_s15 }
 0x59a   :  { %v3407_v35 = vpop.permute.xlu1 %3406  ;;  %v3419_v12 = vpop.permute.xlu0 %3418 }
 0x59b   :  { %v3490_v10 = vmul.f32 %v12844_v38, %v3407_v35  ;;  %v3493_v34 = vmul.f32 %v9343_v15, %v3419_v12  ;;  %v12849_v15 = vld [vmem:[#allocation275_spill] sm:$0xff] }
 0x59d   :  { %3675 = vrot.lane.b32.xlu1 %v3490_v10, %s6664_s15  ;;  %3677 = vrot.lane.b32.xlu0 %v3491_v23, %s6664_s15 }
 0x59e   :  { %v3415_v49 = vpop.permute.xlu1 %3414  ;;  %v3427_v16 = vpop.permute.xlu0 %3426 }
 0x59f   :  { %v3492_v47 = vmul.f32 %v12845_v25, %v3415_v49  ;;  %v3495_v40 = vmul.f32 %v9359_v29, %v3427_v16 }
 0x5a1   :  { %3679 = vrot.lane.b32.xlu1 %v3492_v47, %s6664_s15  ;;  %3681 = vrot.lane.b32.xlu0 %v3493_v34, %s6664_s15 }
 0x5a2   :  { %v3423_v61 = vpop.permute.xlu1 %3422  ;;  %v9674_v2 = vpop.permute.xlu0 %3561 }
 0x5a3   :  { %12846 = vst [vmem:[#allocation213_spill] sm:$0xff] %v9674_v2  ;;  %v3494_v48 = vmul.f32 %v12847_v62, %v3423_v61 }
 0x5a5   :  { %3683 = vrot.lane.b32.xlu1 %v3494_v48, %s6664_s15  ;;  %3685 = vrot.lane.b32.xlu0 %v3495_v40, %s6664_s15 }
 0x5a6   :  { %v3431_v52 = vpop.permute.xlu1 %3430  ;;  %v9680_v39 = vpop.permute.xlu0 %3565 }
 0x5a7   :  { %12848 = vst [vmem:[#allocation214_spill] sm:$0xff] %v9680_v39  ;;  %v3496_v35 = vmul.f32 %v12849_v15, %v3431_v52 }
 0x5a9   :  { %3687 = vrot.lane.b32.xlu1 %v3496_v35, %s6664_s15  ;;  %3818 = vperm.xlu0 %6428, %v12533_v21  }
 0x5aa   :  { %v9685_v12 = vpop.permute.xlu1 %3563  ;;  %v9687_v23 = vpop.permute.xlu0 %3569 }
 0x5ab   :  { %12850 = vst [vmem:[#allocation216_spill] sm:$0xff] %v9685_v12  ;;  %12851 = vst [vmem:[#allocation218_spill] sm:$0xff] %v9687_v23  ;;  %v12916_v12 = vld [vmem:[#allocation34_spill] sm:$0xff] }
 0x5ad   :  { %3822 = vperm.xlu1 %6429, %v12541_v26   ;;  %3830 = vperm.xlu0 %6428, %v12536_v51  }
 0x5ae   :  { %v9691_v29 = vpop.permute.xlu1 %3567  ;;  %v9693_v38 = vpop.permute.xlu0 %3573 }
 0x5af   :  { %12852 = vst [vmem:[#allocation215_spill] sm:$0xff] %v9691_v29  ;;  %12853 = vst [vmem:[#allocation220_spill] sm:$0xff] %v9693_v38  ;;  %v12908_v29 = vld [vmem:[#allocation21_spill] sm:$0xff] }
 0x5b1   :  { %3826 = vperm.xlu1 %6429, %v12545_v32   ;;  %3838 = vperm.xlu0 %6428, %v12539_v18  }
 0x5b2   :  { %v9697_v10 = vpop.permute.xlu1 %3571  ;;  %v9699_v49 = vpop.permute.xlu0 %3577 }
 0x5b3   :  { %12854 = vst [vmem:[#allocation217_spill] sm:$0xff] %v9697_v10  ;;  %12855 = vst [vmem:[#allocation222_spill] sm:$0xff] %v9699_v49  ;;  %v12900_v10 = vld [vmem:[#allocation13_spill] sm:$0xff] }
 0x5b5   :  { %3834 = vperm.xlu1 %6429, %v12549_v57   ;;  %3846 = vperm.xlu0 %6428, %v12543_v13  }
 0x5b6   :  { %v9703_v16 = vpop.permute.xlu1 %3575  ;;  %v9705_v34 = vpop.permute.xlu0 %3581 }
 0x5b7   :  { %12856 = vst [vmem:[#allocation219_spill] sm:$0xff] %v9703_v16  ;;  %12857 = vst [vmem:[#allocation224_spill] sm:$0xff] %v9705_v34 }
 0x5b9   :  { %3842 = vperm.xlu1 %6429, %v12553_v55   ;;  %3854 = vperm.xlu0 %6428, %v12547_v5  }
 0x5ba   :  { %v9709_v25 = vpop.permute.xlu1 %3579  ;;  %v9711_v47 = vpop.permute.xlu0 %3585 }
 0x5bb   :  { %12858 = vst [vmem:[#allocation221_spill] sm:$0xff] %v9709_v25  ;;  %12859 = vst [vmem:[#allocation226_spill] sm:$0xff] %v9711_v47 }
 0x5bd   :  { %3850 = vperm.xlu1 %6429, %v12557_v8   ;;  %3862 = vperm.xlu0 %6428, %v12551_v50  }
 0x5be   :  { %v9715_v61 = vpop.permute.xlu1 %3583  ;;  %v9717_v40 = vpop.permute.xlu0 %3589 }
 0x5bf   :  { %12860 = vst [vmem:[#allocation223_spill] sm:$0xff] %v9715_v61  ;;  %12861 = vst [vmem:[#allocation228_spill] sm:$0xff] %v9717_v40 }
 0x5c1   :  { %3858 = vperm.xlu1 %6429, %v12561_v22   ;;  %3870 = vperm.xlu0 %6428, %v12555_v20  }
 0x5c2   :  { %v9721_v62 = vpop.permute.xlu1 %3587  ;;  %v9723_v48 = vpop.permute.xlu0 %3593 }
 0x5c3   :  { %12862 = vst [vmem:[#allocation225_spill] sm:$0xff] %v9721_v62  ;;  %12863 = vst [vmem:[#allocation230_spill] sm:$0xff] %v9723_v48  ;;  %v12920_v48 = vld [vmem:[#allocation49_spill] sm:$0xff] }
 0x5c5   :  { %3866 = vperm.xlu1 %6429, %v12565_v11   ;;  %3878 = vperm.xlu0 %6428, %v12559_v44  }
 0x5c6   :  { %v9727_v52 = vpop.permute.xlu1 %3591  ;;  %v9729_v15 = vpop.permute.xlu0 %3597 }
 0x5c7   :  { %12864 = vst [vmem:[#allocation227_spill] sm:$0xff] %v9727_v52  ;;  %12865 = vst [vmem:[#allocation232_spill] sm:$0xff] %v9729_v15  ;;  %v12912_v15 = vld [vmem:[#allocation25_spill] sm:$0xff] }
 0x5c9   :  { %3874 = vperm.xlu1 %6429, %v12569_v9   ;;  %3886 = vperm.xlu0 %6428, %v12563_v56  }
 0x5ca   :  { %v9733_v35 = vpop.permute.xlu1 %3595  ;;  %v9735_v40 = vpop.permute.xlu0 %3601 }
 0x5cb   :  { %12866 = vst [vmem:[#allocation229_spill] sm:$0xff] %v9733_v35  ;;  %12867 = vst [vmem:[#allocation234_spill] sm:$0xff] %v9735_v40  ;;  %v12904_v40 = vld [vmem:[#allocation17_spill] sm:$0xff]  ;;  %v12919_v35 = vld [vmem:[#allocation44_spill] sm:$0xff] }
 0x5cd   :  { %3882 = vperm.xlu1 %6429, %v12573_v59   ;;  %3894 = vperm.xlu0 %6428, %v12567_v53  }
 0x5ce   :  { %v9739_v62 = vpop.permute.xlu1 %3599  ;;  %v9741_v47 = vpop.permute.xlu0 %3605 }
 0x5cf   :  { %12868 = vst [vmem:[#allocation231_spill] sm:$0xff] %v9739_v62  ;;  %12869 = vst [vmem:[#allocation236_spill] sm:$0xff] %v9741_v47  ;;  %v12896_v47 = vld [vmem:[#allocation9_spill] sm:$0xff] }
 0x5d1   :  { %3890 = vperm.xlu1 %6429, %v12577_v14   ;;  %3902 = vperm.xlu0 %6428, %v12571_v31  }
 0x5d2   :  { %v9745_v52 = vpop.permute.xlu1 %3603  ;;  %v9747_v61 = vpop.permute.xlu0 %3609 }
 0x5d3   :  { %12870 = vst [vmem:[#allocation233_spill] sm:$0xff] %v9745_v52  ;;  %12871 = vst [vmem:[#allocation238_spill] sm:$0xff] %v9747_v61 }
 0x5d5   :  { %3898 = vperm.xlu1 %6429, %v12581_v54   ;;  %3910 = vperm.xlu0 %6428, %v12575_v37  }
 0x5d6   :  { %v9751_v34 = vpop.permute.xlu1 %3607  ;;  %v9753_v49 = vpop.permute.xlu0 %3613 }
 0x5d7   :  { %12872 = vst [vmem:[#allocation235_spill] sm:$0xff] %v9751_v34  ;;  %12873 = vst [vmem:[#allocation240_spill] sm:$0xff] %v9753_v49 }
 0x5d9   :  { %3906 = vperm.xlu1 %6429, %v12585_v46   ;;  %3918 = vperm.xlu0 %6428, %v12579_v17  }
 0x5da   :  { %v9757_v25 = vpop.permute.xlu1 %3611  ;;  %v9759_v38 = vpop.permute.xlu0 %3617 }
 0x5db   :  { %12874 = vst [vmem:[#allocation237_spill] sm:$0xff] %v9757_v25  ;;  %12875 = vst [vmem:[#allocation242_spill] sm:$0xff] %v9759_v38 }
 0x5dd   :  { %3914 = vperm.xlu1 %6429, %v12588_v27   ;;  %3926 = vperm.xlu0 %6428, %v12583_v45  }
 0x5de   :  { %v9763_v61 = vpop.permute.xlu1 %3615  ;;  %v9765_v16 = vpop.permute.xlu0 %3621 }
 0x5df   :  { %12876 = vst [vmem:[#allocation239_spill] sm:$0xff] %v9763_v61  ;;  %12877 = vst [vmem:[#allocation244_spill] sm:$0xff] %v9765_v16 }
 0x5e1   :  { %3922 = vperm.xlu1 %6429, %v12591_v43   ;;  %3934 = vperm.xlu0 %6428, %v7628_v36  }
 0x5e2   :  { %v9769_v49 = vpop.permute.xlu1 %3619  ;;  %v9771_v34 = vpop.permute.xlu0 %3625 }
 0x5e3   :  { %12878 = vst [vmem:[#allocation241_spill] sm:$0xff] %v9769_v49  ;;  %12879 = vst [vmem:[#allocation246_spill] sm:$0xff] %v9771_v34 }
 0x5e5   :  { %3930 = vperm.xlu1 %6429, %v7642_v58   ;;  %3942 = vperm.xlu0 %6428, %v7654_v19  }
 0x5e6   :  { %v9775_v38 = vpop.permute.xlu1 %3623  ;;  %v9777_v25 = vpop.permute.xlu0 %3629 }
 0x5e7   :  { %12880 = vst [vmem:[#allocation243_spill] sm:$0xff] %v9775_v38  ;;  %12881 = vst [vmem:[#allocation248_spill] sm:$0xff] %v9777_v25 }
 0x5e9   :  { %3938 = vperm.xlu1 %6429, %v7666_v30   ;;  %3950 = vperm.xlu0 %6428, %v7678_v33  }
 0x5ea   :  { %v9781_v16 = vpop.permute.xlu1 %3627  ;;  %v9783_v61 = vpop.permute.xlu0 %3633 }
 0x5eb   :  { %12882 = vst [vmem:[#allocation245_spill] sm:$0xff] %v9781_v16  ;;  %12883 = vst [vmem:[#allocation250_spill] sm:$0xff] %v9783_v61 }
 0x5ed   :  { %3946 = vperm.xlu1 %6429, %v7690_v60   ;;  %3958 = vperm.xlu0 %6428, %v7702_v63  }
 0x5ee   :  { %v9787_v34 = vpop.permute.xlu1 %3631  ;;  %v9789_v49 = vpop.permute.xlu0 %3637 }
 0x5ef   :  { %12884 = vst [vmem:[#allocation247_spill] sm:$0xff] %v9787_v34  ;;  %12885 = vst [vmem:[#allocation252_spill] sm:$0xff] %v9789_v49 }
 0x5f1   :  { %3954 = vperm.xlu1 %6429, %v12601_v0   ;;  %3966 = vperm.xlu0 %6428, %v12411_v28  }
 0x5f2   :  { %v9793_v25 = vpop.permute.xlu1 %3635  ;;  %v9795_v38 = vpop.permute.xlu0 %3641 }
 0x5f3   :  { %12886 = vst [vmem:[#allocation249_spill] sm:$0xff] %v9793_v25  ;;  %12887 = vst [vmem:[#allocation254_spill] sm:$0xff] %v9795_v38 }
 0x5f5   :  { %3962 = vperm.xlu1 %6429, %v12605_v24   ;;  %3974 = vperm.xlu0 %6428, %v12599_v42  }
 0x5f6   :  { %v9799_v61 = vpop.permute.xlu1 %3639  ;;  %v9801_v16 = vpop.permute.xlu0 %3645 }
 0x5f7   :  { %12888 = vst [vmem:[#allocation251_spill] sm:$0xff] %v9799_v61  ;;  %12889 = vst [vmem:[#allocation256_spill] sm:$0xff] %v9801_v16 }
 0x5f9   :  { %3970 = vperm.xlu1 %6429, %v12609_v7   ;;  %3982 = vperm.xlu0 %6428, %v12603_v41  }
 0x5fa   :  { %v9805_v49 = vpop.permute.xlu1 %3643  ;;  %v9807_v34 = vpop.permute.xlu0 %3649 }
 0x5fb   :  { %12890 = vst [vmem:[#allocation253_spill] sm:$0xff] %v9805_v49  ;;  %12891 = vst [vmem:[#allocation258_spill] sm:$0xff] %v9807_v34  ;;  %v12897_v49 = vld [vmem:[#allocation11_spill] sm:$0xff] }
 0x5fd   :  { %3978 = vperm.xlu1 %6429, %v12613_v1   ;;  %3990 = vperm.xlu0 %6428, %v12607_v3  }
 0x5fe   :  { %v9811_v38 = vpop.permute.xlu1 %3647  ;;  %v9813_v25 = vpop.permute.xlu0 %3653 }
 0x5ff   :  { %12892 = vst [vmem:[#allocation255_spill] sm:$0xff] %v9811_v38  ;;  %12893 = vst [vmem:[#allocation260_spill] sm:$0xff] %v9813_v25  ;;  %v12901_v38 = vld [vmem:[#allocation15_spill] sm:$0xff] }
 0x601   :  { %3986 = vperm.xlu1 %6429, %v12617_v6   ;;  %3998 = vperm.xlu0 %6428, %v12611_v4  }
 0x602   :  { %v9817_v16 = vpop.permute.xlu1 %3651  ;;  %v9819_v61 = vpop.permute.xlu0 %3657 }
 0x603   :  { %12894 = vst [vmem:[#allocation257_spill] sm:$0xff] %v9817_v16  ;;  %12895 = vst [vmem:[#allocation262_spill] sm:$0xff] %v9819_v61  ;;  %v12905_v16 = vld [vmem:[#allocation19_spill] sm:$0xff] }
 0x605   :  { %3994 = vperm.xlu1 %6429, %v12896_v47   ;;  %4006 = vperm.xlu0 %6428, %v12897_v49  }
 0x606   :  { %v9823_v34 = vpop.permute.xlu1 %3655  ;;  %v9825_v23 = vpop.permute.xlu0 %3661 }
 0x607   :  { %12898 = vst [vmem:[#allocation259_spill] sm:$0xff] %v9823_v34  ;;  %12899 = vst [vmem:[#allocation264_spill] sm:$0xff] %v9825_v23  ;;  %v12909_v34 = vld [vmem:[#allocation23_spill] sm:$0xff] }
 0x609   :  { %4002 = vperm.xlu1 %6429, %v12900_v10   ;;  %4014 = vperm.xlu0 %6428, %v12901_v38  }
 0x60a   :  { %v9829_v25 = vpop.permute.xlu1 %3659  ;;  %v9831_v52 = vpop.permute.xlu0 %3665 }
 0x60b   :  { %12902 = vst [vmem:[#allocation261_spill] sm:$0xff] %v9829_v25  ;;  %12903 = vst [vmem:[#allocation266_spill] sm:$0xff] %v9831_v52  ;;  %v12913_v25 = vld [vmem:[#allocation29_spill] sm:$0xff] }
 0x60d   :  { %4010 = vperm.xlu1 %6429, %v12904_v40   ;;  %4022 = vperm.xlu0 %6428, %v12905_v16  }
 0x60e   :  { %v9835_v61 = vpop.permute.xlu1 %3663  ;;  %v9837_v39 = vpop.permute.xlu0 %3669 }
 0x60f   :  { %12906 = vst [vmem:[#allocation263_spill] sm:$0xff] %v9835_v61  ;;  %12907 = vst [vmem:[#allocation268_spill] sm:$0xff] %v9837_v39  ;;  %v12917_v61 = vld [vmem:[#allocation40_spill] sm:$0xff] }
 0x611   :  { %4018 = vperm.xlu1 %6429, %v12908_v29   ;;  %4030 = vperm.xlu0 %6428, %v12909_v34  }
 0x612   :  { %v9841_v23 = vpop.permute.xlu1 %3667  ;;  %v9843_v62 = vpop.permute.xlu0 %3673 }
 0x613   :  { %12910 = vst [vmem:[#allocation265_spill] sm:$0xff] %v9841_v23  ;;  %12911 = vst [vmem:[#allocation270_spill] sm:$0xff] %v9843_v62 }
 0x615   :  { %4026 = vperm.xlu1 %6429, %v12912_v15   ;;  %4038 = vperm.xlu0 %6428, %v12913_v25   ;;  %v12923_v15 = vld [vmem:[#allocation55_spill] sm:$0xff] }
 0x616   :  { %v9847_v52 = vpop.permute.xlu1 %3671  ;;  %v9849_v2 = vpop.permute.xlu0 %3677  ;;  %v12924_v25 = vld [vmem:[#allocation59_spill] sm:$0xff] }
 0x617   :  { %12914 = vst [vmem:[#allocation267_spill] sm:$0xff] %v9847_v52  ;;  %12915 = vst [vmem:[#allocation269_spill] sm:$0xff] %v9849_v2 }
 0x619   :  { %4034 = vperm.xlu1 %6429, %v12916_v12   ;;  %4046 = vperm.xlu0 %6428, %v12917_v61   ;;  %v12927_v12 = vld [vmem:[#allocation65_spill] sm:$0xff] }
 0x61a   :  { %v9853_v39 = vpop.permute.xlu1 %3675  ;;  %v9857_v23 = vpop.permute.xlu0 %3681  ;;  %v12928_v61 = vld [vmem:[#allocation69_spill] sm:$0xff] }
 0x61b   :  { %12918 = vst [vmem:[#allocation271_spill] sm:$0xff] %v9853_v39  ;;  %12921 = vst [vmem:[#allocation273_spill] sm:$0xff] %v9857_v23  ;;  %v6515_v23 = vld [vmem:[%s11958_s3] sm:$0xff] }
 0x61d   :  { %4042 = vperm.xlu1 %6429, %v12919_v35   ;;  %4054 = vperm.xlu0 %6428, %v12920_v48   ;;  %v12930_v48 = vld [vmem:[#allocation75_spill] sm:$0xff] }
 0x61e   :  { %v9859_v62 = vpop.permute.xlu1 %3679  ;;  %v9865_v2 = vpop.permute.xlu0 %3685 }
 0x61f   :  { %12922 = vst [vmem:[#allocation275_spill] sm:$0xff] %v9859_v62  ;;  %12926 = vst [vmem:[#allocation11_spill] sm:$0xff] %v9865_v2  ;;  %v9878_v2 = vld [vmem:[%s11958_s3 + $0x8] sm:$0xff] }
 0x620   :  { %12931 = vst [vmem:[#allocation15_spill] sm:$0xff] %v9878_v2 }
 0x621   :  { %4050 = vperm.xlu1 %6429, %v12923_v15   ;;  %4062 = vperm.xlu0 %6428, %v12924_v25  }
 0x622   :  { %v9863_v52 = vpop.permute.xlu1 %3683 }
 0x623   :  { %12925 = vst [vmem:[#allocation9_spill] sm:$0xff] %v9863_v52 }
 0x625   :  { %4058 = vperm.xlu1 %6429, %v12927_v12   ;;  %4070 = vperm.xlu0 %6428, %v12928_v61  }
 0x626   :  { %v9869_v39 = vpop.permute.xlu1 %3687 }
 0x627   :  { %12929 = vst [vmem:[#allocation13_spill] sm:$0xff] %v9869_v39  ;;  %v12179_v39 = vmov 6  }
 0x628   :  { %v3819_v35 = vpop.permute.xlu0 %3818 }
 0x629   :  { %4066 = vperm.xlu1 %6429, %v12930_v48   ;;  %v4073_v62 = vmul.f32 %v6515_v23, %v3819_v35  ;;  %6431 = vset.pattern.permute.xlu0 %v12179_v39  ;;  %v9888_v48 = vld [vmem:[%s11958_s3 + $0x18] sm:$0xff] }
 0x62a   :  { %12932 = vst [vmem:[#allocation17_spill] sm:$0xff] %v9888_v48 }
 0x62c   :  { %v3823_v15 = vpop.permute.xlu1 %3822  ;;  %v3831_v25 = vpop.permute.xlu0 %3830 }
 0x62d   :  { %v4074_v52 = vmul.f32 %v9878_v2, %v3823_v15  ;;  %4201 = vrot.lane.b32.xlu1 %v4073_v62, %s6665_s2  ;;  %v4076_v12 = vmul.f32 %v9888_v48, %v3831_v25  ;;  %v6518_v62 = vld [vmem:[%s11958_s3 + $0x10] sm:$0xff]  ;;  %v9899_v2 = vld [vmem:[%s11958_s3 + $0x28] sm:$0xff]  ;;  %v6520_v25 = vld [vmem:[%s11958_s3 + $0x20] sm:$0xff] }
 0x62e   :  { %6430 = vset.pattern.permute.xlu1 %v12179_v39  ;;  %12933 = vst [vmem:[#allocation19_spill] sm:$0xff] %v9899_v2 }
 0x62f   :  { %4203 = vrot.lane.b32.xlu0 %v4074_v52, %s6665_s2 }
 0x630   :  { %v3827_v23 = vpop.permute.xlu1 %3826  ;;  %v3839_v35 = vpop.permute.xlu0 %3838 }
 0x631   :  { %v4075_v15 = vmul.f32 %v6518_v62, %v3827_v23  ;;  %v4078_v61 = vmul.f32 %v9899_v2, %v3839_v35  ;;  %v9910_v62 = vld [vmem:[%s11958_s3 + $0x38] sm:$0xff]  ;;  %v6522_v35 = vld [vmem:[%s11958_s3 + $0x30] sm:$0xff] }
 0x632   :  { %12934 = vst [vmem:[#allocation21_spill] sm:$0xff] %v9910_v62 }
 0x633   :  { %4205 = vrot.lane.b32.xlu1 %v4075_v15, %s6665_s2  ;;  %4207 = vrot.lane.b32.xlu0 %v4076_v12, %s6665_s2 }
 0x634   :  { %v3835_v39 = vpop.permute.xlu1 %3834  ;;  %v3847_v52 = vpop.permute.xlu0 %3846 }
 0x635   :  { %v4077_v48 = vmul.f32 %v6520_v25, %v3835_v39  ;;  %v4080_v15 = vmul.f32 %v9910_v62, %v3847_v52  ;;  %v6524_v52 = vld [vmem:[%s11958_s3 + $0x40] sm:$0xff] }
 0x637   :  { %4209 = vrot.lane.b32.xlu1 %v4077_v48, %s6665_s2  ;;  %4211 = vrot.lane.b32.xlu0 %v4078_v61, %s6665_s2  ;;  %v6523_v48 = vld [vmem:[%s11958_s3 + $0x48] sm:$0xff] }
 0x638   :  { %v3843_v23 = vpop.permute.xlu1 %3842  ;;  %v3855_v12 = vpop.permute.xlu0 %3854 }
 0x639   :  { %v4079_v2 = vmul.f32 %v6522_v35, %v3843_v23  ;;  %v4082_v25 = vmul.f32 %v6523_v48, %v3855_v12  ;;  %v6526_v12 = vld [vmem:[%s11958_s3 + $0x50] sm:$0xff] }
 0x63b   :  { %4213 = vrot.lane.b32.xlu1 %v4079_v2, %s6665_s2  ;;  %4215 = vrot.lane.b32.xlu0 %v4080_v15, %s6665_s2  ;;  %v6525_v15 = vld [vmem:[%s11958_s3 + $0x58] sm:$0xff] }
 0x63c   :  { %v3851_v39 = vpop.permute.xlu1 %3850  ;;  %v3863_v61 = vpop.permute.xlu0 %3862 }
 0x63d   :  { %v4081_v62 = vmul.f32 %v6524_v52, %v3851_v39  ;;  %v4084_v35 = vmul.f32 %v6525_v15, %v3863_v61  ;;  %v6528_v61 = vld [vmem:[%s11958_s3 + $0x60] sm:$0xff] }
 0x63f   :  { %4217 = vrot.lane.b32.xlu1 %v4081_v62, %s6665_s2  ;;  %4219 = vrot.lane.b32.xlu0 %v4082_v25, %s6665_s2  ;;  %v6527_v25 = vld [vmem:[%s11958_s3 + $0x68] sm:$0xff] }
 0x640   :  { %v3859_v23 = vpop.permute.xlu1 %3858  ;;  %v3871_v2 = vpop.permute.xlu0 %3870 }
 0x641   :  { %v4083_v48 = vmul.f32 %v6526_v12, %v3859_v23  ;;  %v4086_v52 = vmul.f32 %v6527_v25, %v3871_v2  ;;  %v6530_v2 = vld [vmem:[%s11958_s3 + $0x70] sm:$0xff] }
 0x643   :  { %4221 = vrot.lane.b32.xlu1 %v4083_v48, %s6665_s2  ;;  %4223 = vrot.lane.b32.xlu0 %v4084_v35, %s6665_s2  ;;  %v6529_v35 = vld [vmem:[%s11958_s3 + $0x78] sm:$0xff] }
 0x644   :  { %v3867_v39 = vpop.permute.xlu1 %3866  ;;  %v3879_v62 = vpop.permute.xlu0 %3878 }
 0x645   :  { %v4085_v15 = vmul.f32 %v6528_v61, %v3867_v39  ;;  %v4088_v48 = vmul.f32 %v6529_v35, %v3879_v62  ;;  %v9959_v62 = vld [vmem:[%s11958_s3 + $0x80] sm:$0xff] }
 0x646   :  { %12936 = vst [vmem:[#allocation338_spill] sm:$0xff] %v9959_v62 }
 0x647   :  { %4225 = vrot.lane.b32.xlu1 %v4085_v15, %s6665_s2  ;;  %4227 = vrot.lane.b32.xlu0 %v4086_v52, %s6665_s2  ;;  %v9953_v52 = vld [vmem:[%s11958_s3 + $0x88] sm:$0xff] }
 0x648   :  { %v3875_v23 = vpop.permute.xlu1 %3874  ;;  %v3887_v12 = vpop.permute.xlu0 %3886  ;;  %12935 = vst [vmem:[#allocation23_spill] sm:$0xff] %v9953_v52 }
 0x649   :  { %v4087_v25 = vmul.f32 %v6530_v2, %v3875_v23  ;;  %v4090_v15 = vmul.f32 %v9953_v52, %v3887_v12  ;;  %v9967_v2 = vld [vmem:[%s11958_s3 + $0x98] sm:$0xff] }
 0x64a   :  { %12937 = vst [vmem:[#allocation339_spill] sm:$0xff] %v9967_v2 }
 0x64b   :  { %4229 = vrot.lane.b32.xlu1 %v4087_v25, %s6665_s2  ;;  %4231 = vrot.lane.b32.xlu0 %v4088_v48, %s6665_s2  ;;  %v9973_v25 = vld [vmem:[%s11958_s3 + $0x90] sm:$0xff] }
 0x64c   :  { %v3883_v39 = vpop.permute.xlu1 %3882  ;;  %v3895_v61 = vpop.permute.xlu0 %3894  ;;  %12938 = vst [vmem:[#allocation340_spill] sm:$0xff] %v9973_v25 }
 0x64d   :  { %v4089_v23 = vmul.f32 %v9959_v62, %v3883_v39  ;;  %v4092_v12 = vmul.f32 %v9967_v2, %v3895_v61  ;;  %v9981_v62 = vld [vmem:[%s11958_s3 + $0xa8] sm:$0xff]  ;;  %v9987_v2 = vld [vmem:[%s11958_s3 + $0xa0] sm:$0xff] }
 0x64e   :  { %12939 = vst [vmem:[#allocation341_spill] sm:$0xff] %v9981_v62  ;;  %12940 = vst [vmem:[#allocation342_spill] sm:$0xff] %v9987_v2 }
 0x64f   :  { %4233 = vrot.lane.b32.xlu1 %v4089_v23, %s6665_s2  ;;  %4235 = vrot.lane.b32.xlu0 %v4090_v15, %s6665_s2 }
 0x650   :  { %v3891_v35 = vpop.permute.xlu1 %3890  ;;  %v3903_v48 = vpop.permute.xlu0 %3902 }
 0x651   :  { %v4091_v39 = vmul.f32 %v9973_v25, %v3891_v35  ;;  %v4094_v61 = vmul.f32 %v9981_v62, %v3903_v48  ;;  %v9995_v25 = vld [vmem:[%s11958_s3 + $0xb8] sm:$0xff]  ;;  %v6538_v62 = vld [vmem:[%s11958_s3 + $0xb0] sm:$0xff] }
 0x652   :  { %12941 = vst [vmem:[#allocation343_spill] sm:$0xff] %v9995_v25 }
 0x653   :  { %4237 = vrot.lane.b32.xlu1 %v4091_v39, %s6665_s2  ;;  %4239 = vrot.lane.b32.xlu0 %v4092_v12, %s6665_s2 }
 0x654   :  { %v3899_v15 = vpop.permute.xlu1 %3898  ;;  %v3911_v23 = vpop.permute.xlu0 %3910 }
 0x655   :  { %v4093_v35 = vmul.f32 %v9987_v2, %v3899_v15  ;;  %v4096_v48 = vmul.f32 %v9995_v25, %v3911_v23  ;;  %v6540_v23 = vld [vmem:[%s11958_s3 + $0xc0] sm:$0xff] }
 0x657   :  { %4241 = vrot.lane.b32.xlu1 %v4093_v35, %s6665_s2  ;;  %4243 = vrot.lane.b32.xlu0 %v4094_v61, %s6665_s2  ;;  %v10006_v35 = vld [vmem:[%s11958_s3 + $0xc8] sm:$0xff] }
 0x658   :  { %v3907_v12 = vpop.permute.xlu1 %3906  ;;  %v3919_v39 = vpop.permute.xlu0 %3918  ;;  %12942 = vst [vmem:[#allocation344_spill] sm:$0xff] %v10006_v35 }
 0x659   :  { %v4095_v52 = vmul.f32 %v6538_v62, %v3907_v12  ;;  %v4098_v2 = vmul.f32 %v10006_v35, %v3919_v39  ;;  %v10017_v12 = vld [vmem:[%s11958_s3 + $0xd8] sm:$0xff]  ;;  %v6542_v39 = vld [vmem:[%s11958_s3 + $0xd0] sm:$0xff] }
 0x65a   :  { %12943 = vst [vmem:[#allocation345_spill] sm:$0xff] %v10017_v12 }
 0x65b   :  { %4245 = vrot.lane.b32.xlu1 %v4095_v52, %s6665_s2  ;;  %4247 = vrot.lane.b32.xlu0 %v4096_v48, %s6665_s2 }
 0x65c   :  { %v3915_v15 = vpop.permute.xlu1 %3914  ;;  %v3927_v61 = vpop.permute.xlu0 %3926 }
 0x65d   :  { %v4097_v25 = vmul.f32 %v6540_v23, %v3915_v15  ;;  %v4100_v48 = vmul.f32 %v10017_v12, %v3927_v61  ;;  %v10028_v15 = vld [vmem:[%s11958_s3 + $0xe8] sm:$0xff]  ;;  %v6544_v61 = vld [vmem:[%s11958_s3 + $0xe0] sm:$0xff] }
 0x65e   :  { %12944 = vst [vmem:[#allocation346_spill] sm:$0xff] %v10028_v15 }
 0x65f   :  { %4249 = vrot.lane.b32.xlu1 %v4097_v25, %s6665_s2  ;;  %4251 = vrot.lane.b32.xlu0 %v4098_v2, %s6665_s2 }
 0x660   :  { %v3923_v52 = vpop.permute.xlu1 %3922  ;;  %v3935_v62 = vpop.permute.xlu0 %3934 }
 0x661   :  { %v4099_v35 = vmul.f32 %v6542_v39, %v3923_v52  ;;  %v4102_v23 = vmul.f32 %v10028_v15, %v3935_v62  ;;  %v6546_v62 = vld [vmem:[%s11958_s3 + $0xf0] sm:$0xff] }
 0x663   :  { %4253 = vrot.lane.b32.xlu1 %v4099_v35, %s6665_s2  ;;  %4255 = vrot.lane.b32.xlu0 %v4100_v48, %s6665_s2  ;;  %v10039_v48 = vld [vmem:[%s11958_s3 + $0xf8] sm:$0xff] }
 0x664   :  { %v3931_v25 = vpop.permute.xlu1 %3930  ;;  %v3943_v2 = vpop.permute.xlu0 %3942  ;;  %12945 = vst [vmem:[#allocation347_spill] sm:$0xff] %v10039_v48 }
 0x665   :  { %v4101_v12 = vmul.f32 %v6544_v61, %v3931_v25  ;;  %v4104_v39 = vmul.f32 %v10039_v48, %v3943_v2  ;;  %v6548_v2 = vld [vmem:[%s11958_s3 + $0x100] sm:$0xff] }
 0x667   :  { %4257 = vrot.lane.b32.xlu1 %v4101_v12, %s6665_s2  ;;  %4259 = vrot.lane.b32.xlu0 %v4102_v23, %s6665_s2  ;;  %v6547_v23 = vld [vmem:[%s11958_s3 + $0x108] sm:$0xff] }
 0x668   :  { %v3939_v35 = vpop.permute.xlu1 %3938  ;;  %v3951_v52 = vpop.permute.xlu0 %3950 }
 0x669   :  { %v4103_v15 = vmul.f32 %v6546_v62, %v3939_v35  ;;  %v4106_v61 = vmul.f32 %v6547_v23, %v3951_v52  ;;  %v6550_v52 = vld [vmem:[%s11958_s3 + $0x110] sm:$0xff] }
 0x66b   :  { %4261 = vrot.lane.b32.xlu1 %v4103_v15, %s6665_s2  ;;  %4263 = vrot.lane.b32.xlu0 %v4104_v39, %s6665_s2  ;;  %v6549_v39 = vld [vmem:[%s11958_s3 + $0x118] sm:$0xff] }
 0x66c   :  { %v3947_v12 = vpop.permute.xlu1 %3946  ;;  %v3959_v25 = vpop.permute.xlu0 %3958 }
 0x66d   :  { %v4105_v48 = vmul.f32 %v6548_v2, %v3947_v12  ;;  %v4108_v62 = vmul.f32 %v6549_v39, %v3959_v25  ;;  %v6552_v25 = vld [vmem:[%s11958_s3 + $0x120] sm:$0xff] }
 0x66f   :  { %4265 = vrot.lane.b32.xlu1 %v4105_v48, %s6665_s2  ;;  %4267 = vrot.lane.b32.xlu0 %v4106_v61, %s6665_s2  ;;  %v6551_v61 = vld [vmem:[%s11958_s3 + $0x128] sm:$0xff] }
 0x670   :  { %v3955_v35 = vpop.permute.xlu1 %3954  ;;  %v3967_v15 = vpop.permute.xlu0 %3966 }
 0x671   :  { %v4107_v23 = vmul.f32 %v6550_v52, %v3955_v35  ;;  %v4110_v2 = vmul.f32 %v6551_v61, %v3967_v15  ;;  %v6554_v15 = vld [vmem:[%s11958_s3 + $0x130] sm:$0xff] }
 0x673   :  { %4269 = vrot.lane.b32.xlu1 %v4107_v23, %s6665_s2  ;;  %4271 = vrot.lane.b32.xlu0 %v4108_v62, %s6665_s2  ;;  %v6553_v62 = vld [vmem:[%s11958_s3 + $0x138] sm:$0xff] }
 0x674   :  { %v3963_v12 = vpop.permute.xlu1 %3962  ;;  %v3975_v48 = vpop.permute.xlu0 %3974 }
 0x675   :  { %v4109_v39 = vmul.f32 %v6552_v25, %v3963_v12  ;;  %v4112_v23 = vmul.f32 %v6553_v62, %v3975_v48  ;;  %v6556_v48 = vld [vmem:[%s11958_s3 + $0x140] sm:$0xff] }
 0x677   :  { %4273 = vrot.lane.b32.xlu1 %v4109_v39, %s6665_s2  ;;  %4275 = vrot.lane.b32.xlu0 %v4110_v2, %s6665_s2  ;;  %v6555_v2 = vld [vmem:[%s11958_s3 + $0x148] sm:$0xff] }
 0x678   :  { %v3971_v35 = vpop.permute.xlu1 %3970  ;;  %v3983_v52 = vpop.permute.xlu0 %3982 }
 0x679   :  { %v4111_v61 = vmul.f32 %v6554_v15, %v3971_v35  ;;  %v4114_v39 = vmul.f32 %v6555_v2, %v3983_v52  ;;  %v6558_v52 = vld [vmem:[%s11958_s3 + $0x150] sm:$0xff] }
 0x67b   :  { %4277 = vrot.lane.b32.xlu1 %v4111_v61, %s6665_s2  ;;  %4279 = vrot.lane.b32.xlu0 %v4112_v23, %s6665_s2  ;;  %v6557_v23 = vld [vmem:[%s11958_s3 + $0x158] sm:$0xff] }
 0x67c   :  { %v3979_v12 = vpop.permute.xlu1 %3978  ;;  %v3991_v25 = vpop.permute.xlu0 %3990 }
 0x67d   :  { %v4113_v62 = vmul.f32 %v6556_v48, %v3979_v12  ;;  %v4116_v61 = vmul.f32 %v6557_v23, %v3991_v25  ;;  %v6560_v25 = vld [vmem:[%s11958_s3 + $0x160] sm:$0xff] }
 0x67f   :  { %4281 = vrot.lane.b32.xlu1 %v4113_v62, %s6665_s2  ;;  %4283 = vrot.lane.b32.xlu0 %v4114_v39, %s6665_s2  ;;  %v6559_v39 = vld [vmem:[%s11958_s3 + $0x168] sm:$0xff] }
 0x680   :  { %v3987_v35 = vpop.permute.xlu1 %3986  ;;  %v3999_v15 = vpop.permute.xlu0 %3998 }
 0x681   :  { %v4115_v2 = vmul.f32 %v6558_v52, %v3987_v35  ;;  %v4118_v62 = vmul.f32 %v6559_v39, %v3999_v15  ;;  %v6562_v15 = vld [vmem:[%s11958_s3 + $0x170] sm:$0xff] }
 0x683   :  { %4285 = vrot.lane.b32.xlu1 %v4115_v2, %s6665_s2  ;;  %4287 = vrot.lane.b32.xlu0 %v4116_v61, %s6665_s2  ;;  %v6561_v61 = vld [vmem:[%s11958_s3 + $0x178] sm:$0xff] }
 0x684   :  { %v3995_v12 = vpop.permute.xlu1 %3994  ;;  %v4007_v48 = vpop.permute.xlu0 %4006 }
 0x685   :  { %v4117_v23 = vmul.f32 %v6560_v25, %v3995_v12  ;;  %v4120_v2 = vmul.f32 %v6561_v61, %v4007_v48  ;;  %v6564_v48 = vld [vmem:[%s11958_s3 + $0x180] sm:$0xff] }
 0x687   :  { %4289 = vrot.lane.b32.xlu1 %v4117_v23, %s6665_s2  ;;  %4291 = vrot.lane.b32.xlu0 %v4118_v62, %s6665_s2  ;;  %v10114_v62 = vld [vmem:[%s11958_s3 + $0x188] sm:$0xff] }
 0x688   :  { %v4003_v35 = vpop.permute.xlu1 %4002  ;;  %v4015_v52 = vpop.permute.xlu0 %4014  ;;  %12946 = vst [vmem:[#allocation348_spill] sm:$0xff] %v10114_v62 }
 0x689   :  { %v4119_v39 = vmul.f32 %v6562_v15, %v4003_v35  ;;  %v4122_v23 = vmul.f32 %v10114_v62, %v4015_v52  ;;  %v10125_v15 = vld [vmem:[%s11958_s3 + $0x198] sm:$0xff]  ;;  %v6566_v52 = vld [vmem:[%s11958_s3 + $0x190] sm:$0xff] }
 0x68a   :  { %12947 = vst [vmem:[#allocation349_spill] sm:$0xff] %v10125_v15 }
 0x68b   :  { %4293 = vrot.lane.b32.xlu1 %v4119_v39, %s6665_s2  ;;  %4295 = vrot.lane.b32.xlu0 %v4120_v2, %s6665_s2 }
 0x68c   :  { %v4011_v12 = vpop.permute.xlu1 %4010  ;;  %v4023_v25 = vpop.permute.xlu0 %4022 }
 0x68d   :  { %v4121_v61 = vmul.f32 %v6564_v48, %v4011_v12  ;;  %v4124_v39 = vmul.f32 %v10125_v15, %v4023_v25  ;;  %v6567_v48 = vld [vmem:[%s11958_s3 + $0x1a8] sm:$0xff]  ;;  %v6568_v25 = vld [vmem:[%s11958_s3 + $0x1a0] sm:$0xff] }
 0x68f   :  { %4297 = vrot.lane.b32.xlu1 %v4121_v61, %s6665_s2  ;;  %4299 = vrot.lane.b32.xlu0 %v4122_v23, %s6665_s2 }
 0x690   :  { %v4019_v35 = vpop.permute.xlu1 %4018  ;;  %v4031_v2 = vpop.permute.xlu0 %4030 }
 0x691   :  { %v4123_v62 = vmul.f32 %v6566_v52, %v4019_v35  ;;  %v4126_v61 = vmul.f32 %v6567_v48, %v4031_v2  ;;  %v6570_v2 = vld [vmem:[%s11958_s3 + $0x1b0] sm:$0xff] }
 0x693   :  { %4301 = vrot.lane.b32.xlu1 %v4123_v62, %s6665_s2  ;;  %4303 = vrot.lane.b32.xlu0 %v4124_v39, %s6665_s2  ;;  %v6569_v39 = vld [vmem:[%s11958_s3 + $0x1b8] sm:$0xff] }
 0x694   :  { %v4027_v12 = vpop.permute.xlu1 %4026  ;;  %v4039_v23 = vpop.permute.xlu0 %4038 }
 0x695   :  { %v4125_v15 = vmul.f32 %v6568_v25, %v4027_v12  ;;  %v4128_v52 = vmul.f32 %v6569_v39, %v4039_v23  ;;  %v6572_v23 = vld [vmem:[%s11958_s3 + $0x1c0] sm:$0xff] }
 0x697   :  { %4305 = vrot.lane.b32.xlu1 %v4125_v15, %s6665_s2  ;;  %4307 = vrot.lane.b32.xlu0 %v4126_v61, %s6665_s2  ;;  %v6571_v61 = vld [vmem:[%s11958_s3 + $0x1c8] sm:$0xff] }
 0x698   :  { %v4035_v35 = vpop.permute.xlu1 %4034  ;;  %v4047_v62 = vpop.permute.xlu0 %4046 }
 0x699   :  { %v4127_v48 = vmul.f32 %v6570_v2, %v4035_v35  ;;  %v4130_v25 = vmul.f32 %v6571_v61, %v4047_v62  ;;  %v6574_v62 = vld [vmem:[%s11958_s3 + $0x1d0] sm:$0xff] }
 0x69b   :  { %4309 = vrot.lane.b32.xlu1 %v4127_v48, %s6665_s2  ;;  %4311 = vrot.lane.b32.xlu0 %v4128_v52, %s6665_s2  ;;  %v6573_v52 = vld [vmem:[%s11958_s3 + $0x1d8] sm:$0xff] }
 0x69c   :  { %v4043_v12 = vpop.permute.xlu1 %4042  ;;  %v4055_v15 = vpop.permute.xlu0 %4054 }
 0x69d   :  { %v4129_v39 = vmul.f32 %v6572_v23, %v4043_v12  ;;  %v4132_v48 = vmul.f32 %v6573_v52, %v4055_v15  ;;  %v6576_v15 = vld [vmem:[%s11958_s3 + $0x1e0] sm:$0xff] }
 0x69f   :  { %4313 = vrot.lane.b32.xlu1 %v4129_v39, %s6665_s2  ;;  %4315 = vrot.lane.b32.xlu0 %v4130_v25, %s6665_s2  ;;  %v6575_v25 = vld [vmem:[%s11958_s3 + $0x1e8] sm:$0xff] }
 0x6a0   :  { %v4051_v35 = vpop.permute.xlu1 %4050  ;;  %v4063_v2 = vpop.permute.xlu0 %4062 }
 0x6a1   :  { %v4131_v61 = vmul.f32 %v6574_v62, %v4051_v35  ;;  %v4134_v39 = vmul.f32 %v6575_v25, %v4063_v2  ;;  %v6578_v2 = vld [vmem:[%s11958_s3 + $0x1f0] sm:$0xff] }
 0x6a3   :  { %4317 = vrot.lane.b32.xlu1 %v4131_v61, %s6665_s2  ;;  %4319 = vrot.lane.b32.xlu0 %v4132_v48, %s6665_s2  ;;  %v6577_v48 = vld [vmem:[%s11958_s3 + $0x1f8] sm:$0xff] }
 0x6a4   :  { %v4059_v12 = vpop.permute.xlu1 %4058  ;;  %v4071_v23 = vpop.permute.xlu0 %4070 }
 0x6a5   :  { %v4133_v52 = vmul.f32 %v6576_v15, %v4059_v12  ;;  %v4136_v61 = vmul.f32 %v6577_v48, %v4071_v23 }
 0x6a7   :  { %4321 = vrot.lane.b32.xlu1 %v4133_v52, %s6665_s2  ;;  %4323 = vrot.lane.b32.xlu0 %v4134_v39, %s6665_s2 }
 0x6a8   :  { %v4067_v35 = vpop.permute.xlu1 %4066  ;;  %v10173_v62 = vpop.permute.xlu0 %4203 }
 0x6a9   :  { %12948 = vst [vmem:[#allocation350_spill] sm:$0xff] %v10173_v62  ;;  %v4135_v25 = vmul.f32 %v6578_v2, %v4067_v35 }
 0x6ab   :  { %4325 = vrot.lane.b32.xlu1 %v4135_v25, %s6665_s2  ;;  %4327 = vrot.lane.b32.xlu0 %v4136_v61, %s6665_s2  ;;  %s6668_s2 = smov 68  }
 0x6ac   :  { %v10183_v12 = vpop.permute.xlu1 %4201  ;;  %v10185_v39 = vpop.permute.xlu0 %4207 }
 0x6ad   :  { %12949 = vst [vmem:[#allocation351_spill] sm:$0xff] %v10183_v12  ;;  %12950 = vst [vmem:[#allocation352_spill] sm:$0xff] %v10185_v39  ;;  %v13010_v12 = vld [vmem:[#allocation49_spill] sm:$0xff] }
 0x6af   :  { %4458 = vperm.xlu1 %6430, %v12533_v21   ;;  %4462 = vperm.xlu0 %6431, %v12541_v26  }
 0x6b0   :  { %v10189_v15 = vpop.permute.xlu1 %4205  ;;  %v10191_v23 = vpop.permute.xlu0 %4211 }
 0x6b1   :  { %12951 = vst [vmem:[#allocation353_spill] sm:$0xff] %v10189_v15  ;;  %12952 = vst [vmem:[#allocation354_spill] sm:$0xff] %v10191_v23 }
 0x6b3   :  { %4466 = vperm.xlu1 %6430, %v12545_v32   ;;  %4474 = vperm.xlu0 %6431, %v12549_v57  }
 0x6b4   :  { %v10195_v52 = vpop.permute.xlu1 %4209  ;;  %v10197_v35 = vpop.permute.xlu0 %4215 }
 0x6b5   :  { %12953 = vst [vmem:[#allocation355_spill] sm:$0xff] %v10195_v52  ;;  %12954 = vst [vmem:[#allocation356_spill] sm:$0xff] %v10197_v35 }
 0x6b7   :  { %4470 = vperm.xlu1 %6430, %v12536_v51   ;;  %4482 = vperm.xlu0 %6431, %v12553_v55  }
 0x6b8   :  { %v10201_v48 = vpop.permute.xlu1 %4213  ;;  %v10203_v61 = vpop.permute.xlu0 %4219 }
 0x6b9   :  { %12955 = vst [vmem:[#allocation357_spill] sm:$0xff] %v10201_v48  ;;  %12956 = vst [vmem:[#allocation358_spill] sm:$0xff] %v10203_v61 }
 0x6bb   :  { %4478 = vperm.xlu1 %6430, %v12539_v18   ;;  %4490 = vperm.xlu0 %6431, %v12557_v8  }
 0x6bc   :  { %v10207_v2 = vpop.permute.xlu1 %4217  ;;  %v10209_v25 = vpop.permute.xlu0 %4223 }
 0x6bd   :  { %12957 = vst [vmem:[#allocation359_spill] sm:$0xff] %v10207_v2  ;;  %12958 = vst [vmem:[#allocation360_spill] sm:$0xff] %v10209_v25 }
 0x6bf   :  { %4486 = vperm.xlu1 %6430, %v12543_v13   ;;  %4498 = vperm.xlu0 %6431, %v12561_v22  }
 0x6c0   :  { %v10213_v35 = vpop.permute.xlu1 %4221  ;;  %v10215_v52 = vpop.permute.xlu0 %4227 }
 0x6c1   :  { %12959 = vst [vmem:[#allocation361_spill] sm:$0xff] %v10213_v35  ;;  %12960 = vst [vmem:[#allocation362_spill] sm:$0xff] %v10215_v52 }
 0x6c3   :  { %4494 = vperm.xlu1 %6430, %v12547_v5   ;;  %4506 = vperm.xlu0 %6431, %v12565_v11  }
 0x6c4   :  { %v10219_v61 = vpop.permute.xlu1 %4225  ;;  %v10221_v48 = vpop.permute.xlu0 %4231 }
 0x6c5   :  { %12961 = vst [vmem:[#allocation363_spill] sm:$0xff] %v10219_v61  ;;  %12962 = vst [vmem:[#allocation364_spill] sm:$0xff] %v10221_v48 }
 0x6c7   :  { %4502 = vperm.xlu1 %6430, %v12551_v50   ;;  %4514 = vperm.xlu0 %6431, %v12569_v9  }
 0x6c8   :  { %v10225_v25 = vpop.permute.xlu1 %4229  ;;  %v10227_v2 = vpop.permute.xlu0 %4235 }
 0x6c9   :  { %12963 = vst [vmem:[#allocation365_spill] sm:$0xff] %v10225_v25  ;;  %12964 = vst [vmem:[#allocation366_spill] sm:$0xff] %v10227_v2 }
 0x6cb   :  { %4510 = vperm.xlu1 %6430, %v12555_v20   ;;  %4522 = vperm.xlu0 %6431, %v12573_v59  }
 0x6cc   :  { %v10231_v52 = vpop.permute.xlu1 %4233  ;;  %v10233_v35 = vpop.permute.xlu0 %4239 }
 0x6cd   :  { %12965 = vst [vmem:[#allocation367_spill] sm:$0xff] %v10231_v52  ;;  %12966 = vst [vmem:[#allocation368_spill] sm:$0xff] %v10233_v35  ;;  %v12214_v35 = vmov 7  }
 0x6cf   :  { %4518 = vperm.xlu1 %6430, %v12559_v44   ;;  %4530 = vperm.xlu0 %6431, %v12577_v14  }
 0x6d0   :  { %v10237_v48 = vpop.permute.xlu1 %4237  ;;  %v10239_v61 = vpop.permute.xlu0 %4243 }
 0x6d1   :  { %12967 = vst [vmem:[#allocation369_spill] sm:$0xff] %v10237_v48  ;;  %12968 = vst [vmem:[#allocation370_spill] sm:$0xff] %v10239_v61 }
 0x6d3   :  { %4526 = vperm.xlu1 %6430, %v12563_v56   ;;  %4538 = vperm.xlu0 %6431, %v12581_v54  }
 0x6d4   :  { %v10243_v25 = vpop.permute.xlu1 %4241  ;;  %v10245_v23 = vpop.permute.xlu0 %4247 }
 0x6d5   :  { %12969 = vst [vmem:[#allocation371_spill] sm:$0xff] %v10243_v25  ;;  %12970 = vst [vmem:[#allocation372_spill] sm:$0xff] %v10245_v23 }
 0x6d7   :  { %4534 = vperm.xlu1 %6430, %v12567_v53   ;;  %4546 = vperm.xlu0 %6431, %v12585_v46  }
 0x6d8   :  { %v10249_v15 = vpop.permute.xlu1 %4245  ;;  %v10251_v39 = vpop.permute.xlu0 %4251 }
 0x6d9   :  { %12971 = vst [vmem:[#allocation373_spill] sm:$0xff] %v10249_v15  ;;  %12972 = vst [vmem:[#allocation374_spill] sm:$0xff] %v10251_v39 }
 0x6db   :  { %4542 = vperm.xlu1 %6430, %v12571_v31   ;;  %4554 = vperm.xlu0 %6431, %v12588_v27  }
 0x6dc   :  { %v10255_v61 = vpop.permute.xlu1 %4249  ;;  %v10257_v48 = vpop.permute.xlu0 %4255 }
 0x6dd   :  { %12973 = vst [vmem:[#allocation375_spill] sm:$0xff] %v10255_v61  ;;  %12974 = vst [vmem:[#allocation376_spill] sm:$0xff] %v10257_v48 }
 0x6df   :  { %4550 = vperm.xlu1 %6430, %v12575_v37   ;;  %4562 = vperm.xlu0 %6431, %v12591_v43  }
 0x6e0   :  { %v10261_v23 = vpop.permute.xlu1 %4253  ;;  %v10263_v25 = vpop.permute.xlu0 %4259 }
 0x6e1   :  { %12975 = vst [vmem:[#allocation377_spill] sm:$0xff] %v10261_v23  ;;  %12976 = vst [vmem:[#allocation378_spill] sm:$0xff] %v10263_v25 }
 0x6e3   :  { %4558 = vperm.xlu1 %6430, %v12579_v17   ;;  %4570 = vperm.xlu0 %6431, %v7642_v58  }
 0x6e4   :  { %v10267_v39 = vpop.permute.xlu1 %4257  ;;  %v10269_v15 = vpop.permute.xlu0 %4263 }
 0x6e5   :  { %12977 = vst [vmem:[#allocation379_spill] sm:$0xff] %v10267_v39  ;;  %12978 = vst [vmem:[#allocation380_spill] sm:$0xff] %v10269_v15 }
 0x6e7   :  { %4566 = vperm.xlu1 %6430, %v12583_v45   ;;  %4578 = vperm.xlu0 %6431, %v7666_v30  }
 0x6e8   :  { %v10273_v48 = vpop.permute.xlu1 %4261  ;;  %v10275_v61 = vpop.permute.xlu0 %4267 }
 0x6e9   :  { %12979 = vst [vmem:[#allocation381_spill] sm:$0xff] %v10273_v48  ;;  %12980 = vst [vmem:[#allocation382_spill] sm:$0xff] %v10275_v61 }
 0x6eb   :  { %4574 = vperm.xlu1 %6430, %v7628_v36   ;;  %4586 = vperm.xlu0 %6431, %v7690_v60  }
 0x6ec   :  { %v10279_v25 = vpop.permute.xlu1 %4265  ;;  %v10281_v23 = vpop.permute.xlu0 %4271 }
 0x6ed   :  { %12981 = vst [vmem:[#allocation383_spill] sm:$0xff] %v10279_v25  ;;  %12982 = vst [vmem:[#allocation384_spill] sm:$0xff] %v10281_v23 }
 0x6ef   :  { %4582 = vperm.xlu1 %6430, %v7654_v19   ;;  %4594 = vperm.xlu0 %6431, %v12601_v0  }
 0x6f0   :  { %v10285_v15 = vpop.permute.xlu1 %4269  ;;  %v10287_v39 = vpop.permute.xlu0 %4275 }
 0x6f1   :  { %12983 = vst [vmem:[#allocation385_spill] sm:$0xff] %v10285_v15  ;;  %12984 = vst [vmem:[#allocation386_spill] sm:$0xff] %v10287_v39 }
 0x6f3   :  { %4590 = vperm.xlu1 %6430, %v7678_v33   ;;  %4602 = vperm.xlu0 %6431, %v12605_v24  }
 0x6f4   :  { %v10291_v61 = vpop.permute.xlu1 %4273  ;;  %v10293_v48 = vpop.permute.xlu0 %4279 }
 0x6f5   :  { %12985 = vst [vmem:[#allocation387_spill] sm:$0xff] %v10291_v61  ;;  %12986 = vst [vmem:[#allocation388_spill] sm:$0xff] %v10293_v48 }
 0x6f7   :  { %4598 = vperm.xlu1 %6430, %v7702_v63   ;;  %4610 = vperm.xlu0 %6431, %v12609_v7  }
 0x6f8   :  { %v10297_v23 = vpop.permute.xlu1 %4277  ;;  %v10299_v25 = vpop.permute.xlu0 %4283 }
 0x6f9   :  { %12987 = vst [vmem:[#allocation389_spill] sm:$0xff] %v10297_v23  ;;  %12988 = vst [vmem:[#allocation390_spill] sm:$0xff] %v10299_v25 }
 0x6fb   :  { %4606 = vperm.xlu1 %6430, %v12411_v28   ;;  %4618 = vperm.xlu0 %6431, %v12613_v1  }
 0x6fc   :  { %v10303_v39 = vpop.permute.xlu1 %4281  ;;  %v10305_v15 = vpop.permute.xlu0 %4287 }
 0x6fd   :  { %12989 = vst [vmem:[#allocation391_spill] sm:$0xff] %v10303_v39  ;;  %12990 = vst [vmem:[#allocation392_spill] sm:$0xff] %v10305_v15 }
 0x6ff   :  { %4614 = vperm.xlu1 %6430, %v12599_v42   ;;  %4626 = vperm.xlu0 %6431, %v12617_v6  }
 0x700   :  { %v10309_v48 = vpop.permute.xlu1 %4285  ;;  %v10311_v61 = vpop.permute.xlu0 %4291 }
 0x701   :  { %12991 = vst [vmem:[#allocation393_spill] sm:$0xff] %v10309_v48  ;;  %12992 = vst [vmem:[#allocation394_spill] sm:$0xff] %v10311_v61 }
 0x703   :  { %4622 = vperm.xlu1 %6430, %v12603_v41   ;;  %4634 = vperm.xlu0 %6431, %v12896_v47  }
 0x704   :  { %v10315_v25 = vpop.permute.xlu1 %4289  ;;  %v10317_v23 = vpop.permute.xlu0 %4295 }
 0x705   :  { %12993 = vst [vmem:[#allocation395_spill] sm:$0xff] %v10315_v25  ;;  %12994 = vst [vmem:[#allocation396_spill] sm:$0xff] %v10317_v23 }
 0x707   :  { %4630 = vperm.xlu1 %6430, %v12607_v3   ;;  %4642 = vperm.xlu0 %6431, %v12900_v10  }
 0x708   :  { %v10321_v15 = vpop.permute.xlu1 %4293  ;;  %v10323_v39 = vpop.permute.xlu0 %4299 }
 0x709   :  { %12995 = vst [vmem:[#allocation397_spill] sm:$0xff] %v10321_v15  ;;  %12996 = vst [vmem:[#allocation398_spill] sm:$0xff] %v10323_v39 }
 0x70b   :  { %4638 = vperm.xlu1 %6430, %v12611_v4   ;;  %4650 = vperm.xlu0 %6431, %v12904_v40  }
 0x70c   :  { %v10327_v61 = vpop.permute.xlu1 %4297  ;;  %v10329_v48 = vpop.permute.xlu0 %4303 }
 0x70d   :  { %12997 = vst [vmem:[#allocation399_spill] sm:$0xff] %v10327_v61  ;;  %12998 = vst [vmem:[#allocation400_spill] sm:$0xff] %v10329_v48 }
 0x70f   :  { %4646 = vperm.xlu1 %6430, %v12897_v49   ;;  %4658 = vperm.xlu0 %6431, %v12908_v29  }
 0x710   :  { %v10333_v23 = vpop.permute.xlu1 %4301  ;;  %v10335_v25 = vpop.permute.xlu0 %4307 }
 0x711   :  { %12999 = vst [vmem:[#allocation401_spill] sm:$0xff] %v10333_v23  ;;  %13000 = vst [vmem:[#allocation402_spill] sm:$0xff] %v10335_v25  ;;  %v13005_v25 = vld [vmem:[#allocation29_spill] sm:$0xff] }
 0x713   :  { %4654 = vperm.xlu1 %6430, %v12901_v38   ;;  %4662 = vperm.xlu0 %6431, %v12905_v16  }
 0x714   :  { %v10339_v15 = vpop.permute.xlu1 %4305  ;;  %v10341_v39 = vpop.permute.xlu0 %4311 }
 0x715   :  { %13001 = vst [vmem:[#allocation403_spill] sm:$0xff] %v10339_v15  ;;  %13002 = vst [vmem:[#allocation404_spill] sm:$0xff] %v10341_v39  ;;  %v13008_v39 = vld [vmem:[#allocation40_spill] sm:$0xff] }
 0x717   :  { %6432 = vset.pattern.permute.xlu1 %v12214_v35  ;;  %4670 = vperm.xlu0 %6431, %v12909_v34  }
 0x718   :  { %5162 = vperm.xlu1 %6432, %v12573_v59   ;;  %v10346_v48 = vpop.permute.xlu1 %4309  ;;  %v10348_v23 = vpop.permute.xlu0 %4315 }
 0x719   :  { %13003 = vst [vmem:[#allocation405_spill] sm:$0xff] %v10346_v48  ;;  %13004 = vst [vmem:[#allocation406_spill] sm:$0xff] %v10348_v23  ;;  %v13013_v48 = vld [vmem:[#allocation59_spill] sm:$0xff] }
 0x71b   :  { %4678 = vperm.xlu0 %6431, %v13005_v25  }
 0x71c   :  { %5098 = vperm.xlu1 %6432, %v12533_v21   ;;  %v10352_v61 = vpop.permute.xlu1 %4313  ;;  %v10354_v15 = vpop.permute.xlu0 %4319 }
 0x71d   :  { %13006 = vst [vmem:[#allocation29_spill] sm:$0xff] %v10352_v61  ;;  %13007 = vst [vmem:[#allocation407_spill] sm:$0xff] %v10354_v15  ;;  %v13016_v61 = vld [vmem:[#allocation69_spill] sm:$0xff] }
 0x71f   :  { %4686 = vperm.xlu0 %6431, %v13008_v39  }
 0x720   :  { %5102 = vperm.xlu1 %6432, %v12541_v26   ;;  %v10358_v35 = vpop.permute.xlu1 %4317  ;;  %v10361_v59 = vpop.permute.xlu0 %4323 }
 0x721   :  { %13009 = vst [vmem:[#allocation40_spill] sm:$0xff] %v10358_v35  ;;  %13011 = vst [vmem:[#allocation49_spill] sm:$0xff] %v10361_v59  ;;  %v13017_v59 = vmov 7  }
 0x723   :  { %4694 = vperm.xlu0 %6431, %v13010_v12  }
 0x724   :  { %5174 = vperm.xlu1 %6432, %v12567_v53   ;;  %v10364_v23 = vpop.permute.xlu1 %4321  ;;  %v10368_v21 = vpop.permute.xlu0 %4327 }
 0x725   :  { %13012 = vst [vmem:[#allocation408_spill] sm:$0xff] %v10364_v23  ;;  %13014 = vst [vmem:[#allocation59_spill] sm:$0xff] %v10368_v21  ;;  %v13022_v23 = vld [vmem:[#allocation25_spill] sm:$0xff] }
 0x727   :  { %4702 = vperm.xlu0 %6431, %v13013_v48  }
 0x728   :  { %5110 = vperm.xlu1 %6432, %v12536_v51   ;;  %v10370_v15 = vpop.permute.xlu1 %4325 }
 0x729   :  { %13015 = vst [vmem:[#allocation409_spill] sm:$0xff] %v10370_v15 }
 0x72b   :  { %4710 = vperm.xlu0 %6431, %v13016_v61  }
 0x72c   :  { %5182 = vperm.xlu1 %6432, %v12571_v31  }
 0x72e   :  { %v10374_v26 = vpop.permute.xlu1 %4458  ;;  %v10376_v35 = vpop.permute.xlu0 %4462 }
 0x72f   :  { %6444 = vset.pattern.permute.xlu0 %v13017_v59 }
 0x730   :  { %5118 = vperm.xlu1 %6432, %v12539_v18   ;;  %5166 = vperm.xlu0 %6444, %v12563_v56  }
 0x732   :  { %v10381_v53 = vpop.permute.xlu1 %4466  ;;  %v10383_v51 = vpop.permute.xlu0 %4474 }
 0x734   :  { %5190 = vperm.xlu1 %6432, %v12575_v37   ;;  %5170 = vperm.xlu0 %6444, %v12577_v14  }
 0x736   :  { %v10387_v15 = vpop.permute.xlu1 %4470  ;;  %v10389_v31 = vpop.permute.xlu0 %4482 }
 0x738   :  { %5126 = vperm.xlu1 %6432, %v12543_v13   ;;  %5106 = vperm.xlu0 %6444, %v12545_v32  }
 0x73a   :  { %v10393_v21 = vpop.permute.xlu1 %4478  ;;  %v10395_v18 = vpop.permute.xlu0 %4490 }
 0x73c   :  { %5198 = vperm.xlu1 %6432, %v12579_v17   ;;  %5178 = vperm.xlu0 %6444, %v12581_v54  }
 0x73e   :  { %v10399_v56 = vpop.permute.xlu1 %4486  ;;  %v10401_v37 = vpop.permute.xlu0 %4498 }
 0x740   :  { %5134 = vperm.xlu1 %6432, %v12547_v5   ;;  %5114 = vperm.xlu0 %6444, %v12549_v57  }
 0x742   :  { %v10405_v14 = vpop.permute.xlu1 %4494  ;;  %v10407_v13 = vpop.permute.xlu0 %4506 }
 0x744   :  { %5206 = vperm.xlu1 %6432, %v12583_v45   ;;  %5186 = vperm.xlu0 %6444, %v12585_v46  }
 0x746   :  { %v10411_v32 = vpop.permute.xlu1 %4502  ;;  %v10413_v17 = vpop.permute.xlu0 %4514 }
 0x747   :  { %13018 = vst [vmem:[#allocation69_spill] sm:$0xff] %v10413_v17 }
 0x748   :  { %5142 = vperm.xlu1 %6432, %v12551_v50   ;;  %5122 = vperm.xlu0 %6444, %v12553_v55  }
 0x74a   :  { %v10417_v54 = vpop.permute.xlu1 %4510  ;;  %v10419_v5 = vpop.permute.xlu0 %4522 }
 0x74c   :  { %5214 = vperm.xlu1 %6432, %v7628_v36   ;;  %5194 = vperm.xlu0 %6444, %v12588_v27  }
 0x74e   :  { %v10423_v57 = vpop.permute.xlu1 %4518  ;;  %v10425_v45 = vpop.permute.xlu0 %4530 }
 0x750   :  { %5150 = vperm.xlu1 %6432, %v12555_v20   ;;  %5130 = vperm.xlu0 %6444, %v12557_v8  }
 0x752   :  { %v10429_v46 = vpop.permute.xlu1 %4526  ;;  %v10431_v50 = vpop.permute.xlu0 %4538 }
 0x754   :  { %5222 = vperm.xlu1 %6432, %v7654_v19   ;;  %5202 = vperm.xlu0 %6444, %v12591_v43  }
 0x756   :  { %v10435_v55 = vpop.permute.xlu1 %4534  ;;  %v10437_v36 = vpop.permute.xlu0 %4546 }
 0x758   :  { %5158 = vperm.xlu1 %6432, %v12559_v44   ;;  %5138 = vperm.xlu0 %6444, %v12561_v22  }
 0x75a   :  { %v10441_v27 = vpop.permute.xlu1 %4542  ;;  %v10443_v20 = vpop.permute.xlu0 %4554 }
 0x75c   :  { %5294 = vperm.xlu1 %6432, %v12901_v38   ;;  %5210 = vperm.xlu0 %6444, %v7642_v58  }
 0x75e   :  { %v10447_v8 = vpop.permute.xlu1 %4550  ;;  %v10449_v19 = vpop.permute.xlu0 %4562 }
 0x760   :  { %5230 = vperm.xlu1 %6432, %v7678_v33   ;;  %5146 = vperm.xlu0 %6444, %v12565_v11  }
 0x762   :  { %v10453_v43 = vpop.permute.xlu1 %4558  ;;  %v10455_v44 = vpop.permute.xlu0 %4570 }
 0x764   :  { %5298 = vperm.xlu1 %6432, %v12908_v29   ;;  %5218 = vperm.xlu0 %6444, %v7666_v30   ;;  %v13021_v30 = vmov 6  }
 0x766   :  { %v10459_v22 = vpop.permute.xlu1 %4566  ;;  %v10461_v38 = vpop.permute.xlu0 %4578 }
 0x768   :  { %5302 = vperm.xlu1 %6432, %v12905_v16   ;;  %5154 = vperm.xlu0 %6444, %v12569_v9  }
 0x76a   :  { %v10465_v58 = vpop.permute.xlu1 %4574  ;;  %v10467_v33 = vpop.permute.xlu0 %4586 }
 0x76b   :  { %13019 = vst [vmem:[#allocation410_spill] sm:$0xff] %v10467_v33 }
 0x76c   :  { %5238 = vperm.xlu1 %6432, %v7702_v63   ;;  %5290 = vperm.xlu0 %6444, %v12904_v40  }
 0x76e   :  { %v10471_v11 = vpop.permute.xlu1 %4582  ;;  %v10473_v29 = vpop.permute.xlu0 %4594 }
 0x76f   :  { %13020 = vst [vmem:[#allocation411_spill] sm:$0xff] %v10473_v29 }
 0x770   :  { %6433 = vset.pattern.permute.xlu1 %v13021_v30  ;;  %5226 = vperm.xlu0 %6444, %v7690_v60  }
 0x771   :  { %4666 = vperm.xlu1 %6433, %v13022_v23  }
 0x772   :  { %v10478_v16 = vpop.permute.xlu1 %4590  ;;  %v10480_v9 = vpop.permute.xlu0 %4602 }
 0x773   :  { %13023 = vst [vmem:[#allocation25_spill] sm:$0xff] %v10480_v9 }
 0x774   :  { %5234 = vperm.xlu0 %6444, %v12601_v0  }
 0x775   :  { %6434 = vset.pattern.permute.xlu1 %v13017_v59 }
 0x776   :  { %5306 = vperm.xlu1 %6434, %v13022_v23   ;;  %v10485_v63 = vpop.permute.xlu1 %4598  ;;  %v10487_v40 = vpop.permute.xlu0 %4610 }
 0x777   :  { %13024 = vst [vmem:[#allocation412_spill] sm:$0xff] %v10487_v40 }
 0x778   :  { %5242 = vperm.xlu0 %6444, %v12605_v24  }
 0x77a   :  { %5310 = vperm.xlu1 %6434, %v12909_v34   ;;  %v10491_v60 = vpop.permute.xlu1 %4606  ;;  %v10493_v29 = vpop.permute.xlu0 %4618  ;;  %v13030_v34 = vld [vmem:[#allocation34_spill] sm:$0xff] }
 0x77b   :  { %13025 = vst [vmem:[#allocation413_spill] sm:$0xff] %v10493_v29 }
 0x77c   :  { %5250 = vperm.xlu0 %6444, %v12609_v7  }
 0x77e   :  { %5246 = vperm.xlu1 %6434, %v12411_v28   ;;  %v10497_v0 = vpop.permute.xlu1 %4614  ;;  %v10499_v9 = vpop.permute.xlu0 %4626 }
 0x77f   :  { %13026 = vst [vmem:[#allocation414_spill] sm:$0xff] %v10497_v0  ;;  %13027 = vst [vmem:[#allocation415_spill] sm:$0xff] %v10499_v9 }
 0x780   :  { %5258 = vperm.xlu0 %6444, %v12613_v1  }
 0x782   :  { %6435 = vset.pattern.permute.xlu1 %v13021_v30  ;;  %v10503_v23 = vpop.permute.xlu1 %4622  ;;  %v10505_v24 = vpop.permute.xlu0 %4634 }
 0x783   :  { %13028 = vst [vmem:[#allocation416_spill] sm:$0xff] %v10503_v23  ;;  %13029 = vst [vmem:[#allocation417_spill] sm:$0xff] %v10505_v24  ;;  %4674 = vperm.xlu1 %6435, %v13030_v34  }
 0x784   :  { %5266 = vperm.xlu0 %6444, %v12617_v6   ;;  %v13035_v6 = vld [vmem:[#allocation23_spill] sm:$0xff] }
 0x785   :  { %v4730_v24 = vmul.f32 %v13035_v6, %v10429_v46 }
 0x786   :  { %v10509_v29 = vpop.permute.xlu1 %4630  ;;  %v10511_v7 = vpop.permute.xlu0 %4642 }
 0x787   :  { %13031 = vst [vmem:[#allocation34_spill] sm:$0xff] %v10509_v29  ;;  %13032 = vst [vmem:[#allocation418_spill] sm:$0xff] %v10511_v7  ;;  %6436 = vset.pattern.permute.xlu1 %v13017_v59 }
 0x788   :  { %5314 = vperm.xlu1 %6436, %v13030_v34   ;;  %5274 = vperm.xlu0 %6444, %v12896_v47   ;;  %v13038_v47 = vld [vmem:[#allocation15_spill] sm:$0xff] }
 0x789   :  { %v4714_v34 = vmul.f32 %v13038_v47, %v10376_v35 }
 0x78a   :  { %v10516_v28 = vpop.permute.xlu1 %4638  ;;  %v10518_v1 = vpop.permute.xlu0 %4650 }
 0x78b   :  { %13033 = vst [vmem:[#allocation419_spill] sm:$0xff] %v10516_v28  ;;  %13034 = vst [vmem:[#allocation420_spill] sm:$0xff] %v10518_v1 }
 0x78c   :  { %5318 = vperm.xlu1 %6436, %v13005_v25   ;;  %5282 = vperm.xlu0 %6444, %v12900_v10   ;;  %v13039_v10 = vld [vmem:[#allocation44_spill] sm:$0xff] }
 0x78e   :  { %v10524_v9 = vpop.permute.xlu1 %4646  ;;  %v10526_v7 = vpop.permute.xlu0 %4658 }
 0x78f   :  { %13036 = vst [vmem:[#allocation23_spill] sm:$0xff] %v10524_v9  ;;  %13037 = vst [vmem:[#allocation421_spill] sm:$0xff] %v10526_v7  ;;  %v13044_v7 = vld [vmem:[#allocation55_spill] sm:$0xff] }
 0x790   :  { %5254 = vperm.xlu1 %6436, %v12599_v42   ;;  %4875 = vrot.lane.b32.xlu0 %v4730_v24, %s6668_s2 }
 0x792   :  { %v10532_v40 = vpop.permute.xlu1 %4654  ;;  %v10534_v25 = vpop.permute.xlu0 %4662 }
 0x794   :  { %6437 = vset.pattern.permute.xlu1 %v13021_v30  ;;  %4843 = vrot.lane.b32.xlu0 %v4714_v34, %s6668_s2 }
 0x795   :  { %4682 = vperm.xlu1 %6437, %v13039_v10  }
 0x796   :  { %v10539_v46 = vpop.permute.xlu0 %4670 }
 0x797   :  { %v10541_v9 = vpop.permute.xlu1 %5162 }
 0x799   :  { %6438 = vset.pattern.permute.xlu1 %v13017_v59 }
 0x79a   :  { %5322 = vperm.xlu1 %6438, %v13039_v10   ;;  %v10545_v42 = vpop.permute.xlu0 %4678 }
 0x79b   :  { %13040 = vst [vmem:[#allocation15_spill] sm:$0xff] %v10545_v42  ;;  %v10547_v35 = vpop.permute.xlu1 %5098 }
 0x79e   :  { %5326 = vperm.xlu1 %6438, %v13008_v39   ;;  %v10550_v24 = vpop.permute.xlu0 %4686 }
 0x79f   :  { %13041 = vst [vmem:[#allocation44_spill] sm:$0xff] %v10550_v24  ;;  %v5103_v28 = vpop.permute.xlu1 %5102 }
 0x7a2   :  { %5262 = vperm.xlu1 %6438, %v12603_v41   ;;  %v10553_v34 = vpop.permute.xlu0 %4694 }
 0x7a3   :  { %13042 = vst [vmem:[#allocation422_spill] sm:$0xff] %v10553_v34  ;;  %v5175_v29 = vpop.permute.xlu1 %5174 }
 0x7a6   :  { %6439 = vset.pattern.permute.xlu1 %v13021_v30  ;;  %v10556_v23 = vpop.permute.xlu0 %4702 }
 0x7a7   :  { %13043 = vst [vmem:[#allocation423_spill] sm:$0xff] %v10556_v23  ;;  %4690 = vperm.xlu1 %6439, %v13044_v7   ;;  %v5111_v10 = vpop.permute.xlu1 %5110 }
 0x7aa   :  { %v10559_v62 = vpop.permute.xlu0 %4710 }
 0x7ab   :  { %13045 = vst [vmem:[#allocation55_spill] sm:$0xff] %v10559_v62  ;;  %6440 = vset.pattern.permute.xlu1 %v13017_v59  ;;  %v5183_v39 = vpop.permute.xlu1 %5182  ;;  %v5354_v62 = vmul.f32 %v13038_v47, %v5103_v28 }
 0x7ac   :  { %5330 = vperm.xlu1 %6440, %v13044_v7  }
 0x7af   :  { %v5119_v24 = vpop.permute.xlu1 %5118  ;;  %v5167_v52 = vpop.permute.xlu0 %5166 }
 0x7b0   :  { %v5370_v41 = vmul.f32 %v13035_v6, %v5167_v52  ;;  %5334 = vperm.xlu1 %6440, %v13010_v12   ;;  %v13046_v52 = vld [vmem:[#allocation339_spill] sm:$0xff]  ;;  %v13047_v6 = vld [vmem:[#allocation65_spill] sm:$0xff] }
 0x7b1   :  { %v4732_v12 = vmul.f32 %v13046_v52, %v10435_v55  ;;  %v5372_v33 = vmul.f32 %v13046_v52, %v5175_v29  ;;  %v13049_v29 = vld [vmem:[#allocation341_spill] sm:$0xff] }
 0x7b2   :  { %5515 = vrot.lane.b32.xlu0 %v5370_v41, %s6669_s10  ;;  %v4734_v52 = vmul.f32 %v13049_v29, %v10441_v27 }
 0x7b3   :  { %v10566_v23 = vpop.permute.xlu1 %5190  ;;  %v10568_v34 = vpop.permute.xlu0 %5170 }
 0x7b4   :  { %5270 = vperm.xlu1 %6440, %v12607_v3   ;;  %v13048_v3 = vld [vmem:[#allocation17_spill] sm:$0xff] }
 0x7b6   :  { %5483 = vrot.lane.b32.xlu0 %v5354_v62, %s6669_s10  ;;  %v4716_v62 = vmul.f32 %v13048_v3, %v10387_v15  ;;  %v5356_v15 = vmul.f32 %v13048_v3, %v5111_v10 }
 0x7b7   :  { %v10573_v7 = vpop.permute.xlu1 %5126  ;;  %v10575_v2 = vpop.permute.xlu0 %5106 }
 0x7b8   :  { %6441 = vset.pattern.permute.xlu1 %v13021_v30 }
 0x7b9   :  { %4698 = vperm.xlu1 %6441, %v13047_v6  }
 0x7ba   :  { %4879 = vrot.lane.b32.xlu0 %v4732_v12, %s6668_s2 }
 0x7bb   :  { %v10582_v41 = vpop.permute.xlu1 %5198  ;;  %v10584_v28 = vpop.permute.xlu0 %5178 }
 0x7bd   :  { %6442 = vset.pattern.permute.xlu1 %v13017_v59 }
 0x7be   :  { %5338 = vperm.xlu1 %6442, %v13047_v6   ;;  %4847 = vrot.lane.b32.xlu0 %v4716_v62, %s6668_s2 }
 0x7bf   :  { %v10591_v55 = vpop.permute.xlu1 %5134  ;;  %v10593_v47 = vpop.permute.xlu0 %5114 }
 0x7c2   :  { %5342 = vperm.xlu1 %6442, %v13013_v48   ;;  %5519 = vrot.lane.b32.xlu0 %v5372_v33, %s6669_s10  ;;  %v13050_v48 = vld [vmem:[#allocation75_spill] sm:$0xff] }
 0x7c3   :  { %v10598_v12 = vpop.permute.xlu1 %5206  ;;  %v10600_v0 = vpop.permute.xlu0 %5186 }
 0x7c6   :  { %5278 = vperm.xlu1 %6442, %v12611_v4   ;;  %5487 = vrot.lane.b32.xlu0 %v5356_v15, %s6669_s10  ;;  %v13051_v4 = vld [vmem:[#allocation19_spill] sm:$0xff] }
 0x7c7   :  { %v10605_v6 = vpop.permute.xlu1 %5142  ;;  %v10607_v62 = vpop.permute.xlu0 %5122  ;;  %v4718_v3 = vmul.f32 %v13051_v4, %v10393_v21  ;;  %v5358_v21 = vmul.f32 %v13051_v4, %v5119_v24 }
 0x7ca   :  { %6443 = vset.pattern.permute.xlu1 %v13021_v30  ;;  %4883 = vrot.lane.b32.xlu0 %v4734_v52, %s6668_s2  ;;  %v5374_v30 = vmul.f32 %v13049_v29, %v5183_v39  ;;  %v13052_v39 = vld [vmem:[#allocation343_spill] sm:$0xff] }
 0x7cb   :  { %4706 = vperm.xlu1 %6443, %v13050_v48   ;;  %v10614_v33 = vpop.permute.xlu1 %5214  ;;  %v10616_v10 = vpop.permute.xlu0 %5194  ;;  %v4736_v29 = vmul.f32 %v13052_v39, %v10447_v8  ;;  %v10656_v8 = vld [vmem:[%s11958_s3] sm:$0xff] }
 0x7ce   :  { %4851 = vrot.lane.b32.xlu0 %v4718_v3, %s6668_s2 }
 0x7cf   :  { %6445 = vset.pattern.permute.xlu1 %v13017_v59  ;;  %v10622_v15 = vpop.permute.xlu1 %5150  ;;  %v10624_v27 = vpop.permute.xlu0 %5130 }
 0x7d0   :  { %5346 = vperm.xlu1 %6445, %v13050_v48   ;;  %v13053_v48 = vld [vmem:[#allocation338_spill] sm:$0xff] }
 0x7d2   :  { %5523 = vrot.lane.b32.xlu0 %v5374_v30, %s6669_s10  ;;  %v4729_v30 = vmul.f32 %v13053_v48, %v10419_v5 }
 0x7d3   :  { %v10629_v52 = vpop.permute.xlu1 %5222  ;;  %v10631_v1 = vpop.permute.xlu0 %5202 }
 0x7d4   :  { %5350 = vperm.xlu1 %6445, %v13016_v61   ;;  %v13054_v61 = vld [vmem:[#allocation21_spill] sm:$0xff] }
 0x7d5   :  { %v4720_v4 = vmul.f32 %v13054_v61, %v10399_v56  ;;  %v5369_v56 = vmul.f32 %v13053_v48, %v10541_v9  ;;  %v13055_v9 = vld [vmem:[#allocation344_spill] sm:$0xff] }
 0x7d6   :  { %5491 = vrot.lane.b32.xlu0 %v5358_v21, %s6669_s10  ;;  %v4738_v48 = vmul.f32 %v13055_v9, %v10453_v43 }
 0x7d7   :  { %v10636_v59 = vpop.permute.xlu1 %5158  ;;  %v10638_v3 = vpop.permute.xlu0 %5138 }
 0x7d8   :  { %5286 = vperm.xlu1 %6445, %v12897_v49   ;;  %v4713_v49 = vmul.f32 %v10656_v8, %v10374_v26  ;;  %v5360_v26 = vmul.f32 %v13054_v61, %v10573_v7 }
 0x7da   :  { %4887 = vrot.lane.b32.xlu0 %v4736_v29, %s6668_s2  ;;  %v5376_v29 = vmul.f32 %v13052_v39, %v10566_v23 }
 0x7db   :  { %v10646_v42 = vpop.permute.xlu1 %5294  ;;  %v10648_v24 = vpop.permute.xlu0 %5210 }
 0x7dc   :  { %4873 = vrot.lane.b32.xlu1 %v4729_v30, %s6668_s2 }
 0x7de   :  { %4855 = vrot.lane.b32.xlu0 %v4720_v4, %s6668_s2  ;;  %v5353_v4 = vmul.f32 %v10656_v8, %v10547_v35  ;;  %v10698_v35 = vld [vmem:[%s11958_s3 + $0x48] sm:$0xff] }
 0x7df   :  { %v10661_v5 = vpop.permute.xlu1 %5230  ;;  %v10663_v21 = vpop.permute.xlu0 %5146  ;;  %13057 = vst [vmem:[#allocation339_spill] sm:$0xff] %v10698_v35 }
 0x7e0   :  { %4841 = vrot.lane.b32.xlu1 %v4713_v49, %s6668_s2  ;;  %v13056_v49 = vld [vmem:[#allocation340_spill] sm:$0xff] }
 0x7e2   :  { %5527 = vrot.lane.b32.xlu0 %v5376_v29, %s6669_s10  ;;  %v4731_v29 = vmul.f32 %v13056_v49, %v10425_v45  ;;  %v10706_v45 = vld [vmem:[%s11958_s3 + $0x10] sm:$0xff] }
 0x7e3   :  { %v10671_v30 = vpop.permute.xlu1 %5298  ;;  %v10673_v17 = vpop.permute.xlu0 %5218  ;;  %v4715_v43 = vmul.f32 %v10706_v45, %v10381_v53  ;;  %v5362_v53 = vmul.f32 %v10698_v35, %v10591_v55  ;;  %v13059_v55 = vld [vmem:[#allocation342_spill] sm:$0xff] }
 0x7e4   :  { %5513 = vrot.lane.b32.xlu1 %v5369_v56, %s6669_s10  ;;  %v4722_v56 = vmul.f32 %v10698_v35, %v10405_v14  ;;  %v5371_v14 = vmul.f32 %v13056_v49, %v10568_v34  ;;  %v13058_v34 = vld [vmem:[#allocation345_spill] sm:$0xff] }
 0x7e5   :  { %v4740_v49 = vmul.f32 %v13058_v34, %v10459_v22 }
 0x7e6   :  { %5495 = vrot.lane.b32.xlu0 %v5360_v26, %s6669_s10 }
 0x7e7   :  { %v10681_v23 = vpop.permute.xlu1 %5302  ;;  %v10683_v39 = vpop.permute.xlu0 %5154 }
 0x7e8   :  { %5481 = vrot.lane.b32.xlu1 %v5353_v4, %s6669_s10  ;;  %v5378_v4 = vmul.f32 %v13055_v9, %v10582_v41  ;;  %v5355_v41 = vmul.f32 %v10706_v45, %v10575_v2  ;;  %v10744_v2 = vld [vmem:[%s11958_s3 + $0x58] sm:$0xff] }
 0x7e9   :  { %13060 = vst [vmem:[#allocation65_spill] sm:$0xff] %v10744_v2 }
 0x7ea   :  { %4891 = vrot.lane.b32.xlu0 %v4738_v48, %s6668_s2 }
 0x7eb   :  { %v10691_v7 = vpop.permute.xlu1 %5238  ;;  %v10693_v61 = vpop.permute.xlu0 %5290 }
 0x7ec   :  { %4877 = vrot.lane.b32.xlu1 %v4731_v29, %s6668_s2 }
 0x7ee   :  { %4859 = vrot.lane.b32.xlu0 %v4722_v56, %s6668_s2 }
 0x7ef   :  { %v10711_v26 = vpop.permute.xlu0 %5226 }
 0x7f0   :  { %v10715_v48 = vpop.permute.xlu1 %4666  ;;  %4845 = vrot.lane.b32.xlu1 %v4715_v43, %s6668_s2 }
 0x7f2   :  { %5531 = vrot.lane.b32.xlu0 %v5378_v4, %s6669_s10  ;;  %v4733_v4 = vmul.f32 %v13059_v55, %v10431_v50  ;;  %v10756_v50 = vld [vmem:[%s11958_s3 + $0x20] sm:$0xff] }
 0x7f3   :  { %v10721_v29 = vpop.permute.xlu0 %5234 }
 0x7f4   :  { %5517 = vrot.lane.b32.xlu1 %v5371_v14, %s6669_s10  ;;  %v4724_v14 = vmul.f32 %v10744_v2, %v10411_v32  ;;  %v5373_v32 = vmul.f32 %v13059_v55, %v10584_v28  ;;  %v13063_v28 = vld [vmem:[#allocation346_spill] sm:$0xff] }
 0x7f5   :  { %v10726_v56 = vpop.permute.xlu1 %5306 }
 0x7f6   :  { %5499 = vrot.lane.b32.xlu0 %v5362_v53, %s6669_s10 }
 0x7f7   :  { %v10731_v9 = vpop.permute.xlu0 %5242 }
 0x7f8   :  { %5485 = vrot.lane.b32.xlu1 %v5355_v41, %s6669_s10  ;;  %v4717_v41 = vmul.f32 %v10756_v50, %v10383_v51  ;;  %v5357_v51 = vmul.f32 %v10756_v50, %v10593_v47 }
 0x7f9   :  { %v10736_v43 = vpop.permute.xlu1 %5310 }
 0x7fa   :  { %4895 = vrot.lane.b32.xlu0 %v4740_v49, %s6668_s2  ;;  %v5380_v49 = vmul.f32 %v13058_v34, %v10598_v12  ;;  %v4742_v34 = vmul.f32 %v13063_v28, %v10465_v58  ;;  %v10797_v58 = vld [vmem:[%s11958_s3 + $0x68] sm:$0xff] }
 0x7fb   :  { %v10748_v53 = vpop.permute.xlu0 %5250  ;;  %13065 = vst [vmem:[#allocation19_spill] sm:$0xff] %v10797_v58 }
 0x7fc   :  { %13061 = vst [vmem:[#allocation17_spill] sm:$0xff] %v10748_v53  ;;  %4881 = vrot.lane.b32.xlu1 %v4733_v4, %s6668_s2  ;;  %v5364_v53 = vmul.f32 %v10744_v2, %v10605_v6  ;;  %v10787_v6 = vld [vmem:[%s11958_s3 + $0xb0] sm:$0xff] }
 0x7fd   :  { %v10751_v22 = vpop.permute.xlu1 %5246 }
 0x7fe   :  { %4863 = vrot.lane.b32.xlu0 %v4724_v14, %s6668_s2  ;;  %v4735_v14 = vmul.f32 %v10787_v6, %v10437_v36 }
 0x7ff   :  { %v10766_v4 = vpop.permute.xlu0 %5258 }
 0x800   :  { %4849 = vrot.lane.b32.xlu1 %v4717_v41, %s6668_s2  ;;  %13062 = vst [vmem:[#allocation341_spill] sm:$0xff] %v10766_v4  ;;  %v10805_v41 = vld [vmem:[%s11958_s3 + $0x30] sm:$0xff] }
 0x801   :  { %v4719_v36 = vmul.f32 %v10805_v41, %v10389_v31 }
 0x802   :  { %v10768_v35 = vpop.permute.xlu1 %4674  ;;  %5535 = vrot.lane.b32.xlu0 %v5380_v49, %s6669_s10 }
 0x803   :  { %v10781_v55 = vpop.permute.xlu0 %5266 }
 0x804   :  { %5521 = vrot.lane.b32.xlu1 %v5373_v32, %s6669_s10  ;;  %13064 = vst [vmem:[#allocation75_spill] sm:$0xff] %v10781_v55 }
 0x806   :  { %5503 = vrot.lane.b32.xlu0 %v5364_v53, %s6669_s10  ;;  %v4726_v53 = vmul.f32 %v10797_v58, %v10417_v54  ;;  %v5375_v54 = vmul.f32 %v10787_v6, %v10600_v0 }
 0x807   :  { %v10777_v12 = vpop.permute.xlu1 %5314  ;;  %v10809_v49 = vpop.permute.xlu0 %5274 }
 0x808   :  { %5489 = vrot.lane.b32.xlu1 %v5357_v51, %s6669_s10  ;;  %13066 = vst [vmem:[#allocation343_spill] sm:$0xff] %v10809_v49  ;;  %v5382_v51 = vmul.f32 %v13063_v28, %v10614_v33  ;;  %v13069_v33 = vld [vmem:[#allocation347_spill] sm:$0xff] }
 0x809   :  { %v4744_v28 = vmul.f32 %v13069_v33, %v10471_v11  ;;  %v10848_v11 = vld [vmem:[%s11958_s3 + $0x78] sm:$0xff] }
 0x80a   :  { %4899 = vrot.lane.b32.xlu0 %v4742_v34, %s6668_s2  ;;  %v5366_v34 = vmul.f32 %v10797_v58, %v10622_v15  ;;  %v10838_v15 = vld [vmem:[%s11958_s3 + $0xc0] sm:$0xff]  ;;  %13071 = vst [vmem:[#allocation340_spill] sm:$0xff] %v10848_v11 }
 0x80b   :  { %v10792_v47 = vpop.permute.xlu1 %5318  ;;  %v10822_v31 = vpop.permute.xlu0 %5282 }
 0x80c   :  { %4885 = vrot.lane.b32.xlu1 %v4735_v14, %s6668_s2  ;;  %13067 = vst [vmem:[#allocation338_spill] sm:$0xff] %v10822_v31 }
 0x80e   :  { %4867 = vrot.lane.b32.xlu0 %v4726_v53, %s6668_s2  ;;  %v5359_v53 = vmul.f32 %v10805_v41, %v10607_v62  ;;  %v4728_v62 = vmul.f32 %v10848_v11, %v10423_v57 }
 0x80f   :  { %v10812_v32 = vpop.permute.xlu1 %5254 }
 0x810   :  { %4853 = vrot.lane.b32.xlu1 %v4719_v36, %s6668_s2  ;;  %v4737_v36 = vmul.f32 %v10838_v15, %v10443_v20  ;;  %v10858_v20 = vld [vmem:[%s11958_s3 + $0x40] sm:$0xff] }
 0x811   :  { %13072 = vst [vmem:[#allocation345_spill] sm:$0xff] %v10858_v20 }
 0x812   :  { %5539 = vrot.lane.b32.xlu0 %v5382_v51, %s6669_s10  ;;  %v10842_v51 = vpop.permute.xlu0 %4875 }
 0x814   :  { %v10824_v14 = vpop.permute.xlu1 %4682  ;;  %5525 = vrot.lane.b32.xlu1 %v5375_v54, %s6669_s10 }
 0x815   :  { %13068 = vst [vmem:[#allocation21_spill] sm:$0xff] %v10824_v14 }
 0x816   :  { %5507 = vrot.lane.b32.xlu0 %v5366_v34, %s6669_s10  ;;  %v4721_v34 = vmul.f32 %v10858_v20, %v10395_v18  ;;  %v10870_v33 = vpop.permute.xlu0 %4843  ;;  %v5368_v18 = vmul.f32 %v10848_v11, %v10636_v59  ;;  %v10896_v59 = vld [vmem:[%s11958_s3 + $0xd0] sm:$0xff] }
 0x817   :  { %13076 = vst [vmem:[#allocation347_spill] sm:$0xff] %v10896_v59 }
 0x818   :  { %5493 = vrot.lane.b32.xlu1 %v5359_v53, %s6669_s10  ;;  %v10866_v53 = vld [vmem:[%s11958_s3 + $0xf8] sm:$0xff] }
 0x819   :  { %v10833_v0 = vpop.permute.xlu1 %5322  ;;  %13073 = vst [vmem:[#allocation342_spill] sm:$0xff] %v10866_v53  ;;  %v5384_v57 = vmul.f32 %v10866_v53, %v10629_v52  ;;  %v5361_v52 = vmul.f32 %v10858_v20, %v10624_v27 }
 0x81a   :  { %13070 = vst [vmem:[#allocation344_spill] sm:$0xff] %v10833_v0  ;;  %4903 = vrot.lane.b32.xlu0 %v4744_v28, %s6668_s2  ;;  %v13109_v0 = vld [vmem:[#allocation230_spill] sm:$0xff] }
 0x81c   :  { %4889 = vrot.lane.b32.xlu1 %v4737_v36, %s6668_s2  ;;  %v5377_v36 = vmul.f32 %v10838_v15, %v10616_v10 }
 0x81d   :  { %v10853_v54 = vpop.permute.xlu1 %5326 }
 0x81e   :  { %4871 = vrot.lane.b32.xlu0 %v4728_v62, %s6668_s2 }
 0x820   :  { %4857 = vrot.lane.b32.xlu1 %v4721_v34, %s6668_s2  ;;  %v13075_v34 = vld [vmem:[#allocation348_spill] sm:$0xff] }
 0x821   :  { %v10873_v28 = vpop.permute.xlu1 %5262  ;;  %v4762_v49 = vmul.f32 %v13075_v34, %v10532_v40  ;;  %v6592_v40 = vld [vmem:[%s11958_s3 + $0x108] sm:$0xff]  ;;  %v5402_v11 = vmul.f32 %v13075_v34, %v10646_v42  ;;  %v13079_v34 = vld [vmem:[#allocation349_spill] sm:$0xff] }
 0x822   :  { %5543 = vrot.lane.b32.xlu0 %v5384_v57, %s6669_s10  ;;  %v4739_v57 = vmul.f32 %v10896_v59, %v10449_v19 }
 0x824   :  { %5529 = vrot.lane.b32.xlu1 %v5377_v36, %s6669_s10  ;;  %v10881_v62 = vpop.permute.xlu0 %5515  ;;  %v4746_v36 = vmul.f32 %v6592_v40, %v10478_v16 }
 0x826   :  { %v10885_v31 = vpop.permute.xlu1 %4690  ;;  %5511 = vrot.lane.b32.xlu0 %v5368_v18, %s6669_s10 }
 0x827   :  { %13074 = vst [vmem:[#allocation346_spill] sm:$0xff] %v10885_v31 }
 0x828   :  { %5497 = vrot.lane.b32.xlu1 %v5361_v52, %s6669_s10  ;;  %v10891_v10 = vpop.permute.xlu0 %5483  ;;  %v10913_v52 = vld [vmem:[%s11958_s3 + $0x50] sm:$0xff] }
 0x829   :  { %13078 = vst [vmem:[#allocation424_spill] sm:$0xff] %v10913_v52  ;;  %v4723_v19 = vmul.f32 %v10913_v52, %v10401_v37  ;;  %v5386_v37 = vmul.f32 %v6592_v40, %v10661_v5  ;;  %v5363_v42 = vmul.f32 %v10913_v52, %v10638_v3  ;;  %v10947_v5 = vld [vmem:[%s11958_s3 + $0xe0] sm:$0xff] }
 0x82a   :  { %4939 = vrot.lane.b32.xlu0 %v4762_v49, %s6668_s2  ;;  %13081 = vst [vmem:[#allocation425_spill] sm:$0xff] %v10947_v5  ;;  %v13101_v52 = vld [vmem:[#allocation170_spill] sm:$0xff] }
 0x82b   :  { %v10901_v27 = vpop.permute.xlu1 %5330 }
 0x82c   :  { %13077 = vst [vmem:[#allocation348_spill] sm:$0xff] %v10901_v27  ;;  %4893 = vrot.lane.b32.xlu1 %v4739_v57, %s6668_s2  ;;  %v10908_v18 = vpop.permute.xlu0 %4879  ;;  %v5379_v57 = vmul.f32 %v10896_v59, %v10631_v1 }
 0x82e   :  { %4907 = vrot.lane.b32.xlu0 %v4746_v36, %s6668_s2 }
 0x82f   :  { %v10918_v49 = vpop.permute.xlu1 %5334 }
 0x830   :  { %4861 = vrot.lane.b32.xlu1 %v4723_v19, %s6668_s2  ;;  %v10923_v16 = vpop.permute.xlu0 %4847  ;;  %v4764_v19 = vmul.f32 %v13079_v34, %v10534_v25  ;;  %v6595_v25 = vld [vmem:[%s11958_s3 + $0x118] sm:$0xff] }
 0x831   :  { %v4748_v3 = vmul.f32 %v6595_v25, %v10485_v63 }
 0x832   :  { %5579 = vrot.lane.b32.xlu0 %v5402_v11, %s6669_s10  ;;  %v4741_v11 = vmul.f32 %v10947_v5, %v10455_v44 }
 0x833   :  { %v10928_v53 = vpop.permute.xlu1 %5270 }
 0x834   :  { %5533 = vrot.lane.b32.xlu1 %v5379_v57, %s6669_s10  ;;  %v10932_v36 = vpop.permute.xlu0 %5519 }
 0x836   :  { %5547 = vrot.lane.b32.xlu0 %v5386_v37, %s6669_s10  ;;  %v10964_v37 = vld [vmem:[%s11958_s3 + $0x60] sm:$0xff] }
 0x837   :  { %13083 = vst [vmem:[#allocation427_spill] sm:$0xff] %v10964_v37  ;;  %v4725_v44 = vmul.f32 %v10964_v37, %v10407_v13 }
 0x838   :  { %v10939_v58 = vpop.permute.xlu1 %4698  ;;  %5501 = vrot.lane.b32.xlu1 %v5363_v42, %s6669_s10  ;;  %v10942_v1 = vpop.permute.xlu0 %5487  ;;  %v5404_v42 = vmul.f32 %v13079_v34, %v10681_v23  ;;  %v5365_v23 = vmul.f32 %v10964_v37, %v10663_v21  ;;  %v6597_v34 = vld [vmem:[%s11958_s3 + $0x1a8] sm:$0xff] }
 0x839   :  { %13080 = vst [vmem:[#allocation349_spill] sm:$0xff] %v10939_v58 }
 0x83a   :  { %4943 = vrot.lane.b32.xlu0 %v4764_v19, %s6668_s2 }
 0x83c   :  { %4897 = vrot.lane.b32.xlu1 %v4741_v11, %s6668_s2  ;;  %v10957_v40 = vpop.permute.xlu0 %4883  ;;  %v5381_v11 = vmul.f32 %v10947_v5, %v10648_v24  ;;  %v4766_v24 = vmul.f32 %v6597_v34, %v10539_v46  ;;  %v6599_v46 = vld [vmem:[%s11958_s3 + $0x128] sm:$0xff] }
 0x83d   :  { %v10959_v57 = vpop.permute.xlu1 %5338  ;;  %v5390_v37 = vmul.f32 %v6599_v46, %v10751_v22 }
 0x83e   :  { %13082 = vst [vmem:[#allocation426_spill] sm:$0xff] %v10959_v57  ;;  %4911 = vrot.lane.b32.xlu0 %v4748_v3, %s6668_s2  ;;  %v5388_v57 = vmul.f32 %v6595_v25, %v10691_v7  ;;  %v10998_v25 = vld [vmem:[%s11958_s3 + $0xf0] sm:$0xff] }
 0x83f   :  { %13084 = vst [vmem:[#allocation428_spill] sm:$0xff] %v10998_v25  ;;  %v4743_v21 = vmul.f32 %v10998_v25, %v10461_v38  ;;  %v13087_v38 = vld [vmem:[#allocation69_spill] sm:$0xff] }
 0x840   :  { %4865 = vrot.lane.b32.xlu1 %v4725_v44, %s6668_s2  ;;  %v10972_v63 = vpop.permute.xlu0 %4851 }
 0x841   :  { %v10974_v19 = vpop.permute.xlu1 %5342 }
 0x842   :  { %5583 = vrot.lane.b32.xlu0 %v5404_v42, %s6669_s10 }
 0x844   :  { %5537 = vrot.lane.b32.xlu1 %v5381_v11, %s6669_s10  ;;  %v10981_v13 = vpop.permute.xlu0 %5523  ;;  %v11015_v11 = vld [vmem:[%s11958_s3 + $0x70] sm:$0xff] }
 0x845   :  { %v10983_v3 = vpop.permute.xlu1 %5278  ;;  %13086 = vst [vmem:[#allocation430_spill] sm:$0xff] %v11015_v11 }
 0x846   :  { %5551 = vrot.lane.b32.xlu0 %v5388_v57, %s6669_s10  ;;  %v4750_v57 = vmul.f32 %v6599_v46, %v10491_v60  ;;  %v13093_v46 = vld [vmem:[#allocation199_spill] sm:$0xff] }
 0x848   :  { %5505 = vrot.lane.b32.xlu1 %v5365_v23, %s6669_s10  ;;  %v10993_v7 = vpop.permute.xlu0 %5491  ;;  %v4727_v23 = vmul.f32 %v11015_v11, %v13087_v38 }
 0x84a   :  { %v11002_v44 = vpop.permute.xlu1 %4706  ;;  %4947 = vrot.lane.b32.xlu0 %v4766_v24, %s6668_s2 }
 0x84b   :  { %13085 = vst [vmem:[#allocation429_spill] sm:$0xff] %v11002_v44  ;;  %v5406_v44 = vmul.f32 %v6597_v34, %v10736_v43  ;;  %v6601_v43 = vld [vmem:[%s11958_s3 + $0x88] sm:$0xff]  ;;  %v13090_v34 = vld [vmem:[#allocation101_spill] sm:$0xff] }
 0x84c   :  { %4901 = vrot.lane.b32.xlu1 %v4743_v21, %s6668_s2  ;;  %v11010_v42 = vpop.permute.xlu0 %4887  ;;  %v5383_v21 = vmul.f32 %v10998_v25, %v10673_v17  ;;  %v1146_v38 = vmul.f32 %v6601_v43, %v13090_v34  ;;  %v6602_v17 = vld [vmem:[%s11958_s3 + $0x80] sm:$0xff]  ;;  %v13094_v25 = vld [vmem:[#allocation203_spill] sm:$0xff]  ;;  %v6603_v43 = vld [vmem:[%s11958_s3 + $0x1b8] sm:$0xff] }
 0x84d   :  { %v13095_v34 = vld [vmem:[#allocation15_spill] sm:$0xff] }
 0x84e   :  { %4915 = vrot.lane.b32.xlu0 %v4750_v57, %s6668_s2  ;;  %v4768_v5 = vmul.f32 %v6603_v43, %v13095_v34  ;;  %v11068_v34 = vld [vmem:[%s11958_s3 + $0x180] sm:$0xff] }
 0x84f   :  { %v11020_v24 = vpop.permute.xlu1 %5346 }
 0x850   :  { %13088 = vst [vmem:[#allocation69_spill] sm:$0xff] %v11020_v24  ;;  %4869 = vrot.lane.b32.xlu1 %v4727_v23, %s6668_s2  ;;  %v11024_v60 = vpop.permute.xlu0 %4855  ;;  %v13091_v23 = vld [vmem:[#allocation100_spill] sm:$0xff]  ;;  %v5367_v24 = vmul.f32 %v11015_v11, %v10683_v39  ;;  %v6604_v39 = vld [vmem:[%s11958_s3 + $0x8] sm:$0xff]  ;;  %v13097_v11 = vld [vmem:[#allocation33_spill] sm:$0xff] }
 0x852   :  { %5587 = vrot.lane.b32.xlu0 %v5406_v44, %s6669_s10  ;;  %v1145_v44 = vmul.f32 %v6602_v17, %v13091_v23 }
 0x853   :  { %v11029_v58 = vpop.permute.xlu1 %5350 }
 0x854   :  { %13089 = vst [vmem:[#allocation431_spill] sm:$0xff] %v11029_v58  ;;  %5541 = vrot.lane.b32.xlu1 %v5383_v21, %s6669_s10  ;;  %v11033_v57 = vpop.permute.xlu0 %5527  ;;  %v1850_v21 = vadd.f32 %v13093_v46, %v1146_v38  ;;  %v1849_v55 = vadd.f32 %v13094_v25, %v1145_v44  ;;  %v1129_v38 = vmul.f32 %v10656_v8, %v13097_v11  ;;  %v13098_v25 = vld [vmem:[#allocation144_spill] sm:$0xff]  ;;  %v13099_v46 = vld [vmem:[#allocation139_spill] sm:$0xff] }
 0x855   :  { %v13103_v8 = vld [vmem:[#allocation288_spill] sm:$0xff] }
 0x856   :  { %5555 = vrot.lane.b32.xlu0 %v5390_v37, %s6669_s10  ;;  %v13096_v37 = vld [vmem:[#allocation27_spill] sm:$0xff]  ;;  %v2489_v44 = vadd.f32 %v13098_v25, %v1849_v55  ;;  %v2490_v27 = vadd.f32 %v13099_v46, %v1850_v21  ;;  %v13104_v55 = vld [vmem:[#allocation293_spill] sm:$0xff]  ;;  %v13105_v46 = vld [vmem:[#allocation414_spill] sm:$0xff] }
 0x857   :  { %v11046_v22 = vpop.permute.xlu1 %5286  ;;  %v1130_v23 = vmul.f32 %v6604_v39, %v13096_v37  ;;  %v13102_v37 = vld [vmem:[#allocation173_spill] sm:$0xff]  ;;  %v13116_v58 = vld [vmem:[#allocation216_spill] sm:$0xff] }
 0x858   :  { %13092 = vst [vmem:[#allocation101_spill] sm:$0xff] %v11046_v22  ;;  %5509 = vrot.lane.b32.xlu1 %v5367_v24, %s6669_s10  ;;  %v11055_v17 = vpop.permute.xlu0 %5495  ;;  %v13100_v24 = vld [vmem:[#allocation420_spill] sm:$0xff]  ;;  %v1833_v4 = vadd.f32 %v13102_v37, %v1129_v38  ;;  %v3130_v11 = vadd.f32 %v13103_v8, %v2490_v27  ;;  %v3129_v25 = vadd.f32 %v13104_v55, %v2489_v44  ;;  %v6606_v21 = vld [vmem:[%s11958_s3 + $0x138] sm:$0xff]  ;;  %v11091_v44 = vld [vmem:[%s11958_s3 + $0x100] sm:$0xff] }
 0x859   :  { %v4761_v31 = vmul.f32 %v11068_v34, %v13100_v24  ;;  %v1834_v2 = vadd.f32 %v13101_v52, %v1130_v23  ;;  %v4752_v59 = vmul.f32 %v6606_v21, %v13105_v46  ;;  %v13108_v52 = vld [vmem:[#allocation161_spill] sm:$0xff]  ;;  %v13111_v8 = vld [vmem:[#allocation410_spill] sm:$0xff] }
 0x85a   :  { %4951 = vrot.lane.b32.xlu0 %v4768_v5, %s6668_s2  ;;  %v13107_v5 = vld [vmem:[#allocation124_spill] sm:$0xff]  ;;  %v2473_v23 = vadd.f32 %v13108_v52, %v1833_v4  ;;  %v3769_v38 = vadd.f32 %v13109_v0, %v3129_v25  ;;  %v13110_v37 = vld [vmem:[#allocation229_spill] sm:$0xff]  ;;  %v4745_v55 = vmul.f32 %v11091_v44, %v13111_v8  ;;  %v13114_v4 = vld [vmem:[#allocation366_spill] sm:$0xff] }
 0x85b   :  { %v4874_v39 = vpop.permute.xlu1 %4873  ;;  %v2474_v22 = vadd.f32 %v13107_v5, %v1834_v2  ;;  %v3770_v27 = vadd.f32 %v13110_v37, %v3130_v11  ;;  %v13113_v2 = vld [vmem:[#allocation277_spill] sm:$0xff]  ;;  %v13115_v0 = vld [vmem:[#allocation367_spill] sm:$0xff]  ;;  %v5408_v11 = vmul.f32 %v6603_v43, %v10792_v47 }
 0x85c   :  { %4937 = vrot.lane.b32.xlu1 %v4761_v31, %s6668_s2  ;;  %v11082_v24 = vpop.permute.xlu0 %4891  ;;  %v13112_v31 = vld [vmem:[#allocation272_spill] sm:$0xff]  ;;  %v3113_v5 = vadd.f32 %v13113_v2, %v2473_v23  ;;  %v4409_v25 = vadd.f32 %v13115_v0, %v3769_v38  ;;  %v13117_v8 = vld [vmem:[#allocation213_spill] sm:$0xff]  ;;  %v13119_v47 = vld [vmem:[#allocation351_spill] sm:$0xff] }
 0x85d   :  { %13106 = vst [vmem:[#allocation100_spill] sm:$0xff] %v11082_v24  ;;  %v3114_v46 = vadd.f32 %v13112_v31, %v2474_v22  ;;  %v4410_v52 = vadd.f32 %v13114_v4, %v3770_v27  ;;  %v13118_v27 = vld [vmem:[#allocation350_spill] sm:$0xff] }
 0x85e   :  { %4919 = vrot.lane.b32.xlu0 %v4752_v59, %s6668_s2  ;;  %v3753_v20 = vadd.f32 %v13117_v8, %v3113_v5  ;;  %v5401_v59 = vmul.f32 %v11068_v34, %v10693_v61  ;;  %v5049_v23 = vadd.f32 %v4874_v39, %v4409_v25  ;;  %v6608_v61 = vld [vmem:[%s11958_s3 + $0x98] sm:$0xff]  ;;  %v13123_v25 = vld [vmem:[#allocation30_spill] sm:$0xff] }
 0x85f   :  { %v4842_v24 = vpop.permute.xlu1 %4841  ;;  %v3754_v14 = vadd.f32 %v13116_v58, %v3114_v46  ;;  %v5050_v22 = vadd.f32 %v10842_v51, %v4410_v52  ;;  %v13120_v51 = vld [vmem:[#allocation112_spill] sm:$0xff] }
 0x860   :  { %4905 = vrot.lane.b32.xlu1 %v4745_v55, %s6668_s2  ;;  %v11102_v37 = vpop.permute.xlu0 %4859  ;;  %v4393_v43 = vadd.f32 %v13119_v47, %v3753_v20  ;;  %v5392_v55 = vmul.f32 %v6606_v21, %v10812_v32  ;;  %v1148_v39 = vmul.f32 %v6608_v61, %v13120_v51  ;;  %v13121_v20 = vld [vmem:[#allocation110_spill] sm:$0xff]  ;;  %v5385_v32 = vmul.f32 %v11091_v44, %v10711_v26  ;;  %v13122_v52 = vld [vmem:[#allocation32_spill] sm:$0xff]  ;;  %v13126_v47 = vld [vmem:[#allocation41_spill] sm:$0xff] }
 0x861   :  { %v4394_v38 = vadd.f32 %v13118_v27, %v3754_v14  ;;  %v5690_v2 = vadd.f32 %v10881_v62, %v5050_v22  ;;  %v6609_v14 = vld [vmem:[%s11958_s3 + $0x90] sm:$0xff]  ;;  %v13129_v51 = vld [vmem:[#allocation421_spill] sm:$0xff] }
 0x862   :  { %5591 = vrot.lane.b32.xlu0 %v5408_v11, %s6669_s10  ;;  %v1147_v5 = vmul.f32 %v6609_v14, %v13121_v20  ;;  %v5033_v21 = vadd.f32 %v4842_v24, %v4393_v43  ;;  %v1852_v0 = vadd.f32 %v13122_v52, %v1148_v39  ;;  %v13124_v22 = vld [vmem:[#allocation44_spill] sm:$0xff]  ;;  %v6611_v24 = vld [vmem:[%s11958_s3 + $0x18] sm:$0xff]  ;;  %v1131_v43 = vmul.f32 %v10706_v45, %v13126_v47  ;;  %v5738_v20 = vld [vmem:[%s11959_s4 + $0x8] sm:$0xff] }
 0x863   :  { %v5514_v31 = vpop.permute.xlu1 %5513  ;;  %v5034_v62 = vadd.f32 %v10870_v33, %v4394_v38  ;;  %v13125_v38 = vld [vmem:[#allocation35_spill] sm:$0xff]  ;;  %v13130_v45 = vld [vmem:[#allocation172_spill] sm:$0xff]  ;;  %5812 = vmatprep.mubr.f32.mxu1 %v5738_v20 }
 0x864   :  { %v5689_v58 = vadd.f32 %v5514_v31, %v5049_v23  ;;  %5577 = vrot.lane.b32.xlu1 %v5401_v59, %s6669_s10  ;;  %v11115_v46 = vpop.permute.xlu0 %5531  ;;  %v1851_v11 = vadd.f32 %v13123_v25, %v1147_v5  ;;  %v6610_v59 = vld [vmem:[%s11958_s3 + $0x1c8] sm:$0xff]  ;;  %v1132_v31 = vmul.f32 %v6611_v24, %v13125_v38 }
 0x865   :  { %v4770_v23 = vmul.f32 %v6610_v59, %v13124_v22  ;;  %v5674_v27 = vadd.f32 %v10891_v10, %v5034_v62  ;;  %v11150_v10 = vld [vmem:[%s11958_s3 + $0x190] sm:$0xff]  ;;  %v13136_v24 = vld [vmem:[#allocation163_spill] sm:$0xff] }
 0x866   :  { %v6225_v4 = vpack.c.bf16 %v5690_v2, %v5689_v58  ;;  %5559 = vrot.lane.b32.xlu0 %v5392_v55, %s6669_s10  ;;  %v13127_v55 = vld [vmem:[#allocation148_spill] sm:$0xff]  ;;  %v13128_v58 = vld [vmem:[#allocation143_spill] sm:$0xff]  ;;  %v4763_v39 = vmul.f32 %v11150_v10, %v13129_v51  ;;  %v1836_v5 = vadd.f32 %v13130_v45, %v1132_v31  ;;  %v13140_v51 = vld [vmem:[#allocation274_spill] sm:$0xff] }
 0x867   :  { %v5482_v8 = vpop.permute.xlu1 %5481  ;;  %v2491_v2 = vadd.f32 %v13127_v55, %v1851_v11  ;;  %v2492_v61 = vadd.f32 %v13128_v58, %v1852_v0  ;;  %v13133_v0 = vld [vmem:[#allocation295_spill] sm:$0xff]  ;;  %v13137_v31 = vld [vmem:[#allocation232_spill] sm:$0xff] }
 0x868   :  { %v5673_v26 = vadd.f32 %v5482_v8, %v5033_v21  ;;  %5545 = vrot.lane.b32.xlu1 %v5385_v32, %s6669_s10  ;;  %6226 = vmatprep.subr.bf16.mxu1 %v6225_v4  ;;  %v11137_v33 = vpop.permute.xlu0 %5499  ;;  %v13131_v32 = vld [vmem:[#allocation177_spill] sm:$0xff]  ;;  %v13132_v4 = vld [vmem:[#allocation290_spill] sm:$0xff]  ;;  %v6613_v11 = vld [vmem:[%s11958_s3 + $0x148] sm:$0xff] }
 0x869   :  { %v1835_v62 = vadd.f32 %v13131_v32, %v1131_v43  ;;  %v3132_v52 = vadd.f32 %v13132_v4, %v2492_v61  ;;  %v3131_v25 = vadd.f32 %v13133_v0, %v2491_v2  ;;  %v13134_v8 = vld [vmem:[#allocation416_spill] sm:$0xff]  ;;  %v13138_v43 = vld [vmem:[#allocation231_spill] sm:$0xff] }
 0x86a   :  { %v6227_v14 = vpack.c.bf16 %v5674_v27, %v5673_v26  ;;  %4955 = vrot.lane.b32.xlu0 %v4770_v23, %s6668_s2  ;;  %v4754_v22 = vmul.f32 %v6613_v11, %v13134_v8  ;;  %v13135_v27 = vld [vmem:[#allocation129_spill] sm:$0xff]  ;;  %v11176_v2 = vld [vmem:[%s11958_s3 + $0x110] sm:$0xff]  ;;  %v13139_v58 = vld [vmem:[#allocation411_spill] sm:$0xff] }
 0x86b   :  { %v4878_v21 = vpop.permute.xlu1 %4877  ;;  %v2476_v26 = vadd.f32 %v13135_v27, %v1836_v5  ;;  %v2475_v38 = vadd.f32 %v13136_v24, %v1835_v62  ;;  %v3771_v47 = vadd.f32 %v13137_v31, %v3131_v25  ;;  %v3772_v55 = vadd.f32 %v13138_v43, %v3132_v52  ;;  %v13141_v20 = vld [vmem:[#allocation279_spill] sm:$0xff]  ;;  %v13142_v5 = vld [vmem:[#allocation368_spill] sm:$0xff]  ;;  %v13143_v62 = vld [vmem:[#allocation369_spill] sm:$0xff] }
 0x86c   :  { %4941 = vrot.lane.b32.xlu1 %v4763_v39, %s6668_s2  ;;  %6228 = vmatpush3.bf16.msra.mxu1 %v6227_v14  ;;  %v11167_v23 = vpop.permute.xlu0 %4895  ;;  %v4747_v61 = vmul.f32 %v11176_v2, %v13139_v58  ;;  %v5410_v52 = vmul.f32 %v6610_v59, %v10853_v54  ;;  %v13144_v25 = vld [vmem:[#allocation215_spill] sm:$0xff]  ;;  %v13145_v27 = vld [vmem:[#allocation214_spill] sm:$0xff]  ;;  %v13146_v31 = vld [vmem:[#allocation352_spill] sm:$0xff] }
 0x86d   :  { %v3116_v39 = vadd.f32 %v13140_v51, %v2476_v26  ;;  %v3115_v45 = vadd.f32 %v13141_v20, %v2475_v38  ;;  %v4412_v32 = vadd.f32 %v13142_v5, %v3772_v55  ;;  %v4411_v4 = vadd.f32 %v13143_v62, %v3771_v47  ;;  %v13147_v54 = vld [vmem:[#allocation353_spill] sm:$0xff]  ;;  %v13149_v20 = vld [vmem:[#allocation119_spill] sm:$0xff] }
 0x86e   :  { %4923 = vrot.lane.b32.xlu0 %v4754_v22, %s6668_s2  ;;  %v5403_v22 = vmul.f32 %v11150_v10, %v10671_v30  ;;  %v5394_v55 = vmul.f32 %v6613_v11, %v10873_v28  ;;  %v6615_v30 = vld [vmem:[%s11958_s3 + $0xa8] sm:$0xff]  ;;  %v5387_v28 = vmul.f32 %v11176_v2, %v10721_v29 }
 0x86f   :  { %v4846_v14 = vpop.permute.xlu1 %4845  ;;  %v3756_v8 = vadd.f32 %v13144_v25, %v3116_v39  ;;  %v3755_v24 = vadd.f32 %v13145_v27, %v3115_v45  ;;  %v5052_v26 = vadd.f32 %v10908_v18, %v4412_v32  ;;  %v5051_v38 = vadd.f32 %v4878_v21, %v4411_v4  ;;  %v13148_v18 = vld [vmem:[#allocation120_spill] sm:$0xff]  ;;  %v6616_v39 = vld [vmem:[%s11958_s3 + $0xa0] sm:$0xff]  ;;  %v13150_v32 = vld [vmem:[#allocation53_spill] sm:$0xff] }
 0x870   :  { %4909 = vrot.lane.b32.xlu1 %v4747_v61, %s6668_s2  ;;  %v11187_v0 = vpop.permute.xlu0 %4863  ;;  %v1150_v21 = vmul.f32 %v6615_v30, %v13148_v18  ;;  %v1149_v45 = vmul.f32 %v6616_v39, %v13149_v20  ;;  %v13151_v4 = vld [vmem:[#allocation54_spill] sm:$0xff]  ;;  %v13157_v30 = vld [vmem:[#allocation176_spill] sm:$0xff] }
 0x871   :  { %v4396_v47 = vadd.f32 %v13146_v31, %v3756_v8  ;;  %v4395_v59 = vadd.f32 %v13147_v54, %v3755_v24  ;;  %v5692_v58 = vadd.f32 %v10932_v36, %v5052_v26  ;;  %v6617_v8 = vld [vmem:[%s11958_s3 + $0x1d8] sm:$0xff]  ;;  %v13152_v27 = vld [vmem:[#allocation422_spill] sm:$0xff]  ;;  %v13153_v26 = vld [vmem:[#allocation48_spill] sm:$0xff] }
 0x872   :  { %5595 = vrot.lane.b32.xlu0 %v5410_v52, %s6669_s10  ;;  %v1854_v62 = vadd.f32 %v13150_v32, %v1150_v21  ;;  %v1853_v52 = vadd.f32 %v13151_v4, %v1149_v45  ;;  %v4772_v24 = vmul.f32 %v6617_v8, %v13152_v27  ;;  %v13154_v31 = vld [vmem:[#allocation47_spill] sm:$0xff]  ;;  %v13158_v21 = vld [vmem:[#allocation181_spill] sm:$0xff]  ;;  %v13159_v20 = vld [vmem:[#allocation292_spill] sm:$0xff] }
 0x873   :  { %v5518_v43 = vpop.permute.xlu1 %5517  ;;  %v5036_v36 = vadd.f32 %v10923_v16, %v4396_v47  ;;  %v5035_v11 = vadd.f32 %v4846_v14, %v4395_v59  ;;  %v6618_v14 = vld [vmem:[%s11958_s3 + $0x28] sm:$0xff]  ;;  %v1133_v47 = vmul.f32 %v10756_v50, %v13154_v31  ;;  %v13156_v59 = vld [vmem:[#allocation146_spill] sm:$0xff]  ;;  %v13167_v31 = vld [vmem:[#allocation276_spill] sm:$0xff] }
 0x874   :  { %v5691_v61 = vadd.f32 %v5518_v43, %v5051_v38  ;;  %5581 = vrot.lane.b32.xlu1 %v5403_v22, %s6669_s10  ;;  %v11200_v51 = vpop.permute.xlu0 %5535  ;;  %v1134_v38 = vmul.f32 %v6618_v14, %v13153_v26  ;;  %v13155_v43 = vld [vmem:[#allocation152_spill] sm:$0xff]  ;;  %v13164_v27 = vld [vmem:[#allocation234_spill] sm:$0xff]  ;;  %v13166_v26 = vld [vmem:[#allocation25_spill] sm:$0xff] }
 0x875   :  { %v5676_v22 = vadd.f32 %v10942_v1, %v5036_v36  ;;  %v2493_v54 = vadd.f32 %v13155_v43, %v1853_v52  ;;  %v11235_v1 = vld [vmem:[%s11958_s3 + $0x1a0] sm:$0xff]  ;;  %v1837_v39 = vadd.f32 %v13158_v21, %v1133_v47  ;;  %v13163_v52 = vld [vmem:[#allocation165_spill] sm:$0xff] }
 0x876   :  { %v6229_v5 = vpack.c.bf16 %v5692_v58, %v5691_v61  ;;  %5563 = vrot.lane.b32.xlu0 %v5394_v55, %s6669_s10  ;;  %v2494_v55 = vadd.f32 %v13156_v59, %v1854_v62  ;;  %v4765_v58 = vmul.f32 %v11235_v1, %v10715_v48  ;;  %v1838_v18 = vadd.f32 %v13157_v30, %v1134_v38  ;;  %v13162_v62 = vld [vmem:[#allocation121_spill] sm:$0xff]  ;;  %v11258_v14 = vld [vmem:[%s11958_s3 + $0x120] sm:$0xff] }
 0x877   :  { %v5486_v25 = vpop.permute.xlu1 %5485  ;;  %v4749_v38 = vmul.f32 %v11258_v14, %v13166_v26 }
 0x878   :  { %v5675_v29 = vadd.f32 %v5486_v25, %v5035_v11  ;;  %5549 = vrot.lane.b32.xlu1 %v5387_v28, %s6669_s10  ;;  %6230 = vmatprep.subr.bf16.mxu1 %v6229_v5  ;;  %v11222_v16 = vpop.permute.xlu0 %5503  ;;  %v3134_v45 = vadd.f32 %v13159_v20, %v2494_v55  ;;  %v13160_v28 = vld [vmem:[#allocation297_spill] sm:$0xff]  ;;  %v13161_v5 = vld [vmem:[#allocation34_spill] sm:$0xff]  ;;  %v2478_v4 = vadd.f32 %v13162_v62, %v1838_v18 }
 0x879   :  { %v3133_v36 = vadd.f32 %v13160_v28, %v2493_v54  ;;  %v6620_v11 = vld [vmem:[%s11958_s3 + $0x158] sm:$0xff]  ;;  %v2477_v25 = vadd.f32 %v13163_v52, %v1837_v39  ;;  %v13169_v55 = vld [vmem:[#allocation370_spill] sm:$0xff]  ;;  %v5412_v18 = vmul.f32 %v6617_v8, %v10918_v49  ;;  %v13174_v49 = vld [vmem:[#allocation355_spill] sm:$0xff] }
 0x87a   :  { %v6231_v61 = vpack.c.bf16 %v5676_v22, %v5675_v29  ;;  %4959 = vrot.lane.b32.xlu0 %v4772_v24, %s6668_s2  ;;  %v4756_v32 = vmul.f32 %v6620_v11, %v13161_v5  ;;  %v13165_v22 = vld [vmem:[#allocation233_spill] sm:$0xff]  ;;  %v3118_v47 = vadd.f32 %v13167_v31, %v2478_v4  ;;  %v13173_v62 = vld [vmem:[#allocation354_spill] sm:$0xff] }
 0x87b   :  { %v4882_v50 = vpop.permute.xlu1 %4881  ;;  %v3773_v24 = vadd.f32 %v13164_v27, %v3133_v36  ;;  %v3774_v29 = vadd.f32 %v13165_v22, %v3134_v45  ;;  %v13168_v54 = vld [vmem:[#allocation281_spill] sm:$0xff]  ;;  %v13172_v45 = vld [vmem:[#allocation218_spill] sm:$0xff]  ;;  %v5405_v36 = vmul.f32 %v11235_v1, %v10726_v56  ;;  %v13175_v56 = vld [vmem:[#allocation128_spill] sm:$0xff] }
 0x87c   :  { %4945 = vrot.lane.b32.xlu1 %v4765_v58, %s6668_s2  ;;  %6232 = vmatpush3.bf16.msra.mxu1 %v6231_v61  ;;  %v11249_v48 = vpop.permute.xlu0 %4899  ;;  %v3117_v59 = vadd.f32 %v13168_v54, %v2477_v25  ;;  %v13170_v61 = vld [vmem:[#allocation371_spill] sm:$0xff]  ;;  %v13171_v39 = vld [vmem:[#allocation217_spill] sm:$0xff]  ;;  %v5396_v25 = vmul.f32 %v6620_v11, %v10928_v53  ;;  %v13178_v54 = vld [vmem:[#allocation74_spill] sm:$0xff] }
 0x87d   :  { %v4414_v58 = vadd.f32 %v13169_v55, %v3774_v29  ;;  %v4413_v30 = vadd.f32 %v13170_v61, %v3773_v24  ;;  %v3758_v20 = vadd.f32 %v13171_v39, %v3118_v47  ;;  %v13176_v29 = vld [vmem:[#allocation131_spill] sm:$0xff]  ;;  %v13177_v31 = vld [vmem:[#allocation73_spill] sm:$0xff] }
 0x87e   :  { %4927 = vrot.lane.b32.xlu0 %v4756_v32, %s6668_s2  ;;  %v3757_v28 = vadd.f32 %v13172_v45, %v3117_v59  ;;  %v6623_v55 = vld [vmem:[%s11958_s3 + $0x1e8] sm:$0xff] }
 0x87f   :  { %v4850_v43 = vpop.permute.xlu1 %4849  ;;  %v5054_v5 = vadd.f32 %v10957_v40, %v4414_v58  ;;  %v5053_v32 = vadd.f32 %v4882_v50, %v4413_v30  ;;  %v4398_v4 = vadd.f32 %v13173_v62, %v3758_v20  ;;  %v1151_v40 = vmul.f32 %v10787_v6, %v13175_v56  ;;  %v6622_v50 = vld [vmem:[%s11958_s3 + $0xb8] sm:$0xff]  ;;  %v13179_v58 = vld [vmem:[#allocation423_spill] sm:$0xff] }
 0x880   :  { %4913 = vrot.lane.b32.xlu1 %v4749_v38, %s6668_s2  ;;  %v11269_v21 = vpop.permute.xlu0 %4867  ;;  %v4397_v8 = vadd.f32 %v13174_v49, %v3757_v28  ;;  %v1152_v26 = vmul.f32 %v6622_v50, %v13176_v29  ;;  %v5389_v38 = vmul.f32 %v11258_v14, %v10731_v9  ;;  %v4774_v61 = vmul.f32 %v6623_v55, %v13179_v58  ;;  %v13181_v20 = vld [vmem:[#allocation57_spill] sm:$0xff]  ;;  %v13182_v28 = vld [vmem:[#allocation155_spill] sm:$0xff]  ;;  %v13193_v58 = vld [vmem:[#allocation412_spill] sm:$0xff] }
 0x881   :  { %v5694_v27 = vadd.f32 %v10981_v13, %v5054_v5  ;;  %v5038_v53 = vadd.f32 %v10972_v63, %v4398_v4  ;;  %v1855_v59 = vadd.f32 %v13178_v54, %v1151_v40  ;;  %v1135_v45 = vmul.f32 %v10805_v41, %v13181_v20  ;;  %v13183_v5 = vld [vmem:[#allocation5_spill] sm:$0xff]  ;;  %v13187_v56 = vld [vmem:[#allocation299_spill] sm:$0xff]  ;;  %v13196_v20 = vld [vmem:[#allocation372_spill] sm:$0xff] }
 0x882   :  { %5599 = vrot.lane.b32.xlu0 %v5412_v18, %s6669_s10  ;;  %v5037_v13 = vadd.f32 %v4850_v43, %v4397_v8  ;;  %v1856_v47 = vadd.f32 %v13177_v31, %v1152_v26  ;;  %v6624_v43 = vld [vmem:[%s11958_s3 + $0x38] sm:$0xff]  ;;  %v13180_v18 = vld [vmem:[#allocation58_spill] sm:$0xff]  ;;  %v13185_v8 = vld [vmem:[#allocation184_spill] sm:$0xff] }
 0x883   :  { %v5522_v52 = vpop.permute.xlu1 %5521  ;;  %v5678_v30 = vadd.f32 %v10993_v7, %v5038_v53  ;;  %v1136_v39 = vmul.f32 %v6624_v43, %v13180_v18  ;;  %v11315_v7 = vld [vmem:[%s11958_s3 + $0x1b0] sm:$0xff]  ;;  %v6626_v50 = vld [vmem:[%s11958_s3 + $0x168] sm:$0xff] }
 0x884   :  { %v5693_v24 = vadd.f32 %v5522_v52, %v5053_v32  ;;  %5585 = vrot.lane.b32.xlu1 %v5405_v36, %s6669_s10  ;;  %v11282_v22 = vpop.permute.xlu0 %5539  ;;  %v2495_v36 = vadd.f32 %v13182_v28, %v1855_v59  ;;  %v2496_v32 = vadd.f32 %v13183_v5, %v1856_v47  ;;  %v4767_v62 = vmul.f32 %v11315_v7, %v10768_v35  ;;  %v13184_v52 = vld [vmem:[#allocation180_spill] sm:$0xff]  ;;  %v13188_v29 = vld [vmem:[#allocation419_spill] sm:$0xff]  ;;  %v13197_v28 = vld [vmem:[#allocation373_spill] sm:$0xff] }
 0x885   :  { %v1840_v49 = vadd.f32 %v13184_v52, %v1136_v39  ;;  %v4758_v26 = vmul.f32 %v6626_v50, %v13188_v29  ;;  %v13191_v31 = vld [vmem:[#allocation236_spill] sm:$0xff]  ;;  %v13192_v54 = vld [vmem:[#allocation235_spill] sm:$0xff]  ;;  %v5414_v5 = vmul.f32 %v6623_v55, %v10974_v19  ;;  %v13201_v19 = vld [vmem:[#allocation357_spill] sm:$0xff]  ;;  %v5398_v29 = vmul.f32 %v6626_v50, %v10983_v3 }
 0x886   :  { %v6233_v11 = vpack.c.bf16 %v5694_v27, %v5693_v24  ;;  %5567 = vrot.lane.b32.xlu0 %v5396_v25, %s6669_s10  ;;  %v1839_v25 = vadd.f32 %v13185_v8, %v1135_v45  ;;  %v13186_v27 = vld [vmem:[#allocation294_spill] sm:$0xff]  ;;  %v3135_v40 = vadd.f32 %v13187_v56, %v2495_v36  ;;  %v13195_v18 = vld [vmem:[#allocation283_spill] sm:$0xff]  ;;  %v13199_v52 = vld [vmem:[#allocation220_spill] sm:$0xff]  ;;  %v5407_v8 = vmul.f32 %v11315_v7, %v10777_v12 }
 0x887   :  { %v5490_v6 = vpop.permute.xlu1 %5489  ;;  %v3136_v24 = vadd.f32 %v13186_v27, %v2496_v32  ;;  %v13202_v12 = vld [vmem:[#allocation134_spill] sm:$0xff] }
 0x888   :  { %v5677_v9 = vadd.f32 %v5490_v6, %v5037_v13  ;;  %5553 = vrot.lane.b32.xlu1 %v5389_v38, %s6669_s10  ;;  %6234 = vmatprep.subr.bf16.mxu1 %v6233_v11  ;;  %v11302_v63 = vpop.permute.xlu0 %5507  ;;  %v13189_v38 = vld [vmem:[#allocation125_spill] sm:$0xff]  ;;  %v13190_v13 = vld [vmem:[#allocation167_spill] sm:$0xff]  ;;  %v3775_v47 = vadd.f32 %v13191_v31, %v3135_v40  ;;  %v11338_v6 = vld [vmem:[%s11958_s3 + $0x130] sm:$0xff] }
 0x889   :  { %v2480_v53 = vadd.f32 %v13189_v38, %v1840_v49  ;;  %v2479_v11 = vadd.f32 %v13190_v13, %v1839_v25  ;;  %v3776_v59 = vadd.f32 %v13192_v54, %v3136_v24  ;;  %v13200_v24 = vld [vmem:[#allocation356_spill] sm:$0xff]  ;;  %v13204_v31 = vld [vmem:[#allocation17_spill] sm:$0xff]  ;;  %v13205_v54 = vld [vmem:[#allocation82_spill] sm:$0xff] }
 0x88a   :  { %v6235_v4 = vpack.c.bf16 %v5678_v30, %v5677_v9  ;;  %4963 = vrot.lane.b32.xlu0 %v4774_v61, %s6668_s2  ;;  %v4751_v61 = vmul.f32 %v11338_v6, %v13193_v58  ;;  %v13194_v30 = vld [vmem:[#allocation278_spill] sm:$0xff]  ;;  %v4415_v36 = vadd.f32 %v13197_v28, %v3775_v47  ;;  %v13203_v13 = vld [vmem:[#allocation136_spill] sm:$0xff]  ;;  %v5391_v47 = vmul.f32 %v11338_v6, %v13204_v31  ;;  %v13206_v58 = vld [vmem:[#allocation83_spill] sm:$0xff] }
 0x88b   :  { %v4886_v41 = vpop.permute.xlu1 %4885  ;;  %v3120_v9 = vadd.f32 %v13194_v30, %v2480_v53  ;;  %v3119_v39 = vadd.f32 %v13195_v18, %v2479_v11  ;;  %v4416_v45 = vadd.f32 %v13196_v20, %v3776_v59  ;;  %v11379_v30 = vld [vmem:[%s11958_s3 + $0x1f8] sm:$0xff]  ;;  %v13208_v20 = vld [vmem:[#allocation68_spill] sm:$0xff] }
 0x88c   :  { %4949 = vrot.lane.b32.xlu1 %v4767_v62, %s6668_s2  ;;  %6236 = vmatpush3.bf16.msra.mxu1 %v6235_v4  ;;  %v11329_v35 = vpop.permute.xlu0 %4903  ;;  %v13198_v62 = vld [vmem:[#allocation219_spill] sm:$0xff]  ;;  %v5055_v27 = vadd.f32 %v4886_v41, %v4415_v36 }
 0x88d   :  { %v3760_v4 = vadd.f32 %v13198_v62, %v3120_v9  ;;  %v3759_v49 = vadd.f32 %v13199_v52, %v3119_v39  ;;  %v5056_v25 = vadd.f32 %v11010_v42, %v4416_v45  ;;  %v1153_v42 = vmul.f32 %v10838_v15, %v13202_v12  ;;  %v6628_v41 = vld [vmem:[%s11958_s3 + $0xc8] sm:$0xff]  ;;  %v13218_v12 = vld [vmem:[#allocation301_spill] sm:$0xff] }
 0x88e   :  { %4931 = vrot.lane.b32.xlu0 %v4758_v26, %s6668_s2  ;;  %v1154_v11 = vmul.f32 %v6628_v41, %v13203_v13  ;;  %v13207_v9 = vld [vmem:[#allocation55_spill] sm:$0xff]  ;;  %v11408_v41 = vld [vmem:[%s11958_s3 + $0x178] sm:$0xff] }
 0x88f   :  { %v4854_v43 = vpop.permute.xlu1 %4853  ;;  %v4400_v56 = vadd.f32 %v13200_v24, %v3760_v4  ;;  %v4399_v55 = vadd.f32 %v13201_v19, %v3759_v49  ;;  %v5696_v26 = vadd.f32 %v11033_v57, %v5056_v25  ;;  %v4776_v18 = vmul.f32 %v11379_v30, %v13207_v9  ;;  %v13209_v45 = vld [vmem:[#allocation339_spill] sm:$0xff]  ;;  %v13212_v4 = vld [vmem:[#allocation158_spill] sm:$0xff]  ;;  %v13214_v25 = vld [vmem:[#allocation21_spill] sm:$0xff] }
 0x890   :  { %4917 = vrot.lane.b32.xlu1 %v4751_v61, %s6668_s2  ;;  %v11349_v32 = vpop.permute.xlu0 %4871  ;;  %v1858_v59 = vadd.f32 %v13205_v54, %v1154_v11  ;;  %v1857_v61 = vadd.f32 %v13206_v58, %v1153_v42  ;;  %v1138_v28 = vmul.f32 %v13209_v45, %v13208_v20  ;;  %v13210_v36 = vld [vmem:[#allocation67_spill] sm:$0xff]  ;;  %v13213_v49 = vld [vmem:[#allocation6_spill] sm:$0xff]  ;;  %v13216_v19 = vld [vmem:[#allocation188_spill] sm:$0xff] }
 0x891   :  { %v5040_v3 = vadd.f32 %v11024_v60, %v4400_v56  ;;  %v5039_v57 = vadd.f32 %v4854_v43, %v4399_v55  ;;  %v13215_v56 = vld [vmem:[#allocation183_spill] sm:$0xff]  ;;  %v13222_v54 = vld [vmem:[#allocation238_spill] sm:$0xff]  ;;  %v13223_v58 = vld [vmem:[#allocation237_spill] sm:$0xff] }
 0x892   :  { %5603 = vrot.lane.b32.xlu0 %v5414_v5, %s6669_s10  ;;  %v13211_v5 = vld [vmem:[#allocation345_spill] sm:$0xff]  ;;  %v2497_v52 = vadd.f32 %v13212_v4, %v1857_v61  ;;  %v13219_v13 = vld [vmem:[#allocation23_spill] sm:$0xff] }
 0x893   :  { %v5526_v40 = vpop.permute.xlu1 %5525  ;;  %v5680_v39 = vadd.f32 %v11055_v17, %v5040_v3  ;;  %v1137_v62 = vmul.f32 %v13211_v5, %v13210_v36  ;;  %v11396_v17 = vld [vmem:[%s11958_s3 + $0x1c0] sm:$0xff]  ;;  %v4760_v11 = vmul.f32 %v11408_v41, %v13219_v13  ;;  %v13224_v9 = vld [vmem:[#allocation413_spill] sm:$0xff] }
 0x894   :  { %v5695_v38 = vadd.f32 %v5526_v40, %v5055_v27  ;;  %5589 = vrot.lane.b32.xlu1 %v5407_v8, %s6669_s10  ;;  %v11362_v53 = vpop.permute.xlu0 %5543  ;;  %v2498_v8 = vadd.f32 %v13213_v49, %v1858_v59  ;;  %v4769_v27 = vmul.f32 %v11396_v17, %v13214_v25  ;;  %v1842_v40 = vadd.f32 %v13215_v56, %v1138_v28  ;;  %v13226_v45 = vld [vmem:[#allocation285_spill] sm:$0xff]  ;;  %v13227_v36 = vld [vmem:[#allocation374_spill] sm:$0xff] }
 0x895   :  { %v1841_v55 = vadd.f32 %v13216_v19, %v1137_v62  ;;  %v3137_v42 = vadd.f32 %v13218_v12, %v2497_v52  ;;  %v13228_v62 = vld [vmem:[#allocation375_spill] sm:$0xff]  ;;  %v13234_v12 = vld [vmem:[#allocation358_spill] sm:$0xff] }
 0x896   :  { %v6237_v50 = vpack.c.bf16 %v5696_v26, %v5695_v38  ;;  %5571 = vrot.lane.b32.xlu0 %v5398_v29, %s6669_s10  ;;  %v13217_v26 = vld [vmem:[#allocation296_spill] sm:$0xff]  ;;  %v13229_v52 = vld [vmem:[#allocation431_spill] sm:$0xff] }
 0x897   :  { %v5494_v15 = vpop.permute.xlu1 %5493  ;;  %v3138_v38 = vadd.f32 %v13217_v26, %v2498_v8  ;;  %v3777_v59 = vadd.f32 %v13222_v54, %v3137_v42  ;;  %v5416_v49 = vmul.f32 %v11379_v30, %v13229_v52  ;;  %v13230_v8 = vld [vmem:[#allocation221_spill] sm:$0xff] }
 0x898   :  { %v5679_v60 = vadd.f32 %v5494_v15, %v5039_v57  ;;  %5557 = vrot.lane.b32.xlu1 %v5391_v47, %s6669_s10  ;;  %6238 = vmatprep.subr.bf16.mxu1 %v6237_v50  ;;  %v11385_v43 = vpop.permute.xlu0 %5511  ;;  %v13220_v47 = vld [vmem:[#allocation127_spill] sm:$0xff]  ;;  %v13221_v57 = vld [vmem:[#allocation132_spill] sm:$0xff]  ;;  %v11422_v15 = vld [vmem:[%s11958_s3 + $0x140] sm:$0xff] }
 0x899   :  { %v2482_v3 = vadd.f32 %v13220_v47, %v1842_v40  ;;  %v2481_v50 = vadd.f32 %v13221_v57, %v1841_v55  ;;  %v3778_v61 = vadd.f32 %v13223_v58, %v3138_v38  ;;  %v4417_v4 = vadd.f32 %v13228_v62, %v3777_v59  ;;  %v13232_v40 = vld [vmem:[#allocation344_spill] sm:$0xff]  ;;  %v6633_v59 = vld [vmem:[%s11958_s3 + $0xd8] sm:$0xff] }
 0x89a   :  { %v6239_v24 = vpack.c.bf16 %v5680_v39, %v5679_v60  ;;  %4967 = vrot.lane.b32.xlu0 %v4776_v18, %s6668_s2  ;;  %v4753_v18 = vmul.f32 %v11422_v15, %v13224_v9  ;;  %v13225_v39 = vld [vmem:[#allocation280_spill] sm:$0xff]  ;;  %v5409_v19 = vmul.f32 %v11396_v17, %v13232_v40  ;;  %v13239_v9 = vld [vmem:[#allocation347_spill] sm:$0xff]  ;;  %v13242_v52 = vld [vmem:[#allocation93_spill] sm:$0xff] }
 0x89b   :  { %v4890_v29 = vpop.permute.xlu1 %4889  ;;  %v3122_v60 = vadd.f32 %v13225_v39, %v2482_v3  ;;  %v3121_v28 = vadd.f32 %v13226_v45, %v2481_v50  ;;  %v4418_v5 = vadd.f32 %v13227_v36, %v3778_v61  ;;  %v13233_v55 = vld [vmem:[#allocation100_spill] sm:$0xff]  ;;  %v13236_v3 = vld [vmem:[#allocation101_spill] sm:$0xff] }
 0x89c   :  { %4953 = vrot.lane.b32.xlu1 %v4769_v27, %s6668_s2  ;;  %6240 = vmatpush3.bf16.msra.mxu1 %v6239_v24  ;;  %v11413_v31 = vpop.permute.xlu0 %4939  ;;  %v13231_v24 = vld [vmem:[#allocation222_spill] sm:$0xff]  ;;  %v5057_v38 = vadd.f32 %v4890_v29, %v4417_v4  ;;  %v5400_v57 = vmul.f32 %v11408_v41, %v13236_v3  ;;  %v13238_v61 = vld [vmem:[#allocation140_spill] sm:$0xff]  ;;  %v13240_v39 = vld [vmem:[#allocation341_spill] sm:$0xff] }
 0x89d   :  { %v3762_v25 = vadd.f32 %v13230_v8, %v3122_v60  ;;  %v3761_v56 = vadd.f32 %v13231_v24, %v3121_v28  ;;  %v5058_v26 = vadd.f32 %v13233_v55, %v4418_v5  ;;  %v13237_v29 = vld [vmem:[#allocation142_spill] sm:$0xff]  ;;  %v5393_v60 = vmul.f32 %v11422_v15, %v13240_v39  ;;  %v13246_v40 = vld [vmem:[#allocation424_spill] sm:$0xff] }
 0x89e   :  { %4935 = vrot.lane.b32.xlu0 %v4760_v11, %s6668_s2  ;;  %v13235_v11 = vld [vmem:[#allocation359_spill] sm:$0xff]  ;;  %v1156_v58 = vmul.f32 %v6633_v59, %v13237_v29  ;;  %v13243_v24 = vld [vmem:[#allocation78_spill] sm:$0xff] }
 0x89f   :  { %v4858_v20 = vpop.permute.xlu1 %4857  ;;  %v4402_v42 = vadd.f32 %v13234_v12, %v3762_v25  ;;  %v4401_v47 = vadd.f32 %v13235_v11, %v3761_v56  ;;  %v5698_v50 = vadd.f32 %v11115_v46, %v5058_v26  ;;  %v13241_v46 = vld [vmem:[#allocation92_spill] sm:$0xff]  ;;  %v13244_v56 = vld [vmem:[#allocation65_spill] sm:$0xff]  ;;  %v13247_v55 = vld [vmem:[#allocation150_spill] sm:$0xff] }
 0x8a0   :  { %4921 = vrot.lane.b32.xlu1 %v4753_v18, %s6668_s2  ;;  %v11435_v27 = vpop.permute.xlu0 %4907  ;;  %v1155_v18 = vmul.f32 %v13239_v9, %v13238_v61  ;;  %v1860_v5 = vadd.f32 %v13241_v46, %v1156_v58  ;;  %v13252_v59 = vld [vmem:[#allocation298_spill] sm:$0xff]  ;;  %v13253_v58 = vld [vmem:[#allocation303_spill] sm:$0xff] }
 0x8a1   :  { %v5042_v45 = vadd.f32 %v11102_v37, %v4402_v42  ;;  %v5041_v28 = vadd.f32 %v4858_v20, %v4401_v47  ;;  %v1140_v37 = vmul.f32 %v13244_v56, %v13243_v24  ;;  %v13245_v20 = vld [vmem:[#allocation77_spill] sm:$0xff]  ;;  %v11473_v42 = vld [vmem:[%s11958_s3 + $0x1d0] sm:$0xff]  ;;  %v13254_v9 = vld [vmem:[#allocation135_spill] sm:$0xff] }
 0x8a2   :  { %5607 = vrot.lane.b32.xlu0 %v5416_v49, %s6669_s10  ;;  %v1859_v49 = vadd.f32 %v13242_v52, %v1155_v18  ;;  %v13250_v47 = vld [vmem:[#allocation192_spill] sm:$0xff]  ;;  %v13257_v46 = vld [vmem:[#allocation239_spill] sm:$0xff]  ;;  %v13260_v56 = vld [vmem:[#allocation282_spill] sm:$0xff] }
 0x8a3   :  { %v5530_v13 = vpop.permute.xlu1 %5529  ;;  %v5682_v8 = vadd.f32 %v11137_v33, %v5042_v45  ;;  %v13249_v33 = vld [vmem:[#allocation346_spill] sm:$0xff]  ;;  %v13258_v52 = vld [vmem:[#allocation415_spill] sm:$0xff] }
 0x8a4   :  { %v5697_v54 = vadd.f32 %v5530_v13, %v5057_v38  ;;  %5593 = vrot.lane.b32.xlu1 %v5409_v19, %s6669_s10  ;;  %v11459_v62 = vpop.permute.xlu0 %5579  ;;  %v1139_v19 = vmul.f32 %v13246_v40, %v13245_v20  ;;  %v2499_v26 = vadd.f32 %v13247_v55, %v1859_v49  ;;  %v13248_v38 = vld [vmem:[#allocation2_spill] sm:$0xff]  ;;  %v4771_v13 = vmul.f32 %v11473_v42, %v13249_v33  ;;  %v13261_v20 = vld [vmem:[#allocation376_spill] sm:$0xff] }
 0x8a5   :  { %v2500_v12 = vadd.f32 %v13248_v38, %v1860_v5 }
 0x8a6   :  { %v6241_v36 = vpack.c.bf16 %v5698_v50, %v5697_v54  ;;  %5575 = vrot.lane.b32.xlu0 %v5400_v57, %s6669_s10  ;;  %v1843_v3 = vadd.f32 %v13250_v47, %v1139_v19  ;;  %v13251_v50 = vld [vmem:[#allocation187_spill] sm:$0xff]  ;;  %v3139_v61 = vadd.f32 %v13253_v58, %v2499_v26  ;;  %v13262_v19 = vld [vmem:[#allocation377_spill] sm:$0xff]  ;;  %v13263_v26 = vld [vmem:[#allocation224_spill] sm:$0xff] }
 0x8a7   :  { %v5498_v4 = vpop.permute.xlu1 %5497  ;;  %v1844_v54 = vadd.f32 %v13251_v50, %v1140_v37  ;;  %v3140_v29 = vadd.f32 %v13252_v59, %v2500_v12  ;;  %v13264_v12 = vld [vmem:[#allocation223_spill] sm:$0xff]  ;;  %v13266_v59 = vld [vmem:[#allocation360_spill] sm:$0xff]  ;;  %v13267_v58 = vld [vmem:[#allocation361_spill] sm:$0xff] }
 0x8a8   :  { %v5681_v25 = vadd.f32 %v5498_v4, %v5041_v28  ;;  %5561 = vrot.lane.b32.xlu1 %v5393_v60, %s6669_s10  ;;  %6242 = vmatprep.subr.bf16.mxu1 %v6241_v36  ;;  %v2483_v18 = vadd.f32 %v13254_v9, %v1843_v3  ;;  %v11483_v39 = vpop.permute.xlu0 %5547  ;;  %v13255_v60 = vld [vmem:[#allocation130_spill] sm:$0xff]  ;;  %v13256_v28 = vld [vmem:[#allocation240_spill] sm:$0xff] }
 0x8a9   :  { %v2484_v45 = vadd.f32 %v13255_v60, %v1844_v54  ;;  %v3779_v36 = vadd.f32 %v13256_v28, %v3139_v61  ;;  %v3780_v5 = vadd.f32 %v13257_v46, %v3140_v29  ;;  %v11491_v4 = vld [vmem:[%s11958_s3 + $0x150] sm:$0xff]  ;;  %v6636_v60 = vld [vmem:[%s11958_s3 + $0xe8] sm:$0xff] }
 0x8aa   :  { %v6243_v11 = vpack.c.bf16 %v5682_v8, %v5681_v25  ;;  %v4755_v49 = vmul.f32 %v11491_v4, %v13258_v52  ;;  %v13259_v8 = vld [vmem:[#allocation287_spill] sm:$0xff] }
 0x8ab   :  { %v4894_v57 = vpop.permute.xlu1 %4893  ;;  %v3123_v25 = vadd.f32 %v13259_v8, %v2483_v18  ;;  %v3124_v37 = vadd.f32 %v13260_v56, %v2484_v45  ;;  %v4420_v40 = vadd.f32 %v13261_v20, %v3780_v5  ;;  %v4419_v55 = vadd.f32 %v13262_v19, %v3779_v36  ;;  %v13268_v45 = vld [vmem:[#allocation147_spill] sm:$0xff] }
 0x8ac   :  { %4957 = vrot.lane.b32.xlu1 %v4771_v13, %s6668_s2  ;;  %6244 = vmatpush3.bf16.msra.mxu1 %v6243_v11  ;;  %v13265_v13 = vld [vmem:[#allocation348_spill] sm:$0xff]  ;;  %v11505_v50 = vpop.permute.xlu0 %4943  ;;  %v1158_v28 = vmul.f32 %v6636_v60, %v13268_v45  ;;  %v13271_v46 = vld [vmem:[#allocation75_spill] sm:$0xff] }
 0x8ad   :  { %v3763_v38 = vadd.f32 %v13263_v26, %v3123_v25  ;;  %v3764_v33 = vadd.f32 %v13264_v12, %v3124_v37  ;;  %v5411_v11 = vmul.f32 %v11473_v42, %v13265_v13  ;;  %v5060_v47 = vadd.f32 %v11167_v23, %v4420_v40  ;;  %v13269_v23 = vld [vmem:[#allocation145_spill] sm:$0xff]  ;;  %v13273_v37 = vld [vmem:[#allocation99_spill] sm:$0xff]  ;;  %v13276_v12 = vld [vmem:[#allocation86_spill] sm:$0xff] }
 0x8ae   :  { %v5059_v3 = vadd.f32 %v4894_v57, %v4419_v55  ;;  %v13270_v57 = vld [vmem:[#allocation425_spill] sm:$0xff]  ;;  %v5395_v5 = vmul.f32 %v11491_v4, %v13271_v46  ;;  %v13274_v55 = vld [vmem:[#allocation87_spill] sm:$0xff]  ;;  %v13283_v45 = vld [vmem:[#allocation300_spill] sm:$0xff] }
 0x8af   :  { %v4862_v24 = vpop.permute.xlu1 %4861  ;;  %v4404_v29 = vadd.f32 %v13266_v59, %v3764_v33  ;;  %v4403_v61 = vadd.f32 %v13267_v58, %v3763_v38  ;;  %v5700_v9 = vadd.f32 %v11200_v51, %v5060_v47  ;;  %v1157_v36 = vmul.f32 %v13270_v57, %v13269_v23  ;;  %v13272_v51 = vld [vmem:[#allocation98_spill] sm:$0xff]  ;;  %v13275_v26 = vld [vmem:[#allocation19_spill] sm:$0xff]  ;;  %v13279_v47 = vld [vmem:[#allocation8_spill] sm:$0xff] }
 0x8b0   :  { %4925 = vrot.lane.b32.xlu1 %v4755_v49, %s6668_s2  ;;  %v1862_v25 = vadd.f32 %v13272_v51, %v1158_v28  ;;  %v1142_v38 = vmul.f32 %v13275_v26, %v13274_v55  ;;  %v13277_v33 = vld [vmem:[#allocation427_spill] sm:$0xff]  ;;  %v13281_v58 = vld [vmem:[#allocation196_spill] sm:$0xff]  ;;  %v13284_v23 = vld [vmem:[#allocation305_spill] sm:$0xff] }
 0x8b1   :  { %v5044_v52 = vadd.f32 %v11187_v0, %v4404_v29  ;;  %v5043_v49 = vadd.f32 %v4862_v24, %v4403_v61  ;;  %v1861_v20 = vadd.f32 %v13273_v37, %v1157_v36  ;;  %v1141_v13 = vmul.f32 %v13277_v33, %v13276_v12  ;;  %v11528_v0 = vpop.permute.xlu0 %4911  ;;  %v13278_v24 = vld [vmem:[#allocation153_spill] sm:$0xff]  ;;  %v13285_v36 = vld [vmem:[#allocation138_spill] sm:$0xff] }
 0x8b2   :  { %v13288_v51 = vld [vmem:[#allocation241_spill] sm:$0xff]  ;;  %v13292_v33 = vld [vmem:[#allocation378_spill] sm:$0xff] }
 0x8b3   :  { %v5534_v54 = vpop.permute.xlu1 %5533  ;;  %v5684_v40 = vadd.f32 %v11222_v16, %v5044_v52  ;;  %v11535_v16 = vld [vmem:[%s11958_s3 + $0x1e0] sm:$0xff]  ;;  %v1845_v61 = vadd.f32 %v13281_v58, %v1141_v13  ;;  %v13289_v37 = vld [vmem:[#allocation417_spill] sm:$0xff] }
 0x8b4   :  { %v5699_v18 = vadd.f32 %v5534_v54, %v5059_v3  ;;  %5597 = vrot.lane.b32.xlu1 %v5411_v11, %s6669_s10  ;;  %v2501_v11 = vadd.f32 %v13278_v24, %v1861_v20  ;;  %v2502_v3 = vadd.f32 %v13279_v47, %v1862_v25  ;;  %v13280_v54 = vld [vmem:[#allocation349_spill] sm:$0xff]  ;;  %v13293_v24 = vld [vmem:[#allocation379_spill] sm:$0xff]  ;;  %v13294_v47 = vld [vmem:[#allocation226_spill] sm:$0xff] }
 0x8b5   :  { %v4773_v59 = vmul.f32 %v11535_v16, %v13280_v54  ;;  %v2485_v46 = vadd.f32 %v13285_v36, %v1845_v61  ;;  %v11556_v55 = vpop.permute.xlu0 %5583  ;;  %v13295_v54 = vld [vmem:[#allocation225_spill] sm:$0xff] }
 0x8b6   :  { %v6245_v8 = vpack.c.bf16 %v5700_v9, %v5699_v18  ;;  %v13282_v18 = vld [vmem:[#allocation191_spill] sm:$0xff]  ;;  %v3142_v28 = vadd.f32 %v13283_v45, %v2502_v3  ;;  %v3141_v57 = vadd.f32 %v13284_v23, %v2501_v11  ;;  %v13297_v45 = vld [vmem:[#allocation362_spill] sm:$0xff] }
 0x8b7   :  { %v5502_v56 = vpop.permute.xlu1 %5501  ;;  %v1846_v60 = vadd.f32 %v13282_v18, %v1142_v38  ;;  %v13291_v38 = vld [vmem:[#allocation284_spill] sm:$0xff]  ;;  %v13298_v23 = vld [vmem:[#allocation363_spill] sm:$0xff] }
 0x8b8   :  { %v5683_v19 = vadd.f32 %v5502_v56, %v5043_v49  ;;  %5565 = vrot.lane.b32.xlu1 %v5395_v5, %s6669_s10  ;;  %6246 = vmatprep.subr.bf16.mxu1 %v6245_v8  ;;  %v13286_v5 = vld [vmem:[#allocation133_spill] sm:$0xff]  ;;  %v13287_v49 = vld [vmem:[#allocation242_spill] sm:$0xff]  ;;  %v3782_v25 = vadd.f32 %v13288_v51, %v3142_v28  ;;  %v13302_v51 = vld [vmem:[#allocation428_spill] sm:$0xff] }
 0x8b9   :  { %v2486_v52 = vadd.f32 %v13286_v5, %v1846_v60  ;;  %v3781_v8 = vadd.f32 %v13287_v49, %v3141_v57  ;;  %v11551_v56 = vld [vmem:[%s11958_s3 + $0x160] sm:$0xff]  ;;  %v13299_v5 = vld [vmem:[#allocation151_spill] sm:$0xff] }
 0x8ba   :  { %v6247_v29 = vpack.c.bf16 %v5684_v40, %v5683_v19  ;;  %v4757_v20 = vmul.f32 %v11551_v56, %v13289_v37  ;;  %v13290_v40 = vld [vmem:[#allocation289_spill] sm:$0xff]  ;;  %v4422_v13 = vadd.f32 %v13292_v33, %v3782_v25  ;;  %v11575_v37 = vpop.permute.xlu0 %5551  ;;  %v13305_v33 = vld [vmem:[#allocation107_spill] sm:$0xff] }
 0x8bb   :  { %v4898_v9 = vpop.permute.xlu1 %4897  ;;  %v3125_v19 = vadd.f32 %v13290_v40, %v2485_v46  ;;  %v3126_v12 = vadd.f32 %v13291_v38, %v2486_v52  ;;  %v4421_v11 = vadd.f32 %v13293_v24, %v3781_v8  ;;  %v13300_v52 = vld [vmem:[#allocation342_spill] sm:$0xff]  ;;  %v13301_v8 = vld [vmem:[#allocation149_spill] sm:$0xff] }
 0x8bc   :  { %4961 = vrot.lane.b32.xlu1 %v4773_v59, %s6668_s2  ;;  %6248 = vmatpush3.bf16.msra.mxu1 %v6247_v29  ;;  %v13296_v29 = vld [vmem:[#allocation426_spill] sm:$0xff]  ;;  %v5062_v61 = vadd.f32 %v11249_v48, %v4422_v13  ;;  %v1160_v49 = vmul.f32 %v13300_v52, %v13299_v5  ;;  %v1159_v25 = vmul.f32 %v13302_v51, %v13301_v8  ;;  %v13303_v48 = vld [vmem:[#allocation343_spill] sm:$0xff] }
 0x8bd   :  { %v3765_v3 = vadd.f32 %v13294_v47, %v3125_v19  ;;  %v3766_v59 = vadd.f32 %v13295_v54, %v3126_v12  ;;  %v5413_v58 = vmul.f32 %v11535_v16, %v13296_v29  ;;  %v5061_v18 = vadd.f32 %v4898_v9, %v4421_v11  ;;  %v13304_v38 = vld [vmem:[#allocation106_spill] sm:$0xff]  ;;  %v13306_v47 = vld [vmem:[#allocation95_spill] sm:$0xff] }
 0x8be   :  { %v5702_v36 = vadd.f32 %v11282_v22, %v5062_v61  ;;  %v5397_v9 = vmul.f32 %v11551_v56, %v13303_v48  ;;  %v1864_v22 = vadd.f32 %v13304_v38, %v1160_v49  ;;  %v1863_v13 = vadd.f32 %v13305_v33, %v1159_v25  ;;  %v13309_v29 = vld [vmem:[#allocation430_spill] sm:$0xff]  ;;  %v13311_v61 = vld [vmem:[#allocation12_spill] sm:$0xff]  ;;  %v13314_v5 = vld [vmem:[#allocation195_spill] sm:$0xff] }
 0x8bf   :  { %v4866_v26 = vpop.permute.xlu1 %4865  ;;  %v4406_v28 = vadd.f32 %v13297_v45, %v3766_v59  ;;  %v4405_v57 = vadd.f32 %v13298_v23, %v3765_v3  ;;  %v13307_v3 = vld [vmem:[#allocation340_spill] sm:$0xff]  ;;  %v13308_v59 = vld [vmem:[#allocation94_spill] sm:$0xff]  ;;  %v13316_v51 = vld [vmem:[#allocation307_spill] sm:$0xff] }
 0x8c0   :  { %4929 = vrot.lane.b32.xlu1 %v4757_v20, %s6668_s2  ;;  %v1144_v54 = vmul.f32 %v13307_v3, %v13306_v47  ;;  %v13313_v23 = vld [vmem:[#allocation200_spill] sm:$0xff]  ;;  %v13315_v49 = vld [vmem:[#allocation302_spill] sm:$0xff]  ;;  %v13317_v48 = vld [vmem:[#allocation141_spill] sm:$0xff] }
 0x8c1   :  { %v5046_v20 = vadd.f32 %v11269_v21, %v4406_v28  ;;  %v5045_v40 = vadd.f32 %v4866_v26, %v4405_v57  ;;  %v13310_v21 = vld [vmem:[#allocation10_spill] sm:$0xff]  ;;  %v11611_v33 = vld [vmem:[%s11958_s3 + $0x170] sm:$0xff] }
 0x8c2   :  { %v2503_v26 = vadd.f32 %v13310_v21, %v1863_v13  ;;  %v1848_v52 = vadd.f32 %v13314_v5, %v1144_v54  ;;  %v13321_v13 = vld [vmem:[#allocation418_spill] sm:$0xff]  ;;  %v13325_v21 = vld [vmem:[#allocation381_spill] sm:$0xff] }
 0x8c3   :  { %v5538_v60 = vpop.permute.xlu1 %5537  ;;  %v5686_v24 = vadd.f32 %v11302_v63, %v5046_v20  ;;  %v13312_v63 = vld [vmem:[#allocation429_spill] sm:$0xff]  ;;  %v13323_v54 = vld [vmem:[#allocation286_spill] sm:$0xff] }
 0x8c4   :  { %v5701_v46 = vadd.f32 %v5538_v60, %v5061_v18  ;;  %5601 = vrot.lane.b32.xlu1 %v5413_v58, %s6669_s10  ;;  %v1143_v58 = vmul.f32 %v13309_v29, %v13308_v59  ;;  %v2504_v18 = vadd.f32 %v13311_v61, %v1864_v22  ;;  %v11593_v60 = vld [vmem:[%s11958_s3 + $0x1f0] sm:$0xff]  ;;  %v3143_v25 = vadd.f32 %v13316_v51, %v2503_v26  ;;  %v13318_v20 = vld [vmem:[#allocation137_spill] sm:$0xff]  ;;  %v13320_v22 = vld [vmem:[#allocation243_spill] sm:$0xff] }
 0x8c5   :  { %v4775_v45 = vmul.f32 %v11593_v60, %v13312_v63  ;;  %v13324_v29 = vld [vmem:[#allocation380_spill] sm:$0xff] }
 0x8c6   :  { %v6249_v19 = vpack.c.bf16 %v5702_v36, %v5701_v46  ;;  %v1847_v57 = vadd.f32 %v13313_v23, %v1143_v58  ;;  %v11598_v36 = vpop.permute.xlu0 %4947  ;;  %v3144_v8 = vadd.f32 %v13315_v49, %v2504_v18  ;;  %v13326_v61 = vld [vmem:[#allocation228_spill] sm:$0xff]  ;;  %v13328_v23 = vld [vmem:[#allocation69_spill] sm:$0xff] }
 0x8c7   :  { %v5506_v12 = vpop.permute.xlu1 %5505 }
 0x8c8   :  { %v5685_v11 = vadd.f32 %v5506_v12, %v5045_v40  ;;  %5569 = vrot.lane.b32.xlu1 %v5397_v9, %s6669_s10  ;;  %6250 = vmatprep.subr.bf16.mxu1 %v6249_v19  ;;  %v2487_v9 = vadd.f32 %v13317_v48, %v1847_v57  ;;  %v2488_v40 = vadd.f32 %v13318_v20, %v1848_v52  ;;  %v13319_v19 = vld [vmem:[#allocation244_spill] sm:$0xff] }
 0x8c9   :  { %v3783_v38 = vadd.f32 %v13319_v19, %v3143_v25  ;;  %v3784_v12 = vadd.f32 %v13320_v22, %v3144_v8  ;;  %v5415_v57 = vmul.f32 %v11593_v60, %v13328_v23  ;;  %v13329_v8 = vld [vmem:[#allocation364_spill] sm:$0xff]  ;;  %v13330_v25 = vld [vmem:[#allocation365_spill] sm:$0xff]  ;;  %v13339_v23 = vld [vmem:[#allocation79_spill] sm:$0xff] }
 0x8ca   :  { %v6251_v28 = vpack.c.bf16 %v5686_v24, %v5685_v11  ;;  %v4759_v24 = vmul.f32 %v11611_v33, %v13321_v13  ;;  %v13322_v11 = vld [vmem:[#allocation291_spill] sm:$0xff]  ;;  %v3128_v59 = vadd.f32 %v13323_v54, %v2488_v40  ;;  %v11621_v63 = vpop.permute.xlu0 %4915  ;;  %v13331_v19 = vld [vmem:[#allocation61_spill] sm:$0xff]  ;;  %v13332_v22 = vld [vmem:[#allocation60_spill] sm:$0xff] }
 0x8cb   :  { %v4902_v46 = vpop.permute.xlu1 %4901  ;;  %v3127_v47 = vadd.f32 %v13322_v11, %v2487_v9  ;;  %v4424_v58 = vadd.f32 %v13324_v29, %v3784_v12  ;;  %v4423_v26 = vadd.f32 %v13325_v21, %v3783_v38  ;;  %v6641_v40 = vld [vmem:[%s11958_s3 + $0x188] sm:$0xff]  ;;  %v13335_v29 = vld [vmem:[#allocation186_spill] sm:$0xff] }
 0x8cc   :  { %4965 = vrot.lane.b32.xlu1 %v4775_v45, %s6668_s2  ;;  %6252 = vmatpush3.bf16.msra.mxu1 %v6251_v28  ;;  %v13327_v45 = vld [vmem:[#allocation227_spill] sm:$0xff]  ;;  %v1178_v38 = vmul.f32 %v6641_v40, %v13331_v19  ;;  %v5740_v19 = vld [vmem:[%s11959_s4 + $0x18] sm:$0xff] }
 0x8cd   :  { %v3767_v18 = vadd.f32 %v13326_v61, %v3127_v47  ;;  %v3768_v28 = vadd.f32 %v13327_v45, %v3128_v59  ;;  %v5064_v5 = vadd.f32 %v11329_v35, %v4424_v58  ;;  %v5063_v52 = vadd.f32 %v4902_v46, %v4423_v26  ;;  %v13333_v46 = vld [vmem:[#allocation338_spill] sm:$0xff]  ;;  %v13338_v45 = vld [vmem:[#allocation76_spill] sm:$0xff] }
 0x8ce   :  { %v1177_v35 = vmul.f32 %v11068_v34, %v13332_v22  ;;  %v5399_v12 = vmul.f32 %v11611_v33, %v13333_v46  ;;  %v11641_v54 = vpop.permute.xlu0 %5587  ;;  %v13336_v34 = vld [vmem:[#allocation154_spill] sm:$0xff] }
 0x8cf   :  { %v4870_v3 = vpop.permute.xlu1 %4869  ;;  %v4408_v51 = vadd.f32 %v13329_v8, %v3768_v28  ;;  %v4407_v48 = vadd.f32 %v13330_v25, %v3767_v18  ;;  %v5704_v9 = vadd.f32 %v11362_v53, %v5064_v5  ;;  %v13334_v53 = vld [vmem:[#allocation105_spill] sm:$0xff]  ;;  %v1161_v61 = vmul.f32 %v11091_v44, %v13336_v34  ;;  %v13342_v25 = vld [vmem:[#allocation320_spill] sm:$0xff]  ;;  %v13351_v34 = vld [vmem:[#allocation399_spill] sm:$0xff] }
 0x8d0   :  { %4933 = vrot.lane.b32.xlu1 %v4759_v24, %s6668_s2  ;;  %v1882_v47 = vadd.f32 %v13334_v53, %v1178_v38  ;;  %v1881_v58 = vadd.f32 %v13335_v29, %v1177_v35  ;;  %v13341_v8 = vld [vmem:[#allocation117_spill] sm:$0xff]  ;;  %v13344_v38 = vld [vmem:[#allocation14_spill] sm:$0xff]  ;;  %v13345_v35 = vld [vmem:[#allocation16_spill] sm:$0xff] }
 0x8d1   :  { %v5048_v13 = vadd.f32 %v11349_v32, %v4408_v51  ;;  %v5047_v24 = vadd.f32 %v4870_v3, %v4407_v48  ;;  %v6642_v32 = vld [vmem:[%s11958_s3 + $0x108] sm:$0xff]  ;;  %v13337_v3 = vld [vmem:[#allocation156_spill] sm:$0xff]  ;;  %v1865_v51 = vadd.f32 %v13341_v8, %v1161_v61  ;;  %v13349_v29 = vld [vmem:[#allocation309_spill] sm:$0xff] }
 0x8d2   :  { %v1162_v18 = vmul.f32 %v6642_v32, %v13337_v3  ;;  %v2521_v28 = vadd.f32 %v13338_v45, %v1881_v58  ;;  %v11661_v40 = vpop.permute.xlu0 %5555  ;;  %v13352_v32 = vld [vmem:[#allocation246_spill] sm:$0xff]  ;;  %v13355_v8 = vld [vmem:[#allocation383_spill] sm:$0xff] }
 0x8d3   :  { %v5542_v49 = vpop.permute.xlu1 %5541  ;;  %v5688_v21 = vadd.f32 %v11385_v43, %v5048_v13  ;;  %v13340_v43 = vld [vmem:[#allocation116_spill] sm:$0xff]  ;;  %v2505_v22 = vadd.f32 %v13344_v38, %v1865_v51 }
 0x8d4   :  { %v5703_v20 = vadd.f32 %v5542_v49, %v5063_v52  ;;  %5605 = vrot.lane.b32.xlu1 %v5415_v57, %s6669_s10  ;;  %v2522_v57 = vadd.f32 %v13339_v23, %v1882_v47  ;;  %v1866_v49 = vadd.f32 %v13340_v43, %v1162_v18  ;;  %v13348_v47 = vld [vmem:[#allocation304_spill] sm:$0xff]  ;;  %v13353_v18 = vld [vmem:[#allocation245_spill] sm:$0xff]  ;;  %v13354_v43 = vld [vmem:[#allocation382_spill] sm:$0xff] }
 0x8d5   :  { %v3145_v58 = vadd.f32 %v13349_v29, %v2505_v22 }
 0x8d6   :  { %v6253_v11 = vpack.c.bf16 %v5704_v9, %v5703_v20  ;;  %v3162_v48 = vadd.f32 %v13342_v25, %v2522_v57  ;;  %v13343_v9 = vld [vmem:[#allocation325_spill] sm:$0xff]  ;;  %v5737_v20 = vld [vmem:[%s11959_s4] sm:$0xff]  ;;  %v2506_v46 = vadd.f32 %v13345_v35, %v1866_v49  ;;  %v11677_v57 = vpop.permute.xlu0 %4951 }
 0x8d7   :  { %v5510_v59 = vpop.permute.xlu1 %5509  ;;  %v3161_v44 = vadd.f32 %v13343_v9, %v2521_v28  ;;  %v3785_v3 = vadd.f32 %v13352_v32, %v3145_v58  ;;  %v13356_v9 = vld [vmem:[#allocation70_spill] sm:$0xff]  ;;  %v13362_v58 = vld [vmem:[#allocation84_spill] sm:$0xff] }
 0x8d8   :  { %v5687_v26 = vadd.f32 %v5510_v59, %v5047_v24  ;;  %5573 = vrot.lane.b32.xlu1 %v5399_v12, %s6669_s10  ;;  %6254 = vmatprep.subr.bf16.mxu1 %v6253_v11  ;;  %v13346_v12 = vld [vmem:[#allocation262_spill] sm:$0xff]  ;;  %v13347_v24 = vld [vmem:[#allocation261_spill] sm:$0xff]  ;;  %v3146_v59 = vadd.f32 %v13348_v47, %v2506_v46 }
 0x8d9   :  { %v3801_v13 = vadd.f32 %v13346_v12, %v3161_v44  ;;  %v3802_v11 = vadd.f32 %v13347_v24, %v3162_v48  ;;  %v4425_v51 = vadd.f32 %v13355_v8, %v3785_v3  ;;  %v1179_v44 = vmul.f32 %v11150_v10, %v13356_v9  ;;  %v13358_v46 = vld [vmem:[#allocation185_spill] sm:$0xff]  ;;  %v13369_v8 = vld [vmem:[#allocation20_spill] sm:$0xff]  ;;  %v13371_v9 = vld [vmem:[#allocation263_spill] sm:$0xff] }
 0x8da   :  { %v6255_v5 = vpack.c.bf16 %v5688_v21, %v5687_v26  ;;  %v13350_v21 = vld [vmem:[#allocation398_spill] sm:$0xff]  ;;  %v3786_v45 = vadd.f32 %v13353_v18, %v3146_v59  ;;  %v13360_v10 = vld [vmem:[#allocation157_spill] sm:$0xff]  ;;  %v11694_v59 = vpop.permute.xlu0 %4919 }
 0x8db   :  { %v4938_v52 = vpop.permute.xlu1 %4937  ;;  %v4442_v26 = vadd.f32 %v13350_v21, %v3802_v11  ;;  %v4441_v61 = vadd.f32 %v13351_v34, %v3801_v13  ;;  %v13359_v13 = vld [vmem:[#allocation190_spill] sm:$0xff]  ;;  %v1163_v47 = vmul.f32 %v11176_v2, %v13360_v10 }
 0x8dc   :  { %6256 = vmatpush3.bf16.msra.mxu1 %v6255_v5  ;;  %v4426_v49 = vadd.f32 %v13354_v43, %v3786_v45  ;;  %v1883_v24 = vadd.f32 %v13359_v13, %v1179_v44  ;;  %v13365_v18 = vld [vmem:[#allocation126_spill] sm:$0xff] }
 0x8dd   :  { %v5082_v28 = vadd.f32 %v11413_v31, %v4442_v26  ;;  %v5081_v23 = vadd.f32 %v4938_v52, %v4441_v61  ;;  %v13363_v26 = vld [vmem:[#allocation91_spill] sm:$0xff]  ;;  %v1867_v45 = vadd.f32 %v13365_v18, %v1163_v47  ;;  %v13368_v43 = vld [vmem:[#allocation18_spill] sm:$0xff] }
 0x8de   :  { %v5066_v52 = vadd.f32 %v11435_v27, %v4426_v49  ;;  %v6644_v27 = vld [vmem:[%s11958_s3 + $0x118] sm:$0xff]  ;;  %v2523_v21 = vadd.f32 %v13362_v58, %v1883_v24  ;;  %v13376_v24 = vld [vmem:[#allocation248_spill] sm:$0xff] }
 0x8df   :  { %v4906_v53 = vpop.permute.xlu1 %4905  ;;  %5813 = vmatmul.mubr.f32.vlgmr.msra.gmra.mrb[22].mxu1 %v5737_v20  ;;  %v5722_v25 = vadd.f32 %v11459_v62, %v5082_v28  ;;  %v6643_v20 = vld [vmem:[%s11958_s3 + $0x198] sm:$0xff]  ;;  %v13366_v28 = vld [vmem:[#allocation322_spill] sm:$0xff]  ;;  %v2507_v49 = vadd.f32 %v13368_v43, %v1867_v45  ;;  %v6645_v45 = vld [vmem:[%s11958_s3 + $0x1a8] sm:$0xff] }
 0x8e0   :  { %5882 = vmatprep.mubr.f32.mxu1 %v5740_v19  ;;  %v13357_v19 = vld [vmem:[#allocation71_spill] sm:$0xff]  ;;  %v5065_v38 = vadd.f32 %v4906_v53, %v4425_v51  ;;  %v5706_v62 = vadd.f32 %v11483_v39, %v5066_v52  ;;  %v13364_v39 = vld [vmem:[#allocation205_spill] sm:$0xff] }
 0x8e1   :  { %v1180_v31 = vmul.f32 %v6643_v20, %v13357_v19  ;;  %v13361_v53 = vld [vmem:[#allocation159_spill] sm:$0xff]  ;;  %v11710_v20 = vpop.permute.xlu0 %5591  ;;  %v13382_v43 = vld [vmem:[#allocation189_spill] sm:$0xff] }
 0x8e2   :  { %v1164_v29 = vmul.f32 %v6644_v27, %v13361_v53 }
 0x8e3   :  { %v5578_v5 = vpop.permute.xlu1 %5577  ;;  %v1884_v12 = vadd.f32 %v13358_v46, %v1180_v31  ;;  %v13372_v31 = vld [vmem:[#allocation306_spill] sm:$0xff] }
 0x8e4   :  { %v5721_v48 = vadd.f32 %v5578_v5, %v5081_v23  ;;  %v1868_v3 = vadd.f32 %v13364_v39, %v1164_v29  ;;  %v13367_v23 = vld [vmem:[#allocation326_spill] sm:$0xff]  ;;  %v13378_v29 = vld [vmem:[#allocation384_spill] sm:$0xff] }
 0x8e5   :  { %v2524_v34 = vadd.f32 %v13363_v26, %v1884_v12  ;;  %v3163_v5 = vadd.f32 %v13367_v23, %v2523_v21  ;;  %v13375_v12 = vld [vmem:[#allocation401_spill] sm:$0xff]  ;;  %v13380_v39 = vld [vmem:[#allocation80_spill] sm:$0xff]  ;;  %v11724_v18 = vpop.permute.xlu0 %5559 }
 0x8e6   :  { %v6257_v22 = vpack.c.bf16 %v5722_v25, %v5721_v48  ;;  %v2508_v51 = vadd.f32 %v13369_v8, %v1868_v3  ;;  %v13370_v25 = vld [vmem:[#allocation264_spill] sm:$0xff]  ;;  %v13379_v21 = vld [vmem:[#allocation385_spill] sm:$0xff]  ;;  %v1181_v3 = vmul.f32 %v11235_v1, %v13380_v39 }
 0x8e7   :  { %v5546_v35 = vpop.permute.xlu1 %5545  ;;  %v3164_v2 = vadd.f32 %v13366_v28, %v2524_v34  ;;  %v3803_v48 = vadd.f32 %v13370_v25, %v3163_v5  ;;  %v13381_v28 = vld [vmem:[#allocation81_spill] sm:$0xff]  ;;  %v13384_v25 = vld [vmem:[#allocation160_spill] sm:$0xff] }
 0x8e8   :  { %v5705_v11 = vadd.f32 %v5546_v35, %v5065_v38  ;;  %6258 = vmatprep.subr.bf16.mxu1 %v6257_v22  ;;  %v3148_v52 = vadd.f32 %v13372_v31, %v2508_v51  ;;  %v13373_v38 = vld [vmem:[#allocation311_spill] sm:$0xff]  ;;  %v13374_v35 = vld [vmem:[#allocation400_spill] sm:$0xff] }
 0x8e9   :  { %v3804_v44 = vadd.f32 %v13371_v9, %v3164_v2  ;;  %v3147_v22 = vadd.f32 %v13373_v38, %v2507_v49  ;;  %v4443_v13 = vadd.f32 %v13375_v12, %v3803_v48  ;;  %v1165_v48 = vmul.f32 %v11258_v14, %v13384_v25  ;;  %v6646_v9 = vld [vmem:[%s11958_s3 + $0x128] sm:$0xff]  ;;  %v13396_v39 = vld [vmem:[#allocation308_spill] sm:$0xff] }
 0x8ea   :  { %v6259_v61 = vpack.c.bf16 %v5706_v62, %v5705_v11  ;;  %v13377_v11 = vld [vmem:[#allocation247_spill] sm:$0xff] }
 0x8eb   :  { %v4942_v32 = vpop.permute.xlu1 %4941  ;;  %v4444_v46 = vadd.f32 %v13374_v35, %v3804_v44  ;;  %v3787_v62 = vadd.f32 %v13376_v24, %v3147_v22  ;;  %v3788_v10 = vadd.f32 %v13377_v11, %v3148_v52  ;;  %v13385_v44 = vld [vmem:[#allocation162_spill] sm:$0xff]  ;;  %v11742_v35 = vpop.permute.xlu0 %4955  ;;  %v13391_v11 = vld [vmem:[#allocation328_spill] sm:$0xff] }
 0x8ec   :  { %6260 = vmatpush3.bf16.msra.mxu1 %v6259_v61  ;;  %v5083_v27 = vadd.f32 %v4942_v32, %v4443_v13  ;;  %v13387_v52 = vld [vmem:[#allocation102_spill] sm:$0xff]  ;;  %v13389_v13 = vld [vmem:[#allocation209_spill] sm:$0xff] }
 0x8ed   :  { %v5084_v47 = vadd.f32 %v11505_v50, %v4444_v46  ;;  %v4428_v58 = vadd.f32 %v13378_v29, %v3788_v10  ;;  %v4427_v26 = vadd.f32 %v13379_v21, %v3787_v62  ;;  %v1182_v50 = vmul.f32 %v6645_v45, %v13381_v28  ;;  %v13390_v62 = vld [vmem:[#allocation324_spill] sm:$0xff]  ;;  %v13397_v45 = vld [vmem:[#allocation313_spill] sm:$0xff] }
 0x8ee   :  { %v1869_v24 = vadd.f32 %v13389_v13, %v1165_v48  ;;  %v13402_v48 = vld [vmem:[#allocation386_spill] sm:$0xff] }
 0x8ef   :  { %v4910_v19 = vpop.permute.xlu1 %4909  ;;  %v5724_v34 = vadd.f32 %v11556_v55, %v5084_v47  ;;  %v5068_v32 = vadd.f32 %v11528_v0, %v4428_v58  ;;  %v1886_v49 = vadd.f32 %v13382_v43, %v1182_v50  ;;  %v13383_v55 = vld [vmem:[#allocation194_spill] sm:$0xff]  ;;  %v1166_v0 = vmul.f32 %v6646_v9, %v13385_v44  ;;  %v13403_v44 = vld [vmem:[#allocation387_spill] sm:$0xff] }
 0x8f0   :  { %v5067_v2 = vadd.f32 %v4910_v19, %v4427_v26  ;;  %v1885_v8 = vadd.f32 %v13383_v55, %v1181_v3  ;;  %v13386_v19 = vld [vmem:[#allocation89_spill] sm:$0xff]  ;;  %v13392_v47 = vld [vmem:[#allocation22_spill] sm:$0xff] }
 0x8f1   :  { %v5708_v51 = vadd.f32 %v11575_v37, %v5068_v32  ;;  %v2526_v38 = vadd.f32 %v13387_v52, %v1886_v49  ;;  %v13388_v37 = vld [vmem:[#allocation206_spill] sm:$0xff]  ;;  %v13395_v26 = vld [vmem:[#allocation265_spill] sm:$0xff]  ;;  %v13404_v52 = vld [vmem:[#allocation88_spill] sm:$0xff] }
 0x8f2   :  { %v2525_v31 = vadd.f32 %v13386_v19, %v1885_v8  ;;  %v1870_v12 = vadd.f32 %v13388_v37, %v1166_v0  ;;  %v13394_v58 = vld [vmem:[#allocation266_spill] sm:$0xff]  ;;  %v13401_v55 = vld [vmem:[#allocation249_spill] sm:$0xff] }
 0x8f3   :  { %v5582_v53 = vpop.permute.xlu1 %5581  ;;  %v3166_v14 = vadd.f32 %v13390_v62, %v2526_v38  ;;  %v13398_v50 = vld [vmem:[#allocation402_spill] sm:$0xff]  ;;  %v1183_v38 = vmul.f32 %v11315_v7, %v13404_v52 }
 0x8f4   :  { %v5723_v61 = vadd.f32 %v5582_v53, %v5083_v27  ;;  %v3165_v10 = vadd.f32 %v13391_v11, %v2525_v31  ;;  %v2509_v27 = vadd.f32 %v13392_v47, %v1869_v24  ;;  %v13393_v53 = vld [vmem:[#allocation24_spill] sm:$0xff]  ;;  %v13400_v43 = vld [vmem:[#allocation250_spill] sm:$0xff] }
 0x8f5   :  { %v2510_v29 = vadd.f32 %v13393_v53, %v1870_v12  ;;  %v13405_v37 = vld [vmem:[#allocation90_spill] sm:$0xff] }
 0x8f6   :  { %v6261_v23 = vpack.c.bf16 %v5724_v34, %v5723_v61  ;;  %v3805_v21 = vadd.f32 %v13394_v58, %v3165_v10  ;;  %v3806_v34 = vadd.f32 %v13395_v26, %v3166_v14  ;;  %v3149_v28 = vadd.f32 %v13397_v45, %v2509_v27  ;;  %v13406_v14 = vld [vmem:[#allocation193_spill] sm:$0xff]  ;;  %v13408_v27 = vld [vmem:[#allocation164_spill] sm:$0xff]  ;;  %v13412_v45 = vld [vmem:[#allocation207_spill] sm:$0xff] }
 0x8f7   :  { %v5550_v5 = vpop.permute.xlu1 %5549  ;;  %v3150_v3 = vadd.f32 %v13396_v39, %v2510_v29  ;;  %v1167_v53 = vmul.f32 %v11338_v6, %v13408_v27  ;;  %v13409_v29 = vld [vmem:[#allocation166_spill] sm:$0xff]  ;;  %v13427_v27 = vld [vmem:[#allocation389_spill] sm:$0xff] }
 0x8f8   :  { %v5707_v1 = vadd.f32 %v5550_v5, %v5067_v2  ;;  %6262 = vmatprep.subr.bf16.mxu1 %v6261_v23  ;;  %v4446_v32 = vadd.f32 %v13398_v50, %v3806_v34  ;;  %v13399_v2 = vld [vmem:[#allocation403_spill] sm:$0xff]  ;;  %v11756_v5 = vpop.permute.xlu0 %4923  ;;  %v3789_v49 = vadd.f32 %v13400_v43, %v3149_v28  ;;  %v13411_v34 = vld [vmem:[#allocation108_spill] sm:$0xff] }
 0x8f9   :  { %v4445_v23 = vadd.f32 %v13399_v2, %v3805_v21  ;;  %v3790_v8 = vadd.f32 %v13401_v55, %v3150_v3  ;;  %v13410_v21 = vld [vmem:[#allocation85_spill] sm:$0xff] }
 0x8fa   :  { %v6263_v22 = vpack.c.bf16 %v5708_v51, %v5707_v1  ;;  %v5086_v51 = vadd.f32 %v11598_v36, %v4446_v32  ;;  %v4429_v0 = vadd.f32 %v13403_v44, %v3789_v49  ;;  %v13414_v32 = vld [vmem:[#allocation327_spill] sm:$0xff]  ;;  %v13416_v49 = vld [vmem:[#allocation28_spill] sm:$0xff] }
 0x8fb   :  { %v4946_v46 = vpop.permute.xlu1 %4945  ;;  %v4430_v9 = vadd.f32 %v13402_v48, %v3790_v8  ;;  %v13417_v8 = vld [vmem:[#allocation31_spill] sm:$0xff] }
 0x8fc   :  { %6264 = vmatpush3.bf16.msra.mxu1 %v6263_v22  ;;  %v5085_v1 = vadd.f32 %v4946_v46, %v4445_v23  ;;  %v5726_v19 = vadd.f32 %v11641_v54, %v5086_v51  ;;  %v6647_v22 = vld [vmem:[%s11958_s3 + $0x1b8] sm:$0xff]  ;;  %v11771_v24 = vpop.permute.xlu0 %5595  ;;  %v13407_v54 = vld [vmem:[#allocation198_spill] sm:$0xff]  ;;  %v13419_v48 = vld [vmem:[#allocation267_spill] sm:$0xff] }
 0x8fd   :  { %v1184_v12 = vmul.f32 %v6647_v22, %v13405_v37  ;;  %v5070_v36 = vadd.f32 %v11621_v63, %v4430_v9  ;;  %v1887_v10 = vadd.f32 %v13407_v54, %v1183_v38  ;;  %v6648_v63 = vld [vmem:[%s11958_s3 + $0x138] sm:$0xff]  ;;  %v13415_v23 = vld [vmem:[#allocation330_spill] sm:$0xff]  ;;  %v13422_v38 = vld [vmem:[#allocation404_spill] sm:$0xff] }
 0x8fe   :  { %v1168_v58 = vmul.f32 %v6648_v63, %v13409_v29  ;;  %v13423_v37 = vld [vmem:[#allocation405_spill] sm:$0xff] }
 0x8ff   :  { %v4914_v61 = vpop.permute.xlu1 %4913  ;;  %v1888_v11 = vadd.f32 %v13406_v14, %v1184_v12  ;;  %v5710_v47 = vadd.f32 %v11661_v40, %v5070_v36  ;;  %v2527_v26 = vadd.f32 %v13410_v21, %v1887_v10  ;;  %v13413_v40 = vld [vmem:[#allocation210_spill] sm:$0xff]  ;;  %v13424_v36 = vld [vmem:[#allocation252_spill] sm:$0xff] }
 0x900   :  { %v5069_v46 = vadd.f32 %v4914_v61, %v4429_v0  ;;  %v1872_v28 = vadd.f32 %v13412_v45, %v1168_v58  ;;  %v1871_v50 = vadd.f32 %v13413_v40, %v1167_v53  ;;  %v11788_v43 = vpop.permute.xlu0 %5563  ;;  %v13420_v0 = vld [vmem:[#allocation310_spill] sm:$0xff]  ;;  %v13428_v58 = vld [vmem:[#allocation96_spill] sm:$0xff] }
 0x901   :  { %v2528_v61 = vadd.f32 %v13411_v34, %v1888_v11  ;;  %v3167_v6 = vadd.f32 %v13415_v23, %v2527_v26  ;;  %v1185_v21 = vmul.f32 %v11396_v17, %v13428_v58  ;;  %v6649_v26 = vld [vmem:[%s11958_s3 + $0x1c8] sm:$0xff]  ;;  %v13429_v34 = vld [vmem:[#allocation97_spill] sm:$0xff]  ;;  %v13432_v17 = vld [vmem:[#allocation168_spill] sm:$0xff] }
 0x902   :  { %v2511_v55 = vadd.f32 %v13416_v49, %v1871_v50  ;;  %v2512_v51 = vadd.f32 %v13417_v8, %v1872_v28  ;;  %v13430_v28 = vld [vmem:[#allocation197_spill] sm:$0xff]  ;;  %v13431_v50 = vld [vmem:[#allocation202_spill] sm:$0xff]  ;;  %v1169_v23 = vmul.f32 %v11422_v15, %v13432_v17  ;;  %v13452_v17 = vld [vmem:[#allocation103_spill] sm:$0xff] }
 0x903   :  { %v5586_v25 = vpop.permute.xlu1 %5585  ;;  %v3168_v2 = vadd.f32 %v13414_v32, %v2528_v61  ;;  %v1889_v32 = vadd.f32 %v13431_v50, %v1185_v21  ;;  %v13433_v49 = vld [vmem:[#allocation169_spill] sm:$0xff]  ;;  %v13451_v50 = vld [vmem:[#allocation391_spill] sm:$0xff] }
 0x904   :  { %v5725_v31 = vadd.f32 %v5586_v25, %v5085_v1  ;;  %v13418_v1 = vld [vmem:[#allocation268_spill] sm:$0xff]  ;;  %v11801_v54 = vpop.permute.xlu0 %4959  ;;  %v13434_v8 = vld [vmem:[#allocation109_spill] sm:$0xff] }
 0x905   :  { %v3807_v25 = vadd.f32 %v13418_v1, %v3167_v6  ;;  %v3808_v9 = vadd.f32 %v13419_v48, %v3168_v2  ;;  %v13435_v1 = vld [vmem:[#allocation111_spill] sm:$0xff]  ;;  %v13447_v58 = vld [vmem:[#allocation29_spill] sm:$0xff] }
 0x906   :  { %v6265_v13 = vpack.c.bf16 %v5726_v19, %v5725_v31  ;;  %v3152_v19 = vadd.f32 %v13420_v0, %v2512_v51  ;;  %v13421_v31 = vld [vmem:[#allocation315_spill] sm:$0xff]  ;;  %v2529_v51 = vadd.f32 %v13434_v8, %v1889_v32 }
 0x907   :  { %v5554_v62 = vpop.permute.xlu1 %5553  ;;  %v3151_v52 = vadd.f32 %v13421_v31, %v2511_v55  ;;  %v4448_v22 = vadd.f32 %v13422_v38, %v3808_v9  ;;  %v4447_v12 = vadd.f32 %v13423_v37, %v3807_v25  ;;  %v13437_v0 = vld [vmem:[#allocation211_spill] sm:$0xff]  ;;  %v13438_v31 = vld [vmem:[#allocation329_spill] sm:$0xff] }
 0x908   :  { %v5709_v7 = vadd.f32 %v5554_v62, %v5069_v46  ;;  %6266 = vmatprep.subr.bf16.mxu1 %v6265_v13  ;;  %v13425_v13 = vld [vmem:[#allocation251_spill] sm:$0xff]  ;;  %v11818_v6 = vpop.permute.xlu0 %4927 }
 0x909   :  { %v3791_v46 = vadd.f32 %v13424_v36, %v3151_v52  ;;  %v3792_v62 = vadd.f32 %v13425_v13, %v3152_v19  ;;  %v5088_v14 = vadd.f32 %v11677_v57, %v4448_v22  ;;  %v1186_v57 = vmul.f32 %v6649_v26, %v13429_v34  ;;  %v13439_v52 = vld [vmem:[#allocation331_spill] sm:$0xff]  ;;  %v13440_v22 = vld [vmem:[#allocation38_spill] sm:$0xff] }
 0x90a   :  { %v6267_v39 = vpack.c.bf16 %v5710_v47, %v5709_v7  ;;  %v13426_v47 = vld [vmem:[#allocation388_spill] sm:$0xff]  ;;  %v1873_v19 = vadd.f32 %v13437_v0, %v1169_v23  ;;  %v3169_v38 = vadd.f32 %v13439_v52, %v2529_v51  ;;  %v13448_v26 = vld [vmem:[#allocation254_spill] sm:$0xff]  ;;  %v1187_v23 = vmul.f32 %v11473_v42, %v13452_v17  ;;  %v6652_v42 = vld [vmem:[%s11958_s3 + $0x158] sm:$0xff] }
 0x90b   :  { %v4950_v3 = vpop.permute.xlu1 %4949  ;;  %v4432_v7 = vadd.f32 %v13426_v47, %v3792_v62  ;;  %v4431_v53 = vadd.f32 %v13427_v27, %v3791_v46  ;;  %v5728_v63 = vadd.f32 %v11710_v20, %v5088_v14  ;;  %v1890_v40 = vadd.f32 %v13430_v28, %v1186_v57  ;;  %v13442_v46 = vld [vmem:[#allocation270_spill] sm:$0xff]  ;;  %v13443_v62 = vld [vmem:[#allocation271_spill] sm:$0xff]  ;;  %v13444_v47 = vld [vmem:[#allocation312_spill] sm:$0xff] }
 0x90c   :  { %6268 = vmatpush3.bf16.msra.mxu1 %v6267_v39  ;;  %v5087_v11 = vadd.f32 %v4950_v3, %v4447_v12  ;;  %v2513_v37 = vadd.f32 %v13440_v22, %v1873_v19  ;;  %v13441_v12 = vld [vmem:[#allocation42_spill] sm:$0xff]  ;;  %v3809_v13 = vadd.f32 %v13442_v46, %v3169_v38  ;;  %v13445_v27 = vld [vmem:[#allocation317_spill] sm:$0xff]  ;;  %v13458_v52 = vld [vmem:[#allocation115_spill] sm:$0xff] }
 0x90d   :  { %v5072_v61 = vadd.f32 %v11694_v59, %v4432_v7  ;;  %v6650_v59 = vld [vmem:[%s11958_s3 + $0x148] sm:$0xff]  ;;  %v2530_v25 = vadd.f32 %v13435_v1, %v1890_v40  ;;  %v13449_v57 = vld [vmem:[#allocation253_spill] sm:$0xff]  ;;  %v13450_v28 = vld [vmem:[#allocation390_spill] sm:$0xff] }
 0x90e   :  { %v1170_v55 = vmul.f32 %v6650_v59, %v13433_v49  ;;  %v4449_v21 = vadd.f32 %v13447_v58, %v3809_v13  ;;  %v6651_v49 = vld [vmem:[%s11958_s3 + $0x1d8] sm:$0xff]  ;;  %v13456_v19 = vld [vmem:[#allocation26_spill] sm:$0xff] }
 0x90f   :  { %v4918_v44 = vpop.permute.xlu1 %4917  ;;  %v5712_v20 = vadd.f32 %v11724_v18, %v5072_v61  ;;  %v13436_v18 = vld [vmem:[#allocation208_spill] sm:$0xff]  ;;  %v3170_v15 = vadd.f32 %v13438_v31, %v2530_v25  ;;  %v1172_v31 = vmul.f32 %v6652_v42, %v13456_v19  ;;  %v13459_v22 = vld [vmem:[#allocation118_spill] sm:$0xff]  ;;  %v13466_v58 = vld [vmem:[#allocation269_spill] sm:$0xff] }
 0x910   :  { %v5071_v39 = vadd.f32 %v4918_v44, %v4431_v53  ;;  %v1874_v44 = vadd.f32 %v13436_v18, %v1170_v55  ;;  %v3153_v53 = vadd.f32 %v13445_v27, %v2513_v37  ;;  %v13453_v55 = vld [vmem:[#allocation104_spill] sm:$0xff]  ;;  %v13477_v42 = vld [vmem:[#allocation114_spill] sm:$0xff] }
 0x911   :  { %v3810_v14 = vadd.f32 %v13443_v62, %v3170_v15  ;;  %v1188_v8 = vmul.f32 %v6651_v49, %v13453_v55  ;;  %v13455_v18 = vld [vmem:[#allocation204_spill] sm:$0xff]  ;;  %v13461_v62 = vld [vmem:[#allocation175_spill] sm:$0xff] }
 0x912   :  { %v2514_v36 = vadd.f32 %v13441_v12, %v1874_v44  ;;  %v3793_v34 = vadd.f32 %v13448_v26, %v3153_v53  ;;  %v13457_v15 = vld [vmem:[#allocation36_spill] sm:$0xff]  ;;  %v13464_v53 = vld [vmem:[#allocation46_spill] sm:$0xff]  ;;  %v13467_v26 = vld [vmem:[#allocation275_spill] sm:$0xff] }
 0x913   :  { %v5590_v10 = vpop.permute.xlu1 %5589 }
 0x914   :  { %v5727_v29 = vadd.f32 %v5590_v10, %v5087_v11  ;;  %v5600_v11 = vpop.permute.xlu0 %5599  ;;  %v3154_v7 = vadd.f32 %v13444_v47, %v2514_v36  ;;  %v4433_v32 = vadd.f32 %v13451_v50, %v3793_v34  ;;  %v13471_v50 = vld [vmem:[#allocation40_spill] sm:$0xff] }
 0x916   :  { %v6269_v3 = vpack.c.bf16 %v5728_v63, %v5727_v29  ;;  %v13446_v63 = vld [vmem:[#allocation406_spill] sm:$0xff]  ;;  %v3794_v61 = vadd.f32 %v13449_v57, %v3154_v7  ;;  %v13463_v7 = vld [vmem:[#allocation333_spill] sm:$0xff] }
 0x917   :  { %v5558_v45 = vpop.permute.xlu1 %5557  ;;  %v4450_v29 = vadd.f32 %v13446_v63, %v3810_v14 }
 0x918   :  { %v5711_v2 = vadd.f32 %v5558_v45, %v5071_v39  ;;  %6270 = vmatprep.subr.bf16.mxu1 %v6269_v3  ;;  %v4434_v40 = vadd.f32 %v13450_v28, %v3794_v61  ;;  %v5568_v59 = vpop.permute.xlu0 %5567  ;;  %v13468_v61 = vld [vmem:[#allocation314_spill] sm:$0xff]  ;;  %v13470_v28 = vld [vmem:[#allocation407_spill] sm:$0xff] }
 0x919   :  { %v5090_v39 = vadd.f32 %v11742_v35, %v4450_v29 }
 0x91a   :  { %v6271_v48 = vpack.c.bf16 %v5712_v20, %v5711_v2  ;;  %v5074_v35 = vadd.f32 %v11756_v5, %v4434_v40  ;;  %v1171_v5 = vmul.f32 %v11491_v4, %v13457_v15  ;;  %v13465_v4 = vld [vmem:[#allocation52_spill] sm:$0xff] }
 0x91b   :  { %v4954_v9 = vpop.permute.xlu1 %4953  ;;  %v5730_v20 = vadd.f32 %v11771_v24, %v5090_v39  ;;  %v1891_v24 = vadd.f32 %v13455_v18, %v1187_v23  ;;  %v13473_v23 = vld [vmem:[#allocation255_spill] sm:$0xff] }
 0x91c   :  { %6272 = vmatpush3.bf16.msra.mxu1 %v6271_v48  ;;  %v5089_v3 = vadd.f32 %v4954_v9, %v4449_v21  ;;  %v13454_v48 = vld [vmem:[#allocation201_spill] sm:$0xff]  ;;  %v5714_v44 = vadd.f32 %v11788_v43, %v5074_v35  ;;  %v11862_v36 = vpop.permute.xlu0 %4963  ;;  %v13460_v43 = vld [vmem:[#allocation171_spill] sm:$0xff]  ;;  %v1875_v14 = vadd.f32 %v13461_v62, %v1171_v5 }
 0x91d   :  { %v1892_v9 = vadd.f32 %v13454_v48, %v1188_v8  ;;  %v2531_v38 = vadd.f32 %v13458_v52, %v1891_v24  ;;  %v1876_v13 = vadd.f32 %v13460_v43, %v1172_v31  ;;  %v13476_v24 = vld [vmem:[#allocation113_spill] sm:$0xff]  ;;  %v13481_v62 = vld [vmem:[#allocation43_spill] sm:$0xff] }
 0x91e   :  { %v2515_v63 = vadd.f32 %v13464_v53, %v1875_v14  ;;  %v13480_v43 = vld [vmem:[#allocation37_spill] sm:$0xff]  ;;  %v13482_v14 = vld [vmem:[#allocation3_spill] sm:$0xff] }
 0x91f   :  { %v4922_v10 = vpop.permute.xlu1 %4921  ;;  %v2532_v37 = vadd.f32 %v13459_v22, %v1892_v9  ;;  %v3171_v27 = vadd.f32 %v13463_v7, %v2531_v38  ;;  %v2516_v29 = vadd.f32 %v13465_v4, %v1876_v13  ;;  %v13478_v38 = vld [vmem:[#allocation45_spill] sm:$0xff] }
 0x920   :  { %v5073_v51 = vadd.f32 %v4922_v10, %v4433_v32  ;;  %v13462_v10 = vld [vmem:[#allocation332_spill] sm:$0xff] }
 0x921   :  { %v3172_v47 = vadd.f32 %v13462_v10, %v2532_v37  ;;  %v3811_v21 = vadd.f32 %v13466_v58, %v3171_v27  ;;  %v3156_v39 = vadd.f32 %v13468_v61, %v2516_v29  ;;  %v13479_v37 = vld [vmem:[#allocation39_spill] sm:$0xff]  ;;  %v13486_v58 = vld [vmem:[#allocation334_spill] sm:$0xff]  ;;  %v13488_v61 = vld [vmem:[#allocation56_spill] sm:$0xff] }
 0x923   :  { %v5594_v45 = vpop.permute.xlu1 %5593  ;;  %v3812_v34 = vadd.f32 %v13467_v26, %v3172_v47  ;;  %v4451_v32 = vadd.f32 %v13471_v50, %v3811_v21  ;;  %v3796_v49 = vadd.f32 %v13473_v23, %v3156_v39  ;;  %v13483_v47 = vld [vmem:[#allocation4_spill] sm:$0xff]  ;;  %v13487_v26 = vld [vmem:[#allocation335_spill] sm:$0xff]  ;;  %v13493_v23 = vld [vmem:[#allocation321_spill] sm:$0xff] }
 0x924   :  { %v5729_v2 = vadd.f32 %v5594_v45, %v5089_v3  ;;  %v13469_v3 = vld [vmem:[#allocation319_spill] sm:$0xff] }
 0x925   :  { %v3155_v45 = vadd.f32 %v13469_v3, %v2515_v63  ;;  %v4452_v40 = vadd.f32 %v13470_v28, %v3812_v34  ;;  %v13484_v63 = vld [vmem:[#allocation174_spill] sm:$0xff] }
 0x926   :  { %v6273_v1 = vpack.c.bf16 %v5730_v20, %v5729_v2  ;;  %v4932_v20 = vpop.permute.xlu0 %4931  ;;  %v13472_v2 = vld [vmem:[#allocation256_spill] sm:$0xff]  ;;  %v13489_v3 = vld [vmem:[#allocation62_spill] sm:$0xff] }
 0x927   :  { %v5562_v25 = vpop.permute.xlu1 %5561  ;;  %v3795_v17 = vadd.f32 %v13472_v2, %v3155_v45  ;;  %v5092_v55 = vadd.f32 %v11801_v54, %v4452_v40  ;;  %v13490_v45 = vld [vmem:[#allocation273_spill] sm:$0xff]  ;;  %v13492_v2 = vld [vmem:[#allocation316_spill] sm:$0xff] }
 0x928   :  { %v5713_v0 = vadd.f32 %v5562_v25, %v5073_v51  ;;  %6274 = vmatprep.subr.bf16.mxu1 %v6273_v1  ;;  %v13474_v51 = vld [vmem:[#allocation392_spill] sm:$0xff]  ;;  %v13475_v25 = vld [vmem:[#allocation393_spill] sm:$0xff] }
 0x929   :  { %v4436_v1 = vadd.f32 %v13474_v51, %v3796_v49  ;;  %v4435_v48 = vadd.f32 %v13475_v25, %v3795_v17  ;;  %v5732_v9 = vadd.f32 %v5600_v11, %v5092_v55  ;;  %v13491_v40 = vld [vmem:[#allocation9_spill] sm:$0xff] }
 0x92a   :  { %v6275_v12 = vpack.c.bf16 %v5714_v44, %v5713_v0  ;;  %v1189_v44 = vmul.f32 %v11535_v16, %v13476_v24  ;;  %v6653_v0 = vld [vmem:[%s11958_s3 + $0x1e8] sm:$0xff]  ;;  %v5604_v5 = vpop.permute.xlu0 %5603  ;;  %v13494_v55 = vld [vmem:[#allocation49_spill] sm:$0xff] }
 0x92b   :  { %v4958_v46 = vpop.permute.xlu1 %4957  ;;  %v1190_v19 = vmul.f32 %v6653_v0, %v13477_v42  ;;  %v5076_v31 = vadd.f32 %v11818_v6, %v4436_v1  ;;  %v6654_v16 = vld [vmem:[%s11958_s3 + $0x168] sm:$0xff]  ;;  %v1173_v6 = vmul.f32 %v11551_v56, %v13481_v62  ;;  %v13496_v1 = vld [vmem:[#allocation258_spill] sm:$0xff]  ;;  %v13503_v62 = vld [vmem:[#allocation64_spill] sm:$0xff] }
 0x92c   :  { %6276 = vmatpush3.bf16.msra.mxu1 %v6275_v12  ;;  %v5091_v8 = vadd.f32 %v4958_v46, %v4451_v32  ;;  %v1893_v11 = vadd.f32 %v13479_v37, %v1189_v44  ;;  %v1174_v13 = vmul.f32 %v6654_v16, %v13480_v43  ;;  %v13498_v42 = vld [vmem:[#allocation394_spill] sm:$0xff]  ;;  %v13501_v37 = vld [vmem:[#allocation123_spill] sm:$0xff] }
 0x92d   :  { %v1894_v22 = vadd.f32 %v13478_v38, %v1190_v19  ;;  %v5716_v12 = vadd.f32 %v5568_v59, %v5076_v31  ;;  %v13485_v59 = vld [vmem:[#allocation179_spill] sm:$0xff]  ;;  %v13500_v38 = vld [vmem:[#allocation122_spill] sm:$0xff] }
 0x92e   :  { %v2533_v10 = vadd.f32 %v13482_v14, %v1893_v11  ;;  %v1878_v4 = vadd.f32 %v13484_v63, %v1174_v13  ;;  %v1877_v29 = vadd.f32 %v13485_v59, %v1173_v6  ;;  %v13499_v31 = vld [vmem:[#allocation395_spill] sm:$0xff]  ;;  %v1192_v11 = vmul.f32 %v11379_v30, %v13501_v37 }
 0x92f   :  { %v4926_v57 = vpop.permute.xlu1 %4925  ;;  %v2534_v7 = vadd.f32 %v13483_v47, %v1894_v22  ;;  %v1191_v22 = vmul.f32 %v11593_v60, %v13500_v38  ;;  %v13504_v47 = vld [vmem:[#allocation50_spill] sm:$0xff] }
 0x930   :  { %v5075_v54 = vadd.f32 %v4926_v57, %v4435_v48  ;;  %v3173_v34 = vadd.f32 %v13487_v26, %v2533_v10  ;;  %v5572_v57 = vpop.permute.xlu0 %5571  ;;  %v2517_v39 = vadd.f32 %v13488_v61, %v1877_v29  ;;  %v2518_v56 = vadd.f32 %v13489_v3, %v1878_v4  ;;  %v13497_v48 = vld [vmem:[#allocation257_spill] sm:$0xff]  ;;  %v13508_v29 = vld [vmem:[#allocation178_spill] sm:$0xff] }
 0x931   :  { %v3174_v21 = vadd.f32 %v13486_v58, %v2534_v7  ;;  %v1895_v6 = vadd.f32 %v13503_v62, %v1191_v22  ;;  %v13511_v61 = vld [vmem:[#allocation337_spill] sm:$0xff] }
 0x932   :  { %v3813_v28 = vadd.f32 %v13490_v45, %v3173_v34  ;;  %v3158_v17 = vadd.f32 %v13492_v2, %v2518_v56  ;;  %v3157_v49 = vadd.f32 %v13493_v23, %v2517_v39  ;;  %v13510_v34 = vld [vmem:[#allocation336_spill] sm:$0xff] }
 0x933   :  { %v5598_v35 = vpop.permute.xlu1 %5597  ;;  %v3814_v50 = vadd.f32 %v13491_v40, %v3174_v21  ;;  %v13509_v21 = vld [vmem:[#allocation182_spill] sm:$0xff]  ;;  %v13513_v56 = vld [vmem:[#allocation72_spill] sm:$0xff]  ;;  %v13515_v40 = vld [vmem:[#allocation13_spill] sm:$0xff] }
 0x934   :  { %v5731_v18 = vadd.f32 %v5598_v35, %v5091_v8  ;;  %v13495_v35 = vld [vmem:[#allocation408_spill] sm:$0xff]  ;;  %v3797_v25 = vadd.f32 %v13496_v1, %v3157_v49  ;;  %v4968_v44 = vpop.permute.xlu0 %4967  ;;  %v13517_v49 = vld [vmem:[#allocation323_spill] sm:$0xff] }
 0x935   :  { %v4454_v8 = vadd.f32 %v13494_v55, %v3814_v50  ;;  %v4453_v51 = vadd.f32 %v13495_v35, %v3813_v28 }
 0x936   :  { %v6277_v15 = vpack.c.bf16 %v5732_v9, %v5731_v18  ;;  %v3798_v9 = vadd.f32 %v13497_v48, %v3158_v17  ;;  %v13516_v17 = vld [vmem:[#allocation318_spill] sm:$0xff] }
 0x937   :  { %v5566_v52 = vpop.permute.xlu1 %5565  ;;  %v5094_v18 = vadd.f32 %v11862_v36, %v4454_v8  ;;  %v13502_v36 = vld [vmem:[#allocation63_spill] sm:$0xff] }
 0x938   :  { %v5715_v46 = vadd.f32 %v5566_v52, %v5075_v54  ;;  %6278 = vmatprep.subr.bf16.mxu1 %v6277_v15  ;;  %v4438_v19 = vadd.f32 %v13498_v42, %v3798_v9  ;;  %v4437_v54 = vadd.f32 %v13499_v31, %v3797_v25  ;;  %v1896_v13 = vadd.f32 %v13502_v36, %v1192_v11  ;;  %v4936_v7 = vpop.permute.xlu0 %4935  ;;  %v13518_v8 = vld [vmem:[#allocation59_spill] sm:$0xff]  ;;  %v13520_v25 = vld [vmem:[#allocation260_spill] sm:$0xff] }
 0x939   :  { %v5734_v15 = vadd.f32 %v5604_v5, %v5094_v18  ;;  %v1175_v5 = vmul.f32 %v11611_v33, %v13504_v47  ;;  %v13512_v33 = vld [vmem:[#allocation66_spill] sm:$0xff]  ;;  %v13521_v9 = vld [vmem:[#allocation259_spill] sm:$0xff] }
 0x93a   :  { %v6279_v27 = vpack.c.bf16 %v5716_v12, %v5715_v46  ;;  %v5078_v12 = vadd.f32 %v4932_v20, %v4438_v19  ;;  %v13507_v20 = vld [vmem:[#allocation212_spill] sm:$0xff] }
 0x93b   :  { %v4962_v53 = vpop.permute.xlu1 %4961  ;;  %v2536_v63 = vadd.f32 %v13507_v20, %v1896_v13  ;;  %v1879_v26 = vadd.f32 %v13509_v21, %v1175_v5  ;;  %v13522_v19 = vld [vmem:[#allocation396_spill] sm:$0xff] }
 0x93c   :  { %6280 = vmatpush3.bf16.msra.mxu1 %v6279_v27  ;;  %v5093_v24 = vadd.f32 %v4962_v53, %v4453_v51  ;;  %v5718_v14 = vadd.f32 %v5572_v57, %v5078_v12  ;;  %v13505_v27 = vld [vmem:[#allocation51_spill] sm:$0xff]  ;;  %v13519_v51 = vld [vmem:[#allocation409_spill] sm:$0xff] }
 0x93d   :  { %v1176_v60 = vmul.f32 %v11408_v41, %v13505_v27  ;;  %v13506_v53 = vld [vmem:[#allocation7_spill] sm:$0xff]  ;;  %v3176_v57 = vadd.f32 %v13510_v34, %v2536_v63  ;;  %v2519_v3 = vadd.f32 %v13512_v33, %v1879_v26 }
 0x93e   :  { %v2535_v30 = vadd.f32 %v13506_v53, %v1895_v6  ;;  %v13514_v41 = vld [vmem:[#allocation11_spill] sm:$0xff] }
 0x93f   :  { %v4930_v32 = vpop.permute.xlu1 %4929  ;;  %v1880_v58 = vadd.f32 %v13508_v29, %v1176_v60  ;;  %v3816_v50 = vadd.f32 %v13515_v40, %v3176_v57  ;;  %v3159_v55 = vadd.f32 %v13517_v49, %v2519_v3 }
 0x940   :  { %v5077_v46 = vadd.f32 %v4930_v32, %v4437_v54  ;;  %v3175_v39 = vadd.f32 %v13511_v61, %v2535_v30  ;;  %v5608_v32 = vpop.permute.xlu0 %5607  ;;  %v13523_v54 = vld [vmem:[#allocation397_spill] sm:$0xff] }
 0x941   :  { %v2520_v45 = vadd.f32 %v13513_v56, %v1880_v58  ;;  %v4456_v35 = vadd.f32 %v13518_v8, %v3816_v50  ;;  %v3799_v48 = vadd.f32 %v13520_v25, %v3159_v55 }
 0x942   :  { %v3815_v28 = vadd.f32 %v13514_v41, %v3175_v39 }
 0x943   :  { %v5602_v0 = vpop.permute.xlu1 %5601  ;;  %v3160_v23 = vadd.f32 %v13516_v17, %v2520_v45 }
 0x944   :  { %v5733_v52 = vadd.f32 %v5602_v0, %v5093_v24  ;;  %v4455_v1 = vadd.f32 %v13519_v51, %v3815_v28  ;;  %v5096_v24 = vadd.f32 %v4968_v44, %v4456_v35  ;;  %v5576_v22 = vpop.permute.xlu0 %5575  ;;  %v5739_v44 = vld [vmem:[%s11959_s4 + $0x10] sm:$0xff] }
 0x945   :  { %v3800_v18 = vadd.f32 %v13521_v9, %v3160_v23 }
 0x946   :  { %v6281_v16 = vpack.c.bf16 %v5734_v15, %v5733_v52  ;;  %v4439_v15 = vadd.f32 %v13523_v54, %v3799_v48  ;;  %v5736_v52 = vadd.f32 %v5608_v32, %v5096_v24 }
 0x947   :  { %v5570_v43 = vpop.permute.xlu1 %5569  ;;  %v4440_v31 = vadd.f32 %v13522_v19, %v3800_v18 }
 0x948   :  { %v5717_v10 = vadd.f32 %v5570_v43, %v5077_v46  ;;  %6282 = vmatprep.subr.bf16.mxu1 %v6281_v16 }
 0x949   :  { %v5080_v37 = vadd.f32 %v4936_v7, %v4440_v31 }
 0x94a   :  { %v6283_v4 = vpack.c.bf16 %v5718_v14, %v5717_v10  ;;  %v5971_v14 = vld [vmem:[%s11960_s5] ss:$0 sm:$0xff] }
 0x94b   :  { %v4966_v59 = vpop.permute.xlu1 %4965  ;;  %v5720_v16 = vadd.f32 %v5576_v22, %v5080_v37 }
 0x94c   :  { %6284 = vmatpush3.bf16.msra.mxu1 %v6283_v4  ;;  %v5095_v0 = vadd.f32 %v4966_v59, %v4455_v1 }
 0x94f   :  { %v4934_v2 = vpop.permute.xlu1 %4933 }
 0x950   :  { %v5079_v11 = vadd.f32 %v4934_v2, %v4439_v15 }
 0x953   :  { %v5606_v42 = vpop.permute.xlu1 %5605 }
 0x954   :  { %v5735_v38 = vadd.f32 %v5606_v42, %v5095_v0 }
 0x956   :  { %v6285_v12 = vpack.c.bf16 %v5736_v52, %v5735_v38 }
 0x957   :  { %v5574_v46 = vpop.permute.xlu1 %5573 }
 0x958   :  { %v5719_v43 = vadd.f32 %v5574_v46, %v5079_v11  ;;  %6286 = vmatprep.subr.bf16.mxu1 %v6285_v12 }
 0x95a   :  { %v6287_v36 = vpack.c.bf16 %v5720_v16, %v5719_v43 }
 0x95c   :  { %6288 = vmatpush3.bf16.msra.mxu1 %v6287_v36 }
 0x95f   :  { %5883 = vmatmul.mubr.f32.vlgmr.msra.gmra.mrb[24].mxu1 %v5739_v44 }
 0x9b2   :  { %v6073_v13 = vpop.f32.mrb[22].mxu1 }
 0x9b3   :  { %v6074_v62 = vpop.f32.mrb[23].mxu1 }
 0x9b4   :  { %v6075_v6 = vadd.f32 %v6074_v62, %v6073_v13 }
 0x9b6   :  { %v5815_v5 = vadd.f32 %v6075_v6, %v5971_v14 }
 0xa32   :  { %v6108_v10 = vpop.f32.mrb[24].mxu1 }
 0xa33   :  { %v6109_v47 = vpop.f32.mrb[25].mxu1 }
 0xa34   :  { %v6110_v7 = vadd.f32 %v6109_v47, %v6108_v10 }
 0xa36   :  { %v5885_v27 = vadd.f32 %v6110_v7, %v5815_v5 }
 0xa38   :  { %v5889_v60 = vsel %vm5888_vm2, %v5885_v27, -inf }
 0xa39   :  { %5890 = vmax.xlane.f32.xlu1 %v5889_v60 }
 0xac6   :  { %v5891_v53 = vpop.xlane.xlu1 %5890 }
 0xac7   :  { %v5892_v30 = vsub.f32 %v5885_v27, %v5891_v53 }
 0xac9   :  { %v5893_v20 = vmul.f32 1.442695, %v5892_v30 }
 0xacb   :  { %6446 = vpow2.f32 %v5893_v20 }
 0xad5   :  { %v6447_v63 = vpop.eup %6446 }
 0xad6   :  { %v5895_v4 = vsel %vm5888_vm2, %v6447_v63, 0.0 }
 0xad7   :  { %5896 = vadd.xlane.f32.xlu0 %v5895_v4 }
 0xb64   :  { %v5897_v59 = vpop.xlane.xlu0 %5896 }
 0xb65   :  { %6448 = vrcp.f32 %v5897_v59 }
 0xb6f   :  { %v6449_v29 = vpop.eup %6448 }
 0xb70   :  { %v5899_v58 = vmul.f32 %v6449_v29, %v6447_v63 }
 0xb72   :  { %5900 = vst.msk [vmem:[%s11961_s6] sm:$0xff] %vm5888_vm2, %v5899_v58 }

</bundles_post_ra>
